<compile_context>
chip_gen: v7x
topology: tpu7x:2x2x1
jax: 0.10.0
libtpu: 0.0.40
codegen_flags: <defaults>
</compile_context>

<pallas_src>
import math
import functools

import jax
import jax.numpy as jnp
from jax.experimental import pallas as pl
from jax.experimental.pallas import tpu as pltpu

F32 = jnp.float32
BF16 = jnp.bfloat16
VMEM = pltpu.MemorySpace.VMEM
NL_WIDTH = 1024  # non_local theta/phi projection width (fixed in the reference model)


# --------------------------------------------------------------------------
# In-kernel helpers (trace-time Python; all compute stays in VMEM)
# --------------------------------------------------------------------------

def _mlp(x, layers, relu_last=True):
    """4-layer MLP stack; `layers` is a list of (w_ref, b_ref)."""
    h = x
    last = len(layers) - 1
    for i, (w, b) in enumerate(layers):
        h = jnp.dot(h, w[...], preferred_element_type=F32) + b[...]
        if i < last or relu_last:
            h = jnp.maximum(h, 0.0)
    return h


def _mlp_nonlocal(x, layers):
    """Fused theta|phi|g stack: 3x (Linear+ReLU) + final Linear (no ReLU).
    Only the final (large) matmul uses bf16 operands with f32 accumulation."""
    h = x
    for w, b in layers[:-1]:
        h = jnp.maximum(jnp.dot(h, w[...], preferred_element_type=F32) + b[...], 0.0)
    w, b = layers[-1]                       # w stored bf16 host-side
    return jnp.dot(h.astype(BF16), w[...], preferred_element_type=F32) + b[...]


def _softmax_rows(s):
    s = s - jnp.max(s, axis=-1, keepdims=True)
    e = jnp.exp(s)
    return e * pl.reciprocal(jnp.sum(e, axis=-1, keepdims=True), approx=True)


def _attention(q_in, k_in, att, scale, mask=None):
    """SelfAttention: softmax((relu(Q Wq) relu(K Wk)^T) * scale [* mask], dim=-1)."""
    wq, bq, wk, bk = att
    q = jnp.maximum(jnp.dot(q_in, wq[...], preferred_element_type=F32) + bq[...], 0.0)
    k = jnp.maximum(jnp.dot(k_in, wk[...], preferred_element_type=F32) + bk[...], 0.0)
    s = jax.lax.dot_general(q, k, (((1,), (1,)), ((), ())),
                            preferred_element_type=F32) * scale
    if mask is not None:
        s = s * mask
    return _softmax_rows(s)


# --------------------------------------------------------------------------
# Single fused forward kernel
# --------------------------------------------------------------------------

def model_kernel(*refs, enc_dim, att_layer, att_scale):
    out_ref, cat_ref, lat_ref, h_ref = refs[-4:]
    ins = refs[:-4]

    pos = [0]

    def take(n):
        s = pos[0]
        pos[0] += n
        return ins[s:s + n]

    def take_mlp():
        w = take(8)
        return [(w[2 * i], w[2 * i + 1]) for i in range(4)]

    (obs_in_ref, gt_end_ref, route_ref, mask_ref,
     label_oh_ref, init_pos_ref, eps_ref) = take(7)

    obs_encoder   = take_mlp()
    route_encoder = take_mlp()
    end_encoder   = take_mlp()
    int_atts      = [take(4) for _ in range(att_layer)]
    scoring_att   = take(4)
    latent_mlp    = take_mlp()
    latent_dec    = take_mlp()
    decoder_mlp   = take_mlp()
    nl_mlp        = take_mlp()

    mask = mask_ref[...]
    init_pos = init_pos_ref[...]
    E = enc_dim
    Fd = init_pos.shape[1]

    # ---- encoders -------------------------------------------------------
    obs_enc    = _mlp(obs_in_ref[...], obs_encoder)           # (N, E)
    gt_end_enc = _mlp(gt_end_ref[...], end_encoder)           # (N, E)
    route_enc  = _mlp(route_ref[...], route_encoder)          # (R, E)

    # ---- interaction attention (residual), weights VMEM-resident ---------
    for att in int_atts:
        A = _attention(obs_enc, obs_enc, att, att_scale, mask=mask)       # (N, N)
        obs_enc = obs_enc + jnp.dot(A, obs_enc, preferred_element_type=F32)

    # ---- path scoring against all routes (no mask) ------------------------
    path_score = _attention(obs_enc, route_enc, scoring_att, att_scale)   # (N, R)

    # closest route encoding via one-hot gather on the MXU
    closest = jnp.dot(label_oh_ref[...], route_enc, preferred_element_type=F32)  # (N, E)

    # ---- latent head: cat([obs_enc, closest, init_pos, gt_end_enc]) -------
    cat_ref[:, 0:E]                 = obs_enc
    cat_ref[:, E:2 * E]             = closest
    cat_ref[:, 2 * E:2 * E + Fd]    = init_pos
    cat_ref[:, 2 * E + Fd:3 * E + Fd] = gt_end_enc
    lat_ref[...] = _mlp(cat_ref[...], latent_mlp)             # (N, 2E)
    mu  = lat_ref[:, 0:E]
    log = lat_ref[:, E:2 * E]
    z = eps_ref[...] * jnp.exp(0.5 * log) + mu

    # ---- latent decoder: cat([obs_enc, closest, init_pos, z]) -------------
    cat_ref[:, 2 * E + Fd:3 * E + Fd] = z                     # reuse slab, only z changes
    pred_route_end = _mlp(cat_ref[...], latent_dec)           # (N, Fd)
    pred_end_enc   = _mlp(pred_route_end, end_encoder)        # (N, E), weights reused

    # ---- non-local (global_rational) loop ---------------------------------
    # pred_feats = cat([obs_enc, closest, pred_end_enc, init_pos])
    cat_ref[:, 2 * E:3 * E]        = pred_end_enc
    cat_ref[:, 3 * E:3 * E + Fd]   = init_pos
    for _ in range(att_layer):
        feat = cat_ref[...]                                   # (N, 3E+Fd)
        h_ref[...] = _mlp_nonlocal(feat, nl_mlp)              # (N, 2*NL_WIDTH + 3E+Fd)
        theta = h_ref[:, 0:NL_WIDTH].astype(BF16)
        phi   = h_ref[:, NL_WIDTH:2 * NL_WIDTH].astype(BF16)
        g     = h_ref[:, 2 * NL_WIDTH:]
        f = jax.lax.dot_general(theta, phi, (((1,), (1,)), ((), ())),
                                preferred_element_type=F32)   # (N, N)
        w = _softmax_rows(f)
        w = w * mask
        # F.normalize(p=1, dim=1) on the (1, N, N) weights -> column L1 norm
        col = jnp.sum(jnp.abs(w), axis=0, keepdims=True)
        w = w * pl.reciprocal(jnp.maximum(col, 1e-12), approx=True)
        cat_ref[...] = jnp.dot(w, g, preferred_element_type=F32) + feat

    pred_traj = _mlp(cat_ref[...], decoder_mlp)               # (N, Fd*pred_len)

    # ---- pack outputs into one lane slab ----------------------------------
    R = path_score.shape[1]
    o = 0
    out_ref[:, o:o + R] = path_score; o += R
    out_ref[:, o:o + E] = mu;         o += E
    out_ref[:, o:o + E] = log;        o += E
    out_ref[:, o:o + Fd] = pred_route_end; o += Fd
    out_ref[:, o:o + pred_traj.shape[1]] = pred_traj


# --------------------------------------------------------------------------
# Parameter init / packing (deterministic, in-script; done once)
# --------------------------------------------------------------------------

def init_linear(key, din, dout):
    k1, k2 = jax.random.split(key)
    bound = 1.0 / math.sqrt(din)
    w = jax.random.uniform(k1, (din, dout), F32, -bound, bound)
    b = jax.random.uniform(k2, (1, dout), F32, -bound, bound)   # pre-shaped (1, dout)
    return w, b


def init_mlp4(key, dims):
    keys = jax.random.split(key, 4)
    return [init_linear(keys[i], dims[i], dims[i + 1]) for i in range(4)]


def init_attention(key, in_size, hidden):
    k1, k2 = jax.random.split(key)
    wq, bq = init_linear(k1, in_size, hidden)
    wk, bk = init_linear(k2, in_size, hidden)
    return (wq, bq, wk, bk)


class Args:
    enc_dim = 16
    att_hidden = 32
    att_layer = 2
    dropout_rate = 0.0
    obs_len = 8
    pred_len = 12
    feat_dims = 2
    hidden = [64, 64, 32]
    sigma = 1.3


def init_params(key, a):
    ks = jax.random.split(key, 12)
    H, E, Fd = a.hidden, a.enc_dim, a.feat_dims
    p = {}
    p['obs_encoder']     = init_mlp4(ks[0], [a.obs_len * Fd + Fd, H[0], H[1], H[2], E])
    p['route_enc']       = init_mlp4(ks[1], [(a.obs_len + a.pred_len) * Fd, H[0], H[1], H[2], E])
    p['route_end_enc']   = init_mlp4(ks[2], [Fd, H[0], H[1], H[2], E])
    p['int_att']         = [init_attention(k, E, H[2]) for k in jax.random.split(ks[3], a.att_layer)]
    p['scoring_att']     = init_attention(ks[4], E, H[2])
    p['latent']          = init_mlp4(ks[5], [3 * E + Fd, H[0], H[1], H[2], 2 * E])
    p['latent_decoder']  = init_mlp4(ks[6], [3 * E + Fd, H[0], H[1], H[2], Fd])
    p['decoder']         = init_mlp4(ks[7], [3 * E + Fd, H[0], H[1], H[2], Fd * a.pred_len])
    p['non_local_theta'] = init_mlp4(ks[8], [3 * E + Fd, H[0], H[1], H[2], NL_WIDTH])
    p['non_local_phi']   = init_mlp4(ks[9], [3 * E + Fd, H[0], H[1], H[2], NL_WIDTH])
    p['non_local_g']     = init_mlp4(ks[10], [3 * E + Fd, H[0], H[1], H[2], 3 * E + Fd])
    return p


def _block_diag(mats):
    rows = sum(m.shape[0] for m in mats)
    cols = sum(m.shape[1] for m in mats)
    out = jnp.zeros((rows, cols), mats[0].dtype)
    r = c = 0
    for m in mats:
        out = out.at[r:r + m.shape[0], c:c + m.shape[1]].set(m)
        r += m.shape[0]
        c += m.shape[1]
    return out


def fuse_nonlocal(theta, phi, g):
    """Horizontally fuse the three parallel non_local stacks into one block-diagonal
    4-layer stack (same math, 4 matmuls per iteration instead of 12)."""
    fused = [(jnp.concatenate([theta[0][0], phi[0][0], g[0][0]], axis=1),
              jnp.concatenate([theta[0][1], phi[0][1], g[0][1]], axis=1))]
    for i in (1, 2, 3):
        fused.append((_block_diag([theta[i][0], phi[i][0], g[i][0]]),
                      jnp.concatenate([theta[i][1], phi[i][1], g[i][1]], axis=1)))
    w3, b3 = fused[3]                      # only large operand: keep it bf16 on the MXU
    fused[3] = (w3.astype(BF16), b3)
    return fused


def pack_params(params):
    """Flatten all weights ONCE, in the exact order the kernel unpacks them."""
    flat = []

    def add_mlp(layers):
        for w, b in layers:
            flat.extend([w, b])

    add_mlp(params['obs_encoder'])
    add_mlp(params['route_enc'])
    add_mlp(params['route_end_enc'])
    for att in params['int_att']:
        flat.extend(att)
    flat.extend(params['scoring_att'])
    add_mlp(params['latent'])
    add_mlp(params['latent_decoder'])
    add_mlp(params['decoder'])
    add_mlp(fuse_nonlocal(params['non_local_theta'], params['non_local_phi'],
                          params['non_local_g']))
    return flat


# --------------------------------------------------------------------------
# Forward wrapper: one pallas_call for the whole model
# --------------------------------------------------------------------------

def forward(flat_weights, a, obs_traj, init_pos, gt_traj, route, mask, label, eps_key):
    N = obs_traj.shape[0]
    R = route.shape[0]
    E = a.enc_dim
    Fd = a.feat_dims

    # cheap data prep (layout only, no heavy compute)
    obs_in = jnp.concatenate([obs_traj.reshape(N, -1), init_pos.reshape(N, -1)], axis=-1)
    gt_end = gt_traj[:, -2, :]
    route_in = route.reshape(R, -1)
    label_oh = jax.nn.one_hot(label, R, dtype=F32)     # gather done as one-hot matmul
    init_pos2 = init_pos.reshape(N, Fd)
    # TODO(synk): reference samples eps with torch.DoubleTensor; TPU has no f64 -> f32 normal.
    eps = jax.random.normal(eps_key, (N, E), F32)

    inputs = [obs_in, gt_end, route_in, mask.astype(F32), label_oh, init_pos2, eps]
    inputs += flat_weights

    D = 3 * E + Fd
    out_dim = R + 2 * E + Fd + Fd * a.pred_len

    kernel = functools.partial(model_kernel, enc_dim=E, att_layer=a.att_layer,
                               att_scale=1.0 / math.sqrt(a.hidden[2]))

    out = pl.pallas_call(
        kernel,
        out_shape=jax.ShapeDtypeStruct((N, out_dim), F32),
        in_specs=[pl.BlockSpec(memory_space=VMEM)] * len(inputs),
        out_specs=pl.BlockSpec(memory_space=VMEM),
        scratch_shapes=[
            pltpu.VMEM((N, D), F32),                      # concatenated feature slab
            pltpu.VMEM((N, 2 * E), F32),                  # latent (mu | log)
            pltpu.VMEM((N, 2 * NL_WIDTH + D), F32),       # fused theta|phi|g activations
        ],
    )(*inputs)

    path_score     = out[:, :R]
    mu             = out[:, R:R + E]
    log            = out[:, R + E:R + 2 * E]
    pred_route_end = out[:, R + 2 * E:R + 2 * E + Fd]
    pred_traj      = out[:, R + 2 * E + Fd:]
    return {
        'path_score': path_score,                        # (N, R)
        'mu': mu[:, None, :],                            # (N, 1, E)
        'log': log[:, None, :],                          # (N, 1, E)
        'pred_route_end': pred_route_end[:, None, :],    # (N, 1, feat_dims)
        'pred_traj': pred_traj[:, None, :],              # (N, 1, feat_dims*pred_len)
    }


if __name__ == "__main__":
    a = Args()
    key = jax.random.PRNGKey(0)
    kp, kd, ke = jax.random.split(key, 3)
    params = init_params(kp, a)
    flat_weights = pack_params(params)       # packed / fused once, reused every call

    N, R = 8, 8
    k1, k2, k3, k4, k5 = jax.random.split(kd, 5)
    obs_traj = jax.random.normal(k1, (N, a.obs_len, a.feat_dims), F32)
    init_pos = jax.random.normal(k2, (N, 1, a.feat_dims), F32)
    gt_traj = jax.random.normal(k3, (N, a.obs_len + a.pred_len, a.feat_dims), F32)
    route = jax.random.normal(k4, (R, a.obs_len + a.pred_len, a.feat_dims), F32)
    mask = jnp.ones((N, N), F32)
    label = jax.random.randint(k5, (N,), 0, R)

    out = forward(flat_weights, a, obs_traj, init_pos, gt_traj, route, mask, label, ke)
    out = jax.block_until_ready(out)

    assert out['path_score'].shape == (N, R)
    assert out['mu'].shape == (N, 1, a.enc_dim)
    assert out['log'].shape == (N, 1, a.enc_dim)
    assert out['pred_route_end'].shape == (N, 1, a.feat_dims)
    assert out['pred_traj'].shape == (N, 1, a.feat_dims * a.pred_len)
    assert all(bool(jnp.all(jnp.isfinite(v))) for v in out.values())

    print("KERNEL_OK")
</pallas_src>

<mosaic_0001>
module attributes {stable_mosaic.version = 11 : i64} {
  func.func @model_kernel(%arg0: memref<8x18xf32, #tpu.memory_space<vmem>>, %arg1: memref<8x2xf32, #tpu.memory_space<vmem>>, %arg2: memref<8x40xf32, #tpu.memory_space<vmem>>, %arg3: memref<8x8xf32, #tpu.memory_space<vmem>>, %arg4: memref<8x8xf32, #tpu.memory_space<vmem>>, %arg5: memref<8x2xf32, #tpu.memory_space<vmem>>, %arg6: memref<8x16xf32, #tpu.memory_space<vmem>>, %arg7: memref<18x64xf32, #tpu.memory_space<vmem>>, %arg8: memref<1x64xf32, #tpu.memory_space<vmem>>, %arg9: memref<64x64xf32, #tpu.memory_space<vmem>>, %arg10: memref<1x64xf32, #tpu.memory_space<vmem>>, %arg11: memref<64x32xf32, #tpu.memory_space<vmem>>, %arg12: memref<1x32xf32, #tpu.memory_space<vmem>>, %arg13: memref<32x16xf32, #tpu.memory_space<vmem>>, %arg14: memref<1x16xf32, #tpu.memory_space<vmem>>, %arg15: memref<40x64xf32, #tpu.memory_space<vmem>>, %arg16: memref<1x64xf32, #tpu.memory_space<vmem>>, %arg17: memref<64x64xf32, #tpu.memory_space<vmem>>, %arg18: memref<1x64xf32, #tpu.memory_space<vmem>>, %arg19: memref<64x32xf32, #tpu.memory_space<vmem>>, %arg20: memref<1x32xf32, #tpu.memory_space<vmem>>, %arg21: memref<32x16xf32, #tpu.memory_space<vmem>>, %arg22: memref<1x16xf32, #tpu.memory_space<vmem>>, %arg23: memref<2x64xf32, #tpu.memory_space<vmem>>, %arg24: memref<1x64xf32, #tpu.memory_space<vmem>>, %arg25: memref<64x64xf32, #tpu.memory_space<vmem>>, %arg26: memref<1x64xf32, #tpu.memory_space<vmem>>, %arg27: memref<64x32xf32, #tpu.memory_space<vmem>>, %arg28: memref<1x32xf32, #tpu.memory_space<vmem>>, %arg29: memref<32x16xf32, #tpu.memory_space<vmem>>, %arg30: memref<1x16xf32, #tpu.memory_space<vmem>>, %arg31: memref<16x32xf32, #tpu.memory_space<vmem>>, %arg32: memref<1x32xf32, #tpu.memory_space<vmem>>, %arg33: memref<16x32xf32, #tpu.memory_space<vmem>>, %arg34: memref<1x32xf32, #tpu.memory_space<vmem>>, %arg35: memref<16x32xf32, #tpu.memory_space<vmem>>, %arg36: memref<1x32xf32, #tpu.memory_space<vmem>>, %arg37: memref<16x32xf32, #tpu.memory_space<vmem>>, %arg38: memref<1x32xf32, #tpu.memory_space<vmem>>, %arg39: memref<16x32xf32, #tpu.memory_space<vmem>>, %arg40: memref<1x32xf32, #tpu.memory_space<vmem>>, %arg41: memref<16x32xf32, #tpu.memory_space<vmem>>, %arg42: memref<1x32xf32, #tpu.memory_space<vmem>>, %arg43: memref<50x64xf32, #tpu.memory_space<vmem>>, %arg44: memref<1x64xf32, #tpu.memory_space<vmem>>, %arg45: memref<64x64xf32, #tpu.memory_space<vmem>>, %arg46: memref<1x64xf32, #tpu.memory_space<vmem>>, %arg47: memref<64x32xf32, #tpu.memory_space<vmem>>, %arg48: memref<1x32xf32, #tpu.memory_space<vmem>>, %arg49: memref<32x32xf32, #tpu.memory_space<vmem>>, %arg50: memref<1x32xf32, #tpu.memory_space<vmem>>, %arg51: memref<50x64xf32, #tpu.memory_space<vmem>>, %arg52: memref<1x64xf32, #tpu.memory_space<vmem>>, %arg53: memref<64x64xf32, #tpu.memory_space<vmem>>, %arg54: memref<1x64xf32, #tpu.memory_space<vmem>>, %arg55: memref<64x32xf32, #tpu.memory_space<vmem>>, %arg56: memref<1x32xf32, #tpu.memory_space<vmem>>, %arg57: memref<32x2xf32, #tpu.memory_space<vmem>>, %arg58: memref<1x2xf32, #tpu.memory_space<vmem>>, %arg59: memref<50x64xf32, #tpu.memory_space<vmem>>, %arg60: memref<1x64xf32, #tpu.memory_space<vmem>>, %arg61: memref<64x64xf32, #tpu.memory_space<vmem>>, %arg62: memref<1x64xf32, #tpu.memory_space<vmem>>, %arg63: memref<64x32xf32, #tpu.memory_space<vmem>>, %arg64: memref<1x32xf32, #tpu.memory_space<vmem>>, %arg65: memref<32x24xf32, #tpu.memory_space<vmem>>, %arg66: memref<1x24xf32, #tpu.memory_space<vmem>>, %arg67: memref<50x192xf32, #tpu.memory_space<vmem>>, %arg68: memref<1x192xf32, #tpu.memory_space<vmem>>, %arg69: memref<192x192xf32, #tpu.memory_space<vmem>>, %arg70: memref<1x192xf32, #tpu.memory_space<vmem>>, %arg71: memref<192x96xf32, #tpu.memory_space<vmem>>, %arg72: memref<1x96xf32, #tpu.memory_space<vmem>>, %arg73: memref<96x2098xbf16, #tpu.memory_space<vmem>>, %arg74: memref<1x2098xf32, #tpu.memory_space<vmem>>, %arg75: memref<8x66xf32, #tpu.memory_space<vmem>>, %arg76: memref<8x50xf32, #tpu.memory_space<vmem>>, %arg77: memref<8x32xf32, #tpu.memory_space<vmem>>, %arg78: memref<8x2098xf32, #tpu.memory_space<vmem>>) attributes {dimension_semantics = [], scalar_prefetch = 0 : i64, scratch_operands = 3 : i64, tpu.core_type = #tpu.core_type<tc>} {
    %c0 = arith.constant 0 : index
    %c0_0 = arith.constant 0 : index
    %0 = vector.load %arg3[%c0, %c0_0] : memref<8x8xf32, #tpu.memory_space<vmem>>, vector<8x8xf32>
    %c0_1 = arith.constant 0 : index
    %c0_2 = arith.constant 0 : index
    %1 = vector.load %arg5[%c0_1, %c0_2] : memref<8x2xf32, #tpu.memory_space<vmem>>, vector<8x2xf32>
    %c0_3 = arith.constant 0 : index
    %c0_4 = arith.constant 0 : index
    %2 = vector.load %arg0[%c0_3, %c0_4] : memref<8x18xf32, #tpu.memory_space<vmem>>, vector<8x18xf32>
    %c0_5 = arith.constant 0 : index
    %c0_6 = arith.constant 0 : index
    %3 = vector.load %arg7[%c0_5, %c0_6] : memref<18x64xf32, #tpu.memory_space<vmem>>, vector<18x64xf32>
    %cst = arith.constant dense<0.000000e+00> : vector<8x64xf32>
    %4 = tpu.matmul %2, %3, %cst {dimension_numbers = #tpu.dot_dimension_numbers<[1], [0], [0], [1], [0, 0, 1, 1], [], []>} : vector<8x18xf32>, vector<18x64xf32>, vector<8x64xf32> -> vector<8x64xf32>
    %c0_7 = arith.constant 0 : index
    %c0_8 = arith.constant 0 : index
    %5 = vector.load %arg8[%c0_7, %c0_8] : memref<1x64xf32, #tpu.memory_space<vmem>>, vector<1x64xf32>
    %6 = vector.broadcast %5 : vector<1x64xf32> to vector<8x64xf32>
    %7 = arith.addf %4, %6 : vector<8x64xf32>
    %cst_9 = arith.constant 0.000000e+00 : f32
    %8 = vector.broadcast %cst_9 : f32 to vector<8x64xf32>
    %9 = arith.maximumf %7, %8 : vector<8x64xf32>
    %c0_10 = arith.constant 0 : index
    %c0_11 = arith.constant 0 : index
    %10 = vector.load %arg9[%c0_10, %c0_11] : memref<64x64xf32, #tpu.memory_space<vmem>>, vector<64x64xf32>
    %cst_12 = arith.constant dense<0.000000e+00> : vector<8x64xf32>
    %11 = tpu.matmul %9, %10, %cst_12 {dimension_numbers = #tpu.dot_dimension_numbers<[1], [0], [0], [1], [0, 0, 1, 1], [], []>} : vector<8x64xf32>, vector<64x64xf32>, vector<8x64xf32> -> vector<8x64xf32>
    %c0_13 = arith.constant 0 : index
    %c0_14 = arith.constant 0 : index
    %12 = vector.load %arg10[%c0_13, %c0_14] : memref<1x64xf32, #tpu.memory_space<vmem>>, vector<1x64xf32>
    %13 = vector.broadcast %12 : vector<1x64xf32> to vector<8x64xf32>
    %14 = arith.addf %11, %13 : vector<8x64xf32>
    %cst_15 = arith.constant 0.000000e+00 : f32
    %15 = vector.broadcast %cst_15 : f32 to vector<8x64xf32>
    %16 = arith.maximumf %14, %15 : vector<8x64xf32>
    %c0_16 = arith.constant 0 : index
    %c0_17 = arith.constant 0 : index
    %17 = vector.load %arg11[%c0_16, %c0_17] : memref<64x32xf32, #tpu.memory_space<vmem>>, vector<64x32xf32>
    %cst_18 = arith.constant dense<0.000000e+00> : vector<8x32xf32>
    %18 = tpu.matmul %16, %17, %cst_18 {dimension_numbers = #tpu.dot_dimension_numbers<[1], [0], [0], [1], [0, 0, 1, 1], [], []>} : vector<8x64xf32>, vector<64x32xf32>, vector<8x32xf32> -> vector<8x32xf32>
    %c0_19 = arith.constant 0 : index
    %c0_20 = arith.constant 0 : index
    %19 = vector.load %arg12[%c0_19, %c0_20] : memref<1x32xf32, #tpu.memory_space<vmem>>, vector<1x32xf32>
    %20 = vector.broadcast %19 : vector<1x32xf32> to vector<8x32xf32>
    %21 = arith.addf %18, %20 : vector<8x32xf32>
    %cst_21 = arith.constant 0.000000e+00 : f32
    %22 = vector.broadcast %cst_21 : f32 to vector<8x32xf32>
    %23 = arith.maximumf %21, %22 : vector<8x32xf32>
    %c0_22 = arith.constant 0 : index
    %c0_23 = arith.constant 0 : index
    %24 = vector.load %arg13[%c0_22, %c0_23] : memref<32x16xf32, #tpu.memory_space<vmem>>, vector<32x16xf32>
    %cst_24 = arith.constant dense<0.000000e+00> : vector<8x16xf32>
    %25 = tpu.matmul %23, %24, %cst_24 {dimension_numbers = #tpu.dot_dimension_numbers<[1], [0], [0], [1], [0, 0, 1, 1], [], []>} : vector<8x32xf32>, vector<32x16xf32>, vector<8x16xf32> -> vector<8x16xf32>
    %c0_25 = arith.constant 0 : index
    %c0_26 = arith.constant 0 : index
    %26 = vector.load %arg14[%c0_25, %c0_26] : memref<1x16xf32, #tpu.memory_space<vmem>>, vector<1x16xf32>
    %27 = vector.broadcast %26 : vector<1x16xf32> to vector<8x16xf32>
    %28 = arith.addf %25, %27 : vector<8x16xf32>
    %cst_27 = arith.constant 0.000000e+00 : f32
    %29 = vector.broadcast %cst_27 : f32 to vector<8x16xf32>
    %30 = arith.maximumf %28, %29 : vector<8x16xf32>
    %c0_28 = arith.constant 0 : index
    %c0_29 = arith.constant 0 : index
    %31 = vector.load %arg1[%c0_28, %c0_29] : memref<8x2xf32, #tpu.memory_space<vmem>>, vector<8x2xf32>
    %c0_30 = arith.constant 0 : index
    %c0_31 = arith.constant 0 : index
    %32 = vector.load %arg23[%c0_30, %c0_31] : memref<2x64xf32, #tpu.memory_space<vmem>>, vector<2x64xf32>
    %cst_32 = arith.constant dense<0.000000e+00> : vector<8x64xf32>
    %33 = tpu.matmul %31, %32, %cst_32 {dimension_numbers = #tpu.dot_dimension_numbers<[1], [0], [0], [1], [0, 0, 1, 1], [], []>} : vector<8x2xf32>, vector<2x64xf32>, vector<8x64xf32> -> vector<8x64xf32>
    %c0_33 = arith.constant 0 : index
    %c0_34 = arith.constant 0 : index
    %34 = vector.load %arg24[%c0_33, %c0_34] : memref<1x64xf32, #tpu.memory_space<vmem>>, vector<1x64xf32>
    %35 = vector.broadcast %34 : vector<1x64xf32> to vector<8x64xf32>
    %36 = arith.addf %33, %35 : vector<8x64xf32>
    %cst_35 = arith.constant 0.000000e+00 : f32
    %37 = vector.broadcast %cst_35 : f32 to vector<8x64xf32>
    %38 = arith.maximumf %36, %37 : vector<8x64xf32>
    %c0_36 = arith.constant 0 : index
    %c0_37 = arith.constant 0 : index
    %39 = vector.load %arg25[%c0_36, %c0_37] : memref<64x64xf32, #tpu.memory_space<vmem>>, vector<64x64xf32>
    %cst_38 = arith.constant dense<0.000000e+00> : vector<8x64xf32>
    %40 = tpu.matmul %38, %39, %cst_38 {dimension_numbers = #tpu.dot_dimension_numbers<[1], [0], [0], [1], [0, 0, 1, 1], [], []>} : vector<8x64xf32>, vector<64x64xf32>, vector<8x64xf32> -> vector<8x64xf32>
    %c0_39 = arith.constant 0 : index
    %c0_40 = arith.constant 0 : index
    %41 = vector.load %arg26[%c0_39, %c0_40] : memref<1x64xf32, #tpu.memory_space<vmem>>, vector<1x64xf32>
    %42 = vector.broadcast %41 : vector<1x64xf32> to vector<8x64xf32>
    %43 = arith.addf %40, %42 : vector<8x64xf32>
    %cst_41 = arith.constant 0.000000e+00 : f32
    %44 = vector.broadcast %cst_41 : f32 to vector<8x64xf32>
    %45 = arith.maximumf %43, %44 : vector<8x64xf32>
    %c0_42 = arith.constant 0 : index
    %c0_43 = arith.constant 0 : index
    %46 = vector.load %arg27[%c0_42, %c0_43] : memref<64x32xf32, #tpu.memory_space<vmem>>, vector<64x32xf32>
    %cst_44 = arith.constant dense<0.000000e+00> : vector<8x32xf32>
    %47 = tpu.matmul %45, %46, %cst_44 {dimension_numbers = #tpu.dot_dimension_numbers<[1], [0], [0], [1], [0, 0, 1, 1], [], []>} : vector<8x64xf32>, vector<64x32xf32>, vector<8x32xf32> -> vector<8x32xf32>
    %c0_45 = arith.constant 0 : index
    %c0_46 = arith.constant 0 : index
    %48 = vector.load %arg28[%c0_45, %c0_46] : memref<1x32xf32, #tpu.memory_space<vmem>>, vector<1x32xf32>
    %49 = vector.broadcast %48 : vector<1x32xf32> to vector<8x32xf32>
    %50 = arith.addf %47, %49 : vector<8x32xf32>
    %cst_47 = arith.constant 0.000000e+00 : f32
    %51 = vector.broadcast %cst_47 : f32 to vector<8x32xf32>
    %52 = arith.maximumf %50, %51 : vector<8x32xf32>
    %c0_48 = arith.constant 0 : index
    %c0_49 = arith.constant 0 : index
    %53 = vector.load %arg29[%c0_48, %c0_49] : memref<32x16xf32, #tpu.memory_space<vmem>>, vector<32x16xf32>
    %cst_50 = arith.constant dense<0.000000e+00> : vector<8x16xf32>
    %54 = tpu.matmul %52, %53, %cst_50 {dimension_numbers = #tpu.dot_dimension_numbers<[1], [0], [0], [1], [0, 0, 1, 1], [], []>} : vector<8x32xf32>, vector<32x16xf32>, vector<8x16xf32> -> vector<8x16xf32>
    %c0_51 = arith.constant 0 : index
    %c0_52 = arith.constant 0 : index
    %55 = vector.load %arg30[%c0_51, %c0_52] : memref<1x16xf32, #tpu.memory_space<vmem>>, vector<1x16xf32>
    %56 = vector.broadcast %55 : vector<1x16xf32> to vector<8x16xf32>
    %57 = arith.addf %54, %56 : vector<8x16xf32>
    %cst_53 = arith.constant 0.000000e+00 : f32
    %58 = vector.broadcast %cst_53 : f32 to vector<8x16xf32>
    %59 = arith.maximumf %57, %58 : vector<8x16xf32>
    %c0_54 = arith.constant 0 : index
    %c0_55 = arith.constant 0 : index
    %60 = vector.load %arg2[%c0_54, %c0_55] : memref<8x40xf32, #tpu.memory_space<vmem>>, vector<8x40xf32>
    %c0_56 = arith.constant 0 : index
    %c0_57 = arith.constant 0 : index
    %61 = vector.load %arg15[%c0_56, %c0_57] : memref<40x64xf32, #tpu.memory_space<vmem>>, vector<40x64xf32>
    %cst_58 = arith.constant dense<0.000000e+00> : vector<8x64xf32>
    %62 = tpu.matmul %60, %61, %cst_58 {dimension_numbers = #tpu.dot_dimension_numbers<[1], [0], [0], [1], [0, 0, 1, 1], [], []>} : vector<8x40xf32>, vector<40x64xf32>, vector<8x64xf32> -> vector<8x64xf32>
    %c0_59 = arith.constant 0 : index
    %c0_60 = arith.constant 0 : index
    %63 = vector.load %arg16[%c0_59, %c0_60] : memref<1x64xf32, #tpu.memory_space<vmem>>, vector<1x64xf32>
    %64 = vector.broadcast %63 : vector<1x64xf32> to vector<8x64xf32>
    %65 = arith.addf %62, %64 : vector<8x64xf32>
    %cst_61 = arith.constant 0.000000e+00 : f32
    %66 = vector.broadcast %cst_61 : f32 to vector<8x64xf32>
    %67 = arith.maximumf %65, %66 : vector<8x64xf32>
    %c0_62 = arith.constant 0 : index
    %c0_63 = arith.constant 0 : index
    %68 = vector.load %arg17[%c0_62, %c0_63] : memref<64x64xf32, #tpu.memory_space<vmem>>, vector<64x64xf32>
    %cst_64 = arith.constant dense<0.000000e+00> : vector<8x64xf32>
    %69 = tpu.matmul %67, %68, %cst_64 {dimension_numbers = #tpu.dot_dimension_numbers<[1], [0], [0], [1], [0, 0, 1, 1], [], []>} : vector<8x64xf32>, vector<64x64xf32>, vector<8x64xf32> -> vector<8x64xf32>
    %c0_65 = arith.constant 0 : index
    %c0_66 = arith.constant 0 : index
    %70 = vector.load %arg18[%c0_65, %c0_66] : memref<1x64xf32, #tpu.memory_space<vmem>>, vector<1x64xf32>
    %71 = vector.broadcast %70 : vector<1x64xf32> to vector<8x64xf32>
    %72 = arith.addf %69, %71 : vector<8x64xf32>
    %cst_67 = arith.constant 0.000000e+00 : f32
    %73 = vector.broadcast %cst_67 : f32 to vector<8x64xf32>
    %74 = arith.maximumf %72, %73 : vector<8x64xf32>
    %c0_68 = arith.constant 0 : index
    %c0_69 = arith.constant 0 : index
    %75 = vector.load %arg19[%c0_68, %c0_69] : memref<64x32xf32, #tpu.memory_space<vmem>>, vector<64x32xf32>
    %cst_70 = arith.constant dense<0.000000e+00> : vector<8x32xf32>
    %76 = tpu.matmul %74, %75, %cst_70 {dimension_numbers = #tpu.dot_dimension_numbers<[1], [0], [0], [1], [0, 0, 1, 1], [], []>} : vector<8x64xf32>, vector<64x32xf32>, vector<8x32xf32> -> vector<8x32xf32>
    %c0_71 = arith.constant 0 : index
    %c0_72 = arith.constant 0 : index
    %77 = vector.load %arg20[%c0_71, %c0_72] : memref<1x32xf32, #tpu.memory_space<vmem>>, vector<1x32xf32>
    %78 = vector.broadcast %77 : vector<1x32xf32> to vector<8x32xf32>
    %79 = arith.addf %76, %78 : vector<8x32xf32>
    %cst_73 = arith.constant 0.000000e+00 : f32
    %80 = vector.broadcast %cst_73 : f32 to vector<8x32xf32>
    %81 = arith.maximumf %79, %80 : vector<8x32xf32>
    %c0_74 = arith.constant 0 : index
    %c0_75 = arith.constant 0 : index
    %82 = vector.load %arg21[%c0_74, %c0_75] : memref<32x16xf32, #tpu.memory_space<vmem>>, vector<32x16xf32>
    %cst_76 = arith.constant dense<0.000000e+00> : vector<8x16xf32>
    %83 = tpu.matmul %81, %82, %cst_76 {dimension_numbers = #tpu.dot_dimension_numbers<[1], [0], [0], [1], [0, 0, 1, 1], [], []>} : vector<8x32xf32>, vector<32x16xf32>, vector<8x16xf32> -> vector<8x16xf32>
    %c0_77 = arith.constant 0 : index
    %c0_78 = arith.constant 0 : index
    %84 = vector.load %arg22[%c0_77, %c0_78] : memref<1x16xf32, #tpu.memory_space<vmem>>, vector<1x16xf32>
    %85 = vector.broadcast %84 : vector<1x16xf32> to vector<8x16xf32>
    %86 = arith.addf %83, %85 : vector<8x16xf32>
    %cst_79 = arith.constant 0.000000e+00 : f32
    %87 = vector.broadcast %cst_79 : f32 to vector<8x16xf32>
    %88 = arith.maximumf %86, %87 : vector<8x16xf32>
    %c0_80 = arith.constant 0 : index
    %c0_81 = arith.constant 0 : index
    %89 = vector.load %arg31[%c0_80, %c0_81] : memref<16x32xf32, #tpu.memory_space<vmem>>, vector<16x32xf32>
    %cst_82 = arith.constant dense<0.000000e+00> : vector<8x32xf32>
    %90 = tpu.matmul %30, %89, %cst_82 {dimension_numbers = #tpu.dot_dimension_numbers<[1], [0], [0], [1], [0, 0, 1, 1], [], []>} : vector<8x16xf32>, vector<16x32xf32>, vector<8x32xf32> -> vector<8x32xf32>
    %c0_83 = arith.constant 0 : index
    %c0_84 = arith.constant 0 : index
    %91 = vector.load %arg32[%c0_83, %c0_84] : memref<1x32xf32, #tpu.memory_space<vmem>>, vector<1x32xf32>
    %92 = vector.broadcast %91 : vector<1x32xf32> to vector<8x32xf32>
    %93 = arith.addf %90, %92 : vector<8x32xf32>
    %cst_85 = arith.constant 0.000000e+00 : f32
    %94 = vector.broadcast %cst_85 : f32 to vector<8x32xf32>
    %95 = arith.maximumf %93, %94 : vector<8x32xf32>
    %c0_86 = arith.constant 0 : index
    %c0_87 = arith.constant 0 : index
    %96 = vector.load %arg33[%c0_86, %c0_87] : memref<16x32xf32, #tpu.memory_space<vmem>>, vector<16x32xf32>
    %cst_88 = arith.constant dense<0.000000e+00> : vector<8x32xf32>
    %97 = tpu.matmul %30, %96, %cst_88 {dimension_numbers = #tpu.dot_dimension_numbers<[1], [0], [0], [1], [0, 0, 1, 1], [], []>} : vector<8x16xf32>, vector<16x32xf32>, vector<8x32xf32> -> vector<8x32xf32>
    %c0_89 = arith.constant 0 : index
    %c0_90 = arith.constant 0 : index
    %98 = vector.load %arg34[%c0_89, %c0_90] : memref<1x32xf32, #tpu.memory_space<vmem>>, vector<1x32xf32>
    %99 = vector.broadcast %98 : vector<1x32xf32> to vector<8x32xf32>
    %100 = arith.addf %97, %99 : vector<8x32xf32>
    %cst_91 = arith.constant 0.000000e+00 : f32
    %101 = vector.broadcast %cst_91 : f32 to vector<8x32xf32>
    %102 = arith.maximumf %100, %101 : vector<8x32xf32>
    %cst_92 = arith.constant dense<0.000000e+00> : vector<8x8xf32>
    %103 = tpu.matmul %95, %102, %cst_92 {dimension_numbers = #tpu.dot_dimension_numbers<[1], [1], [0], [0], [0, 0, 1, 0], [], []>} : vector<8x32xf32>, vector<8x32xf32>, vector<8x8xf32> -> vector<8x8xf32>
    %cst_93 = arith.constant 0.176776692 : f32
    %104 = vector.broadcast %cst_93 : f32 to vector<8x8xf32>
    %105 = arith.mulf %103, %104 : vector<8x8xf32>
    %106 = arith.mulf %105, %0 : vector<8x8xf32>
    %cst_94 = arith.constant dense<0xFF800000> : vector<8xf32>
    %107 = vector.multi_reduction <maximumf>, %106, %cst_94 [1] : vector<8x8xf32> to vector<8xf32>
    %108 = vector.shape_cast %107 : vector<8xf32> to vector<8x1xf32>
    %109 = vector.broadcast %108 : vector<8x1xf32> to vector<8x8xf32>
    %110 = arith.subf %106, %109 : vector<8x8xf32>
    %111 = math.exp %110 : vector<8x8xf32>
    %cst_95 = arith.constant dense<0.000000e+00> : vector<8xf32>
    %112 = vector.multi_reduction <add>, %111, %cst_95 [1] : vector<8x8xf32> to vector<8xf32>
    %113 = vector.shape_cast %112 : vector<8xf32> to vector<8x1xf32>
    %114 = tpu.reciprocal %113 {approx = true} : vector<8x1xf32> -> vector<8x1xf32>
    %115 = vector.broadcast %114 : vector<8x1xf32> to vector<8x8xf32>
    %116 = arith.mulf %111, %115 : vector<8x8xf32>
    %cst_96 = arith.constant dense<0.000000e+00> : vector<8x16xf32>
    %117 = tpu.matmul %116, %30, %cst_96 {dimension_numbers = #tpu.dot_dimension_numbers<[1], [0], [0], [1], [0, 0, 1, 1], [], []>} : vector<8x8xf32>, vector<8x16xf32>, vector<8x16xf32> -> vector<8x16xf32>
    %118 = arith.addf %30, %117 : vector<8x16xf32>
    %c0_97 = arith.constant 0 : index
    %c0_98 = arith.constant 0 : index
    %119 = vector.load %arg35[%c0_97, %c0_98] : memref<16x32xf32, #tpu.memory_space<vmem>>, vector<16x32xf32>
    %cst_99 = arith.constant dense<0.000000e+00> : vector<8x32xf32>
    %120 = tpu.matmul %118, %119, %cst_99 {dimension_numbers = #tpu.dot_dimension_numbers<[1], [0], [0], [1], [0, 0, 1, 1], [], []>} : vector<8x16xf32>, vector<16x32xf32>, vector<8x32xf32> -> vector<8x32xf32>
    %c0_100 = arith.constant 0 : index
    %c0_101 = arith.constant 0 : index
    %121 = vector.load %arg36[%c0_100, %c0_101] : memref<1x32xf32, #tpu.memory_space<vmem>>, vector<1x32xf32>
    %122 = vector.broadcast %121 : vector<1x32xf32> to vector<8x32xf32>
    %123 = arith.addf %120, %122 : vector<8x32xf32>
    %cst_102 = arith.constant 0.000000e+00 : f32
    %124 = vector.broadcast %cst_102 : f32 to vector<8x32xf32>
    %125 = arith.maximumf %123, %124 : vector<8x32xf32>
    %c0_103 = arith.constant 0 : index
    %c0_104 = arith.constant 0 : index
    %126 = vector.load %arg37[%c0_103, %c0_104] : memref<16x32xf32, #tpu.memory_space<vmem>>, vector<16x32xf32>
    %cst_105 = arith.constant dense<0.000000e+00> : vector<8x32xf32>
    %127 = tpu.matmul %118, %126, %cst_105 {dimension_numbers = #tpu.dot_dimension_numbers<[1], [0], [0], [1], [0, 0, 1, 1], [], []>} : vector<8x16xf32>, vector<16x32xf32>, vector<8x32xf32> -> vector<8x32xf32>
    %c0_106 = arith.constant 0 : index
    %c0_107 = arith.constant 0 : index
    %128 = vector.load %arg38[%c0_106, %c0_107] : memref<1x32xf32, #tpu.memory_space<vmem>>, vector<1x32xf32>
    %129 = vector.broadcast %128 : vector<1x32xf32> to vector<8x32xf32>
    %130 = arith.addf %127, %129 : vector<8x32xf32>
    %cst_108 = arith.constant 0.000000e+00 : f32
    %131 = vector.broadcast %cst_108 : f32 to vector<8x32xf32>
    %132 = arith.maximumf %130, %131 : vector<8x32xf32>
    %cst_109 = arith.constant dense<0.000000e+00> : vector<8x8xf32>
    %133 = tpu.matmul %125, %132, %cst_109 {dimension_numbers = #tpu.dot_dimension_numbers<[1], [1], [0], [0], [0, 0, 1, 0], [], []>} : vector<8x32xf32>, vector<8x32xf32>, vector<8x8xf32> -> vector<8x8xf32>
    %cst_110 = arith.constant 0.176776692 : f32
    %134 = vector.broadcast %cst_110 : f32 to vector<8x8xf32>
    %135 = arith.mulf %133, %134 : vector<8x8xf32>
    %136 = arith.mulf %135, %0 : vector<8x8xf32>
    %cst_111 = arith.constant dense<0xFF800000> : vector<8xf32>
    %137 = vector.multi_reduction <maximumf>, %136, %cst_111 [1] : vector<8x8xf32> to vector<8xf32>
    %138 = vector.shape_cast %137 : vector<8xf32> to vector<8x1xf32>
    %139 = vector.broadcast %138 : vector<8x1xf32> to vector<8x8xf32>
    %140 = arith.subf %136, %139 : vector<8x8xf32>
    %141 = math.exp %140 : vector<8x8xf32>
    %cst_112 = arith.constant dense<0.000000e+00> : vector<8xf32>
    %142 = vector.multi_reduction <add>, %141, %cst_112 [1] : vector<8x8xf32> to vector<8xf32>
    %143 = vector.shape_cast %142 : vector<8xf32> to vector<8x1xf32>
    %144 = tpu.reciprocal %143 {approx = true} : vector<8x1xf32> -> vector<8x1xf32>
    %145 = vector.broadcast %144 : vector<8x1xf32> to vector<8x8xf32>
    %146 = arith.mulf %141, %145 : vector<8x8xf32>
    %cst_113 = arith.constant dense<0.000000e+00> : vector<8x16xf32>
    %147 = tpu.matmul %146, %118, %cst_113 {dimension_numbers = #tpu.dot_dimension_numbers<[1], [0], [0], [1], [0, 0, 1, 1], [], []>} : vector<8x8xf32>, vector<8x16xf32>, vector<8x16xf32> -> vector<8x16xf32>
    %148 = arith.addf %118, %147 : vector<8x16xf32>
    %c0_114 = arith.constant 0 : index
    %c0_115 = arith.constant 0 : index
    %149 = vector.load %arg39[%c0_114, %c0_115] : memref<16x32xf32, #tpu.memory_space<vmem>>, vector<16x32xf32>
    %cst_116 = arith.constant dense<0.000000e+00> : vector<8x32xf32>
    %150 = tpu.matmul %148, %149, %cst_116 {dimension_numbers = #tpu.dot_dimension_numbers<[1], [0], [0], [1], [0, 0, 1, 1], [], []>} : vector<8x16xf32>, vector<16x32xf32>, vector<8x32xf32> -> vector<8x32xf32>
    %c0_117 = arith.constant 0 : index
    %c0_118 = arith.constant 0 : index
    %151 = vector.load %arg40[%c0_117, %c0_118] : memref<1x32xf32, #tpu.memory_space<vmem>>, vector<1x32xf32>
    %152 = vector.broadcast %151 : vector<1x32xf32> to vector<8x32xf32>
    %153 = arith.addf %150, %152 : vector<8x32xf32>
    %cst_119 = arith.constant 0.000000e+00 : f32
    %154 = vector.broadcast %cst_119 : f32 to vector<8x32xf32>
    %155 = arith.maximumf %153, %154 : vector<8x32xf32>
    %c0_120 = arith.constant 0 : index
    %c0_121 = arith.constant 0 : index
    %156 = vector.load %arg41[%c0_120, %c0_121] : memref<16x32xf32, #tpu.memory_space<vmem>>, vector<16x32xf32>
    %cst_122 = arith.constant dense<0.000000e+00> : vector<8x32xf32>
    %157 = tpu.matmul %88, %156, %cst_122 {dimension_numbers = #tpu.dot_dimension_numbers<[1], [0], [0], [1], [0, 0, 1, 1], [], []>} : vector<8x16xf32>, vector<16x32xf32>, vector<8x32xf32> -> vector<8x32xf32>
    %c0_123 = arith.constant 0 : index
    %c0_124 = arith.constant 0 : index
    %158 = vector.load %arg42[%c0_123, %c0_124] : memref<1x32xf32, #tpu.memory_space<vmem>>, vector<1x32xf32>
    %159 = vector.broadcast %158 : vector<1x32xf32> to vector<8x32xf32>
    %160 = arith.addf %157, %159 : vector<8x32xf32>
    %cst_125 = arith.constant 0.000000e+00 : f32
    %161 = vector.broadcast %cst_125 : f32 to vector<8x32xf32>
    %162 = arith.maximumf %160, %161 : vector<8x32xf32>
    %cst_126 = arith.constant dense<0.000000e+00> : vector<8x8xf32>
    %163 = tpu.matmul %155, %162, %cst_126 {dimension_numbers = #tpu.dot_dimension_numbers<[1], [1], [0], [0], [0, 0, 1, 0], [], []>} : vector<8x32xf32>, vector<8x32xf32>, vector<8x8xf32> -> vector<8x8xf32>
    %cst_127 = arith.constant 0.176776692 : f32
    %164 = vector.broadcast %cst_127 : f32 to vector<8x8xf32>
    %165 = arith.mulf %163, %164 : vector<8x8xf32>
    %cst_128 = arith.constant dense<0xFF800000> : vector<8xf32>
    %166 = vector.multi_reduction <maximumf>, %165, %cst_128 [1] : vector<8x8xf32> to vector<8xf32>
    %167 = vector.shape_cast %166 : vector<8xf32> to vector<8x1xf32>
    %168 = vector.broadcast %167 : vector<8x1xf32> to vector<8x8xf32>
    %169 = arith.subf %165, %168 : vector<8x8xf32>
    %170 = math.exp %169 : vector<8x8xf32>
    %cst_129 = arith.constant dense<0.000000e+00> : vector<8xf32>
    %171 = vector.multi_reduction <add>, %170, %cst_129 [1] : vector<8x8xf32> to vector<8xf32>
    %172 = vector.shape_cast %171 : vector<8xf32> to vector<8x1xf32>
    %173 = tpu.reciprocal %172 {approx = true} : vector<8x1xf32> -> vector<8x1xf32>
    %174 = vector.broadcast %173 : vector<8x1xf32> to vector<8x8xf32>
    %175 = arith.mulf %170, %174 : vector<8x8xf32>
    %c0_130 = arith.constant 0 : index
    %c0_131 = arith.constant 0 : index
    %176 = vector.load %arg4[%c0_130, %c0_131] : memref<8x8xf32, #tpu.memory_space<vmem>>, vector<8x8xf32>
    %cst_132 = arith.constant dense<0.000000e+00> : vector<8x16xf32>
    %177 = tpu.matmul %176, %88, %cst_132 {dimension_numbers = #tpu.dot_dimension_numbers<[1], [0], [0], [1], [0, 0, 1, 1], [], []>} : vector<8x8xf32>, vector<8x16xf32>, vector<8x16xf32> -> vector<8x16xf32>
    %c0_133 = arith.constant 0 : index
    %c0_134 = arith.constant 0 : index
    %178 = vector.load %arg76[%c0_133, %c0_134] : memref<8x50xf32, #tpu.memory_space<vmem>>, vector<8x16xf32>
    tpu.vector_store %arg76[%c0_133, %c0_134], %148 {strides = array<i32>} : memref<8x50xf32, #tpu.memory_space<vmem>>, vector<8x16xf32>,
    %c0_135 = arith.constant 0 : index
    %c16 = arith.constant 16 : index
    %179 = vector.load %arg76[%c0_135, %c16] : memref<8x50xf32, #tpu.memory_space<vmem>>, vector<8x16xf32>
    tpu.vector_store %arg76[%c0_135, %c16], %177 {strides = array<i32>} : memref<8x50xf32, #tpu.memory_space<vmem>>, vector<8x16xf32>,
    %c0_136 = arith.constant 0 : index
    %c32 = arith.constant 32 : index
    %180 = vector.load %arg76[%c0_136, %c32] : memref<8x50xf32, #tpu.memory_space<vmem>>, vector<8x2xf32>
    tpu.vector_store %arg76[%c0_136, %c32], %1 {strides = array<i32>} : memref<8x50xf32, #tpu.memory_space<vmem>>, vector<8x2xf32>,
    %c0_137 = arith.constant 0 : index
    %c34 = arith.constant 34 : index
    %181 = vector.load %arg76[%c0_137, %c34] : memref<8x50xf32, #tpu.memory_space<vmem>>, vector<8x16xf32>
    tpu.vector_store %arg76[%c0_137, %c34], %59 {strides = array<i32>} : memref<8x50xf32, #tpu.memory_space<vmem>>, vector<8x16xf32>,
    %c0_138 = arith.constant 0 : index
    %c0_139 = arith.constant 0 : index
    %182 = vector.load %arg76[%c0_138, %c0_139] : memref<8x50xf32, #tpu.memory_space<vmem>>, vector<8x50xf32>
    %c0_140 = arith.constant 0 : index
    %c0_141 = arith.constant 0 : index
    %183 = vector.load %arg43[%c0_140, %c0_141] : memref<50x64xf32, #tpu.memory_space<vmem>>, vector<50x64xf32>
    %cst_142 = arith.constant dense<0.000000e+00> : vector<8x64xf32>
    %184 = tpu.matmul %182, %183, %cst_142 {dimension_numbers = #tpu.dot_dimension_numbers<[1], [0], [0], [1], [0, 0, 1, 1], [], []>} : vector<8x50xf32>, vector<50x64xf32>, vector<8x64xf32> -> vector<8x64xf32>
    %c0_143 = arith.constant 0 : index
    %c0_144 = arith.constant 0 : index
    %185 = vector.load %arg44[%c0_143, %c0_144] : memref<1x64xf32, #tpu.memory_space<vmem>>, vector<1x64xf32>
    %186 = vector.broadcast %185 : vector<1x64xf32> to vector<8x64xf32>
    %187 = arith.addf %184, %186 : vector<8x64xf32>
    %cst_145 = arith.constant 0.000000e+00 : f32
    %188 = vector.broadcast %cst_145 : f32 to vector<8x64xf32>
    %189 = arith.maximumf %187, %188 : vector<8x64xf32>
    %c0_146 = arith.constant 0 : index
    %c0_147 = arith.constant 0 : index
    %190 = vector.load %arg45[%c0_146, %c0_147] : memref<64x64xf32, #tpu.memory_space<vmem>>, vector<64x64xf32>
    %cst_148 = arith.constant dense<0.000000e+00> : vector<8x64xf32>
    %191 = tpu.matmul %189, %190, %cst_148 {dimension_numbers = #tpu.dot_dimension_numbers<[1], [0], [0], [1], [0, 0, 1, 1], [], []>} : vector<8x64xf32>, vector<64x64xf32>, vector<8x64xf32> -> vector<8x64xf32>
    %c0_149 = arith.constant 0 : index
    %c0_150 = arith.constant 0 : index
    %192 = vector.load %arg46[%c0_149, %c0_150] : memref<1x64xf32, #tpu.memory_space<vmem>>, vector<1x64xf32>
    %193 = vector.broadcast %192 : vector<1x64xf32> to vector<8x64xf32>
    %194 = arith.addf %191, %193 : vector<8x64xf32>
    %cst_151 = arith.constant 0.000000e+00 : f32
    %195 = vector.broadcast %cst_151 : f32 to vector<8x64xf32>
    %196 = arith.maximumf %194, %195 : vector<8x64xf32>
    %c0_152 = arith.constant 0 : index
    %c0_153 = arith.constant 0 : index
    %197 = vector.load %arg47[%c0_152, %c0_153] : memref<64x32xf32, #tpu.memory_space<vmem>>, vector<64x32xf32>
    %cst_154 = arith.constant dense<0.000000e+00> : vector<8x32xf32>
    %198 = tpu.matmul %196, %197, %cst_154 {dimension_numbers = #tpu.dot_dimension_numbers<[1], [0], [0], [1], [0, 0, 1, 1], [], []>} : vector<8x64xf32>, vector<64x32xf32>, vector<8x32xf32> -> vector<8x32xf32>
    %c0_155 = arith.constant 0 : index
    %c0_156 = arith.constant 0 : index
    %199 = vector.load %arg48[%c0_155, %c0_156] : memref<1x32xf32, #tpu.memory_space<vmem>>, vector<1x32xf32>
    %200 = vector.broadcast %199 : vector<1x32xf32> to vector<8x32xf32>
    %201 = arith.addf %198, %200 : vector<8x32xf32>
    %cst_157 = arith.constant 0.000000e+00 : f32
    %202 = vector.broadcast %cst_157 : f32 to vector<8x32xf32>
    %203 = arith.maximumf %201, %202 : vector<8x32xf32>
    %c0_158 = arith.constant 0 : index
    %c0_159 = arith.constant 0 : index
    %204 = vector.load %arg49[%c0_158, %c0_159] : memref<32x32xf32, #tpu.memory_space<vmem>>, vector<32x32xf32>
    %cst_160 = arith.constant dense<0.000000e+00> : vector<8x32xf32>
    %205 = tpu.matmul %203, %204, %cst_160 {dimension_numbers = #tpu.dot_dimension_numbers<[1], [0], [0], [1], [0, 0, 1, 1], [], []>} : vector<8x32xf32>, vector<32x32xf32>, vector<8x32xf32> -> vector<8x32xf32>
    %c0_161 = arith.constant 0 : index
    %c0_162 = arith.constant 0 : index
    %206 = vector.load %arg50[%c0_161, %c0_162] : memref<1x32xf32, #tpu.memory_space<vmem>>, vector<1x32xf32>
    %207 = vector.broadcast %206 : vector<1x32xf32> to vector<8x32xf32>
    %208 = arith.addf %205, %207 : vector<8x32xf32>
    %cst_163 = arith.constant 0.000000e+00 : f32
    %209 = vector.broadcast %cst_163 : f32 to vector<8x32xf32>
    %210 = arith.maximumf %208, %209 : vector<8x32xf32>
    %c0_164 = arith.constant 0 : index
    %c0_165 = arith.constant 0 : index
    %211 = vector.load %arg77[%c0_164, %c0_165] : memref<8x32xf32, #tpu.memory_space<vmem>>, vector<8x32xf32>
    tpu.vector_store %arg77[%c0_164, %c0_165], %210 {strides = array<i32>} : memref<8x32xf32, #tpu.memory_space<vmem>>, vector<8x32xf32>,
    %c0_166 = arith.constant 0 : index
    %c0_167 = arith.constant 0 : index
    %212 = vector.load %arg77[%c0_166, %c0_167] : memref<8x32xf32, #tpu.memory_space<vmem>>, vector<8x16xf32>
    %c0_168 = arith.constant 0 : index
    %c16_169 = arith.constant 16 : index
    %213 = vector.load %arg77[%c0_168, %c16_169] : memref<8x32xf32, #tpu.memory_space<vmem>>, vector<8x16xf32>
    %c0_170 = arith.constant 0 : index
    %c0_171 = arith.constant 0 : index
    %214 = vector.load %arg6[%c0_170, %c0_171] : memref<8x16xf32, #tpu.memory_space<vmem>>, vector<8x16xf32>
    %cst_172 = arith.constant 5.000000e-01 : f32
    %215 = vector.broadcast %cst_172 : f32 to vector<8x16xf32>
    %216 = arith.mulf %215, %213 : vector<8x16xf32>
    %217 = math.exp %216 : vector<8x16xf32>
    %218 = arith.mulf %214, %217 : vector<8x16xf32>
    %219 = arith.addf %218, %212 : vector<8x16xf32>
    %c0_173 = arith.constant 0 : index
    %c34_174 = arith.constant 34 : index
    %220 = vector.load %arg76[%c0_173, %c34_174] : memref<8x50xf32, #tpu.memory_space<vmem>>, vector<8x16xf32>
    tpu.vector_store %arg76[%c0_173, %c34_174], %219 {strides = array<i32>} : memref<8x50xf32, #tpu.memory_space<vmem>>, vector<8x16xf32>,
    %c0_175 = arith.constant 0 : index
    %c0_176 = arith.constant 0 : index
    %221 = vector.load %arg76[%c0_175, %c0_176] : memref<8x50xf32, #tpu.memory_space<vmem>>, vector<8x50xf32>
    %c0_177 = arith.constant 0 : index
    %c0_178 = arith.constant 0 : index
    %222 = vector.load %arg51[%c0_177, %c0_178] : memref<50x64xf32, #tpu.memory_space<vmem>>, vector<50x64xf32>
    %cst_179 = arith.constant dense<0.000000e+00> : vector<8x64xf32>
    %223 = tpu.matmul %221, %222, %cst_179 {dimension_numbers = #tpu.dot_dimension_numbers<[1], [0], [0], [1], [0, 0, 1, 1], [], []>} : vector<8x50xf32>, vector<50x64xf32>, vector<8x64xf32> -> vector<8x64xf32>
    %c0_180 = arith.constant 0 : index
    %c0_181 = arith.constant 0 : index
    %224 = vector.load %arg52[%c0_180, %c0_181] : memref<1x64xf32, #tpu.memory_space<vmem>>, vector<1x64xf32>
    %225 = vector.broadcast %224 : vector<1x64xf32> to vector<8x64xf32>
    %226 = arith.addf %223, %225 : vector<8x64xf32>
    %cst_182 = arith.constant 0.000000e+00 : f32
    %227 = vector.broadcast %cst_182 : f32 to vector<8x64xf32>
    %228 = arith.maximumf %226, %227 : vector<8x64xf32>
    %c0_183 = arith.constant 0 : index
    %c0_184 = arith.constant 0 : index
    %229 = vector.load %arg53[%c0_183, %c0_184] : memref<64x64xf32, #tpu.memory_space<vmem>>, vector<64x64xf32>
    %cst_185 = arith.constant dense<0.000000e+00> : vector<8x64xf32>
    %230 = tpu.matmul %228, %229, %cst_185 {dimension_numbers = #tpu.dot_dimension_numbers<[1], [0], [0], [1], [0, 0, 1, 1], [], []>} : vector<8x64xf32>, vector<64x64xf32>, vector<8x64xf32> -> vector<8x64xf32>
    %c0_186 = arith.constant 0 : index
    %c0_187 = arith.constant 0 : index
    %231 = vector.load %arg54[%c0_186, %c0_187] : memref<1x64xf32, #tpu.memory_space<vmem>>, vector<1x64xf32>
    %232 = vector.broadcast %231 : vector<1x64xf32> to vector<8x64xf32>
    %233 = arith.addf %230, %232 : vector<8x64xf32>
    %cst_188 = arith.constant 0.000000e+00 : f32
    %234 = vector.broadcast %cst_188 : f32 to vector<8x64xf32>
    %235 = arith.maximumf %233, %234 : vector<8x64xf32>
    %c0_189 = arith.constant 0 : index
    %c0_190 = arith.constant 0 : index
    %236 = vector.load %arg55[%c0_189, %c0_190] : memref<64x32xf32, #tpu.memory_space<vmem>>, vector<64x32xf32>
    %cst_191 = arith.constant dense<0.000000e+00> : vector<8x32xf32>
    %237 = tpu.matmul %235, %236, %cst_191 {dimension_numbers = #tpu.dot_dimension_numbers<[1], [0], [0], [1], [0, 0, 1, 1], [], []>} : vector<8x64xf32>, vector<64x32xf32>, vector<8x32xf32> -> vector<8x32xf32>
    %c0_192 = arith.constant 0 : index
    %c0_193 = arith.constant 0 : index
    %238 = vector.load %arg56[%c0_192, %c0_193] : memref<1x32xf32, #tpu.memory_space<vmem>>, vector<1x32xf32>
    %239 = vector.broadcast %238 : vector<1x32xf32> to vector<8x32xf32>
    %240 = arith.addf %237, %239 : vector<8x32xf32>
    %cst_194 = arith.constant 0.000000e+00 : f32
    %241 = vector.broadcast %cst_194 : f32 to vector<8x32xf32>
    %242 = arith.maximumf %240, %241 : vector<8x32xf32>
    %c0_195 = arith.constant 0 : index
    %c0_196 = arith.constant 0 : index
    %243 = vector.load %arg57[%c0_195, %c0_196] : memref<32x2xf32, #tpu.memory_space<vmem>>, vector<32x2xf32>
    %cst_197 = arith.constant dense<0.000000e+00> : vector<8x2xf32>
    %244 = tpu.matmul %242, %243, %cst_197 {dimension_numbers = #tpu.dot_dimension_numbers<[1], [0], [0], [1], [0, 0, 1, 1], [], []>} : vector<8x32xf32>, vector<32x2xf32>, vector<8x2xf32> -> vector<8x2xf32>
    %c0_198 = arith.constant 0 : index
    %c0_199 = arith.constant 0 : index
    %245 = vector.load %arg58[%c0_198, %c0_199] : memref<1x2xf32, #tpu.memory_space<vmem>>, vector<1x2xf32>
    %246 = vector.broadcast %245 : vector<1x2xf32> to vector<8x2xf32>
    %247 = arith.addf %244, %246 : vector<8x2xf32>
    %cst_200 = arith.constant 0.000000e+00 : f32
    %248 = vector.broadcast %cst_200 : f32 to vector<8x2xf32>
    %249 = arith.maximumf %247, %248 : vector<8x2xf32>
    %c0_201 = arith.constant 0 : index
    %c0_202 = arith.constant 0 : index
    %250 = vector.load %arg23[%c0_201, %c0_202] : memref<2x64xf32, #tpu.memory_space<vmem>>, vector<2x64xf32>
    %cst_203 = arith.constant dense<0.000000e+00> : vector<8x64xf32>
    %251 = tpu.matmul %249, %250, %cst_203 {dimension_numbers = #tpu.dot_dimension_numbers<[1], [0], [0], [1], [0, 0, 1, 1], [], []>} : vector<8x2xf32>, vector<2x64xf32>, vector<8x64xf32> -> vector<8x64xf32>
    %c0_204 = arith.constant 0 : index
    %c0_205 = arith.constant 0 : index
    %252 = vector.load %arg24[%c0_204, %c0_205] : memref<1x64xf32, #tpu.memory_space<vmem>>, vector<1x64xf32>
    %253 = vector.broadcast %252 : vector<1x64xf32> to vector<8x64xf32>
    %254 = arith.addf %251, %253 : vector<8x64xf32>
    %cst_206 = arith.constant 0.000000e+00 : f32
    %255 = vector.broadcast %cst_206 : f32 to vector<8x64xf32>
    %256 = arith.maximumf %254, %255 : vector<8x64xf32>
    %c0_207 = arith.constant 0 : index
    %c0_208 = arith.constant 0 : index
    %257 = vector.load %arg25[%c0_207, %c0_208] : memref<64x64xf32, #tpu.memory_space<vmem>>, vector<64x64xf32>
    %cst_209 = arith.constant dense<0.000000e+00> : vector<8x64xf32>
    %258 = tpu.matmul %256, %257, %cst_209 {dimension_numbers = #tpu.dot_dimension_numbers<[1], [0], [0], [1], [0, 0, 1, 1], [], []>} : vector<8x64xf32>, vector<64x64xf32>, vector<8x64xf32> -> vector<8x64xf32>
    %c0_210 = arith.constant 0 : index
    %c0_211 = arith.constant 0 : index
    %259 = vector.load %arg26[%c0_210, %c0_211] : memref<1x64xf32, #tpu.memory_space<vmem>>, vector<1x64xf32>
    %260 = vector.broadcast %259 : vector<1x64xf32> to vector<8x64xf32>
    %261 = arith.addf %258, %260 : vector<8x64xf32>
    %cst_212 = arith.constant 0.000000e+00 : f32
    %262 = vector.broadcast %cst_212 : f32 to vector<8x64xf32>
    %263 = arith.maximumf %261, %262 : vector<8x64xf32>
    %c0_213 = arith.constant 0 : index
    %c0_214 = arith.constant 0 : index
    %264 = vector.load %arg27[%c0_213, %c0_214] : memref<64x32xf32, #tpu.memory_space<vmem>>, vector<64x32xf32>
    %cst_215 = arith.constant dense<0.000000e+00> : vector<8x32xf32>
    %265 = tpu.matmul %263, %264, %cst_215 {dimension_numbers = #tpu.dot_dimension_numbers<[1], [0], [0], [1], [0, 0, 1, 1], [], []>} : vector<8x64xf32>, vector<64x32xf32>, vector<8x32xf32> -> vector<8x32xf32>
    %c0_216 = arith.constant 0 : index
    %c0_217 = arith.constant 0 : index
    %266 = vector.load %arg28[%c0_216, %c0_217] : memref<1x32xf32, #tpu.memory_space<vmem>>, vector<1x32xf32>
    %267 = vector.broadcast %266 : vector<1x32xf32> to vector<8x32xf32>
    %268 = arith.addf %265, %267 : vector<8x32xf32>
    %cst_218 = arith.constant 0.000000e+00 : f32
    %269 = vector.broadcast %cst_218 : f32 to vector<8x32xf32>
    %270 = arith.maximumf %268, %269 : vector<8x32xf32>
    %c0_219 = arith.constant 0 : index
    %c0_220 = arith.constant 0 : index
    %271 = vector.load %arg29[%c0_219, %c0_220] : memref<32x16xf32, #tpu.memory_space<vmem>>, vector<32x16xf32>
    %cst_221 = arith.constant dense<0.000000e+00> : vector<8x16xf32>
    %272 = tpu.matmul %270, %271, %cst_221 {dimension_numbers = #tpu.dot_dimension_numbers<[1], [0], [0], [1], [0, 0, 1, 1], [], []>} : vector<8x32xf32>, vector<32x16xf32>, vector<8x16xf32> -> vector<8x16xf32>
    %c0_222 = arith.constant 0 : index
    %c0_223 = arith.constant 0 : index
    %273 = vector.load %arg30[%c0_222, %c0_223] : memref<1x16xf32, #tpu.memory_space<vmem>>, vector<1x16xf32>
    %274 = vector.broadcast %273 : vector<1x16xf32> to vector<8x16xf32>
    %275 = arith.addf %272, %274 : vector<8x16xf32>
    %cst_224 = arith.constant 0.000000e+00 : f32
    %276 = vector.broadcast %cst_224 : f32 to vector<8x16xf32>
    %277 = arith.maximumf %275, %276 : vector<8x16xf32>
    %c0_225 = arith.constant 0 : index
    %c32_226 = arith.constant 32 : index
    %278 = vector.load %arg76[%c0_225, %c32_226] : memref<8x50xf32, #tpu.memory_space<vmem>>, vector<8x16xf32>
    tpu.vector_store %arg76[%c0_225, %c32_226], %277 {strides = array<i32>} : memref<8x50xf32, #tpu.memory_space<vmem>>, vector<8x16xf32>,
    %c0_227 = arith.constant 0 : index
    %c48 = arith.constant 48 : index
    %279 = vector.load %arg76[%c0_227, %c48] : memref<8x50xf32, #tpu.memory_space<vmem>>, vector<8x2xf32>
    tpu.vector_store %arg76[%c0_227, %c48], %1 {strides = array<i32>} : memref<8x50xf32, #tpu.memory_space<vmem>>, vector<8x2xf32>,
    %c0_228 = arith.constant 0 : index
    %c0_229 = arith.constant 0 : index
    %280 = vector.load %arg76[%c0_228, %c0_229] : memref<8x50xf32, #tpu.memory_space<vmem>>, vector<8x50xf32>
    %c0_230 = arith.constant 0 : index
    %c0_231 = arith.constant 0 : index
    %281 = vector.load %arg67[%c0_230, %c0_231] : memref<50x192xf32, #tpu.memory_space<vmem>>, vector<50x192xf32>
    %cst_232 = arith.constant dense<0.000000e+00> : vector<8x192xf32>
    %282 = tpu.matmul %280, %281, %cst_232 {dimension_numbers = #tpu.dot_dimension_numbers<[1], [0], [0], [1], [0, 0, 1, 1], [], []>} : vector<8x50xf32>, vector<50x192xf32>, vector<8x192xf32> -> vector<8x192xf32>
    %c0_233 = arith.constant 0 : index
    %c0_234 = arith.constant 0 : index
    %283 = vector.load %arg68[%c0_233, %c0_234] : memref<1x192xf32, #tpu.memory_space<vmem>>, vector<1x192xf32>
    %284 = vector.broadcast %283 : vector<1x192xf32> to vector<8x192xf32>
    %285 = arith.addf %282, %284 : vector<8x192xf32>
    %cst_235 = arith.constant 0.000000e+00 : f32
    %286 = vector.broadcast %cst_235 : f32 to vector<8x192xf32>
    %287 = arith.maximumf %285, %286 : vector<8x192xf32>
    %c0_236 = arith.constant 0 : index
    %c0_237 = arith.constant 0 : index
    %288 = vector.load %arg69[%c0_236, %c0_237] : memref<192x192xf32, #tpu.memory_space<vmem>>, vector<192x192xf32>
    %cst_238 = arith.constant dense<0.000000e+00> : vector<8x192xf32>
    %289 = tpu.matmul %287, %288, %cst_238 {dimension_numbers = #tpu.dot_dimension_numbers<[1], [0], [0], [1], [0, 0, 1, 1], [], []>} : vector<8x192xf32>, vector<192x192xf32>, vector<8x192xf32> -> vector<8x192xf32>
    %c0_239 = arith.constant 0 : index
    %c0_240 = arith.constant 0 : index
    %290 = vector.load %arg70[%c0_239, %c0_240] : memref<1x192xf32, #tpu.memory_space<vmem>>, vector<1x192xf32>
    %291 = vector.broadcast %290 : vector<1x192xf32> to vector<8x192xf32>
    %292 = arith.addf %289, %291 : vector<8x192xf32>
    %cst_241 = arith.constant 0.000000e+00 : f32
    %293 = vector.broadcast %cst_241 : f32 to vector<8x192xf32>
    %294 = arith.maximumf %292, %293 : vector<8x192xf32>
    %c0_242 = arith.constant 0 : index
    %c0_243 = arith.constant 0 : index
    %295 = vector.load %arg71[%c0_242, %c0_243] : memref<192x96xf32, #tpu.memory_space<vmem>>, vector<192x96xf32>
    %cst_244 = arith.constant dense<0.000000e+00> : vector<8x96xf32>
    %296 = tpu.matmul %294, %295, %cst_244 {dimension_numbers = #tpu.dot_dimension_numbers<[1], [0], [0], [1], [0, 0, 1, 1], [], []>} : vector<8x192xf32>, vector<192x96xf32>, vector<8x96xf32> -> vector<8x96xf32>
    %c0_245 = arith.constant 0 : index
    %c0_246 = arith.constant 0 : index
    %297 = vector.load %arg72[%c0_245, %c0_246] : memref<1x96xf32, #tpu.memory_space<vmem>>, vector<1x96xf32>
    %298 = vector.broadcast %297 : vector<1x96xf32> to vector<8x96xf32>
    %299 = arith.addf %296, %298 : vector<8x96xf32>
    %cst_247 = arith.constant 0.000000e+00 : f32
    %300 = vector.broadcast %cst_247 : f32 to vector<8x96xf32>
    %301 = arith.maximumf %299, %300 : vector<8x96xf32>
    %302 = arith.truncf %301 : vector<8x96xf32> to vector<8x96xbf16>
    %c0_248 = arith.constant 0 : index
    %c0_249 = arith.constant 0 : index
    %303 = vector.load %arg73[%c0_248, %c0_249] : memref<96x2098xbf16, #tpu.memory_space<vmem>>, vector<96x2098xbf16>
    %cst_250 = arith.constant dense<0.000000e+00> : vector<8x2098xf32>
    %304 = tpu.matmul %302, %303, %cst_250 {dimension_numbers = #tpu.dot_dimension_numbers<[1], [0], [0], [1], [0, 0, 1, 1], [], []>} : vector<8x96xbf16>, vector<96x2098xbf16>, vector<8x2098xf32> -> vector<8x2098xf32>
    %c0_251 = arith.constant 0 : index
    %c0_252 = arith.constant 0 : index
    %305 = vector.load %arg74[%c0_251, %c0_252] : memref<1x2098xf32, #tpu.memory_space<vmem>>, vector<1x2098xf32>
    %306 = vector.broadcast %305 : vector<1x2098xf32> to vector<8x2098xf32>
    %307 = arith.addf %304, %306 : vector<8x2098xf32>
    %c0_253 = arith.constant 0 : index
    %c0_254 = arith.constant 0 : index
    %308 = vector.load %arg78[%c0_253, %c0_254] : memref<8x2098xf32, #tpu.memory_space<vmem>>, vector<8x2098xf32>
    tpu.vector_store %arg78[%c0_253, %c0_254], %307 {strides = array<i32>} : memref<8x2098xf32, #tpu.memory_space<vmem>>, vector<8x2098xf32>,
    %c0_255 = arith.constant 0 : index
    %c0_256 = arith.constant 0 : index
    %309 = vector.load %arg78[%c0_255, %c0_256] : memref<8x2098xf32, #tpu.memory_space<vmem>>, vector<8x1024xf32>
    %310 = arith.truncf %309 : vector<8x1024xf32> to vector<8x1024xbf16>
    %c0_257 = arith.constant 0 : index
    %c1024 = arith.constant 1024 : index
    %311 = vector.load %arg78[%c0_257, %c1024] : memref<8x2098xf32, #tpu.memory_space<vmem>>, vector<8x1024xf32>
    %312 = arith.truncf %311 : vector<8x1024xf32> to vector<8x1024xbf16>
    %c0_258 = arith.constant 0 : index
    %c2048 = arith.constant 2048 : index
    %313 = vector.load %arg78[%c0_258, %c2048] : memref<8x2098xf32, #tpu.memory_space<vmem>>, vector<8x50xf32>
    %cst_259 = arith.constant dense<0.000000e+00> : vector<8x8xf32>
    %314 = tpu.matmul %310, %312, %cst_259 {dimension_numbers = #tpu.dot_dimension_numbers<[1], [1], [0], [0], [0, 0, 1, 0], [], []>} : vector<8x1024xbf16>, vector<8x1024xbf16>, vector<8x8xf32> -> vector<8x8xf32>
    %cst_260 = arith.constant dense<0xFF800000> : vector<8xf32>
    %315 = vector.multi_reduction <maximumf>, %314, %cst_260 [1] : vector<8x8xf32> to vector<8xf32>
    %316 = vector.shape_cast %315 : vector<8xf32> to vector<8x1xf32>
    %317 = vector.broadcast %316 : vector<8x1xf32> to vector<8x8xf32>
    %318 = arith.subf %314, %317 : vector<8x8xf32>
    %319 = math.exp %318 : vector<8x8xf32>
    %cst_261 = arith.constant dense<0.000000e+00> : vector<8xf32>
    %320 = vector.multi_reduction <add>, %319, %cst_261 [1] : vector<8x8xf32> to vector<8xf32>
    %321 = vector.shape_cast %320 : vector<8xf32> to vector<8x1xf32>
    %322 = tpu.reciprocal %321 {approx = true} : vector<8x1xf32> -> vector<8x1xf32>
    %323 = vector.broadcast %322 : vector<8x1xf32> to vector<8x8xf32>
    %324 = arith.mulf %319, %323 : vector<8x8xf32>
    %325 = arith.mulf %324, %0 : vector<8x8xf32>
    %326 = math.absf %325 : vector<8x8xf32>
    %cst_262 = arith.constant dense<0.000000e+00> : vector<8xf32>
    %327 = vector.multi_reduction <add>, %326, %cst_262 [0] : vector<8x8xf32> to vector<8xf32>
    %328 = vector.shape_cast %327 : vector<8xf32> to vector<1x8xf32>
    %cst_263 = arith.constant 9.99999996E-13 : f32
    %329 = vector.broadcast %cst_263 : f32 to vector<1x8xf32>
    %330 = arith.maximumf %328, %329 : vector<1x8xf32>
    %331 = tpu.reciprocal %330 {approx = true} : vector<1x8xf32> -> vector<1x8xf32>
    %332 = vector.broadcast %331 : vector<1x8xf32> to vector<8x8xf32>
    %333 = arith.mulf %325, %332 : vector<8x8xf32>
    %cst_264 = arith.constant dense<0.000000e+00> : vector<8x50xf32>
    %334 = tpu.matmul %333, %313, %cst_264 {dimension_numbers = #tpu.dot_dimension_numbers<[1], [0], [0], [1], [0, 0, 1, 1], [], []>} : vector<8x8xf32>, vector<8x50xf32>, vector<8x50xf32> -> vector<8x50xf32>
    %335 = arith.addf %334, %280 : vector<8x50xf32>
    %c0_265 = arith.constant 0 : index
    %c0_266 = arith.constant 0 : index
    %336 = vector.load %arg76[%c0_265, %c0_266] : memref<8x50xf32, #tpu.memory_space<vmem>>, vector<8x50xf32>
    tpu.vector_store %arg76[%c0_265, %c0_266], %335 {strides = array<i32>} : memref<8x50xf32, #tpu.memory_space<vmem>>, vector<8x50xf32>,
    %c0_267 = arith.constant 0 : index
    %c0_268 = arith.constant 0 : index
    %337 = vector.load %arg76[%c0_267, %c0_268] : memref<8x50xf32, #tpu.memory_space<vmem>>, vector<8x50xf32>
    %c0_269 = arith.constant 0 : index
    %c0_270 = arith.constant 0 : index
    %338 = vector.load %arg67[%c0_269, %c0_270] : memref<50x192xf32, #tpu.memory_space<vmem>>, vector<50x192xf32>
    %cst_271 = arith.constant dense<0.000000e+00> : vector<8x192xf32>
    %339 = tpu.matmul %337, %338, %cst_271 {dimension_numbers = #tpu.dot_dimension_numbers<[1], [0], [0], [1], [0, 0, 1, 1], [], []>} : vector<8x50xf32>, vector<50x192xf32>, vector<8x192xf32> -> vector<8x192xf32>
    %c0_272 = arith.constant 0 : index
    %c0_273 = arith.constant 0 : index
    %340 = vector.load %arg68[%c0_272, %c0_273] : memref<1x192xf32, #tpu.memory_space<vmem>>, vector<1x192xf32>
    %341 = vector.broadcast %340 : vector<1x192xf32> to vector<8x192xf32>
    %342 = arith.addf %339, %341 : vector<8x192xf32>
    %cst_274 = arith.constant 0.000000e+00 : f32
    %343 = vector.broadcast %cst_274 : f32 to vector<8x192xf32>
    %344 = arith.maximumf %342, %343 : vector<8x192xf32>
    %c0_275 = arith.constant 0 : index
    %c0_276 = arith.constant 0 : index
    %345 = vector.load %arg69[%c0_275, %c0_276] : memref<192x192xf32, #tpu.memory_space<vmem>>, vector<192x192xf32>
    %cst_277 = arith.constant dense<0.000000e+00> : vector<8x192xf32>
    %346 = tpu.matmul %344, %345, %cst_277 {dimension_numbers = #tpu.dot_dimension_numbers<[1], [0], [0], [1], [0, 0, 1, 1], [], []>} : vector<8x192xf32>, vector<192x192xf32>, vector<8x192xf32> -> vector<8x192xf32>
    %c0_278 = arith.constant 0 : index
    %c0_279 = arith.constant 0 : index
    %347 = vector.load %arg70[%c0_278, %c0_279] : memref<1x192xf32, #tpu.memory_space<vmem>>, vector<1x192xf32>
    %348 = vector.broadcast %347 : vector<1x192xf32> to vector<8x192xf32>
    %349 = arith.addf %346, %348 : vector<8x192xf32>
    %cst_280 = arith.constant 0.000000e+00 : f32
    %350 = vector.broadcast %cst_280 : f32 to vector<8x192xf32>
    %351 = arith.maximumf %349, %350 : vector<8x192xf32>
    %c0_281 = arith.constant 0 : index
    %c0_282 = arith.constant 0 : index
    %352 = vector.load %arg71[%c0_281, %c0_282] : memref<192x96xf32, #tpu.memory_space<vmem>>, vector<192x96xf32>
    %cst_283 = arith.constant dense<0.000000e+00> : vector<8x96xf32>
    %353 = tpu.matmul %351, %352, %cst_283 {dimension_numbers = #tpu.dot_dimension_numbers<[1], [0], [0], [1], [0, 0, 1, 1], [], []>} : vector<8x192xf32>, vector<192x96xf32>, vector<8x96xf32> -> vector<8x96xf32>
    %c0_284 = arith.constant 0 : index
    %c0_285 = arith.constant 0 : index
    %354 = vector.load %arg72[%c0_284, %c0_285] : memref<1x96xf32, #tpu.memory_space<vmem>>, vector<1x96xf32>
    %355 = vector.broadcast %354 : vector<1x96xf32> to vector<8x96xf32>
    %356 = arith.addf %353, %355 : vector<8x96xf32>
    %cst_286 = arith.constant 0.000000e+00 : f32
    %357 = vector.broadcast %cst_286 : f32 to vector<8x96xf32>
    %358 = arith.maximumf %356, %357 : vector<8x96xf32>
    %359 = arith.truncf %358 : vector<8x96xf32> to vector<8x96xbf16>
    %c0_287 = arith.constant 0 : index
    %c0_288 = arith.constant 0 : index
    %360 = vector.load %arg73[%c0_287, %c0_288] : memref<96x2098xbf16, #tpu.memory_space<vmem>>, vector<96x2098xbf16>
    %cst_289 = arith.constant dense<0.000000e+00> : vector<8x2098xf32>
    %361 = tpu.matmul %359, %360, %cst_289 {dimension_numbers = #tpu.dot_dimension_numbers<[1], [0], [0], [1], [0, 0, 1, 1], [], []>} : vector<8x96xbf16>, vector<96x2098xbf16>, vector<8x2098xf32> -> vector<8x2098xf32>
    %c0_290 = arith.constant 0 : index
    %c0_291 = arith.constant 0 : index
    %362 = vector.load %arg74[%c0_290, %c0_291] : memref<1x2098xf32, #tpu.memory_space<vmem>>, vector<1x2098xf32>
    %363 = vector.broadcast %362 : vector<1x2098xf32> to vector<8x2098xf32>
    %364 = arith.addf %361, %363 : vector<8x2098xf32>
    %c0_292 = arith.constant 0 : index
    %c0_293 = arith.constant 0 : index
    %365 = vector.load %arg78[%c0_292, %c0_293] : memref<8x2098xf32, #tpu.memory_space<vmem>>, vector<8x2098xf32>
    tpu.vector_store %arg78[%c0_292, %c0_293], %364 {strides = array<i32>} : memref<8x2098xf32, #tpu.memory_space<vmem>>, vector<8x2098xf32>,
    %c0_294 = arith.constant 0 : index
    %c0_295 = arith.constant 0 : index
    %366 = vector.load %arg78[%c0_294, %c0_295] : memref<8x2098xf32, #tpu.memory_space<vmem>>, vector<8x1024xf32>
    %367 = arith.truncf %366 : vector<8x1024xf32> to vector<8x1024xbf16>
    %c0_296 = arith.constant 0 : index
    %c1024_297 = arith.constant 1024 : index
    %368 = vector.load %arg78[%c0_296, %c1024_297] : memref<8x2098xf32, #tpu.memory_space<vmem>>, vector<8x1024xf32>
    %369 = arith.truncf %368 : vector<8x1024xf32> to vector<8x1024xbf16>
    %c0_298 = arith.constant 0 : index
    %c2048_299 = arith.constant 2048 : index
    %370 = vector.load %arg78[%c0_298, %c2048_299] : memref<8x2098xf32, #tpu.memory_space<vmem>>, vector<8x50xf32>
    %cst_300 = arith.constant dense<0.000000e+00> : vector<8x8xf32>
    %371 = tpu.matmul %367, %369, %cst_300 {dimension_numbers = #tpu.dot_dimension_numbers<[1], [1], [0], [0], [0, 0, 1, 0], [], []>} : vector<8x1024xbf16>, vector<8x1024xbf16>, vector<8x8xf32> -> vector<8x8xf32>
    %cst_301 = arith.constant dense<0xFF800000> : vector<8xf32>
    %372 = vector.multi_reduction <maximumf>, %371, %cst_301 [1] : vector<8x8xf32> to vector<8xf32>
    %373 = vector.shape_cast %372 : vector<8xf32> to vector<8x1xf32>
    %374 = vector.broadcast %373 : vector<8x1xf32> to vector<8x8xf32>
    %375 = arith.subf %371, %374 : vector<8x8xf32>
    %376 = math.exp %375 : vector<8x8xf32>
    %cst_302 = arith.constant dense<0.000000e+00> : vector<8xf32>
    %377 = vector.multi_reduction <add>, %376, %cst_302 [1] : vector<8x8xf32> to vector<8xf32>
    %378 = vector.shape_cast %377 : vector<8xf32> to vector<8x1xf32>
    %379 = tpu.reciprocal %378 {approx = true} : vector<8x1xf32> -> vector<8x1xf32>
    %380 = vector.broadcast %379 : vector<8x1xf32> to vector<8x8xf32>
    %381 = arith.mulf %376, %380 : vector<8x8xf32>
    %382 = arith.mulf %381, %0 : vector<8x8xf32>
    %383 = math.absf %382 : vector<8x8xf32>
    %cst_303 = arith.constant dense<0.000000e+00> : vector<8xf32>
    %384 = vector.multi_reduction <add>, %383, %cst_303 [0] : vector<8x8xf32> to vector<8xf32>
    %385 = vector.shape_cast %384 : vector<8xf32> to vector<1x8xf32>
    %cst_304 = arith.constant 9.99999996E-13 : f32
    %386 = vector.broadcast %cst_304 : f32 to vector<1x8xf32>
    %387 = arith.maximumf %385, %386 : vector<1x8xf32>
    %388 = tpu.reciprocal %387 {approx = true} : vector<1x8xf32> -> vector<1x8xf32>
    %389 = vector.broadcast %388 : vector<1x8xf32> to vector<8x8xf32>
    %390 = arith.mulf %382, %389 : vector<8x8xf32>
    %cst_305 = arith.constant dense<0.000000e+00> : vector<8x50xf32>
    %391 = tpu.matmul %390, %370, %cst_305 {dimension_numbers = #tpu.dot_dimension_numbers<[1], [0], [0], [1], [0, 0, 1, 1], [], []>} : vector<8x8xf32>, vector<8x50xf32>, vector<8x50xf32> -> vector<8x50xf32>
    %392 = arith.addf %391, %337 : vector<8x50xf32>
    %c0_306 = arith.constant 0 : index
    %c0_307 = arith.constant 0 : index
    %393 = vector.load %arg76[%c0_306, %c0_307] : memref<8x50xf32, #tpu.memory_space<vmem>>, vector<8x50xf32>
    tpu.vector_store %arg76[%c0_306, %c0_307], %392 {strides = array<i32>} : memref<8x50xf32, #tpu.memory_space<vmem>>, vector<8x50xf32>,
    %c0_308 = arith.constant 0 : index
    %c0_309 = arith.constant 0 : index
    %394 = vector.load %arg76[%c0_308, %c0_309] : memref<8x50xf32, #tpu.memory_space<vmem>>, vector<8x50xf32>
    %c0_310 = arith.constant 0 : index
    %c0_311 = arith.constant 0 : index
    %395 = vector.load %arg59[%c0_310, %c0_311] : memref<50x64xf32, #tpu.memory_space<vmem>>, vector<50x64xf32>
    %cst_312 = arith.constant dense<0.000000e+00> : vector<8x64xf32>
    %396 = tpu.matmul %394, %395, %cst_312 {dimension_numbers = #tpu.dot_dimension_numbers<[1], [0], [0], [1], [0, 0, 1, 1], [], []>} : vector<8x50xf32>, vector<50x64xf32>, vector<8x64xf32> -> vector<8x64xf32>
    %c0_313 = arith.constant 0 : index
    %c0_314 = arith.constant 0 : index
    %397 = vector.load %arg60[%c0_313, %c0_314] : memref<1x64xf32, #tpu.memory_space<vmem>>, vector<1x64xf32>
    %398 = vector.broadcast %397 : vector<1x64xf32> to vector<8x64xf32>
    %399 = arith.addf %396, %398 : vector<8x64xf32>
    %cst_315 = arith.constant 0.000000e+00 : f32
    %400 = vector.broadcast %cst_315 : f32 to vector<8x64xf32>
    %401 = arith.maximumf %399, %400 : vector<8x64xf32>
    %c0_316 = arith.constant 0 : index
    %c0_317 = arith.constant 0 : index
    %402 = vector.load %arg61[%c0_316, %c0_317] : memref<64x64xf32, #tpu.memory_space<vmem>>, vector<64x64xf32>
    %cst_318 = arith.constant dense<0.000000e+00> : vector<8x64xf32>
    %403 = tpu.matmul %401, %402, %cst_318 {dimension_numbers = #tpu.dot_dimension_numbers<[1], [0], [0], [1], [0, 0, 1, 1], [], []>} : vector<8x64xf32>, vector<64x64xf32>, vector<8x64xf32> -> vector<8x64xf32>
    %c0_319 = arith.constant 0 : index
    %c0_320 = arith.constant 0 : index
    %404 = vector.load %arg62[%c0_319, %c0_320] : memref<1x64xf32, #tpu.memory_space<vmem>>, vector<1x64xf32>
    %405 = vector.broadcast %404 : vector<1x64xf32> to vector<8x64xf32>
    %406 = arith.addf %403, %405 : vector<8x64xf32>
    %cst_321 = arith.constant 0.000000e+00 : f32
    %407 = vector.broadcast %cst_321 : f32 to vector<8x64xf32>
    %408 = arith.maximumf %406, %407 : vector<8x64xf32>
    %c0_322 = arith.constant 0 : index
    %c0_323 = arith.constant 0 : index
    %409 = vector.load %arg63[%c0_322, %c0_323] : memref<64x32xf32, #tpu.memory_space<vmem>>, vector<64x32xf32>
    %cst_324 = arith.constant dense<0.000000e+00> : vector<8x32xf32>
    %410 = tpu.matmul %408, %409, %cst_324 {dimension_numbers = #tpu.dot_dimension_numbers<[1], [0], [0], [1], [0, 0, 1, 1], [], []>} : vector<8x64xf32>, vector<64x32xf32>, vector<8x32xf32> -> vector<8x32xf32>
    %c0_325 = arith.constant 0 : index
    %c0_326 = arith.constant 0 : index
    %411 = vector.load %arg64[%c0_325, %c0_326] : memref<1x32xf32, #tpu.memory_space<vmem>>, vector<1x32xf32>
    %412 = vector.broadcast %411 : vector<1x32xf32> to vector<8x32xf32>
    %413 = arith.addf %410, %412 : vector<8x32xf32>
    %cst_327 = arith.constant 0.000000e+00 : f32
    %414 = vector.broadcast %cst_327 : f32 to vector<8x32xf32>
    %415 = arith.maximumf %413, %414 : vector<8x32xf32>
    %c0_328 = arith.constant 0 : index
    %c0_329 = arith.constant 0 : index
    %416 = vector.load %arg65[%c0_328, %c0_329] : memref<32x24xf32, #tpu.memory_space<vmem>>, vector<32x24xf32>
    %cst_330 = arith.constant dense<0.000000e+00> : vector<8x24xf32>
    %417 = tpu.matmul %415, %416, %cst_330 {dimension_numbers = #tpu.dot_dimension_numbers<[1], [0], [0], [1], [0, 0, 1, 1], [], []>} : vector<8x32xf32>, vector<32x24xf32>, vector<8x24xf32> -> vector<8x24xf32>
    %c0_331 = arith.constant 0 : index
    %c0_332 = arith.constant 0 : index
    %418 = vector.load %arg66[%c0_331, %c0_332] : memref<1x24xf32, #tpu.memory_space<vmem>>, vector<1x24xf32>
    %419 = vector.broadcast %418 : vector<1x24xf32> to vector<8x24xf32>
    %420 = arith.addf %417, %419 : vector<8x24xf32>
    %cst_333 = arith.constant 0.000000e+00 : f32
    %421 = vector.broadcast %cst_333 : f32 to vector<8x24xf32>
    %422 = arith.maximumf %420, %421 : vector<8x24xf32>
    %c0_334 = arith.constant 0 : index
    %c0_335 = arith.constant 0 : index
    %423 = vector.load %arg75[%c0_334, %c0_335] : memref<8x66xf32, #tpu.memory_space<vmem>>, vector<8x8xf32>
    tpu.vector_store %arg75[%c0_334, %c0_335], %175 {strides = array<i32>} : memref<8x66xf32, #tpu.memory_space<vmem>>, vector<8x8xf32>,
    %c0_336 = arith.constant 0 : index
    %c8 = arith.constant 8 : index
    %424 = vector.load %arg75[%c0_336, %c8] : memref<8x66xf32, #tpu.memory_space<vmem>>, vector<8x16xf32>
    tpu.vector_store %arg75[%c0_336, %c8], %212 {strides = array<i32>} : memref<8x66xf32, #tpu.memory_space<vmem>>, vector<8x16xf32>,
    %c0_337 = arith.constant 0 : index
    %c24 = arith.constant 24 : index
    %425 = vector.load %arg75[%c0_337, %c24] : memref<8x66xf32, #tpu.memory_space<vmem>>, vector<8x16xf32>
    tpu.vector_store %arg75[%c0_337, %c24], %213 {strides = array<i32>} : memref<8x66xf32, #tpu.memory_space<vmem>>, vector<8x16xf32>,
    %c0_338 = arith.constant 0 : index
    %c40 = arith.constant 40 : index
    %426 = vector.load %arg75[%c0_338, %c40] : memref<8x66xf32, #tpu.memory_space<vmem>>, vector<8x2xf32>
    tpu.vector_store %arg75[%c0_338, %c40], %249 {strides = array<i32>} : memref<8x66xf32, #tpu.memory_space<vmem>>, vector<8x2xf32>,
    %c0_339 = arith.constant 0 : index
    %c42 = arith.constant 42 : index
    %427 = vector.load %arg75[%c0_339, %c42] : memref<8x66xf32, #tpu.memory_space<vmem>>, vector<8x24xf32>
    tpu.vector_store %arg75[%c0_339, %c42], %422 {strides = array<i32>} : memref<8x66xf32, #tpu.memory_space<vmem>>, vector<8x24xf32>,
    return
  }
}

</mosaic_0001>

<bundles_post_ra>
// kernel: tpu_custom_call.1
= control target key start
LH: loop header
LB: loop body
LE: loop exit
PB: predicated region body
PF: predicated region fallthrough
CT: control target
= control target key end

     0   :  { %s11530_s6 = smov 1   ;;  %s11531_s10 = smov 2   ;;  %s13224_s0 = inlined_call_operand.smem [shape: u32[76], index: -1, kind: input, shape index: {}] }
   0x1   :  { %s11685_s5 = sld [smem:[%s13224_s0]]   ;;  %s11532_s14 = smov 3  }
   0x2   :  { %s11690_s9 = sld [smem:[%s13224_s0 + %s11530_s6]]   ;;  %s11533_s18 = smov 4  }
   0x3   :  { %s11695_s13 = sld [smem:[%s13224_s0 + %s11531_s10]]   ;;  %s11534_s22 = smov 5  }
   0x4   :  { %s11700_s17 = sld [smem:[%s13224_s0 + %s11532_s14]]   ;;  %s11535_s26 = smov 6  }
   0x5   :  { %s11705_s21 = sld [smem:[%s13224_s0 + %s11533_s18]]   ;;  %s11536_s30 = smov 7  }
   0x6   :  { %s11710_s25 = sld [smem:[%s13224_s0 + %s11534_s22]]   ;;  %s11537_s4 = smov 8  }
   0x7   :  { %13281 = sst [smem:[#allocation123_spill]] %s11685_s5  ;;  %s11538_s10 = smov 9  }
   0x8   :  { %13282 = sst [smem:[#allocation124_spill]] %s11690_s9  ;;  %s11539_s15 = smov 10  }
   0x9   :  { %s11715_s29 = sld [smem:[%s13224_s0 + %s11535_s26]]   ;;  %s11540_s20 = smov 11  }
   0xa   :  { %13283 = sst [smem:[#allocation125_spill]] %s11700_s17  ;;  %s11541_s26 = smov 12  }
   0xb   :  { %s11720_s3 = sld [smem:[%s13224_s0 + %s11536_s30]]   ;;  %s11542_s1 = smov 13  }
   0xc   :  { %13284 = sst [smem:[#allocation126_spill]] %s11710_s25  ;;  %s11543_s7 = smov 14  }
   0xd   :  { %s11725_s8 = sld [smem:[%s13224_s0 + %s11537_s4]]   ;;  %s11545_s22 = smov 16  }
   0xe   :  { %s11730_s14 = sld [smem:[%s13224_s0 + %s11538_s10]]   ;;  %s11546_s28 = smov 17  }
   0xf   :  { %13285 = sst [smem:[#allocation127_spill]] %s11715_s29 }
  0x10   :  { %s11735_s19 = sld [smem:[%s13224_s0 + %s11539_s15]]   ;;  %s11544_s15 = smov 15  }
  0x11   :  { %s11740_s24 = sld [smem:[%s13224_s0 + %s11540_s20]]  }
  0x12   :  { %s11745_s30 = sld [smem:[%s13224_s0 + %s11541_s26]]  }
  0x13   :  { %13286 = sst [smem:[#allocation128_spill]] %s11725_s8 }
  0x14   :  { %13287 = sst [smem:[#allocation129_spill]] %s11730_s14 }
  0x15   :  { %s11750_s6 = sld [smem:[%s13224_s0 + %s11542_s1]]  }
  0x16   :  { %s11755_s12 = sld [smem:[%s13224_s0 + %s11543_s7]]   ;;  %s11547_s7 = smov 18  }
  0x17   :  { %13288 = sst [smem:[#allocation130_spill]] %s11740_s24 }
  0x18   :  { %13289 = sst [smem:[#allocation131_spill]] %s11745_s30 }
  0x19   :  { %s11760_s20 = sld [smem:[%s13224_s0 + %s11544_s15]]   ;;  %s11548_s15 = smov 19  }
  0x1a   :  { %s11765_s27 = sld [smem:[%s13224_s0 + %s11545_s22]]   ;;  %s11549_s22 = smov 20  }
  0x1b   :  { %13290 = sst [smem:[#allocation132_spill]] %s11750_s6 }
  0x1c   :  { %s11770_s4 = sld [smem:[%s13224_s0 + %s11546_s28]]   ;;  %s11550_s28 = smov 21  }
  0x1d   :  { %s11775_s25 = sld [smem:[%s13224_s0 + %s11547_s7]]   ;;  %s11551_s7 = smov 22  }
  0x1e   :  { %s11780_s9 = sld [smem:[%s13224_s0 + %s11548_s15]]   ;;  %s11552_s15 = smov 23  }
  0x1f   :  { %13291 = sst [smem:[#allocation133_spill]] %s11760_s20 }
  0x20   :  { %s11785_s6 = sld [smem:[%s13224_s0 + %s11549_s22]]   ;;  %s11553_s22 = smov 24  }
  0x21   :  { %s11790_s24 = sld [smem:[%s13224_s0 + %s11550_s28]]   ;;  %s11554_s28 = smov 25  }
  0x22   :  { %13292 = sst [smem:[#allocation134_spill]] %s11770_s4 }
  0x23   :  { %s11795_s14 = sld [smem:[%s13224_s0 + %s11551_s7]]   ;;  %s11555_s7 = smov 26  }
  0x24   :  { %13293 = sst [smem:[#allocation135_spill]] %s11780_s9 }
  0x25   :  { %s11800_s9 = sld [smem:[%s13224_s0 + %s11552_s15]]   ;;  %s11556_s15 = smov 27  }
  0x26   :  { %13294 = sst [smem:[#allocation136_spill]] %s11785_s6 }
  0x27   :  { %13295 = sst [smem:[#allocation137_spill]] %s11790_s24 }
  0x28   :  { %s11805_s6 = sld [smem:[%s13224_s0 + %s11553_s22]]   ;;  %s11557_s22 = smov 28  }
  0x29   :  { %s11810_s24 = sld [smem:[%s13224_s0 + %s11554_s28]]   ;;  %s11558_s28 = smov 29  }
  0x2a   :  { %s11815_s4 = sld [smem:[%s13224_s0 + %s11555_s7]]   ;;  %s11559_s7 = smov 30  }
  0x2b   :  { %13296 = sst [smem:[#allocation138_spill]] %s11800_s9 }
  0x2c   :  { %s11820_s9 = sld [smem:[%s13224_s0 + %s11556_s15]]   ;;  %s11560_s15 = smov 31  }
  0x2d   :  { %s11830_s20 = sld [smem:[%s13224_s0 + %s11558_s28]]   ;;  %s11562_s28 = smov 33  }
  0x2e   :  { %13297 = sst [smem:[#allocation139_spill]] %s11805_s6 }
  0x2f   :  { %s11825_s6 = sld [smem:[%s13224_s0 + %s11557_s22]]   ;;  %s11561_s22 = smov 32  }
  0x30   :  { %13298 = sst [smem:[#allocation140_spill]] %s11815_s4 }
  0x31   :  { %s11835_s4 = sld [smem:[%s13224_s0 + %s11559_s7]]   ;;  %s11563_s7 = smov 34  }
  0x32   :  { %13299 = sst [smem:[#allocation141_spill]] %s11820_s9 }
  0x33   :  { %13300 = sst [smem:[#allocation142_spill]] %s11830_s20 }
  0x34   :  { %s11840_s9 = sld [smem:[%s13224_s0 + %s11560_s15]]   ;;  %s11564_s15 = smov 35  }
  0x35   :  { %s11845_s30 = sld [smem:[%s13224_s0 + %s11561_s22]]   ;;  %s11565_s22 = smov 36  }
  0x36   :  { %s11850_s20 = sld [smem:[%s13224_s0 + %s11562_s28]]   ;;  %s11566_s28 = smov 37  }
  0x37   :  { %13301 = sst [smem:[#allocation143_spill]] %s11835_s4 }
  0x38   :  { %s11855_s4 = sld [smem:[%s13224_s0 + %s11563_s7]]   ;;  %s11567_s7 = smov 38  }
  0x39   :  { %s11860_s8 = sld [smem:[%s13224_s0 + %s11564_s15]]   ;;  %s11568_s15 = smov 39  }
  0x3a   :  { %s11870_s29 = sld [smem:[%s13224_s0 + %s11566_s28]]   ;;  %s11570_s28 = smov 41  }
  0x3b   :  { %13302 = sst [smem:[#allocation144_spill]] %s11845_s30 }
  0x3c   :  { %s11865_s30 = sld [smem:[%s13224_s0 + %s11565_s22]]   ;;  %s11569_s22 = smov 40  }
  0x3d   :  { %s11880_s17 = sld [smem:[%s13224_s0 + %s11568_s15]]   ;;  %s11572_s15 = smov 43  }
  0x3e   :  { %13303 = sst [smem:[#allocation145_spill]] %s11855_s4 }
  0x3f   :  { %s11875_s4 = sld [smem:[%s13224_s0 + %s11567_s7]]   ;;  %s11571_s7 = smov 42  }
  0x40   :  { %s11890_s5 = sld [smem:[%s13224_s0 + %s11570_s28]]   ;;  %s11574_s28 = smov 45  }
  0x42   :  { %13304 = sst [smem:[#allocation146_spill]] %s11865_s30 }
  0x43   :  { %13306 = sst [smem:[#allocation148_spill]] %s11880_s17 }
  0x44   :  { %s11885_s30 = sld [smem:[%s13224_s0 + %s11569_s22]]   ;;  %s11573_s22 = smov 44  }
  0x45   :  { %13305 = sst [smem:[#allocation147_spill]] %s11875_s4 }
  0x46   :  { %13308 = sst [smem:[#allocation150_spill]] %s11890_s5 }
  0x47   :  { %s11895_s4 = sld [smem:[%s13224_s0 + %s11571_s7]]   ;;  %s11575_s7 = smov 46  }
  0x48   :  { %s11900_s17 = sld [smem:[%s13224_s0 + %s11572_s15]]   ;;  %s11576_s15 = smov 47  }
  0x49   :  { %s11910_s5 = sld [smem:[%s13224_s0 + %s11574_s28]]   ;;  %s11578_s28 = smov 49  }
  0x4a   :  { %13307 = sst [smem:[#allocation149_spill]] %s11885_s30 }
  0x4b   :  { %s11905_s30 = sld [smem:[%s13224_s0 + %s11573_s22]]   ;;  %s11577_s22 = smov 48  }
  0x4d   :  { %13309 = sst [smem:[#allocation151_spill]] %s11895_s4 }
  0x4e   :  { %13310 = sst [smem:[#allocation152_spill]] %s11900_s17 }
  0x4f   :  { %13312 = sst [smem:[#allocation154_spill]] %s11910_s5 }
  0x50   :  { %s11915_s4 = sld [smem:[%s13224_s0 + %s11575_s7]]   ;;  %s11579_s7 = smov 50  }
  0x51   :  { %13311 = sst [smem:[#allocation153_spill]] %s11905_s30 }
  0x52   :  { %s11920_s17 = sld [smem:[%s13224_s0 + %s11576_s15]]   ;;  %s11580_s15 = smov 51  }
  0x53   :  { %s11925_s30 = sld [smem:[%s13224_s0 + %s11577_s22]]   ;;  %s11581_s22 = smov 52  }
  0x54   :  { %s11930_s5 = sld [smem:[%s13224_s0 + %s11578_s28]]   ;;  %s11582_s28 = smov 53  }
  0x56   :  { %13313 = sst [smem:[#allocation155_spill]] %s11915_s4 }
  0x57   :  { %s11935_s4 = sld [smem:[%s13224_s0 + %s11579_s7]]   ;;  %s11583_s7 = smov 54  }
  0x58   :  { %13314 = sst [smem:[#allocation156_spill]] %s11920_s17 }
  0x59   :  { %13315 = sst [smem:[#allocation157_spill]] %s11925_s30 }
  0x5a   :  { %13316 = sst [smem:[#allocation158_spill]] %s11930_s5 }
  0x5b   :  { %s11940_s17 = sld [smem:[%s13224_s0 + %s11580_s15]]   ;;  %s11584_s15 = smov 55  }
  0x5c   :  { %s11945_s30 = sld [smem:[%s13224_s0 + %s11581_s22]]   ;;  %s11585_s22 = smov 56  }
  0x5d   :  { %13317 = sst [smem:[#allocation159_spill]] %s11935_s4 }
  0x5e   :  { %s11950_s5 = sld [smem:[%s13224_s0 + %s11582_s28]]   ;;  %s11586_s28 = smov 57  }
  0x5f   :  { %s11955_s4 = sld [smem:[%s13224_s0 + %s11583_s7]]   ;;  %s11587_s7 = smov 58  }
  0x61   :  { %13318 = sst [smem:[#allocation160_spill]] %s11940_s17 }
  0x62   :  { %13319 = sst [smem:[#allocation161_spill]] %s11945_s30 }
  0x63   :  { %s11960_s17 = sld [smem:[%s13224_s0 + %s11584_s15]]   ;;  %s11588_s15 = smov 59  }
  0x64   :  { %13320 = sst [smem:[#allocation162_spill]] %s11950_s5 }
  0x65   :  { %13321 = sst [smem:[#allocation163_spill]] %s11955_s4 }
  0x66   :  { %s11965_s30 = sld [smem:[%s13224_s0 + %s11585_s22]]   ;;  %s11589_s22 = smov 60  }
  0x67   :  { %s11970_s5 = sld [smem:[%s13224_s0 + %s11586_s28]]   ;;  %s11590_s28 = smov 61  }
  0x68   :  { %s11975_s4 = sld [smem:[%s13224_s0 + %s11587_s7]]   ;;  %s11591_s7 = smov 62  }
  0x69   :  { %13322 = sst [smem:[#allocation164_spill]] %s11960_s17 }
  0x6a   :  { %s11980_s17 = sld [smem:[%s13224_s0 + %s11588_s15]]   ;;  %s11592_s15 = smov 63  }
  0x6c   :  { %13323 = sst [smem:[#allocation165_spill]] %s11965_s30 }
  0x6d   :  { %13324 = sst [smem:[#allocation166_spill]] %s11970_s5 }
  0x6e   :  { %13325 = sst [smem:[#allocation167_spill]] %s11975_s4 }
  0x6f   :  { %s11985_s30 = sld [smem:[%s13224_s0 + %s11589_s22]]   ;;  %s11593_s22 = smov 64  }
  0x70   :  { %13326 = sst [smem:[#allocation168_spill]] %s11980_s17 }
  0x71   :  { %s11990_s5 = sld [smem:[%s13224_s0 + %s11590_s28]]   ;;  %s11594_s28 = smov 65  }
  0x72   :  { %s11995_s4 = sld [smem:[%s13224_s0 + %s11591_s7]]   ;;  %s11595_s7 = smov 66  }
  0x73   :  { %s12000_s17 = sld [smem:[%s13224_s0 + %s11592_s15]]   ;;  %s11596_s15 = smov 67  }
  0x75   :  { %13327 = sst [smem:[#allocation169_spill]] %s11985_s30 }
  0x76   :  { %s12005_s30 = sld [smem:[%s13224_s0 + %s11593_s22]]   ;;  %s11597_s22 = smov 68  }
  0x77   :  { %13328 = sst [smem:[#allocation170_spill]] %s11990_s5 }
  0x78   :  { %13329 = sst [smem:[#allocation171_spill]] %s11995_s4 }
  0x79   :  { %13330 = sst [smem:[#allocation172_spill]] %s12000_s17 }
  0x7a   :  { %s12010_s5 = sld [smem:[%s13224_s0 + %s11594_s28]]   ;;  %s11598_s28 = smov 69  }
  0x7b   :  { %s12015_s4 = sld [smem:[%s13224_s0 + %s11595_s7]]   ;;  %s11599_s7 = smov 70  }
  0x7c   :  { %13331 = sst [smem:[#allocation173_spill]] %s12005_s30 }
  0x7d   :  { %s12020_s17 = sld [smem:[%s13224_s0 + %s11596_s15]]   ;;  %s11600_s15 = smov 71  }
  0x7e   :  { %s12025_s30 = sld [smem:[%s13224_s0 + %s11597_s22]]   ;;  %s11601_s22 = smov 72  }
  0x80   :  { %13332 = sst [smem:[#allocation174_spill]] %s12010_s5 }
  0x81   :  { %13333 = sst [smem:[#allocation175_spill]] %s12015_s4 }
  0x82   :  { %s12030_s5 = sld [smem:[%s13224_s0 + %s11598_s28]]   ;;  %s11602_s28 = smov 73  }
  0x83   :  { %13334 = sst [smem:[#allocation176_spill]] %s12020_s17 }
  0x84   :  { %13335 = sst [smem:[#allocation177_spill]] %s12025_s30 }
  0x85   :  { %s12035_s4 = sld [smem:[%s13224_s0 + %s11599_s7]]   ;;  %s11603_s7 = smov 74  }
  0x86   :  { %s12040_s17 = sld [smem:[%s13224_s0 + %s11600_s15]]   ;;  %s11604_s15 = smov 75  }
  0x87   :  { %s12045_s30 = sld [smem:[%s13224_s0 + %s11601_s22]]  }
  0x88   :  { %13336 = sst [smem:[#allocation178_spill]] %s12030_s5 }
  0x89   :  { %s12050_s5 = sld [smem:[%s13224_s0 + %s11602_s28]]  }
  0x8b   :  { %13337 = sst [smem:[#allocation179_spill]] %s12035_s4 }
  0x8c   :  { %13338 = sst [smem:[#allocation180_spill]] %s12040_s17 }
  0x8d   :  { %s12055_s4 = sld [smem:[%s13224_s0 + %s11603_s7]]  }
  0x8e   :  { %s12060_s17 = sld [smem:[%s13224_s0 + %s11604_s15]]  }
  0x8f   :  { %156 = vsyncpa [#allocation6], 0 }
  0x90   :  { %157 = vsyncpa [#allocation9], 0 }
  0x91   :  { %158 = vsyncpa [#allocation12], 0 }
  0x92   :  { %159 = vsyncpa [#allocation15], 0 }
  0x93   :  { %160 = vsyncpa [#allocation18], 0 }
  0x94   :  { %161 = vsyncpa [#allocation21], 0 }
  0x95   :  { %162 = vsyncpa [#allocation24], 0 }
  0x96   :  { %163 = vsyncpa [#allocation27], 0 }
  0x97   :  { %164 = vsyncpa [#allocation30], 0 }
  0x98   :  { %165 = vsyncpa [#allocation33], 0 }
  0x99   :  { %166 = vsyncpa [#allocation36], 0 }
  0x9a   :  { %167 = vsyncpa [#allocation39], 0 }
  0x9b   :  { %168 = vsyncpa [#allocation42], 0 }
  0x9c   :  { %169 = vsyncpa [#allocation45], 0 }
  0x9d   :  { %170 = vsyncpa [#allocation48], 0 }
  0x9e   :  { %171 = vsyncpa [#allocation51], 0 }
  0x9f   :  { %172 = vsyncpa [#allocation54], 0 }
  0xa0   :  { %173 = vsyncpa [#allocation57], 0 }
  0xa1   :  { %174 = vsyncpa [#allocation60], 0 }
  0xa2   :  { %175 = vsyncpa [#allocation63], 0 }
  0xa3   :  { %176 = vsyncpa [#allocation66], 0 }
  0xa4   :  { %177 = vsyncpa [#allocation69], 0 }
  0xa5   :  { %178 = vsyncpa [#allocation72], 0 }
  0xa6   :  { %179 = vsyncpa [#allocation75], 0 }
  0xa7   :  { %180 = vsyncpa [#allocation78], 0 }
  0xa8   :  { %181 = vsyncpa [#allocation81], 0 }
  0xa9   :  { %182 = vsyncpa [#allocation84], 0 }
  0xaa   :  { %183 = vsyncpa [#allocation87], 0 }
  0xab   :  { %184 = vsyncpa [#allocation90], 0 }
  0xac   :  { %185 = vsyncpa [#allocation7], 0  ;;  %s11605_s0 = smov [#allocation8]   ;;  %s11606_s23 = smov [#allocation11]  }
  0xad   :  { %s204_s22 = sshll.u32 %s11605_s0, 4  ;;  %s224_s26 = sshll.u32 %s11606_s23, 4  ;;  %s205_s22 = int_to_ptr.vmem [resolvable:$true] %s204_s22  ;;  %s225_s26 = int_to_ptr.vmem [resolvable:$true] %s224_s26 }
  0xae   :  { %s10194_s28 = scalar_lea.hbm %s11695_s13, 128 }
  0xaf   :  { %p10195_p0 = scmp.ne.s32.totalorder %s11695_s13, %s10194_s28  ;;  %p10198_p1 = scmp.lt.u32.totalorder %s10194_s28, %s11695_s13 }
  0xb1   :  { %p10200_p2 = pnand %p10198_p1, %p10195_p0 }
  0xb3   :  { %10203 = shalt.err (!%p10200_p2)
}
  0xb4   :  { %s10204_s1 = scalar_lea.vmem %s205_s22, 128  ;;  %p10209_p4 = scmp.lt.s32.totalorder %s205_s22, %s205_s22 }
  0xb5   :  { %p10205_p3 = scmp.ne.s32.totalorder %s205_s22, %s10204_s1  ;;  %p10210_p5 = scmp.lt.s32.totalorder %s10204_s1, %s10204_s1 }
  0xb7   :  { %p10211_p6 = por %p10210_p5, %p10209_p4 }
  0xb9   :  { %p10212_p7 = pnand %p10211_p6, %p10205_p3 }
  0xbb   :  { %10215 = shalt.err (!%p10212_p7)
}
  0xbc   :  { %207 = dma.hbm_to_vmem [thread:$0]  %s11695_s13, 128, %s205_s22, [#allocation9]  }
  0xbd   :  { %s10216_s2 = scalar_lea.hbm %s11705_s21, 128 }
  0xbe   :  { %p10217_p8 = scmp.ne.s32.totalorder %s11705_s21, %s10216_s2  ;;  %p10220_p9 = scmp.lt.u32.totalorder %s10216_s2, %s11705_s21 }
  0xc0   :  { %p10222_p10 = pnand %p10220_p9, %p10217_p8 }
  0xc2   :  { %10225 = shalt.err (!%p10222_p10)
}
  0xc3   :  { %s10226_s7 = scalar_lea.vmem %s225_s26, 128  ;;  %p10231_p12 = scmp.lt.s32.totalorder %s225_s26, %s225_s26 }
  0xc4   :  { %p10227_p11 = scmp.ne.s32.totalorder %s225_s26, %s10226_s7  ;;  %p10232_p13 = scmp.lt.s32.totalorder %s10226_s7, %s10226_s7 }
  0xc6   :  { %p10233_p0 = por %p10232_p13, %p10231_p12 }
  0xc8   :  { %p10234_p1 = pnand %p10233_p0, %p10227_p11 }
  0xca   :  { %10237 = shalt.err (!%p10234_p1)
}
  0xcb   :  { %227 = dma.hbm_to_vmem [thread:$0]  %s11705_s21, 128, %s225_s26, [#allocation12]  }
  0xcc   :  { %s11607_s10 = smov [#allocation14]   ;;  %s10238_s13 = scalar_lea.hbm %s11720_s3, 384 }
  0xcd   :  { %s245_s11 = sshll.u32 %s11607_s10, 4  ;;  %p10239_p2 = scmp.ne.s32.totalorder %s11720_s3, %s10238_s13  ;;  %s246_s11 = int_to_ptr.vmem [resolvable:$true] %s245_s11 }
  0xce   :  { %p10242_p3 = scmp.lt.u32.totalorder %s10238_s13, %s11720_s3 }
  0xd0   :  { %p10244_p4 = pnand %p10242_p3, %p10239_p2 }
  0xd2   :  { %10247 = shalt.err (!%p10244_p4)
}
  0xd3   :  { %s10248_s15 = scalar_lea.vmem %s246_s11, 384  ;;  %p10253_p6 = scmp.lt.s32.totalorder %s246_s11, %s246_s11 }
  0xd4   :  { %p10249_p5 = scmp.ne.s32.totalorder %s246_s11, %s10248_s15  ;;  %p10254_p7 = scmp.lt.s32.totalorder %s10248_s15, %s10248_s15 }
  0xd6   :  { %p10255_p8 = por %p10254_p7, %p10253_p6 }
  0xd8   :  { %p10256_p9 = pnand %p10255_p8, %p10249_p5 }
  0xda   :  { %10259 = shalt.err (!%p10256_p9)
}
  0xdb   :  { %s11608_s16 = smov 128   ;;  %s11609_s21 = smov 8  }
  0xdc   :  { %251 = dma.hbm_to_vmem [thread:$0]  %s11720_s3, 384, %s246_s11, [#allocation15], %s11608_s16, %s11608_s16, %s11609_s21  }
  0xdd   :  { %s11610_s18 = smov [#allocation17]   ;;  %s11611_s22 = smov [#allocation20]  }
  0xde   :  { %s270_s0 = sshll.u32 %s11610_s18, 4  ;;  %s294_s23 = sshll.u32 %s11611_s22, 4  ;;  %s271_s0 = int_to_ptr.vmem [resolvable:$true] %s270_s0  ;;  %s295_s23 = int_to_ptr.vmem [resolvable:$true] %s294_s23 }
  0xdf   :  { %s10260_s26 = scalar_lea.hbm %s11735_s19, 16 }
  0xe0   :  { %p10261_p10 = scmp.ne.s32.totalorder %s11735_s19, %s10260_s26  ;;  %p10264_p11 = scmp.lt.u32.totalorder %s10260_s26, %s11735_s19 }
  0xe2   :  { %p10266_p12 = pnand %p10264_p11, %p10261_p10 }
  0xe4   :  { %10269 = shalt.err (!%p10266_p12)
}
  0xe5   :  { %s10270_s28 = scalar_lea.vmem %s271_s0, 16  ;;  %s10274_s1 = scalar_lea.vmem %s271_s0, 32 }
  0xe6   :  { %p10271_p13 = scmp.ne.s32.totalorder %s271_s0, %s10270_s28  ;;  %p10275_p0 = scmp.lt.s32.totalorder %s271_s0, %s271_s0 }
  0xe7   :  { %p10276_p1 = scmp.lt.s32.totalorder %s10274_s1, %s10270_s28 }
  0xe9   :  { %p10277_p2 = por %p10276_p1, %p10275_p0 }
  0xeb   :  { %p10278_p3 = pnand %p10277_p2, %p10271_p13 }
  0xed   :  { %10281 = shalt.err (!%p10278_p3)
}
  0xee   :  { %273 = dma.hbm_to_vmem [thread:$0]  %s11735_s19, 16, %s271_s0, [#allocation18]  }
  0xef   :  { %s10282_s3 = scalar_lea.hbm %s11755_s12, 16 }
  0xf0   :  { %p10283_p4 = scmp.ne.s32.totalorder %s11755_s12, %s10282_s3  ;;  %p10286_p5 = scmp.lt.u32.totalorder %s10282_s3, %s11755_s12 }
  0xf2   :  { %p10288_p6 = pnand %p10286_p5, %p10283_p4 }
  0xf4   :  { %10291 = shalt.err (!%p10288_p6)
}
  0xf5   :  { %s10292_s2 = scalar_lea.vmem %s295_s23, 16  ;;  %s10296_s7 = scalar_lea.vmem %s295_s23, 32 }
  0xf6   :  { %p10293_p7 = scmp.ne.s32.totalorder %s295_s23, %s10292_s2  ;;  %p10297_p8 = scmp.lt.s32.totalorder %s295_s23, %s295_s23 }
  0xf7   :  { %p10298_p9 = scmp.lt.s32.totalorder %s10296_s7, %s10292_s2 }
  0xf9   :  { %p10299_p10 = por %p10298_p9, %p10297_p8 }
  0xfb   :  { %p10300_p11 = pnand %p10299_p10, %p10293_p7 }
  0xfd   :  { %10303 = shalt.err (!%p10300_p11)
}
  0xfe   :  { %297 = dma.hbm_to_vmem [thread:$0]  %s11755_s12, 16, %s295_s23, [#allocation21]  }
  0xff   :  { %s11612_s19 = smov [#allocation23]   ;;  %s11613_s11 = smov [#allocation26]  }
 0x100   :  { %s316_s10 = sshll.u32 %s11612_s19, 4  ;;  %s338_s13 = sshll.u32 %s11613_s11, 4  ;;  %s317_s10 = int_to_ptr.vmem [resolvable:$true] %s316_s10  ;;  %s339_s13 = int_to_ptr.vmem [resolvable:$true] %s338_s13 }
 0x101   :  { %s10304_s15 = scalar_lea.hbm %s11765_s27, 16 }
 0x102   :  { %p10305_p12 = scmp.ne.s32.totalorder %s11765_s27, %s10304_s15  ;;  %p10308_p13 = scmp.lt.u32.totalorder %s10304_s15, %s11765_s27 }
 0x104   :  { %p10310_p0 = pnand %p10308_p13, %p10305_p12 }
 0x106   :  { %10313 = shalt.err (!%p10310_p0)
}
 0x107   :  { %s10314_s18 = scalar_lea.vmem %s317_s10, 16  ;;  %s10318_s0 = scalar_lea.vmem %s317_s10, 32 }
 0x108   :  { %p10315_p1 = scmp.ne.s32.totalorder %s317_s10, %s10314_s18  ;;  %p10319_p2 = scmp.lt.s32.totalorder %s317_s10, %s317_s10 }
 0x109   :  { %p10320_p3 = scmp.lt.s32.totalorder %s10318_s0, %s10314_s18 }
 0x10b   :  { %p10321_p4 = por %p10320_p3, %p10319_p2 }
 0x10d   :  { %p10322_p5 = pnand %p10321_p4, %p10315_p1 }
 0x10f   :  { %10325 = shalt.err (!%p10322_p5)
}
 0x110   :  { %319 = dma.hbm_to_vmem [thread:$0]  %s11765_s27, 16, %s317_s10, [#allocation24]  }
 0x111   :  { %s10326_s12 = scalar_lea.hbm %s11775_s25, 16 }
 0x112   :  { %p10327_p6 = scmp.ne.s32.totalorder %s11775_s25, %s10326_s12  ;;  %p10330_p7 = scmp.lt.u32.totalorder %s10326_s12, %s11775_s25 }
 0x114   :  { %p10332_p8 = pnand %p10330_p7, %p10327_p6 }
 0x116   :  { %10335 = shalt.err (!%p10332_p8)
}
 0x117   :  { %s10336_s22 = scalar_lea.vmem %s339_s13, 16  ;;  %s10340_s23 = scalar_lea.vmem %s339_s13, 32 }
 0x118   :  { %p10337_p9 = scmp.ne.s32.totalorder %s339_s13, %s10336_s22  ;;  %p10341_p10 = scmp.lt.s32.totalorder %s339_s13, %s339_s13 }
 0x119   :  { %p10342_p11 = scmp.lt.s32.totalorder %s10340_s23, %s10336_s22 }
 0x11b   :  { %p10343_p12 = por %p10342_p11, %p10341_p10 }
 0x11d   :  { %p10344_p13 = pnand %p10343_p12, %p10337_p9 }
 0x11f   :  { %10347 = shalt.err (!%p10344_p13)
}
 0x120   :  { %341 = dma.hbm_to_vmem [thread:$0]  %s11775_s25, 16, %s339_s13, [#allocation27]  }
 0x121   :  { %s11614_s27 = smov [#allocation29]   ;;  %s11615_s28 = smov [#allocation32]  }
 0x122   :  { %s362_s26 = sshll.u32 %s11614_s27, 4  ;;  %s383_s1 = sshll.u32 %s11615_s28, 4  ;;  %s363_s26 = int_to_ptr.vmem [resolvable:$true] %s362_s26  ;;  %s384_s1 = int_to_ptr.vmem [resolvable:$true] %s383_s1 }
 0x123   :  { %s10348_s3 = scalar_lea.hbm %s11795_s14, 16 }
 0x124   :  { %p10349_p0 = scmp.ne.s32.totalorder %s11795_s14, %s10348_s3  ;;  %p10352_p1 = scmp.lt.u32.totalorder %s10348_s3, %s11795_s14 }
 0x126   :  { %p10354_p2 = pnand %p10352_p1, %p10349_p0 }
 0x128   :  { %10357 = shalt.err (!%p10354_p2)
}
 0x129   :  { %s10358_s2 = scalar_lea.vmem %s363_s26, 16  ;;  %s10362_s7 = scalar_lea.vmem %s363_s26, 32 }
 0x12a   :  { %p10359_p3 = scmp.ne.s32.totalorder %s363_s26, %s10358_s2  ;;  %p10363_p4 = scmp.lt.s32.totalorder %s363_s26, %s363_s26 }
 0x12b   :  { %p10364_p5 = scmp.lt.s32.totalorder %s10362_s7, %s10358_s2 }
 0x12d   :  { %p10365_p6 = por %p10364_p5, %p10363_p4 }
 0x12f   :  { %p10366_p7 = pnand %p10365_p6, %p10359_p3 }
 0x131   :  { %10369 = shalt.err (!%p10366_p7)
}
 0x132   :  { %365 = dma.hbm_to_vmem [thread:$0]  %s11795_s14, 16, %s363_s26, [#allocation30]  }
 0x133   :  { %s10370_s25 = scalar_lea.hbm %s11810_s24, 1024 }
 0x134   :  { %p10371_p8 = scmp.ne.s32.totalorder %s11810_s24, %s10370_s25  ;;  %p10374_p9 = scmp.lt.u32.totalorder %s10370_s25, %s11810_s24 }
 0x136   :  { %p10376_p10 = pnand %p10374_p9, %p10371_p8 }
 0x138   :  { %10379 = shalt.err (!%p10376_p10)
}
 0x139   :  { %s10380_s19 = scalar_lea.vmem %s384_s1, 1024  ;;  %p10385_p12 = scmp.lt.s32.totalorder %s384_s1, %s384_s1 }
 0x13a   :  { %p10381_p11 = scmp.ne.s32.totalorder %s384_s1, %s10380_s19  ;;  %p10386_p13 = scmp.lt.s32.totalorder %s10380_s19, %s10380_s19 }
 0x13c   :  { %p10387_p0 = por %p10386_p13, %p10385_p12 }
 0x13e   :  { %p10388_p1 = pnand %p10387_p0, %p10381_p11 }
 0x140   :  { %10391 = shalt.err (!%p10388_p1)
}
 0x141   :  { %389 = dma.hbm_to_vmem [thread:$0]  %s11810_s24, 1024, %s384_s1, [#allocation33], %s11608_s16, %s11608_s16, %s11609_s21  }
 0x142   :  { %s11616_s14 = smov [#allocation35]   ;;  %s11617_s11 = smov [#allocation38]  }
 0x143   :  { %s408_s10 = sshll.u32 %s11616_s14, 4  ;;  %s429_s13 = sshll.u32 %s11617_s11, 4  ;;  %s409_s10 = int_to_ptr.vmem [resolvable:$true] %s408_s10  ;;  %s430_s13 = int_to_ptr.vmem [resolvable:$true] %s429_s13 }
 0x144   :  { %s10392_s15 = scalar_lea.hbm %s11825_s6, 16 }
 0x145   :  { %p10393_p2 = scmp.ne.s32.totalorder %s11825_s6, %s10392_s15  ;;  %p10396_p3 = scmp.lt.u32.totalorder %s10392_s15, %s11825_s6 }
 0x147   :  { %p10398_p4 = pnand %p10396_p3, %p10393_p2 }
 0x149   :  { %10401 = shalt.err (!%p10398_p4)
}
 0x14a   :  { %s10402_s18 = scalar_lea.vmem %s409_s10, 16  ;;  %s10406_s0 = scalar_lea.vmem %s409_s10, 32 }
 0x14b   :  { %p10403_p5 = scmp.ne.s32.totalorder %s409_s10, %s10402_s18  ;;  %p10407_p6 = scmp.lt.s32.totalorder %s409_s10, %s409_s10 }
 0x14c   :  { %p10408_p7 = scmp.lt.s32.totalorder %s10406_s0, %s10402_s18 }
 0x14e   :  { %p10409_p8 = por %p10408_p7, %p10407_p6 }
 0x150   :  { %p10410_p9 = pnand %p10409_p8, %p10403_p5 }
 0x152   :  { %10413 = shalt.err (!%p10410_p9)
}
 0x153   :  { %411 = dma.hbm_to_vmem [thread:$0]  %s11825_s6, 16, %s409_s10, [#allocation36]  }
 0x154   :  { %s10414_s24 = scalar_lea.hbm %s11840_s9, 256 }
 0x155   :  { %p10415_p10 = scmp.ne.s32.totalorder %s11840_s9, %s10414_s24  ;;  %p10418_p11 = scmp.lt.u32.totalorder %s10414_s24, %s11840_s9 }
 0x157   :  { %p10420_p12 = pnand %p10418_p11, %p10415_p10 }
 0x159   :  { %10423 = shalt.err (!%p10420_p12)
}
 0x15a   :  { %s10424_s12 = scalar_lea.vmem %s430_s13, 256  ;;  %p10429_p0 = scmp.lt.s32.totalorder %s430_s13, %s430_s13 }
 0x15b   :  { %p10425_p13 = scmp.ne.s32.totalorder %s430_s13, %s10424_s12  ;;  %p10430_p1 = scmp.lt.s32.totalorder %s10424_s12, %s10424_s12 }
 0x15d   :  { %p10431_p2 = por %p10430_p1, %p10429_p0 }
 0x15f   :  { %p10432_p3 = pnand %p10431_p2, %p10425_p13 }
 0x161   :  { %10435 = shalt.err (!%p10432_p3)
}
 0x162   :  { %435 = dma.hbm_to_vmem [thread:$0]  %s11840_s9, 256, %s430_s13, [#allocation39], %s11608_s16, %s11608_s16, %s11609_s21  }
 0x163   :  { %s11618_s6 = smov [#allocation41]   ;;  %s11619_s23 = smov [#allocation44]  }
 0x164   :  { %s451_s22 = sshll.u32 %s11618_s6, 4  ;;  %s473_s27 = sshll.u32 %s11619_s23, 4  ;;  %s452_s22 = int_to_ptr.vmem [resolvable:$true] %s451_s22  ;;  %s474_s27 = int_to_ptr.vmem [resolvable:$true] %s473_s27 }
 0x165   :  { %s10436_s26 = scalar_lea.hbm %s11850_s20, 256 }
 0x166   :  { %p10437_p4 = scmp.ne.s32.totalorder %s11850_s20, %s10436_s26  ;;  %p10440_p5 = scmp.lt.u32.totalorder %s10436_s26, %s11850_s20 }
 0x168   :  { %p10442_p6 = pnand %p10440_p5, %p10437_p4 }
 0x16a   :  { %10445 = shalt.err (!%p10442_p6)
}
 0x16b   :  { %s10446_s28 = scalar_lea.vmem %s452_s22, 256  ;;  %p10451_p8 = scmp.lt.s32.totalorder %s452_s22, %s452_s22 }
 0x16c   :  { %p10447_p7 = scmp.ne.s32.totalorder %s452_s22, %s10446_s28  ;;  %p10452_p9 = scmp.lt.s32.totalorder %s10446_s28, %s10446_s28 }
 0x16e   :  { %p10453_p10 = por %p10452_p9, %p10451_p8 }
 0x170   :  { %p10454_p11 = pnand %p10453_p10, %p10447_p7 }
 0x172   :  { %10457 = shalt.err (!%p10454_p11)
}
 0x173   :  { %457 = dma.hbm_to_vmem [thread:$0]  %s11850_s20, 256, %s452_s22, [#allocation42], %s11608_s16, %s11608_s16, %s11609_s21  }
 0x174   :  { %s10458_s9 = scalar_lea.hbm %s11860_s8, 256 }
 0x175   :  { %p10459_p12 = scmp.ne.s32.totalorder %s11860_s8, %s10458_s9  ;;  %p10462_p13 = scmp.lt.u32.totalorder %s10458_s9, %s11860_s8 }
 0x177   :  { %p10464_p0 = pnand %p10462_p13, %p10459_p12 }
 0x179   :  { %10467 = shalt.err (!%p10464_p0)
}
 0x17a   :  { %s10468_s1 = scalar_lea.vmem %s474_s27, 256  ;;  %p10473_p2 = scmp.lt.s32.totalorder %s474_s27, %s474_s27 }
 0x17b   :  { %p10469_p1 = scmp.ne.s32.totalorder %s474_s27, %s10468_s1  ;;  %p10474_p3 = scmp.lt.s32.totalorder %s10468_s1, %s10468_s1 }
 0x17d   :  { %p10475_p4 = por %p10474_p3, %p10473_p2 }
 0x17f   :  { %p10476_p5 = pnand %p10475_p4, %p10469_p1 }
 0x181   :  { %10479 = shalt.err (!%p10476_p5)
}
 0x182   :  { %479 = dma.hbm_to_vmem [thread:$0]  %s11860_s8, 256, %s474_s27, [#allocation45], %s11608_s16, %s11608_s16, %s11609_s21  }
 0x183   :  { %s11620_s20 = smov [#allocation47]   ;;  %s11621_s2 = smov [#allocation50]  }
 0x184   :  { %s495_s3 = sshll.u32 %s11620_s20, 4  ;;  %s517_s7 = sshll.u32 %s11621_s2, 4  ;;  %s496_s3 = int_to_ptr.vmem [resolvable:$true] %s495_s3  ;;  %s518_s7 = int_to_ptr.vmem [resolvable:$true] %s517_s7 }
 0x185   :  { %s10480_s25 = scalar_lea.hbm %s11870_s29, 256 }
 0x186   :  { %p10481_p6 = scmp.ne.s32.totalorder %s11870_s29, %s10480_s25  ;;  %p10484_p7 = scmp.lt.u32.totalorder %s10480_s25, %s11870_s29 }
 0x188   :  { %p10486_p8 = pnand %p10484_p7, %p10481_p6 }
 0x18a   :  { %10489 = shalt.err (!%p10486_p8)
}
 0x18b   :  { %s10490_s19 = scalar_lea.vmem %s496_s3, 256  ;;  %p10495_p10 = scmp.lt.s32.totalorder %s496_s3, %s496_s3 }
 0x18c   :  { %p10491_p9 = scmp.ne.s32.totalorder %s496_s3, %s10490_s19  ;;  %p10496_p11 = scmp.lt.s32.totalorder %s10490_s19, %s10490_s19 }
 0x18e   :  { %p10497_p12 = por %p10496_p11, %p10495_p10 }
 0x190   :  { %p10498_p13 = pnand %p10497_p12, %p10491_p9 }
 0x192   :  { %10501 = shalt.err (!%p10498_p13)
}
 0x193   :  { %s13339_s8 = sld [smem:[#allocation148_spill]] }
 0x194   :  { %501 = dma.hbm_to_vmem [thread:$0]  %s11870_s29, 256, %s496_s3, [#allocation48], %s11608_s16, %s11608_s16, %s11609_s21  }
 0x199   :  { %s10502_s14 = scalar_lea.hbm %s13339_s8, 256 }
 0x19a   :  { %p10503_p0 = scmp.ne.s32.totalorder %s13339_s8, %s10502_s14  ;;  %p10506_p1 = scmp.lt.u32.totalorder %s10502_s14, %s13339_s8 }
 0x19c   :  { %p10508_p2 = pnand %p10506_p1, %p10503_p0 }
 0x19e   :  { %10511 = shalt.err (!%p10508_p2)
}
 0x19f   :  { %s10512_s10 = scalar_lea.vmem %s518_s7, 256  ;;  %p10517_p4 = scmp.lt.s32.totalorder %s518_s7, %s518_s7 }
 0x1a0   :  { %p10513_p3 = scmp.ne.s32.totalorder %s518_s7, %s10512_s10  ;;  %p10518_p5 = scmp.lt.s32.totalorder %s10512_s10, %s10512_s10 }
 0x1a2   :  { %p10519_p6 = por %p10518_p5, %p10517_p4 }
 0x1a4   :  { %p10520_p7 = pnand %p10519_p6, %p10513_p3 }
 0x1a6   :  { %10523 = shalt.err (!%p10520_p7)
}
 0x1a7   :  { %s13340_s11 = sld [smem:[#allocation150_spill]]  ;;  %s11622_s29 = smov [#allocation53]  }
 0x1a8   :  { %523 = dma.hbm_to_vmem [thread:$0]  %s13339_s8, 256, %s518_s7, [#allocation51], %s11608_s16, %s11608_s16, %s11609_s21  }
 0x1a9   :  { %s539_s13 = sshll.u32 %s11622_s29, 4  ;;  %s11623_s15 = smov [#allocation56]   ;;  %s540_s13 = int_to_ptr.vmem [resolvable:$true] %s539_s13 }
 0x1aa   :  { %s561_s18 = sshll.u32 %s11623_s15, 4  ;;  %s562_s18 = int_to_ptr.vmem [resolvable:$true] %s561_s18 }
 0x1ad   :  { %s10524_s0 = scalar_lea.hbm %s13340_s11, 256 }
 0x1ae   :  { %p10525_p8 = scmp.ne.s32.totalorder %s13340_s11, %s10524_s0  ;;  %p10528_p9 = scmp.lt.u32.totalorder %s10524_s0, %s13340_s11 }
 0x1b0   :  { %p10530_p10 = pnand %p10528_p9, %p10525_p8 }
 0x1b2   :  { %10533 = shalt.err (!%p10530_p10)
}
 0x1b3   :  { %s10534_s24 = scalar_lea.vmem %s540_s13, 256  ;;  %p10539_p12 = scmp.lt.s32.totalorder %s540_s13, %s540_s13 }
 0x1b4   :  { %p10535_p11 = scmp.ne.s32.totalorder %s540_s13, %s10534_s24  ;;  %p10540_p13 = scmp.lt.s32.totalorder %s10534_s24, %s10534_s24 }
 0x1b6   :  { %p10541_p0 = por %p10540_p13, %p10539_p12 }
 0x1b8   :  { %p10542_p1 = pnand %p10541_p0, %p10535_p11 }
 0x1ba   :  { %10545 = shalt.err (!%p10542_p1)
}
 0x1bb   :  { %s13341_s12 = sld [smem:[#allocation152_spill]] }
 0x1bc   :  { %545 = dma.hbm_to_vmem [thread:$0]  %s13340_s11, 256, %s540_s13, [#allocation54], %s11608_s16, %s11608_s16, %s11609_s21  }
 0x1c1   :  { %s10546_s6 = scalar_lea.hbm %s13341_s12, 896 }
 0x1c2   :  { %p10547_p2 = scmp.ne.s32.totalorder %s13341_s12, %s10546_s6  ;;  %p10550_p3 = scmp.lt.u32.totalorder %s10546_s6, %s13341_s12 }
 0x1c4   :  { %p10552_p4 = pnand %p10550_p3, %p10547_p2 }
 0x1c6   :  { %10555 = shalt.err (!%p10552_p4)
}
 0x1c7   :  { %s10556_s22 = scalar_lea.vmem %s562_s18, 896  ;;  %p10561_p6 = scmp.lt.s32.totalorder %s562_s18, %s562_s18 }
 0x1c8   :  { %p10557_p5 = scmp.ne.s32.totalorder %s562_s18, %s10556_s22  ;;  %p10562_p7 = scmp.lt.s32.totalorder %s10556_s22, %s10556_s22 }
 0x1ca   :  { %p10563_p8 = por %p10562_p7, %p10561_p6 }
 0x1cc   :  { %p10564_p9 = pnand %p10563_p8, %p10557_p5 }
 0x1ce   :  { %10567 = shalt.err (!%p10564_p9)
}
 0x1cf   :  { %s13342_s23 = sld [smem:[#allocation154_spill]]  ;;  %s11624_s27 = smov [#allocation59]  }
 0x1d0   :  { %567 = dma.hbm_to_vmem [thread:$0]  %s13341_s12, 896, %s562_s18, [#allocation57], %s11608_s16, %s11608_s16, %s11609_s21  }
 0x1d1   :  { %s583_s26 = sshll.u32 %s11624_s27, 4  ;;  %s11625_s28 = smov [#allocation62]   ;;  %s584_s26 = int_to_ptr.vmem [resolvable:$true] %s583_s26 }
 0x1d2   :  { %s608_s9 = sshll.u32 %s11625_s28, 4  ;;  %s609_s9 = int_to_ptr.vmem [resolvable:$true] %s608_s9 }
 0x1d5   :  { %s10568_s1 = scalar_lea.hbm %s13342_s23, 1024 }
 0x1d6   :  { %p10569_p10 = scmp.ne.s32.totalorder %s13342_s23, %s10568_s1  ;;  %p10572_p11 = scmp.lt.u32.totalorder %s10568_s1, %s13342_s23 }
 0x1d8   :  { %p10574_p12 = pnand %p10572_p11, %p10569_p10 }
 0x1da   :  { %10577 = shalt.err (!%p10574_p12)
}
 0x1db   :  { %s10578_s20 = scalar_lea.vmem %s584_s26, 1024  ;;  %p10583_p0 = scmp.lt.s32.totalorder %s584_s26, %s584_s26 }
 0x1dc   :  { %p10579_p13 = scmp.ne.s32.totalorder %s584_s26, %s10578_s20  ;;  %p10584_p1 = scmp.lt.s32.totalorder %s10578_s20, %s10578_s20 }
 0x1de   :  { %p10585_p2 = por %p10584_p1, %p10583_p0 }
 0x1e0   :  { %p10586_p3 = pnand %p10585_p2, %p10579_p13 }
 0x1e2   :  { %10589 = shalt.err (!%p10586_p3)
}
 0x1e3   :  { %s13343_s3 = sld [smem:[#allocation157_spill]] }
 0x1e4   :  { %589 = dma.hbm_to_vmem [thread:$0]  %s13342_s23, 1024, %s584_s26, [#allocation60], %s11608_s16, %s11608_s16, %s11609_s21  }
 0x1e9   :  { %s10590_s2 = scalar_lea.hbm %s13343_s3, 16 }
 0x1ea   :  { %p10591_p4 = scmp.ne.s32.totalorder %s13343_s3, %s10590_s2  ;;  %p10594_p5 = scmp.lt.u32.totalorder %s10590_s2, %s13343_s3 }
 0x1ec   :  { %p10596_p6 = pnand %p10594_p5, %p10591_p4 }
 0x1ee   :  { %10599 = shalt.err (!%p10596_p6)
}
 0x1ef   :  { %s10600_s7 = scalar_lea.vmem %s609_s9, 16  ;;  %s10604_s25 = scalar_lea.vmem %s609_s9, 32 }
 0x1f0   :  { %p10601_p7 = scmp.ne.s32.totalorder %s609_s9, %s10600_s7  ;;  %p10605_p8 = scmp.lt.s32.totalorder %s609_s9, %s609_s9 }
 0x1f1   :  { %p10606_p9 = scmp.lt.s32.totalorder %s10604_s25, %s10600_s7 }
 0x1f3   :  { %p10607_p10 = por %p10606_p9, %p10605_p8 }
 0x1f5   :  { %p10608_p11 = pnand %p10607_p10, %p10601_p7 }
 0x1f7   :  { %10611 = shalt.err (!%p10608_p11)
}
 0x1f8   :  { %s13344_s19 = sld [smem:[#allocation160_spill]]  ;;  %s11626_s8 = smov [#allocation65]  }
 0x1f9   :  { %611 = dma.hbm_to_vmem [thread:$0]  %s13343_s3, 16, %s609_s9, [#allocation63]  }
 0x1fa   :  { %s629_s14 = sshll.u32 %s11626_s8, 4  ;;  %s11627_s10 = smov [#allocation68]   ;;  %s630_s14 = int_to_ptr.vmem [resolvable:$true] %s629_s14 }
 0x1fb   :  { %s651_s11 = sshll.u32 %s11627_s10, 4  ;;  %s652_s11 = int_to_ptr.vmem [resolvable:$true] %s651_s11 }
 0x1fe   :  { %s10612_s29 = scalar_lea.hbm %s13344_s19, 896 }
 0x1ff   :  { %p10613_p12 = scmp.ne.s32.totalorder %s13344_s19, %s10612_s29  ;;  %p10616_p13 = scmp.lt.u32.totalorder %s10612_s29, %s13344_s19 }
 0x201   :  { %p10618_p0 = pnand %p10616_p13, %p10613_p12 }
 0x203   :  { %10621 = shalt.err (!%p10618_p0)
}
 0x204   :  { %s10622_s13 = scalar_lea.vmem %s630_s14, 896  ;;  %p10627_p2 = scmp.lt.s32.totalorder %s630_s14, %s630_s14 }
 0x205   :  { %p10623_p1 = scmp.ne.s32.totalorder %s630_s14, %s10622_s13  ;;  %p10628_p3 = scmp.lt.s32.totalorder %s10622_s13, %s10622_s13 }
 0x207   :  { %p10629_p4 = por %p10628_p3, %p10627_p2 }
 0x209   :  { %p10630_p5 = pnand %p10629_p4, %p10623_p1 }
 0x20b   :  { %10633 = shalt.err (!%p10630_p5)
}
 0x20c   :  { %s13345_s15 = sld [smem:[#allocation162_spill]] }
 0x20d   :  { %635 = dma.hbm_to_vmem [thread:$0]  %s13344_s19, 896, %s630_s14, [#allocation66], %s11608_s16, %s11608_s16, %s11609_s21  }
 0x212   :  { %s10634_s18 = scalar_lea.hbm %s13345_s15, 1024 }
 0x213   :  { %p10635_p6 = scmp.ne.s32.totalorder %s13345_s15, %s10634_s18  ;;  %p10638_p7 = scmp.lt.u32.totalorder %s10634_s18, %s13345_s15 }
 0x215   :  { %p10640_p8 = pnand %p10638_p7, %p10635_p6 }
 0x217   :  { %10643 = shalt.err (!%p10640_p8)
}
 0x218   :  { %s10644_s0 = scalar_lea.vmem %s652_s11, 1024  ;;  %p10649_p10 = scmp.lt.s32.totalorder %s652_s11, %s652_s11 }
 0x219   :  { %p10645_p9 = scmp.ne.s32.totalorder %s652_s11, %s10644_s0  ;;  %p10650_p11 = scmp.lt.s32.totalorder %s10644_s0, %s10644_s0 }
 0x21b   :  { %p10651_p12 = por %p10650_p11, %p10649_p10 }
 0x21d   :  { %p10652_p13 = pnand %p10651_p12, %p10645_p9 }
 0x21f   :  { %10655 = shalt.err (!%p10652_p13)
}
 0x220   :  { %s13346_s24 = sld [smem:[#allocation165_spill]]  ;;  %s11628_s12 = smov [#allocation71]  }
 0x221   :  { %657 = dma.hbm_to_vmem [thread:$0]  %s13345_s15, 1024, %s652_s11, [#allocation69], %s11608_s16, %s11608_s16, %s11609_s21  }
 0x222   :  { %s676_s6 = sshll.u32 %s11628_s12, 4  ;;  %s11629_s22 = smov [#allocation74]   ;;  %s677_s6 = int_to_ptr.vmem [resolvable:$true] %s676_s6 }
 0x223   :  { %s697_s23 = sshll.u32 %s11629_s22, 4  ;;  %s698_s23 = int_to_ptr.vmem [resolvable:$true] %s697_s23 }
 0x226   :  { %s10656_s27 = scalar_lea.hbm %s13346_s24, 16 }
 0x227   :  { %p10657_p0 = scmp.ne.s32.totalorder %s13346_s24, %s10656_s27  ;;  %p10660_p1 = scmp.lt.u32.totalorder %s10656_s27, %s13346_s24 }
 0x229   :  { %p10662_p2 = pnand %p10660_p1, %p10657_p0 }
 0x22b   :  { %10665 = shalt.err (!%p10662_p2)
}
 0x22c   :  { %s10666_s26 = scalar_lea.vmem %s677_s6, 16  ;;  %s10670_s28 = scalar_lea.vmem %s677_s6, 32 }
 0x22d   :  { %p10667_p3 = scmp.ne.s32.totalorder %s677_s6, %s10666_s26  ;;  %p10671_p4 = scmp.lt.s32.totalorder %s677_s6, %s677_s6 }
 0x22e   :  { %p10672_p5 = scmp.lt.s32.totalorder %s10670_s28, %s10666_s26 }
 0x230   :  { %p10673_p6 = por %p10672_p5, %p10671_p4 }
 0x232   :  { %p10674_p7 = pnand %p10673_p6, %p10667_p3 }
 0x234   :  { %10677 = shalt.err (!%p10674_p7)
}
 0x235   :  { %s13347_s9 = sld [smem:[#allocation168_spill]] }
 0x236   :  { %679 = dma.hbm_to_vmem [thread:$0]  %s13346_s24, 16, %s677_s6, [#allocation72]  }
 0x23b   :  { %s10678_s1 = scalar_lea.hbm %s13347_s9, 896 }
 0x23c   :  { %p10679_p8 = scmp.ne.s32.totalorder %s13347_s9, %s10678_s1  ;;  %p10682_p9 = scmp.lt.u32.totalorder %s10678_s1, %s13347_s9 }
 0x23e   :  { %p10684_p10 = pnand %p10682_p9, %p10679_p8 }
 0x240   :  { %10687 = shalt.err (!%p10684_p10)
}
 0x241   :  { %s10688_s20 = scalar_lea.vmem %s698_s23, 896  ;;  %p10693_p12 = scmp.lt.s32.totalorder %s698_s23, %s698_s23 }
 0x242   :  { %p10689_p11 = scmp.ne.s32.totalorder %s698_s23, %s10688_s20  ;;  %p10694_p13 = scmp.lt.s32.totalorder %s10688_s20, %s10688_s20 }
 0x244   :  { %p10695_p0 = por %p10694_p13, %p10693_p12 }
 0x246   :  { %p10696_p1 = pnand %p10695_p0, %p10689_p11 }
 0x248   :  { %10699 = shalt.err (!%p10696_p1)
}
 0x249   :  { %s13348_s3 = sld [smem:[#allocation170_spill]]  ;;  %s11630_s2 = smov [#allocation77]  }
 0x24a   :  { %703 = dma.hbm_to_vmem [thread:$0]  %s13347_s9, 896, %s698_s23, [#allocation75], %s11608_s16, %s11608_s16, %s11609_s21  }
 0x24b   :  { %s719_s7 = sshll.u32 %s11630_s2, 4  ;;  %s11631_s25 = smov [#allocation80]   ;;  %s720_s7 = int_to_ptr.vmem [resolvable:$true] %s719_s7 }
 0x24c   :  { %s744_s19 = sshll.u32 %s11631_s25, 4  ;;  %s745_s19 = int_to_ptr.vmem [resolvable:$true] %s744_s19 }
 0x24f   :  { %s10700_s8 = scalar_lea.hbm %s13348_s3, 1024 }
 0x250   :  { %p10701_p2 = scmp.ne.s32.totalorder %s13348_s3, %s10700_s8  ;;  %p10704_p3 = scmp.lt.u32.totalorder %s10700_s8, %s13348_s3 }
 0x252   :  { %p10706_p4 = pnand %p10704_p3, %p10701_p2 }
 0x254   :  { %10709 = shalt.err (!%p10706_p4)
}
 0x255   :  { %s10710_s14 = scalar_lea.vmem %s720_s7, 1024  ;;  %p10715_p6 = scmp.lt.s32.totalorder %s720_s7, %s720_s7 }
 0x256   :  { %p10711_p5 = scmp.ne.s32.totalorder %s720_s7, %s10710_s14  ;;  %p10716_p7 = scmp.lt.s32.totalorder %s10710_s14, %s10710_s14 }
 0x258   :  { %p10717_p8 = por %p10716_p7, %p10715_p6 }
 0x25a   :  { %p10718_p9 = pnand %p10717_p8, %p10711_p5 }
 0x25c   :  { %10721 = shalt.err (!%p10718_p9)
}
 0x25d   :  { %s13349_s10 = sld [smem:[#allocation173_spill]] }
 0x25e   :  { %725 = dma.hbm_to_vmem [thread:$0]  %s13348_s3, 1024, %s720_s7, [#allocation78], %s11608_s16, %s11608_s16, %s11609_s21  }
 0x263   :  { %s10722_s11 = scalar_lea.hbm %s13349_s10, 16 }
 0x264   :  { %p10723_p10 = scmp.ne.s32.totalorder %s13349_s10, %s10722_s11  ;;  %p10726_p11 = scmp.lt.u32.totalorder %s10722_s11, %s13349_s10 }
 0x266   :  { %p10728_p12 = pnand %p10726_p11, %p10723_p10 }
 0x268   :  { %10731 = shalt.err (!%p10728_p12)
}
 0x269   :  { %s10732_s29 = scalar_lea.vmem %s745_s19, 16  ;;  %s10736_s13 = scalar_lea.vmem %s745_s19, 32 }
 0x26a   :  { %p10733_p13 = scmp.ne.s32.totalorder %s745_s19, %s10732_s29  ;;  %p10737_p0 = scmp.lt.s32.totalorder %s745_s19, %s745_s19 }
 0x26b   :  { %p10738_p1 = scmp.lt.s32.totalorder %s10736_s13, %s10732_s29 }
 0x26d   :  { %p10739_p2 = por %p10738_p1, %p10737_p0 }
 0x26f   :  { %p10740_p3 = pnand %p10739_p2, %p10733_p13 }
 0x271   :  { %10743 = shalt.err (!%p10740_p3)
}
 0x272   :  { %s13350_s15 = sld [smem:[#allocation176_spill]]  ;;  %s11632_s18 = smov [#allocation83]  }
 0x273   :  { %747 = dma.hbm_to_vmem [thread:$0]  %s13349_s10, 16, %s745_s19, [#allocation81]  }
 0x274   :  { %s765_s0 = sshll.u32 %s11632_s18, 4  ;;  %s766_s0 = int_to_ptr.vmem [resolvable:$true] %s765_s0 }
 0x278   :  { %s10744_s24 = scalar_lea.hbm %s13350_s15, 1792 }
 0x279   :  { %p10745_p4 = scmp.ne.s32.totalorder %s13350_s15, %s10744_s24  ;;  %p10748_p5 = scmp.lt.u32.totalorder %s10744_s24, %s13350_s15 }
 0x27b   :  { %p10750_p6 = pnand %p10748_p5, %p10745_p4 }
 0x27d   :  { %10753 = shalt.err (!%p10750_p6)
}
 0x27e   :  { %s10754_s12 = scalar_lea.vmem %s766_s0, 1792  ;;  %p10759_p8 = scmp.lt.s32.totalorder %s766_s0, %s766_s0 }
 0x27f   :  { %p10755_p7 = scmp.ne.s32.totalorder %s766_s0, %s10754_s12  ;;  %p10760_p9 = scmp.lt.s32.totalorder %s10754_s12, %s10754_s12 }
 0x281   :  { %p10761_p10 = por %p10760_p9, %p10759_p8 }
 0x283   :  { %p10762_p11 = pnand %p10761_p10, %p10755_p7 }
 0x285   :  { %10765 = shalt.err (!%p10762_p11)
}
 0x286   :  { %s11633_s6 = smov 256   ;;  %s13351_s22 = sld [smem:[#allocation178_spill]] }
 0x287   :  { %s11634_s23 = smov 16   ;;  %s11635_s27 = smov [#allocation86]  }
 0x288   :  { %771 = dma.hbm_to_vmem [thread:$0]  %s13350_s15, 1792, %s766_s0, [#allocation84], %s11633_s6, %s11633_s6, %s11634_s23  }
 0x289   :  { %s787_s26 = sshll.u32 %s11635_s27, 4  ;;  %s11636_s28 = smov [#allocation89]   ;;  %s788_s26 = int_to_ptr.vmem [resolvable:$true] %s787_s26 }
 0x28a   :  { %s812_s9 = sshll.u32 %s11636_s28, 4  ;;  %s813_s9 = int_to_ptr.vmem [resolvable:$true] %s812_s9 }
 0x28c   :  { %s10766_s1 = scalar_lea.hbm %s13351_s22, 6144 }
 0x28d   :  { %p10767_p12 = scmp.ne.s32.totalorder %s13351_s22, %s10766_s1  ;;  %p10770_p13 = scmp.lt.u32.totalorder %s10766_s1, %s13351_s22 }
 0x28f   :  { %p10772_p0 = pnand %p10770_p13, %p10767_p12 }
 0x291   :  { %10775 = shalt.err (!%p10772_p0)
}
 0x292   :  { %s10776_s20 = scalar_lea.vmem %s788_s26, 6144  ;;  %p10781_p2 = scmp.lt.s32.totalorder %s788_s26, %s788_s26 }
 0x293   :  { %p10777_p1 = scmp.ne.s32.totalorder %s788_s26, %s10776_s20  ;;  %p10782_p3 = scmp.lt.s32.totalorder %s10776_s20, %s10776_s20 }
 0x295   :  { %p10783_p4 = por %p10782_p3, %p10781_p2 }
 0x297   :  { %p10784_p5 = pnand %p10783_p4, %p10777_p1 }
 0x299   :  { %10787 = shalt.err (!%p10784_p5)
}
 0x29a   :  { %793 = dma.hbm_to_vmem [thread:$0]  %s13351_s22, 6144, %s788_s26, [#allocation87], %s11633_s6, %s11633_s6, %s11634_s23  }
 0x29b   :  { %s10788_s3 = scalar_lea.hbm %s12045_s30, 16 }
 0x29c   :  { %p10789_p6 = scmp.ne.s32.totalorder %s12045_s30, %s10788_s3  ;;  %p10792_p7 = scmp.lt.u32.totalorder %s10788_s3, %s12045_s30 }
 0x29e   :  { %p10794_p8 = pnand %p10792_p7, %p10789_p6 }
 0x2a0   :  { %10797 = shalt.err (!%p10794_p8)
}
 0x2a1   :  { %s10798_s2 = scalar_lea.vmem %s813_s9, 16  ;;  %s10802_s7 = scalar_lea.vmem %s813_s9, 32 }
 0x2a2   :  { %p10799_p9 = scmp.ne.s32.totalorder %s813_s9, %s10798_s2  ;;  %p10803_p10 = scmp.lt.s32.totalorder %s813_s9, %s813_s9 }
 0x2a3   :  { %p10804_p11 = scmp.lt.s32.totalorder %s10802_s7, %s10798_s2 }
 0x2a5   :  { %p10805_p12 = por %p10804_p11, %p10803_p10 }
 0x2a7   :  { %p10806_p13 = pnand %p10805_p12, %p10799_p9 }
 0x2a9   :  { %10809 = shalt.err (!%p10806_p13)
}
 0x2aa   :  { %s13352_s25 = sld [smem:[#allocation123_spill]]  ;;  %s11637_s19 = smov [#allocation5]  }
 0x2ab   :  { %815 = dma.hbm_to_vmem [thread:$0]  %s12045_s30, 16, %s813_s9, [#allocation90]  }
 0x2ac   :  { %s192_s8 = sshll.u32 %s11637_s19, 4  ;;  %s11638_s14 = smov [#allocation10]   ;;  %s193_s8 = int_to_ptr.vmem [resolvable:$true] %s192_s8 }
 0x2ad   :  { %s214_s10 = sshll.u32 %s11638_s14, 4  ;;  %s215_s10 = int_to_ptr.vmem [resolvable:$true] %s214_s10 }
 0x2b0   :  { %s10810_s11 = scalar_lea.hbm %s13352_s25, 128 }
 0x2b1   :  { %p10811_p0 = scmp.ne.s32.totalorder %s13352_s25, %s10810_s11  ;;  %p10814_p1 = scmp.lt.u32.totalorder %s10810_s11, %s13352_s25 }
 0x2b3   :  { %p10816_p2 = pnand %p10814_p1, %p10811_p0 }
 0x2b5   :  { %10819 = shalt.err (!%p10816_p2)
}
 0x2b6   :  { %s10820_s29 = scalar_lea.vmem %s193_s8, 128  ;;  %p10825_p4 = scmp.lt.s32.totalorder %s193_s8, %s193_s8 }
 0x2b7   :  { %p10821_p3 = scmp.ne.s32.totalorder %s193_s8, %s10820_s29  ;;  %p10826_p5 = scmp.lt.s32.totalorder %s10820_s29, %s10820_s29 }
 0x2b9   :  { %p10827_p6 = por %p10826_p5, %p10825_p4 }
 0x2bb   :  { %p10828_p7 = pnand %p10827_p6, %p10821_p3 }
 0x2bd   :  { %10831 = shalt.err (!%p10828_p7)
}
 0x2be   :  { %s13353_s30 = sld [smem:[#allocation125_spill]] }
 0x2bf   :  { %195 = dma.hbm_to_vmem [thread:$0]  %s13352_s25, 128, %s193_s8, [#allocation6]  }
 0x2c4   :  { %s10832_s13 = scalar_lea.hbm %s13353_s30, 128 }
 0x2c5   :  { %p10833_p8 = scmp.ne.s32.totalorder %s13353_s30, %s10832_s13  ;;  %p10836_p9 = scmp.lt.u32.totalorder %s10832_s13, %s13353_s30 }
 0x2c7   :  { %p10838_p10 = pnand %p10836_p9, %p10833_p8 }
 0x2c9   :  { %10841 = shalt.err (!%p10838_p10)
}
 0x2ca   :  { %s10842_s15 = scalar_lea.vmem %s215_s10, 128  ;;  %p10847_p12 = scmp.lt.s32.totalorder %s215_s10, %s215_s10 }
 0x2cb   :  { %p10843_p11 = scmp.ne.s32.totalorder %s215_s10, %s10842_s15  ;;  %p10848_p13 = scmp.lt.s32.totalorder %s10842_s15, %s10842_s15 }
 0x2cd   :  { %p10849_p0 = por %p10848_p13, %p10847_p12 }
 0x2cf   :  { %p10850_p1 = pnand %p10849_p0, %p10843_p11 }
 0x2d1   :  { %10853 = shalt.err (!%p10850_p1)
}
 0x2d2   :  { %s13354_s18 = sld [smem:[#allocation127_spill]]  ;;  %s11639_s0 = smov [#allocation13]  }
 0x2d3   :  { %217 = dma.hbm_to_vmem [thread:$0]  %s13353_s30, 128, %s215_s10, [#allocation9]  }
 0x2d4   :  { %s236_s24 = sshll.u32 %s11639_s0, 4  ;;  %s11640_s12 = smov [#allocation16]   ;;  %s237_s24 = int_to_ptr.vmem [resolvable:$true] %s236_s24 }
 0x2d5   :  { %s258_s6 = sshll.u32 %s11640_s12, 4  ;;  %s259_s6 = int_to_ptr.vmem [resolvable:$true] %s258_s6 }
 0x2d8   :  { %s10854_s22 = scalar_lea.hbm %s13354_s18, 128 }
 0x2d9   :  { %p10855_p2 = scmp.ne.s32.totalorder %s13354_s18, %s10854_s22  ;;  %p10858_p3 = scmp.lt.u32.totalorder %s10854_s22, %s13354_s18 }
 0x2db   :  { %p10860_p4 = pnand %p10858_p3, %p10855_p2 }
 0x2dd   :  { %10863 = shalt.err (!%p10860_p4)
}
 0x2de   :  { %s10864_s27 = scalar_lea.vmem %s237_s24, 128  ;;  %p10869_p6 = scmp.lt.s32.totalorder %s237_s24, %s237_s24 }
 0x2df   :  { %p10865_p5 = scmp.ne.s32.totalorder %s237_s24, %s10864_s27  ;;  %p10870_p7 = scmp.lt.s32.totalorder %s10864_s27, %s10864_s27 }
 0x2e1   :  { %p10871_p8 = por %p10870_p7, %p10869_p6 }
 0x2e3   :  { %p10872_p9 = pnand %p10871_p8, %p10865_p5 }
 0x2e5   :  { %10875 = shalt.err (!%p10872_p9)
}
 0x2e6   :  { %s13355_s26 = sld [smem:[#allocation128_spill]] }
 0x2e7   :  { %239 = dma.hbm_to_vmem [thread:$0]  %s13354_s18, 128, %s237_s24, [#allocation12]  }
 0x2ec   :  { %s10876_s28 = scalar_lea.hbm %s13355_s26, 16 }
 0x2ed   :  { %p10877_p10 = scmp.ne.s32.totalorder %s13355_s26, %s10876_s28  ;;  %p10880_p11 = scmp.lt.u32.totalorder %s10876_s28, %s13355_s26 }
 0x2ef   :  { %p10882_p12 = pnand %p10880_p11, %p10877_p10 }
 0x2f1   :  { %10885 = shalt.err (!%p10882_p12)
}
 0x2f2   :  { %s10886_s9 = scalar_lea.vmem %s259_s6, 16  ;;  %s10890_s1 = scalar_lea.vmem %s259_s6, 32 }
 0x2f3   :  { %p10887_p13 = scmp.ne.s32.totalorder %s259_s6, %s10886_s9  ;;  %p10891_p0 = scmp.lt.s32.totalorder %s259_s6, %s259_s6 }
 0x2f4   :  { %p10892_p1 = scmp.lt.s32.totalorder %s10890_s1, %s10886_s9 }
 0x2f6   :  { %p10893_p2 = por %p10892_p1, %p10891_p0 }
 0x2f8   :  { %p10894_p3 = pnand %p10893_p2, %p10887_p13 }
 0x2fa   :  { %10897 = shalt.err (!%p10894_p3)
}
 0x2fb   :  { %s13356_s20 = sld [smem:[#allocation131_spill]]  ;;  %s11641_s3 = smov [#allocation19]  }
 0x2fc   :  { %261 = dma.hbm_to_vmem [thread:$0]  %s13355_s26, 16, %s259_s6, [#allocation15]  }
 0x2fd   :  { %s282_s2 = sshll.u32 %s11641_s3, 4  ;;  %s11642_s7 = smov [#allocation22]   ;;  %s283_s2 = int_to_ptr.vmem [resolvable:$true] %s282_s2 }
 0x2fe   :  { %s303_s25 = sshll.u32 %s11642_s7, 4  ;;  %s12234_s25 = int_to_ptr.vmem [resolvable:$true] %s303_s25 }
 0x301   :  { %s10898_s19 = scalar_lea.hbm %s13356_s20, 16 }
 0x302   :  { %p10899_p4 = scmp.ne.s32.totalorder %s13356_s20, %s10898_s19  ;;  %p10902_p5 = scmp.lt.u32.totalorder %s10898_s19, %s13356_s20 }
 0x304   :  { %p10904_p6 = pnand %p10902_p5, %p10899_p4 }
 0x306   :  { %10907 = shalt.err (!%p10904_p6)
}
 0x307   :  { %s10908_s8 = scalar_lea.vmem %s283_s2, 16  ;;  %s10912_s14 = scalar_lea.vmem %s283_s2, 32 }
 0x308   :  { %p10909_p7 = scmp.ne.s32.totalorder %s283_s2, %s10908_s8  ;;  %p10913_p8 = scmp.lt.s32.totalorder %s283_s2, %s283_s2 }
 0x309   :  { %p10914_p9 = scmp.lt.s32.totalorder %s10912_s14, %s10908_s8 }
 0x30b   :  { %p10915_p10 = por %p10914_p9, %p10913_p8 }
 0x30d   :  { %p10916_p11 = pnand %p10915_p10, %p10909_p7 }
 0x30f   :  { %10919 = shalt.err (!%p10916_p11)
}
 0x310   :  { %s13357_s10 = sld [smem:[#allocation133_spill]] }
 0x311   :  { %285 = dma.hbm_to_vmem [thread:$0]  %s13356_s20, 16, %s283_s2, [#allocation18]  }
 0x316   :  { %s10920_s11 = scalar_lea.hbm %s13357_s10, 640 }
 0x317   :  { %p10921_p12 = scmp.ne.s32.totalorder %s13357_s10, %s10920_s11  ;;  %p10924_p13 = scmp.lt.u32.totalorder %s10920_s11, %s13357_s10 }
 0x319   :  { %p10926_p0 = pnand %p10924_p13, %p10921_p12 }
 0x31b   :  { %10929 = shalt.err (!%p10926_p0)
}
 0x31c   :  { %s10930_s29 = scalar_lea.vmem %s12234_s25, 640  ;;  %p10935_p2 = scmp.lt.s32.totalorder %s12234_s25, %s12234_s25 }
 0x31d   :  { %p10931_p1 = scmp.ne.s32.totalorder %s12234_s25, %s10930_s29  ;;  %p10936_p3 = scmp.lt.s32.totalorder %s10930_s29, %s10930_s29 }
 0x31f   :  { %p10937_p4 = por %p10936_p3, %p10935_p2 }
 0x321   :  { %p10938_p5 = pnand %p10937_p4, %p10931_p1 }
 0x323   :  { %10941 = shalt.err (!%p10938_p5)
}
 0x324   :  { %s13358_s30 = sld [smem:[#allocation134_spill]]  ;;  %s11643_s13 = smov [#allocation25]  }
 0x325   :  { %309 = dma.hbm_to_vmem [thread:$0]  %s13357_s10, 640, %s12234_s25, [#allocation21], %s11608_s16, %s11608_s16, %s11609_s21  }
 0x326   :  { %s325_s15 = sshll.u32 %s11643_s13, 4  ;;  %s11644_s18 = smov [#allocation28]   ;;  %s326_s15 = int_to_ptr.vmem [resolvable:$true] %s325_s15 }
 0x327   :  { %s350_s0 = sshll.u32 %s11644_s18, 4  ;;  %s351_s0 = int_to_ptr.vmem [resolvable:$true] %s350_s0 }
 0x32a   :  { %s10942_s24 = scalar_lea.hbm %s13358_s30, 1024 }
 0x32b   :  { %p10943_p6 = scmp.ne.s32.totalorder %s13358_s30, %s10942_s24  ;;  %p10946_p7 = scmp.lt.u32.totalorder %s10942_s24, %s13358_s30 }
 0x32d   :  { %p10948_p8 = pnand %p10946_p7, %p10943_p6 }
 0x32f   :  { %10951 = shalt.err (!%p10948_p8)
}
 0x330   :  { %s10952_s12 = scalar_lea.vmem %s326_s15, 1024  ;;  %p10957_p10 = scmp.lt.s32.totalorder %s326_s15, %s326_s15 }
 0x331   :  { %p10953_p9 = scmp.ne.s32.totalorder %s326_s15, %s10952_s12  ;;  %p10958_p11 = scmp.lt.s32.totalorder %s10952_s12, %s10952_s12 }
 0x333   :  { %p10959_p12 = por %p10958_p11, %p10957_p10 }
 0x335   :  { %p10960_p13 = pnand %p10959_p12, %p10953_p9 }
 0x337   :  { %10963 = shalt.err (!%p10960_p13)
}
 0x338   :  { %s13359_s6 = sld [smem:[#allocation136_spill]] }
 0x339   :  { %331 = dma.hbm_to_vmem [thread:$0]  %s13358_s30, 1024, %s326_s15, [#allocation24], %s11608_s16, %s11608_s16, %s11609_s21  }
 0x33e   :  { %s10964_s22 = scalar_lea.hbm %s13359_s6, 16 }
 0x33f   :  { %p10965_p0 = scmp.ne.s32.totalorder %s13359_s6, %s10964_s22  ;;  %p10968_p1 = scmp.lt.u32.totalorder %s10964_s22, %s13359_s6 }
 0x341   :  { %p10970_p2 = pnand %p10968_p1, %p10965_p0 }
 0x343   :  { %10973 = shalt.err (!%p10970_p2)
}
 0x344   :  { %s10974_s27 = scalar_lea.vmem %s351_s0, 16  ;;  %s10978_s26 = scalar_lea.vmem %s351_s0, 32 }
 0x345   :  { %p10975_p3 = scmp.ne.s32.totalorder %s351_s0, %s10974_s27  ;;  %p10979_p4 = scmp.lt.s32.totalorder %s351_s0, %s351_s0 }
 0x346   :  { %p10980_p5 = scmp.lt.s32.totalorder %s10978_s26, %s10974_s27 }
 0x348   :  { %p10981_p6 = por %p10980_p5, %p10979_p4 }
 0x34a   :  { %p10982_p7 = pnand %p10981_p6, %p10975_p3 }
 0x34c   :  { %10985 = shalt.err (!%p10982_p7)
}
 0x34d   :  { %s13360_s28 = sld [smem:[#allocation139_spill]]  ;;  %s11645_s9 = smov [#allocation31]  }
 0x34e   :  { %353 = dma.hbm_to_vmem [thread:$0]  %s13359_s6, 16, %s351_s0, [#allocation27]  }
 0x34f   :  { %s374_s16 = sshll.u32 %s11645_s9, 4  ;;  %s11646_s1 = smov [#allocation34]   ;;  %s375_s16 = int_to_ptr.vmem [resolvable:$true] %s374_s16 }
 0x350   :  { %s396_s20 = sshll.u32 %s11646_s1, 4  ;;  %s397_s20 = int_to_ptr.vmem [resolvable:$true] %s396_s20 }
 0x353   :  { %s10986_s3 = scalar_lea.hbm %s13360_s28, 16 }
 0x354   :  { %p10987_p8 = scmp.ne.s32.totalorder %s13360_s28, %s10986_s3  ;;  %p10990_p9 = scmp.lt.u32.totalorder %s10986_s3, %s13360_s28 }
 0x356   :  { %p10992_p10 = pnand %p10990_p9, %p10987_p8 }
 0x358   :  { %10995 = shalt.err (!%p10992_p10)
}
 0x359   :  { %s10996_s2 = scalar_lea.vmem %s375_s16, 16  ;;  %s11000_s7 = scalar_lea.vmem %s375_s16, 32 }
 0x35a   :  { %p10997_p11 = scmp.ne.s32.totalorder %s375_s16, %s10996_s2  ;;  %p11001_p12 = scmp.lt.s32.totalorder %s375_s16, %s375_s16 }
 0x35b   :  { %p11002_p13 = scmp.lt.s32.totalorder %s11000_s7, %s10996_s2 }
 0x35d   :  { %p11003_p0 = por %p11002_p13, %p11001_p12 }
 0x35f   :  { %p11004_p1 = pnand %p11003_p0, %p10997_p11 }
 0x361   :  { %11007 = shalt.err (!%p11004_p1)
}
 0x362   :  { %s13361_s25 = sld [smem:[#allocation140_spill]] }
 0x363   :  { %377 = dma.hbm_to_vmem [thread:$0]  %s13360_s28, 16, %s375_s16, [#allocation30]  }
 0x368   :  { %s11008_s19 = scalar_lea.hbm %s13361_s25, 16 }
 0x369   :  { %p11009_p2 = scmp.ne.s32.totalorder %s13361_s25, %s11008_s19  ;;  %p11012_p3 = scmp.lt.u32.totalorder %s11008_s19, %s13361_s25 }
 0x36b   :  { %p11014_p4 = pnand %p11012_p3, %p11009_p2 }
 0x36d   :  { %11017 = shalt.err (!%p11014_p4)
}
 0x36e   :  { %s11018_s8 = scalar_lea.vmem %s397_s20, 16  ;;  %s11022_s14 = scalar_lea.vmem %s397_s20, 32 }
 0x36f   :  { %p11019_p5 = scmp.ne.s32.totalorder %s397_s20, %s11018_s8  ;;  %p11023_p6 = scmp.lt.s32.totalorder %s397_s20, %s397_s20 }
 0x370   :  { %p11024_p7 = scmp.lt.s32.totalorder %s11022_s14, %s11018_s8 }
 0x372   :  { %p11025_p8 = por %p11024_p7, %p11023_p6 }
 0x374   :  { %p11026_p9 = pnand %p11025_p8, %p11019_p5 }
 0x376   :  { %11029 = shalt.err (!%p11026_p9)
}
 0x377   :  { %s13362_s10 = sld [smem:[#allocation143_spill]]  ;;  %s11647_s11 = smov [#allocation37]  }
 0x378   :  { %399 = dma.hbm_to_vmem [thread:$0]  %s13361_s25, 16, %s397_s20, [#allocation33]  }
 0x379   :  { %s420_s29 = sshll.u32 %s11647_s11, 4  ;;  %s11648_s30 = smov [#allocation40]   ;;  %s421_s29 = int_to_ptr.vmem [resolvable:$true] %s420_s29 }
 0x37a   :  { %s442_s13 = sshll.u32 %s11648_s30, 4  ;;  %s443_s13 = int_to_ptr.vmem [resolvable:$true] %s442_s13 }
 0x37d   :  { %s11030_s15 = scalar_lea.hbm %s13362_s10, 16 }
 0x37e   :  { %p11031_p10 = scmp.ne.s32.totalorder %s13362_s10, %s11030_s15  ;;  %p11034_p11 = scmp.lt.u32.totalorder %s11030_s15, %s13362_s10 }
 0x380   :  { %p11036_p12 = pnand %p11034_p11, %p11031_p10 }
 0x382   :  { %11039 = shalt.err (!%p11036_p12)
}
 0x383   :  { %s11040_s18 = scalar_lea.vmem %s421_s29, 16  ;;  %s11044_s0 = scalar_lea.vmem %s421_s29, 32 }
 0x384   :  { %p11041_p13 = scmp.ne.s32.totalorder %s421_s29, %s11040_s18  ;;  %p11045_p0 = scmp.lt.s32.totalorder %s421_s29, %s421_s29 }
 0x385   :  { %p11046_p1 = scmp.lt.s32.totalorder %s11044_s0, %s11040_s18 }
 0x387   :  { %p11047_p2 = por %p11046_p1, %p11045_p0 }
 0x389   :  { %p11048_p3 = pnand %p11047_p2, %p11041_p13 }
 0x38b   :  { %11051 = shalt.err (!%p11048_p3)
}
 0x38c   :  { %s13363_s24 = sld [smem:[#allocation144_spill]] }
 0x38d   :  { %423 = dma.hbm_to_vmem [thread:$0]  %s13362_s10, 16, %s421_s29, [#allocation36]  }
 0x392   :  { %s11052_s12 = scalar_lea.hbm %s13363_s24, 16 }
 0x393   :  { %p11053_p4 = scmp.ne.s32.totalorder %s13363_s24, %s11052_s12  ;;  %p11056_p5 = scmp.lt.u32.totalorder %s11052_s12, %s13363_s24 }
 0x395   :  { %p11058_p6 = pnand %p11056_p5, %p11053_p4 }
 0x397   :  { %11061 = shalt.err (!%p11058_p6)
}
 0x398   :  { %s11062_s6 = scalar_lea.vmem %s443_s13, 16  ;;  %s11066_s22 = scalar_lea.vmem %s443_s13, 32 }
 0x399   :  { %p11063_p7 = scmp.ne.s32.totalorder %s443_s13, %s11062_s6  ;;  %p11067_p8 = scmp.lt.s32.totalorder %s443_s13, %s443_s13 }
 0x39a   :  { %p11068_p9 = scmp.lt.s32.totalorder %s11066_s22, %s11062_s6 }
 0x39c   :  { %p11069_p10 = por %p11068_p9, %p11067_p8 }
 0x39e   :  { %p11070_p11 = pnand %p11069_p10, %p11063_p7 }
 0x3a0   :  { %11073 = shalt.err (!%p11070_p11)
}
 0x3a1   :  { %s13364_s27 = sld [smem:[#allocation145_spill]]  ;;  %s11649_s26 = smov [#allocation43]  }
 0x3a2   :  { %445 = dma.hbm_to_vmem [thread:$0]  %s13363_s24, 16, %s443_s13, [#allocation39]  }
 0x3a3   :  { %s464_s28 = sshll.u32 %s11649_s26, 4  ;;  %s11650_s9 = smov [#allocation46]   ;;  %s465_s28 = int_to_ptr.vmem [resolvable:$true] %s464_s28 }
 0x3a4   :  { %s486_s16 = sshll.u32 %s11650_s9, 4  ;;  %s487_s16 = int_to_ptr.vmem [resolvable:$true] %s486_s16 }
 0x3a7   :  { %s11074_s1 = scalar_lea.hbm %s13364_s27, 16 }
 0x3a8   :  { %p11075_p12 = scmp.ne.s32.totalorder %s13364_s27, %s11074_s1  ;;  %p11078_p13 = scmp.lt.u32.totalorder %s11074_s1, %s13364_s27 }
 0x3aa   :  { %p11080_p0 = pnand %p11078_p13, %p11075_p12 }
 0x3ac   :  { %11083 = shalt.err (!%p11080_p0)
}
 0x3ad   :  { %s11084_s20 = scalar_lea.vmem %s465_s28, 16  ;;  %s11088_s3 = scalar_lea.vmem %s465_s28, 32 }
 0x3ae   :  { %p11085_p1 = scmp.ne.s32.totalorder %s465_s28, %s11084_s20  ;;  %p11089_p2 = scmp.lt.s32.totalorder %s465_s28, %s465_s28 }
 0x3af   :  { %p11090_p3 = scmp.lt.s32.totalorder %s11088_s3, %s11084_s20 }
 0x3b1   :  { %p11091_p4 = por %p11090_p3, %p11089_p2 }
 0x3b3   :  { %p11092_p5 = pnand %p11091_p4, %p11085_p1 }
 0x3b5   :  { %11095 = shalt.err (!%p11092_p5)
}
 0x3b6   :  { %s13365_s2 = sld [smem:[#allocation146_spill]] }
 0x3b7   :  { %467 = dma.hbm_to_vmem [thread:$0]  %s13364_s27, 16, %s465_s28, [#allocation42]  }
 0x3bc   :  { %s11096_s7 = scalar_lea.hbm %s13365_s2, 16 }
 0x3bd   :  { %p11097_p6 = scmp.ne.s32.totalorder %s13365_s2, %s11096_s7  ;;  %p11100_p7 = scmp.lt.u32.totalorder %s11096_s7, %s13365_s2 }
 0x3bf   :  { %p11102_p8 = pnand %p11100_p7, %p11097_p6 }
 0x3c1   :  { %11105 = shalt.err (!%p11102_p8)
}
 0x3c2   :  { %s11106_s25 = scalar_lea.vmem %s487_s16, 16  ;;  %s11110_s19 = scalar_lea.vmem %s487_s16, 32 }
 0x3c3   :  { %p11107_p9 = scmp.ne.s32.totalorder %s487_s16, %s11106_s25  ;;  %p11111_p10 = scmp.lt.s32.totalorder %s487_s16, %s487_s16 }
 0x3c4   :  { %p11112_p11 = scmp.lt.s32.totalorder %s11110_s19, %s11106_s25 }
 0x3c6   :  { %p11113_p12 = por %p11112_p11, %p11111_p10 }
 0x3c8   :  { %p11114_p13 = pnand %p11113_p12, %p11107_p9 }
 0x3ca   :  { %11117 = shalt.err (!%p11114_p13)
}
 0x3cb   :  { %s13366_s8 = sld [smem:[#allocation147_spill]]  ;;  %s11651_s14 = smov [#allocation49]  }
 0x3cc   :  { %489 = dma.hbm_to_vmem [thread:$0]  %s13365_s2, 16, %s487_s16, [#allocation45]  }
 0x3cd   :  { %s508_s10 = sshll.u32 %s11651_s14, 4  ;;  %s11652_s11 = smov [#allocation52]   ;;  %s509_s10 = int_to_ptr.vmem [resolvable:$true] %s508_s10 }
 0x3ce   :  { %s530_s29 = sshll.u32 %s11652_s11, 4  ;;  %s531_s29 = int_to_ptr.vmem [resolvable:$true] %s530_s29 }
 0x3d1   :  { %s11118_s30 = scalar_lea.hbm %s13366_s8, 16 }
 0x3d2   :  { %p11119_p0 = scmp.ne.s32.totalorder %s13366_s8, %s11118_s30  ;;  %p11122_p1 = scmp.lt.u32.totalorder %s11118_s30, %s13366_s8 }
 0x3d4   :  { %p11124_p2 = pnand %p11122_p1, %p11119_p0 }
 0x3d6   :  { %11127 = shalt.err (!%p11124_p2)
}
 0x3d7   :  { %s11128_s13 = scalar_lea.vmem %s509_s10, 16  ;;  %s11132_s15 = scalar_lea.vmem %s509_s10, 32 }
 0x3d8   :  { %p11129_p3 = scmp.ne.s32.totalorder %s509_s10, %s11128_s13  ;;  %p11133_p4 = scmp.lt.s32.totalorder %s509_s10, %s509_s10 }
 0x3d9   :  { %p11134_p5 = scmp.lt.s32.totalorder %s11132_s15, %s11128_s13 }
 0x3db   :  { %p11135_p6 = por %p11134_p5, %p11133_p4 }
 0x3dd   :  { %p11136_p7 = pnand %p11135_p6, %p11129_p3 }
 0x3df   :  { %11139 = shalt.err (!%p11136_p7)
}
 0x3e0   :  { %s13367_s18 = sld [smem:[#allocation149_spill]] }
 0x3e1   :  { %511 = dma.hbm_to_vmem [thread:$0]  %s13366_s8, 16, %s509_s10, [#allocation48]  }
 0x3e6   :  { %s11140_s0 = scalar_lea.hbm %s13367_s18, 16 }
 0x3e7   :  { %p11141_p8 = scmp.ne.s32.totalorder %s13367_s18, %s11140_s0  ;;  %p11144_p9 = scmp.lt.u32.totalorder %s11140_s0, %s13367_s18 }
 0x3e9   :  { %p11146_p10 = pnand %p11144_p9, %p11141_p8 }
 0x3eb   :  { %11149 = shalt.err (!%p11146_p10)
}
 0x3ec   :  { %s11150_s24 = scalar_lea.vmem %s531_s29, 16  ;;  %s11154_s12 = scalar_lea.vmem %s531_s29, 32 }
 0x3ed   :  { %p11151_p11 = scmp.ne.s32.totalorder %s531_s29, %s11150_s24  ;;  %p11155_p12 = scmp.lt.s32.totalorder %s531_s29, %s531_s29 }
 0x3ee   :  { %p11156_p13 = scmp.lt.s32.totalorder %s11154_s12, %s11150_s24 }
 0x3f0   :  { %p11157_p0 = por %p11156_p13, %p11155_p12 }
 0x3f2   :  { %p11158_p1 = pnand %p11157_p0, %p11151_p11 }
 0x3f4   :  { %11161 = shalt.err (!%p11158_p1)
}
 0x3f5   :  { %s13368_s6 = sld [smem:[#allocation151_spill]]  ;;  %s11653_s22 = smov [#allocation55]  }
 0x3f6   :  { %533 = dma.hbm_to_vmem [thread:$0]  %s13367_s18, 16, %s531_s29, [#allocation51]  }
 0x3f7   :  { %s552_s27 = sshll.u32 %s11653_s22, 4  ;;  %s11654_s26 = smov [#allocation58]   ;;  %s553_s27 = int_to_ptr.vmem [resolvable:$true] %s552_s27 }
 0x3f8   :  { %s574_s28 = sshll.u32 %s11654_s26, 4  ;;  %s575_s28 = int_to_ptr.vmem [resolvable:$true] %s574_s28 }
 0x3fb   :  { %s11162_s9 = scalar_lea.hbm %s13368_s6, 16 }
 0x3fc   :  { %p11163_p2 = scmp.ne.s32.totalorder %s13368_s6, %s11162_s9  ;;  %p11166_p3 = scmp.lt.u32.totalorder %s11162_s9, %s13368_s6 }
 0x3fe   :  { %p11168_p4 = pnand %p11166_p3, %p11163_p2 }
 0x400   :  { %11171 = shalt.err (!%p11168_p4)
}
 0x401   :  { %s11172_s16 = scalar_lea.vmem %s553_s27, 16  ;;  %s11176_s1 = scalar_lea.vmem %s553_s27, 32 }
 0x402   :  { %p11173_p5 = scmp.ne.s32.totalorder %s553_s27, %s11172_s16  ;;  %p11177_p6 = scmp.lt.s32.totalorder %s553_s27, %s553_s27 }
 0x403   :  { %p11178_p7 = scmp.lt.s32.totalorder %s11176_s1, %s11172_s16 }
 0x405   :  { %p11179_p8 = por %p11178_p7, %p11177_p6 }
 0x407   :  { %p11180_p9 = pnand %p11179_p8, %p11173_p5 }
 0x409   :  { %11183 = shalt.err (!%p11180_p9)
}
 0x40a   :  { %s13369_s20 = sld [smem:[#allocation153_spill]] }
 0x40b   :  { %555 = dma.hbm_to_vmem [thread:$0]  %s13368_s6, 16, %s553_s27, [#allocation54]  }
 0x410   :  { %s11184_s3 = scalar_lea.hbm %s13369_s20, 16 }
 0x411   :  { %p11185_p10 = scmp.ne.s32.totalorder %s13369_s20, %s11184_s3  ;;  %p11188_p11 = scmp.lt.u32.totalorder %s11184_s3, %s13369_s20 }
 0x413   :  { %p11190_p12 = pnand %p11188_p11, %p11185_p10 }
 0x415   :  { %11193 = shalt.err (!%p11190_p12)
}
 0x416   :  { %s11194_s2 = scalar_lea.vmem %s575_s28, 16  ;;  %s11198_s7 = scalar_lea.vmem %s575_s28, 32 }
 0x417   :  { %p11195_p13 = scmp.ne.s32.totalorder %s575_s28, %s11194_s2  ;;  %p11199_p0 = scmp.lt.s32.totalorder %s575_s28, %s575_s28 }
 0x418   :  { %p11200_p1 = scmp.lt.s32.totalorder %s11198_s7, %s11194_s2 }
 0x41a   :  { %p11201_p2 = por %p11200_p1, %p11199_p0 }
 0x41c   :  { %p11202_p3 = pnand %p11201_p2, %p11195_p13 }
 0x41e   :  { %11205 = shalt.err (!%p11202_p3)
}
 0x41f   :  { %s13370_s25 = sld [smem:[#allocation155_spill]]  ;;  %s11655_s19 = smov [#allocation61]  }
 0x420   :  { %577 = dma.hbm_to_vmem [thread:$0]  %s13369_s20, 16, %s575_s28, [#allocation57]  }
 0x421   :  { %s596_s8 = sshll.u32 %s11655_s19, 4  ;;  %s11656_s14 = smov [#allocation64]   ;;  %s597_s8 = int_to_ptr.vmem [resolvable:$true] %s596_s8 }
 0x422   :  { %s620_s10 = sshll.u32 %s11656_s14, 4  ;;  %s621_s10 = int_to_ptr.vmem [resolvable:$true] %s620_s10 }
 0x425   :  { %s11206_s11 = scalar_lea.hbm %s13370_s25, 16 }
 0x426   :  { %p11207_p4 = scmp.ne.s32.totalorder %s13370_s25, %s11206_s11  ;;  %p11210_p5 = scmp.lt.u32.totalorder %s11206_s11, %s13370_s25 }
 0x428   :  { %p11212_p6 = pnand %p11210_p5, %p11207_p4 }
 0x42a   :  { %11215 = shalt.err (!%p11212_p6)
}
 0x42b   :  { %s11216_s29 = scalar_lea.vmem %s597_s8, 16  ;;  %s11220_s30 = scalar_lea.vmem %s597_s8, 32 }
 0x42c   :  { %p11217_p7 = scmp.ne.s32.totalorder %s597_s8, %s11216_s29  ;;  %p11221_p8 = scmp.lt.s32.totalorder %s597_s8, %s597_s8 }
 0x42d   :  { %p11222_p9 = scmp.lt.s32.totalorder %s11220_s30, %s11216_s29 }
 0x42f   :  { %p11223_p10 = por %p11222_p9, %p11221_p8 }
 0x431   :  { %p11224_p11 = pnand %p11223_p10, %p11217_p7 }
 0x433   :  { %11227 = shalt.err (!%p11224_p11)
}
 0x434   :  { %s13371_s13 = sld [smem:[#allocation159_spill]] }
 0x435   :  { %599 = dma.hbm_to_vmem [thread:$0]  %s13370_s25, 16, %s597_s8, [#allocation60]  }
 0x43a   :  { %s11228_s15 = scalar_lea.hbm %s13371_s13, 16 }
 0x43b   :  { %p11229_p12 = scmp.ne.s32.totalorder %s13371_s13, %s11228_s15  ;;  %p11232_p13 = scmp.lt.u32.totalorder %s11228_s15, %s13371_s13 }
 0x43d   :  { %p11234_p0 = pnand %p11232_p13, %p11229_p12 }
 0x43f   :  { %11237 = shalt.err (!%p11234_p0)
}
 0x440   :  { %s11238_s18 = scalar_lea.vmem %s621_s10, 16  ;;  %s11242_s0 = scalar_lea.vmem %s621_s10, 32 }
 0x441   :  { %p11239_p1 = scmp.ne.s32.totalorder %s621_s10, %s11238_s18  ;;  %p11243_p2 = scmp.lt.s32.totalorder %s621_s10, %s621_s10 }
 0x442   :  { %p11244_p3 = scmp.lt.s32.totalorder %s11242_s0, %s11238_s18 }
 0x444   :  { %p11245_p4 = por %p11244_p3, %p11243_p2 }
 0x446   :  { %p11246_p5 = pnand %p11245_p4, %p11239_p1 }
 0x448   :  { %11249 = shalt.err (!%p11246_p5)
}
 0x449   :  { %s13372_s24 = sld [smem:[#allocation161_spill]]  ;;  %s11657_s12 = smov [#allocation67]  }
 0x44a   :  { %623 = dma.hbm_to_vmem [thread:$0]  %s13371_s13, 16, %s621_s10, [#allocation63]  }
 0x44b   :  { %s642_s6 = sshll.u32 %s11657_s12, 4  ;;  %s11658_s22 = smov [#allocation70]   ;;  %s643_s6 = int_to_ptr.vmem [resolvable:$true] %s642_s6 }
 0x44c   :  { %s664_s27 = sshll.u32 %s11658_s22, 4  ;;  %s665_s27 = int_to_ptr.vmem [resolvable:$true] %s664_s27 }
 0x44f   :  { %s11250_s26 = scalar_lea.hbm %s13372_s24, 16 }
 0x450   :  { %p11251_p6 = scmp.ne.s32.totalorder %s13372_s24, %s11250_s26  ;;  %p11254_p7 = scmp.lt.u32.totalorder %s11250_s26, %s13372_s24 }
 0x452   :  { %p11256_p8 = pnand %p11254_p7, %p11251_p6 }
 0x454   :  { %11259 = shalt.err (!%p11256_p8)
}
 0x455   :  { %s11260_s28 = scalar_lea.vmem %s643_s6, 16  ;;  %s11264_s9 = scalar_lea.vmem %s643_s6, 32 }
 0x456   :  { %p11261_p9 = scmp.ne.s32.totalorder %s643_s6, %s11260_s28  ;;  %p11265_p10 = scmp.lt.s32.totalorder %s643_s6, %s643_s6 }
 0x457   :  { %p11266_p11 = scmp.lt.s32.totalorder %s11264_s9, %s11260_s28 }
 0x459   :  { %p11267_p12 = por %p11266_p11, %p11265_p10 }
 0x45b   :  { %p11268_p13 = pnand %p11267_p12, %p11261_p9 }
 0x45d   :  { %11271 = shalt.err (!%p11268_p13)
}
 0x45e   :  { %s13373_s16 = sld [smem:[#allocation163_spill]] }
 0x45f   :  { %645 = dma.hbm_to_vmem [thread:$0]  %s13372_s24, 16, %s643_s6, [#allocation66]  }
 0x464   :  { %s11272_s1 = scalar_lea.hbm %s13373_s16, 16 }
 0x465   :  { %p11273_p0 = scmp.ne.s32.totalorder %s13373_s16, %s11272_s1  ;;  %p11276_p1 = scmp.lt.u32.totalorder %s11272_s1, %s13373_s16 }
 0x467   :  { %p11278_p2 = pnand %p11276_p1, %p11273_p0 }
 0x469   :  { %11281 = shalt.err (!%p11278_p2)
}
 0x46a   :  { %s11282_s20 = scalar_lea.vmem %s665_s27, 16  ;;  %s11286_s3 = scalar_lea.vmem %s665_s27, 32 }
 0x46b   :  { %p11283_p3 = scmp.ne.s32.totalorder %s665_s27, %s11282_s20  ;;  %p11287_p4 = scmp.lt.s32.totalorder %s665_s27, %s665_s27 }
 0x46c   :  { %p11288_p5 = scmp.lt.s32.totalorder %s11286_s3, %s11282_s20 }
 0x46e   :  { %p11289_p6 = por %p11288_p5, %p11287_p4 }
 0x470   :  { %p11290_p7 = pnand %p11289_p6, %p11283_p3 }
 0x472   :  { %11293 = shalt.err (!%p11290_p7)
}
 0x473   :  { %s13374_s2 = sld [smem:[#allocation167_spill]]  ;;  %s11659_s7 = smov [#allocation73]  }
 0x474   :  { %667 = dma.hbm_to_vmem [thread:$0]  %s13373_s16, 16, %s665_s27, [#allocation69]  }
 0x475   :  { %s688_s25 = sshll.u32 %s11659_s7, 4  ;;  %s11660_s19 = smov [#allocation76]   ;;  %s689_s25 = int_to_ptr.vmem [resolvable:$true] %s688_s25 }
 0x476   :  { %s710_s8 = sshll.u32 %s11660_s19, 4  ;;  %s711_s8 = int_to_ptr.vmem [resolvable:$true] %s710_s8 }
 0x479   :  { %s11294_s14 = scalar_lea.hbm %s13374_s2, 16 }
 0x47a   :  { %p11295_p8 = scmp.ne.s32.totalorder %s13374_s2, %s11294_s14  ;;  %p11298_p9 = scmp.lt.u32.totalorder %s11294_s14, %s13374_s2 }
 0x47c   :  { %p11300_p10 = pnand %p11298_p9, %p11295_p8 }
 0x47e   :  { %11303 = shalt.err (!%p11300_p10)
}
 0x47f   :  { %s11304_s10 = scalar_lea.vmem %s689_s25, 16  ;;  %s11308_s11 = scalar_lea.vmem %s689_s25, 32 }
 0x480   :  { %p11305_p11 = scmp.ne.s32.totalorder %s689_s25, %s11304_s10  ;;  %p11309_p12 = scmp.lt.s32.totalorder %s689_s25, %s689_s25 }
 0x481   :  { %p11310_p13 = scmp.lt.s32.totalorder %s11308_s11, %s11304_s10 }
 0x483   :  { %p11311_p0 = por %p11310_p13, %p11309_p12 }
 0x485   :  { %p11312_p1 = pnand %p11311_p0, %p11305_p11 }
 0x487   :  { %11315 = shalt.err (!%p11312_p1)
}
 0x488   :  { %s13375_s29 = sld [smem:[#allocation169_spill]] }
 0x489   :  { %691 = dma.hbm_to_vmem [thread:$0]  %s13374_s2, 16, %s689_s25, [#allocation72]  }
 0x48e   :  { %s11316_s30 = scalar_lea.hbm %s13375_s29, 16 }
 0x48f   :  { %p11317_p2 = scmp.ne.s32.totalorder %s13375_s29, %s11316_s30  ;;  %p11320_p3 = scmp.lt.u32.totalorder %s11316_s30, %s13375_s29 }
 0x491   :  { %p11322_p4 = pnand %p11320_p3, %p11317_p2 }
 0x493   :  { %11325 = shalt.err (!%p11322_p4)
}
 0x494   :  { %s11326_s13 = scalar_lea.vmem %s711_s8, 16  ;;  %s11330_s15 = scalar_lea.vmem %s711_s8, 32 }
 0x495   :  { %p11327_p5 = scmp.ne.s32.totalorder %s711_s8, %s11326_s13  ;;  %p11331_p6 = scmp.lt.s32.totalorder %s711_s8, %s711_s8 }
 0x496   :  { %p11332_p7 = scmp.lt.s32.totalorder %s11330_s15, %s11326_s13 }
 0x498   :  { %p11333_p8 = por %p11332_p7, %p11331_p6 }
 0x49a   :  { %p11334_p9 = pnand %p11333_p8, %p11327_p5 }
 0x49c   :  { %11337 = shalt.err (!%p11334_p9)
}
 0x49d   :  { %s13376_s18 = sld [smem:[#allocation171_spill]]  ;;  %s11661_s0 = smov [#allocation79]  }
 0x49e   :  { %713 = dma.hbm_to_vmem [thread:$0]  %s13375_s29, 16, %s711_s8, [#allocation75]  }
 0x49f   :  { %s732_s24 = sshll.u32 %s11661_s0, 4  ;;  %s11662_s12 = smov [#allocation82]   ;;  %s733_s24 = int_to_ptr.vmem [resolvable:$true] %s732_s24 }
 0x4a0   :  { %s756_s6 = sshll.u32 %s11662_s12, 4  ;;  %s757_s6 = int_to_ptr.vmem [resolvable:$true] %s756_s6 }
 0x4a3   :  { %s11338_s22 = scalar_lea.hbm %s13376_s18, 16 }
 0x4a4   :  { %p11339_p10 = scmp.ne.s32.totalorder %s13376_s18, %s11338_s22  ;;  %p11342_p11 = scmp.lt.u32.totalorder %s11338_s22, %s13376_s18 }
 0x4a6   :  { %p11344_p12 = pnand %p11342_p11, %p11339_p10 }
 0x4a8   :  { %11347 = shalt.err (!%p11344_p12)
}
 0x4a9   :  { %s11348_s27 = scalar_lea.vmem %s733_s24, 16  ;;  %s11352_s26 = scalar_lea.vmem %s733_s24, 32 }
 0x4aa   :  { %p11349_p13 = scmp.ne.s32.totalorder %s733_s24, %s11348_s27  ;;  %p11353_p0 = scmp.lt.s32.totalorder %s733_s24, %s733_s24 }
 0x4ab   :  { %p11354_p1 = scmp.lt.s32.totalorder %s11352_s26, %s11348_s27 }
 0x4ad   :  { %p11355_p2 = por %p11354_p1, %p11353_p0 }
 0x4af   :  { %p11356_p3 = pnand %p11355_p2, %p11349_p13 }
 0x4b1   :  { %11359 = shalt.err (!%p11356_p3)
}
 0x4b2   :  { %s13377_s28 = sld [smem:[#allocation175_spill]] }
 0x4b3   :  { %735 = dma.hbm_to_vmem [thread:$0]  %s13376_s18, 16, %s733_s24, [#allocation78]  }
 0x4b8   :  { %s11360_s9 = scalar_lea.hbm %s13377_s28, 16 }
 0x4b9   :  { %p11361_p4 = scmp.ne.s32.totalorder %s13377_s28, %s11360_s9  ;;  %p11364_p5 = scmp.lt.u32.totalorder %s11360_s9, %s13377_s28 }
 0x4bb   :  { %p11366_p6 = pnand %p11364_p5, %p11361_p4 }
 0x4bd   :  { %11369 = shalt.err (!%p11366_p6)
}
 0x4be   :  { %s11370_s16 = scalar_lea.vmem %s757_s6, 16  ;;  %s11374_s1 = scalar_lea.vmem %s757_s6, 32 }
 0x4bf   :  { %p11371_p7 = scmp.ne.s32.totalorder %s757_s6, %s11370_s16  ;;  %p11375_p8 = scmp.lt.s32.totalorder %s757_s6, %s757_s6 }
 0x4c0   :  { %p11376_p9 = scmp.lt.s32.totalorder %s11374_s1, %s11370_s16 }
 0x4c2   :  { %p11377_p10 = por %p11376_p9, %p11375_p8 }
 0x4c4   :  { %p11378_p11 = pnand %p11377_p10, %p11371_p7 }
 0x4c6   :  { %11381 = shalt.err (!%p11378_p11)
}
 0x4c7   :  { %s13378_s20 = sld [smem:[#allocation177_spill]]  ;;  %s11663_s3 = smov [#allocation85]  }
 0x4c8   :  { %759 = dma.hbm_to_vmem [thread:$0]  %s13377_s28, 16, %s757_s6, [#allocation81]  }
 0x4c9   :  { %s778_s2 = sshll.u32 %s11663_s3, 4  ;;  %s11664_s7 = smov [#allocation88]   ;;  %s779_s2 = int_to_ptr.vmem [resolvable:$true] %s778_s2 }
 0x4ca   :  { %s800_s25 = sshll.u32 %s11664_s7, 4  ;;  %s801_s25 = int_to_ptr.vmem [resolvable:$true] %s800_s25 }
 0x4cd   :  { %s11382_s19 = scalar_lea.hbm %s13378_s20, 32 }
 0x4ce   :  { %p11383_p12 = scmp.ne.s32.totalorder %s13378_s20, %s11382_s19  ;;  %p11386_p13 = scmp.lt.u32.totalorder %s11382_s19, %s13378_s20 }
 0x4d0   :  { %p11388_p0 = pnand %p11386_p13, %p11383_p12 }
 0x4d2   :  { %11391 = shalt.err (!%p11388_p0)
}
 0x4d3   :  { %s11392_s8 = scalar_lea.vmem %s779_s2, 32  ;;  %p11397_p2 = scmp.lt.s32.totalorder %s779_s2, %s779_s2 }
 0x4d4   :  { %p11393_p1 = scmp.ne.s32.totalorder %s779_s2, %s11392_s8  ;;  %p11398_p3 = scmp.lt.s32.totalorder %s11392_s8, %s11392_s8 }
 0x4d6   :  { %p11399_p4 = por %p11398_p3, %p11397_p2 }
 0x4d8   :  { %p11400_p5 = pnand %p11399_p4, %p11393_p1 }
 0x4da   :  { %11403 = shalt.err (!%p11400_p5)
}
 0x4db   :  { %s13379_s14 = sld [smem:[#allocation179_spill]] }
 0x4dc   :  { %781 = dma.hbm_to_vmem [thread:$0]  %s13378_s20, 32, %s779_s2, [#allocation84]  }
 0x4e1   :  { %s11404_s10 = scalar_lea.hbm %s13379_s14, 32 }
 0x4e2   :  { %p11405_p6 = scmp.ne.s32.totalorder %s13379_s14, %s11404_s10  ;;  %p11408_p7 = scmp.lt.u32.totalorder %s11404_s10, %s13379_s14 }
 0x4e4   :  { %p11410_p8 = pnand %p11408_p7, %p11405_p6 }
 0x4e6   :  { %11413 = shalt.err (!%p11410_p8)
}
 0x4e7   :  { %s11414_s11 = scalar_lea.vmem %s801_s25, 32  ;;  %p11419_p10 = scmp.lt.s32.totalorder %s801_s25, %s801_s25 }
 0x4e8   :  { %p11415_p9 = scmp.ne.s32.totalorder %s801_s25, %s11414_s11  ;;  %p11420_p11 = scmp.lt.s32.totalorder %s11414_s11, %s11414_s11 }
 0x4ea   :  { %p11421_p12 = por %p11420_p11, %p11419_p10 }
 0x4ec   :  { %p11422_p13 = pnand %p11421_p12, %p11415_p9 }
 0x4ee   :  { %11425 = shalt.err (!%p11422_p13)
}
 0x4ef   :  { %803 = dma.hbm_to_vmem [thread:$0]  %s13379_s14, 32, %s801_s25, [#allocation87]  }
 0x4f0   :  { %s11665_s29 = smov [#allocation91]   ;;  %s11426_s13 = scalar_lea.hbm %s12055_s4, 272 }
 0x4f1   :  { %s824_s30 = sshll.u32 %s11665_s29, 4  ;;  %p11427_p0 = scmp.ne.s32.totalorder %s12055_s4, %s11426_s13  ;;  %s825_s30 = int_to_ptr.vmem [resolvable:$true] %s824_s30 }
 0x4f2   :  { %p11430_p1 = scmp.lt.u32.totalorder %s11426_s13, %s12055_s4 }
 0x4f4   :  { %p11432_p2 = pnand %p11430_p1, %p11427_p0 }
 0x4f6   :  { %11435 = shalt.err (!%p11432_p2)
}
 0x4f7   :  { %s11436_s15 = scalar_lea.vmem %s825_s30, 272  ;;  %s11440_s18 = scalar_lea.vmem %s825_s30, 288 }
 0x4f8   :  { %p11437_p3 = scmp.ne.s32.totalorder %s825_s30, %s11436_s15  ;;  %p11441_p4 = scmp.lt.s32.totalorder %s825_s30, %s825_s30 }
 0x4f9   :  { %p11442_p5 = scmp.lt.s32.totalorder %s11440_s18, %s11436_s15 }
 0x4fb   :  { %p11443_p6 = por %p11442_p5, %p11441_p4 }
 0x4fd   :  { %p11444_p7 = pnand %p11443_p6, %p11437_p3 }
 0x4ff   :  { %11447 = shalt.err (!%p11444_p7)
}
 0x500   :  { %827 = dma.hbm_to_vmem [thread:$0]  %s12055_s4, 272, %s825_s30, [#allocation90]  }
 0x501   :  { %11470 = dma.done.wait [#allocation6], 128  }
 0x502   :  { %11471 = vsyncadd [#allocation6], 4294967168 }
 0x503   :  { %11472 = dma.done.wait [#allocation9], 256  }
 0x504   :  { %11473 = vsyncadd [#allocation9], 4294967040 }
 0x505   :  { %11474 = dma.done.wait [#allocation12], 256  }
 0x506   :  { %11475 = vsyncadd [#allocation12], 4294967040 }
 0x507   :  { %11476 = dma.done.wait [#allocation15], 400  }
 0x508   :  { %11477 = vsyncadd [#allocation15], 4294966896 }
 0x509   :  { %11478 = dma.done.wait [#allocation18], 32  }
 0x50a   :  { %11479 = vsyncadd [#allocation18], 4294967264 }
 0x50b   :  { %11480 = dma.done.wait [#allocation21], 656  }
 0x50c   :  { %11481 = vsyncadd [#allocation21], 4294966640 }
 0x50d   :  { %11482 = dma.done.wait [#allocation24], 1040  }
 0x50e   :  { %11483 = vsyncadd [#allocation24], 4294966256 }
 0x50f   :  { %11484 = dma.done.wait [#allocation27], 32  }
 0x510   :  { %11485 = vsyncadd [#allocation27], 4294967264 }
 0x511   :  { %11486 = dma.done.wait [#allocation30], 32  }
 0x512   :  { %11487 = vsyncadd [#allocation30], 4294967264 }
 0x513   :  { %11488 = dma.done.wait [#allocation33], 1040  }
 0x514   :  { %11489 = vsyncadd [#allocation33], 4294966256 }
 0x515   :  { %11490 = dma.done.wait [#allocation36], 32  }
 0x516   :  { %11491 = vsyncadd [#allocation36], 4294967264 }
 0x517   :  { %11492 = dma.done.wait [#allocation39], 272  }
 0x518   :  { %11493 = vsyncadd [#allocation39], 4294967024 }
 0x519   :  { %11494 = dma.done.wait [#allocation42], 272  }
 0x51a   :  { %11495 = vsyncadd [#allocation42], 4294967024 }
 0x51b   :  { %11496 = dma.done.wait [#allocation45], 272  }
 0x51c   :  { %11497 = vsyncadd [#allocation45], 4294967024 }
 0x51d   :  { %11498 = dma.done.wait [#allocation48], 272  }
 0x51e   :  { %11499 = vsyncadd [#allocation48], 4294967024 }
 0x51f   :  { %11500 = dma.done.wait [#allocation51], 272  }
 0x520   :  { %11501 = vsyncadd [#allocation51], 4294967024 }
 0x521   :  { %11502 = dma.done.wait [#allocation54], 272  }
 0x522   :  { %11503 = vsyncadd [#allocation54], 4294967024 }
 0x523   :  { %11504 = dma.done.wait [#allocation57], 912  }
 0x524   :  { %11505 = vsyncadd [#allocation57], 4294966384 }
 0x525   :  { %11506 = dma.done.wait [#allocation60], 1040  }
 0x526   :  { %11507 = vsyncadd [#allocation60], 4294966256 }
 0x527   :  { %11508 = dma.done.wait [#allocation63], 32  }
 0x528   :  { %11509 = vsyncadd [#allocation63], 4294967264 }
 0x529   :  { %11510 = dma.done.wait [#allocation66], 912  }
 0x52a   :  { %11511 = vsyncadd [#allocation66], 4294966384 }
 0x52b   :  { %11512 = dma.done.wait [#allocation69], 1040  }
 0x52c   :  { %11513 = vsyncadd [#allocation69], 4294966256 }
 0x52d   :  { %11514 = dma.done.wait [#allocation72], 32  }
 0x52e   :  { %11515 = vsyncadd [#allocation72], 4294967264 }
 0x52f   :  { %11516 = dma.done.wait [#allocation75], 912  }
 0x530   :  { %11517 = vsyncadd [#allocation75], 4294966384 }
 0x531   :  { %11518 = dma.done.wait [#allocation78], 1040  }
 0x532   :  { %11519 = vsyncadd [#allocation78], 4294966256 }
 0x533   :  { %11520 = dma.done.wait [#allocation81], 32  }
 0x534   :  { %11521 = vsyncadd [#allocation81], 4294967264 }
 0x535   :  { %11522 = dma.done.wait [#allocation84], 1824  }
 0x536   :  { %11523 = vsyncadd [#allocation84], 4294965472 }
 0x537   :  { %11524 = dma.done.wait [#allocation87], 6176  }
 0x538   :  { %11525 = vsyncadd [#allocation87], 4294961120 }
 0x539   :  { %11526 = dma.done.wait [#allocation90], 288  }
 0x53a   :  { %11527 = vsyncadd [#allocation90], 4294967008  ;;  %s13380_s4 = sld [smem:[#allocation129_spill]]  ;;  %v11666_v0 = vmov 0.0|0.0   ;;  %vm11667_vm0 = vmmov 0   ;;  %v11668_v1 = vmov 0.0  }
 0x53b   :  { %9236 = vmatprep.subr.bf16.mxu0 %v11666_v0  ;;  %8702 = vmatprep.mubr.msk.f32.mxu0 %vm11667_vm0, %v11668_v1  ;;  %v1003_v2 = vld [vmem:[#allocation14] sm:$0xff]  ;;  %v1004_v3 = vld [vmem:[#allocation14 + $0x8] sm:$0xff]  ;;  %v1005_v7 = vld [vmem:[#allocation14 + $0x10] sm:$0x3]  ;;  %vm1017_vm1 = vcmask 1041408   ;;  %vm1013_vm2 = vcmask 146432  }
 0x53c   :  { %9239 = vmatprep.subr.bf16.mxu1 %v11666_v0  ;;  %8721 = vmatprep.mubr.msk.f32.mxu1 %vm11667_vm0, %v11668_v1  ;;  %v9237_v4 = vpack.c.bf16 %v1004_v3, %v1003_v2  ;;  %v1002_v11 = vld [vmem:[#allocation5] sm:$0xff]  ;;  %s13381_s0 = sld [smem:[#allocation130_spill]]  ;;  %s13382_s24 = sld [smem:[#allocation132_spill]]  ;;  %vm1107_vm3 = vcmask 523264   ;;  %vm1366_vm4 = vcmask 15360   ;;  %vm1282_vm5 = vcmask 261120  }
 0x53d   :  { %v8128_v28 = vld [vmem:[#allocation16] ss:$0 sm:$0xff]  ;;  %s13383_s12 = sld [smem:[#allocation138_spill]]  ;;  %s13384_s6 = sld [smem:[#allocation124_spill]]  ;;  %v8131_v39 = vld [vmem:[#allocation17] ss:$0 sm:$0xff] }
 0x53e   :  { %9238 = vmatpush3.bf16.msra.mxu0 %v9237_v4  ;;  %v8133_v49 = vld [vmem:[#allocation19] ss:$0 sm:$0xff]  ;;  %v1444_v50 = vld [vmem:[#allocation32] sm:$0xff]  ;;  %v1446_v57 = vld [vmem:[#allocation32 + $0x10] sm:$0xff]  ;;  %s13385_s22 = sld [smem:[#allocation141_spill]]  ;;  %s13386_s27 = sld [smem:[#allocation142_spill]] }
 0x53f   :  { %8700 = vmatprep.subr.mxu0 %v11668_v1  ;;  %v1445_v51 = vld [vmem:[#allocation32 + $0x8] sm:$0xff]  ;;  %v1447_v58 = vld [vmem:[#allocation32 + $0x18] sm:$0xff]  ;;  %v1448_v62 = vld [vmem:[#allocation32 + $0x20] sm:$0xff]  ;;  %vm1720_vm6 = vcmask 326656   ;;  %s13387_s26 = sld [smem:[#allocation135_spill]]  ;;  %s13388_s28 = sld [smem:[#allocation137_spill]] }
 0x540   :  { %v1092_v5 = vld [vmem:[%s13380_s4] sm:$0xff]  ;;  %v1093_v6 = vld [vmem:[%s13380_s4 + $0x8] sm:$0xff]  ;;  %v1094_v9 = vld [vmem:[%s13380_s4 + $0x10] sm:$0xff]  ;;  %v9270_v55 = vpack.c.bf16 %v1445_v51, %v1444_v50  ;;  %v9273_v61 = vpack.c.bf16 %v1447_v58, %v1446_v57  ;;  %vm2067_vm7 = vcmask 130048   ;;  %vm2300_vm8 = vcmask 64512   ;;  %s13389_s9 = sld [smem:[#allocation126_spill]] }
 0x541   :  { %v9240_v8 = vpack.c.bf16 %v1093_v6, %v1092_v5  ;;  %v1095_v10 = vld [vmem:[%s13380_s4 + $0x18] sm:$0xff]  ;;  %v1096_v12 = vld [vmem:[%s13380_s4 + $0x20] sm:$0xff]  ;;  %v1097_v13 = vld [vmem:[%s13380_s4 + $0x28] sm:$0xff]  ;;  %s11669_s16 = smov 32   ;;  %s11670_s1 = smov 34   ;;  %vm3045_vm9 = vcmask 261248  }
 0x542   :  { %v9243_v14 = vpack.c.bf16 %v1095_v10, %v1094_v9  ;;  %8701 = vmatpush3.msk.msra.mxu0 %vm1017_vm1, %v1005_v7  ;;  %v9246_v15 = vpack.c.bf16 %v1097_v13, %v1096_v12  ;;  %v1098_v16 = vld [vmem:[%s13380_s4 + $0x30] sm:$0xff]  ;;  %v1099_v17 = vld [vmem:[%s13380_s4 + $0x38] sm:$0xff]  ;;  %v1182_v19 = vld [vmem:[%s13381_s0] sm:$0xff]  ;;  %vm3051_vm10 = vcmask 277760   ;;  %vm3057_vm11 = vcmask 408848   ;;  %s13391_s20 = sld [smem:[#allocation158_spill]] }
 0x543   :  { %9241 = vmatpush3.bf16.msra.mxu1 %v9240_v8  ;;  %8703 = vmatmul.mubr.msk.f32.vlgmr.msra.gmra.mrb[0].mxu0 %vm1013_vm2, %v1002_v11  ;;  %v9249_v18 = vpack.c.bf16 %v1099_v17, %v1098_v16  ;;  %v1183_v20 = vld [vmem:[%s13381_s0 + $0x8] sm:$0xff]  ;;  %v1184_v21 = vld [vmem:[%s13381_s0 + $0x10] sm:$0xff]  ;;  %v1185_v23 = vld [vmem:[%s13381_s0 + $0x18] sm:$0xff]  ;;  %vm3074_vm12 = vcmask 408576   ;;  %s11671_s3 = smov 112   ;;  %s13392_s2 = sld [smem:[#allocation164_spill]] }
 0x544   :  { %9242 = vmatprep.subr.bf16.mxu1 %v11666_v0  ;;  %9251 = vmatprep.subr.bf16.mxu0 %v11666_v0  ;;  %v9252_v22 = vpack.c.bf16 %v1183_v20, %v1182_v19  ;;  %v9255_v24 = vpack.c.bf16 %v1185_v23, %v1184_v21  ;;  %v1186_v25 = vld [vmem:[%s13381_s0 + $0x20] sm:$0xff]  ;;  %v1187_v26 = vld [vmem:[%s13381_s0 + $0x28] sm:$0xff]  ;;  %v1188_v33 = vld [vmem:[%s13381_s0 + $0x30] sm:$0xff]  ;;  %s13393_s7 = sld [smem:[#allocation166_spill]]  ;;  %s11672_s25 = smov 48   ;;  %vm4139_vm13 = vcmask 392448  }
 0x545   :  { %8740 = vmatprep.mubr.msk.f32.mxu0 %vm11667_vm0, %v11668_v1  ;;  %v9258_v27 = vpack.c.bf16 %v1187_v26, %v1186_v25  ;;  %v1189_v34 = vld [vmem:[%s13381_s0 + $0x38] sm:$0xff]  ;;  %v1271_v36 = vld [vmem:[%s13382_s24] sm:$0xff]  ;;  %v1272_v37 = vld [vmem:[%s13382_s24 + $0x8] sm:$0xff]  ;;  %vm4144_vm14 = vcmask 408960   ;;  %s13394_s19 = sld [smem:[#allocation180_spill]]  ;;  %vm5212_vm15 = vcmask 785408  }
 0x546   :  { %9253 = vmatpush3.bf16.msra.mxu0 %v9252_v22  ;;  %v9261_v35 = vpack.c.bf16 %v1189_v34, %v1188_v33  ;;  %v9264_v38 = vpack.c.bf16 %v1272_v37, %v1271_v36  ;;  %v1358_v44 = vld [vmem:[%s13383_s12] sm:$0x3]  ;;  %v1273_v46 = vld [vmem:[%s13382_s24 + $0x10] sm:$0xff]  ;;  %v1274_v47 = vld [vmem:[%s13382_s24 + $0x18] sm:$0xff]  ;;  %vm7995_vm2 = vcmask 195648   ;;  %s13396_s8 = sld [smem:[#allocation174_spill]] }
 0x547   :  { %9244 = vmatpush3.bf16.msra.mxu1 %v9243_v14  ;;  %9254 = vmatprep.subr.bf16.mxu0 %v11666_v0  ;;  %v1357_v45 = vld [vmem:[%s13384_s6] sm:$0xff]  ;;  %v9267_v48 = vpack.c.bf16 %v1274_v47, %v1273_v46  ;;  %v8137_v3 = vld [vmem:[#allocation31] ss:$0 sm:$0xff]  ;;  %v1534_v10 = vld [vmem:[%s13385_s22 + $0x8] sm:$0xff]  ;;  %s11675_s14 = smov 42   ;;  %s11676_s10 = smov [#allocation92]  }
 0x548   :  { %9245 = vmatprep.subr.bf16.mxu1 %v11666_v0  ;;  %v1449_v63 = vld [vmem:[#allocation32 + $0x28] sm:$0xff]  ;;  %v1450_v4 = vld [vmem:[#allocation32 + $0x30] sm:$0xff]  ;;  %v1451_v5 = vld [vmem:[#allocation32 + $0x38] sm:$0xff]  ;;  %s8016_s11 = sshll.u32 %s11676_s10, 4  ;;  %s8017_s11 = int_to_ptr.vmem [resolvable:$true] %s8016_s11 }
 0x549   :  { %v9276_v2 = vpack.c.bf16 %v1449_v63, %v1448_v62  ;;  %v9279_v7 = vpack.c.bf16 %v1451_v5, %v1450_v4  ;;  %v1533_v9 = vld [vmem:[%s13385_s22] sm:$0xff]  ;;  %v1535_v11 = vld [vmem:[%s13385_s22 + $0x10] sm:$0xff]  ;;  %v1536_v13 = vld [vmem:[%s13385_s22 + $0x18] sm:$0xff]  ;;  %s11448_s29 = scalar_lea.vmem %s8017_s11, 128  ;;  %p11453_p9 = scmp.lt.s32.totalorder %s8017_s11, %s8017_s11 }
 0x54a   :  { %9256 = vmatpush3.bf16.msra.mxu0 %v9255_v24  ;;  %v9282_v12 = vpack.c.bf16 %v1534_v10, %v1533_v9  ;;  %v9285_v14 = vpack.c.bf16 %v1536_v13, %v1535_v11  ;;  %v1538_v16 = vld [vmem:[%s13385_s22 + $0x28] sm:$0xff]  ;;  %v1540_v19 = vld [vmem:[%s13385_s22 + $0x38] sm:$0xff]  ;;  %v1622_v21 = vld [vmem:[%s13386_s27] sm:$0xff]  ;;  %p11449_p8 = scmp.ne.s32.totalorder %s8017_s11, %s11448_s29  ;;  %p11454_p10 = scmp.lt.s32.totalorder %s11448_s29, %s11448_s29 }
 0x54b   :  { %9247 = vmatpush3.bf16.msra.mxu1 %v9246_v15  ;;  %9257 = vmatprep.subr.bf16.mxu0 %v11666_v0  ;;  %v1537_v15 = vld [vmem:[%s13385_s22 + $0x20] sm:$0xff]  ;;  %v1623_v22 = vld [vmem:[%s13386_s27 + $0x8] sm:$0xff]  ;;  %v8140_v26 = vld [vmem:[#allocation34] ss:$0 sm:$0xff] }
 0x54c   :  { %9248 = vmatprep.subr.bf16.mxu1 %v11666_v0  ;;  %v9288_v17 = vpack.c.bf16 %v1538_v16, %v1537_v15  ;;  %v9294_v23 = vpack.c.bf16 %v1623_v22, %v1622_v21  ;;  %v1710_v34 = vld [vmem:[#allocation22 + $0x10] sm:$0xff]  ;;  %v1712_v37 = vld [vmem:[#allocation22 + $0x20] sm:$0xff]  ;;  %v1889_v9 = vld [vmem:[%s13387_s26 + $0x28] sm:$0xff]  ;;  %p11455_p11 = por %p11454_p10, %p11453_p9 }
 0x54d   :  { %v1797_v50 = vld [vmem:[#allocation25 + $0x10] sm:$0xff]  ;;  %v1798_v51 = vld [vmem:[#allocation25 + $0x18] sm:$0xff]  ;;  %v1886_v5 = vld [vmem:[%s13387_s26 + $0x10] sm:$0xff] }
 0x54e   :  { %9259 = vmatpush3.bf16.msra.mxu0 %v9258_v27  ;;  %v1708_v27 = vld [vmem:[#allocation22] sm:$0xff]  ;;  %v1890_v11 = vld [vmem:[%s13387_s26 + $0x30] sm:$0xff]  ;;  %v1974_v15 = vld [vmem:[%s13388_s28 + $0x8] sm:$0xff]  ;;  %p11456_p12 = pnand %p11455_p11, %p11449_p8 }
 0x54f   :  { %9250 = vmatpush3.bf16.msra.mxu1 %v9249_v18  ;;  %9260 = vmatprep.subr.bf16.mxu0 %v11666_v0  ;;  %v1539_v18 = vld [vmem:[%s13385_s22 + $0x30] sm:$0xff]  ;;  %v2059_v21 = vld [vmem:[#allocation38 + $0x8] sm:$0xff]  ;;  %v8135_v22 = vld [vmem:[#allocation20] ss:$0 sm:$0xff] }
 0x550   :  { %9263 = vmatprep.subr.bf16.mxu1 %v11666_v0  ;;  %v9291_v20 = vpack.c.bf16 %v1540_v19, %v1539_v18  ;;  %v8148_v19 = vld [vmem:[#allocation26] ss:$0 sm:$0xff] }
 0x552   :  { %9262 = vmatpush3.bf16.msra.mxu0 %v9261_v35  ;;  %v1711_v35 = vld [vmem:[#allocation22 + $0x18] sm:$0xff] }
 0x553   :  { %8754 = vmatprep.subr.mxu0 %v11668_v1  ;;  %v9303_v36 = vpack.c.bf16 %v1711_v35, %v1710_v34  ;;  %v1976_v34 = vld [vmem:[%s13388_s28 + $0x18] sm:$0xff] }
 0x616   :  { %v1087_v29 = vpop.f32.mrb[0].mxu0 }
 0x617   :  { %v1088_v30 = vadd.f32 %v8128_v28, %v1087_v29  ;;  %v8704_v31 = vpop.f32.mrb[1].mxu0  ;;  %v1709_v28 = vld [vmem:[#allocation22 + $0x8] sm:$0xff] }
 0x619   :  { %v1091_v32 = vmax.f32 %v1088_v30, 0.0 }
 0x61b   :  { %8722 = vmatmul.mubr.msk.f32.vlgmr.msra.gmra.mrb[0].mxu1 %vm1107_vm3, %v1091_v32  ;;  %v9300_v32 = vpack.c.bf16 %v1709_v28, %v1708_v27 }
 0x61c   :  { %8751 = vmatprep.mubr.msk.f32.mxu1 %vm11667_vm0, %v11668_v1  ;;  %9265 = vmatpush3.bf16.msra.mxu1 %v9264_v38  ;;  %v1707_v38 = vld [vmem:[#allocation8] sm:$0xff] }
 0x61d   :  { %9266 = vmatprep.subr.bf16.mxu1 %v11666_v0 }
 0x620   :  { %9268 = vmatpush3.bf16.msra.mxu1 %v9267_v48 }
 0x621   :  { %9269 = vmatprep.subr.bf16.mxu1 %v11666_v0 }
 0x6ee   :  { %v1177_v40 = vpop.f32.mrb[0].mxu1 }
 0x6ef   :  { %v1178_v41 = vadd.f32 %v8131_v39, %v1177_v40  ;;  %v8723_v42 = vpop.f32.mrb[1].mxu1  ;;  %v1624_v39 = vld [vmem:[%s13386_s27 + $0x10] sm:$0xff]  ;;  %v1625_v40 = vld [vmem:[%s13386_s27 + $0x18] sm:$0xff] }
 0x6f0   :  { %v8142_v42 = vld [vmem:[#allocation35] ss:$0 sm:$0xff] }
 0x6f1   :  { %v1181_v43 = vmax.f32 %v1178_v41, 0.0  ;;  %v9297_v41 = vpack.c.bf16 %v1625_v40, %v1624_v39 }
 0x6f3   :  { %8741 = vmatmul.mubr.msk.f32.vlgmr.msra.gmra.mrb[2].mxu0 %vm1107_vm3, %v1181_v43  ;;  %v1795_v43 = vld [vmem:[#allocation25] sm:$0xff] }
 0x6f4   :  { %8755 = vmatpush3.msk.msra.mxu0 %vm1017_vm1, %v1358_v44  ;;  %8756 = vmatprep.mubr.msk.f32.mxu0 %vm11667_vm0, %v11668_v1  ;;  %v1796_v44 = vld [vmem:[#allocation25 + $0x8] sm:$0xff] }
 0x6f5   :  { %9281 = vmatprep.subr.bf16.mxu0 %v11666_v0  ;;  %v9306_v48 = vpack.c.bf16 %v1796_v44, %v1795_v43  ;;  %v8156_v43 = vld [vmem:[#allocation43] ss:$0 sm:$0xff]  ;;  %v8154_v44 = vld [vmem:[#allocation40] ss:$0 sm:$0xff] }
 0x6f7   :  { %8757 = vmatmul.mubr.msk.f32.vlgmr.msra.gmra.mrb[4].mxu0 %vm1366_vm4, %v1357_v45 }
 0x6f8   :  { %8794 = vmatprep.mubr.msk.f32.mxu0 %vm11667_vm0, %v11668_v1  ;;  %9283 = vmatpush3.bf16.msra.mxu0 %v9282_v12  ;;  %v1891_v12 = vld [vmem:[%s13387_s26 + $0x38] sm:$0xff] }
 0x6f9   :  { %9284 = vmatprep.subr.bf16.mxu0 %v11666_v0  ;;  %v9327_v13 = vpack.c.bf16 %v1891_v12, %v1890_v11 }
 0x6fc   :  { %9286 = vmatpush3.bf16.msra.mxu0 %v9285_v14  ;;  %v1973_v14 = vld [vmem:[%s13388_s28] sm:$0xff] }
 0x6fd   :  { %9287 = vmatprep.subr.bf16.mxu0 %v11666_v0  ;;  %v9330_v16 = vpack.c.bf16 %v1974_v15, %v1973_v14  ;;  %v8163_v14 = vld [vmem:[#allocation49] ss:$0 sm:$0xff]  ;;  %v8161_v15 = vld [vmem:[#allocation46] ss:$0 sm:$0xff] }
 0x700   :  { %9289 = vmatpush3.bf16.msra.mxu0 %v9288_v17 }
 0x701   :  { %9290 = vmatprep.subr.bf16.mxu0 %v11666_v0 }
 0x704   :  { %9292 = vmatpush3.bf16.msra.mxu0 %v9291_v20  ;;  %v2058_v20 = vld [vmem:[#allocation38] sm:$0xff] }
 0x705   :  { %9299 = vmatprep.subr.bf16.mxu0 %v11666_v0  ;;  %v9336_v27 = vpack.c.bf16 %v2059_v21, %v2058_v20 }
 0x7c6   :  { %v1266_v52 = vpop.f32.mrb[2].mxu0 }
 0x7c7   :  { %v1267_v53 = vadd.f32 %v8133_v49, %v1266_v52  ;;  %v8742_v54 = vpop.f32.mrb[3].mxu0  ;;  %v9309_v52 = vpack.c.bf16 %v1798_v51, %v1797_v50 }
 0x7c8   :  { %v1800_v54 = vld [vmem:[#allocation25 + $0x28] sm:$0xff] }
 0x7c9   :  { %v1270_v56 = vmax.f32 %v1267_v53, 0.0  ;;  %v1799_v53 = vld [vmem:[#allocation25 + $0x20] sm:$0xff] }
 0x7ca   :  { %v1439_v59 = vpop.f32.mrb[4].mxu0 }
 0x7cb   :  { %8752 = vmatmul.mubr.msk.f32.vlgmr.msra.gmra.mrb[2].mxu1 %vm1282_vm5, %v1270_v56  ;;  %v8758_v60 = vpop.f32.mrb[5].mxu0  ;;  %v1440_v6 = vadd.f32 %v8137_v3, %v1439_v59  ;;  %v8146_v56 = vld [vmem:[#allocation23] ss:$0 sm:$0xff]  ;;  %v1801_v59 = vld [vmem:[#allocation25 + $0x30] sm:$0xff] }
 0x7cc   :  { %9271 = vmatpush3.bf16.msra.mxu1 %v9270_v55  ;;  %8775 = vmatprep.mubr.msk.f32.mxu1 %vm11667_vm0, %v11668_v1  ;;  %v9312_v55 = vpack.c.bf16 %v1800_v54, %v1799_v53  ;;  %v1802_v60 = vld [vmem:[#allocation25 + $0x38] sm:$0xff] }
 0x7cd   :  { %9272 = vmatprep.subr.bf16.mxu1 %v11666_v0  ;;  %v1443_v8 = vmax.f32 %v1440_v6, 0.0  ;;  %v9315_v62 = vpack.c.bf16 %v1802_v60, %v1801_v59  ;;  %v1885_v3 = vld [vmem:[%s13387_s26 + $0x8] sm:$0xff]  ;;  %v1887_v6 = vld [vmem:[%s13387_s26 + $0x18] sm:$0xff] }
 0x7ce   :  { %v1000_v54 = vld [vmem:[#allocation10] sm:$0xff] }
 0x7d0   :  { %9274 = vmatpush3.bf16.msra.mxu1 %v9273_v61 }
 0x7d1   :  { %9275 = vmatprep.subr.bf16.mxu1 %v11666_v0 }
 0x7d4   :  { %9277 = vmatpush3.bf16.msra.mxu1 %v9276_v2  ;;  %v1884_v2 = vld [vmem:[%s13387_s26] sm:$0xff] }
 0x7d5   :  { %9278 = vmatprep.subr.bf16.mxu1 %v11666_v0  ;;  %v9318_v4 = vpack.c.bf16 %v1885_v3, %v1884_v2  ;;  %v2469_v3 = vld [vmem:[#allocation47] sm:$0xff] }
 0x7d8   :  { %9280 = vmatpush3.bf16.msra.mxu1 %v9279_v7  ;;  %v9321_v7 = vpack.c.bf16 %v1887_v6, %v1886_v5 }
 0x7d9   :  { %9293 = vmatprep.subr.bf16.mxu1 %v11666_v0 }
 0x7db   :  { %8776 = vmatmul.mubr.msk.f32.vlgmr.msra.gmra.mrb[4].mxu1 %vm1107_vm3, %v1443_v8  ;;  %v1888_v8 = vld [vmem:[%s13387_s26 + $0x20] sm:$0xff] }
 0x7dc   :  { %8805 = vmatprep.mubr.msk.f32.mxu1 %vm11667_vm0, %v11668_v1  ;;  %9295 = vmatpush3.bf16.msra.mxu1 %v9294_v23  ;;  %v9324_v10 = vpack.c.bf16 %v1889_v9, %v1888_v8  ;;  %v2386_v8 = vld [vmem:[#allocation44] sm:$0xff]  ;;  %v2387_v9 = vld [vmem:[#allocation44 + $0x8] sm:$0xff] }
 0x7dd   :  { %9296 = vmatprep.subr.bf16.mxu1 %v11666_v0 }
 0x7e0   :  { %9298 = vmatpush3.bf16.msra.mxu1 %v9297_v41 }
 0x7e1   :  { %9305 = vmatprep.subr.bf16.mxu1 %v11666_v0 }
 0x89e   :  { %v12426_v24 = vpop.f32.mrb[2].mxu1 }
 0x89f   :  { %v8753_v25 = vpop.f32.mrb[3].mxu1  ;;  %v1353_v28 = vadd.f32 %v8135_v22, %v12426_v24  ;;  %v1975_v24 = vld [vmem:[%s13388_s28 + $0x10] sm:$0xff] }
 0x8a0   :  { %v9333_v35 = vpack.c.bf16 %v1976_v34, %v1975_v24 }
 0x8ae   :  { %v1528_v29 = vpop.f32.mrb[4].mxu1 }
 0x8af   :  { %v1529_v30 = vadd.f32 %v8140_v26, %v1528_v29  ;;  %v8777_v31 = vpop.f32.mrb[5].mxu1 }
 0x8b0   :  { %v2143_v31 = vld [vmem:[#allocation41 + $0x8] sm:$0xff] }
 0x8b1   :  { %v1532_v33 = vmax.f32 %v1529_v30, 0.0  ;;  %v2142_v30 = vld [vmem:[#allocation41] sm:$0xff] }
 0x8b3   :  { %8795 = vmatmul.mubr.msk.f32.vlgmr.msra.gmra.mrb[6].mxu0 %vm1107_vm3, %v1532_v33  ;;  %v12470_v33 = vmax.f32 %v1353_v28, 0.0 }
 0x8b4   :  { %9301 = vmatpush3.bf16.msra.mxu0 %v9300_v32  ;;  %8818 = vmatprep.mubr.msk.f32.mxu0 %vm11667_vm0, %v11668_v1  ;;  %v9339_v32 = vpack.c.bf16 %v2143_v31, %v2142_v30 }
 0x8b5   :  { %9302 = vmatprep.subr.bf16.mxu0 %v11666_v0 }
 0x8b8   :  { %9304 = vmatpush3.bf16.msra.mxu0 %v9303_v36  ;;  %v8150_v36 = vld [vmem:[#allocation28] ss:$0 sm:$0xff] }
 0x8b9   :  { %8816 = vmatprep.subr.mxu0 %v11668_v1 }
 0x8bc   :  { %8817 = vmatpush3.msra.mxu0 %v1712_v37 }
 0x8bd   :  { %8819 = vmatmul.mubr.msk.f32.vlgmr.msra.gmra.mrb[8].mxu0 %vm1720_vm6, %v1707_v38  ;;  %9317 = vmatprep.subr.bf16.mxu0 %v11666_v0  ;;  %vm8002_vm6 = vcmask 343360  }
 0x8be   :  { %8856 = vmatprep.mubr.msk.f32.mxu0 %vm11667_vm0, %v11668_v1  ;;  %9319 = vmatpush3.bf16.msra.mxu0 %v9318_v4  ;;  %v2470_v4 = vld [vmem:[#allocation47 + $0x8] sm:$0xff] }
 0x8bf   :  { %9320 = vmatprep.subr.bf16.mxu0 %v11666_v0  ;;  %v9345_v6 = vpack.c.bf16 %v2470_v4, %v2469_v3  ;;  %v3060_v3 = vld [vmem:[#allocation56] sm:$0xff]  ;;  %v3061_v4 = vld [vmem:[#allocation56 + $0x8] sm:$0xff] }
 0x8c2   :  { %9322 = vmatpush3.bf16.msra.mxu0 %v9321_v7 }
 0x8c3   :  { %9323 = vmatprep.subr.bf16.mxu0 %v11666_v0 }
 0x8c6   :  { %9325 = vmatpush3.bf16.msra.mxu0 %v9324_v10  ;;  %v9342_v10 = vpack.c.bf16 %v2387_v9, %v2386_v8  ;;  %v9354_v8 = vpack.c.bf16 %v3061_v4, %v3060_v3 }
 0x8c7   :  { %9326 = vmatprep.subr.bf16.mxu0 %v11666_v0 }
 0x8ca   :  { %9328 = vmatpush3.bf16.msra.mxu0 %v9327_v13 }
 0x8cb   :  { %9335 = vmatprep.subr.bf16.mxu0 %v11666_v0 }
 0x986   :  { %v1617_v45 = vpop.f32.mrb[6].mxu0 }
 0x987   :  { %v1618_v46 = vadd.f32 %v8142_v42, %v1617_v45  ;;  %v8796_v47 = vpop.f32.mrb[7].mxu0 }
 0x989   :  { %v1621_v49 = vmax.f32 %v1618_v46, 0.0 }
 0x98b   :  { %8806 = vmatmul.mubr.msk.f32.vlgmr.msra.gmra.mrb[6].mxu1 %vm1282_vm5, %v1621_v49 }
 0x98c   :  { %9307 = vmatpush3.bf16.msra.mxu1 %v9306_v48  ;;  %8837 = vmatprep.mubr.msk.f32.mxu1 %vm11667_vm0, %v11668_v1 }
 0x98d   :  { %9308 = vmatprep.subr.bf16.mxu1 %v11666_v0 }
 0x990   :  { %9310 = vmatpush3.bf16.msra.mxu1 %v9309_v52  ;;  %v1790_v57 = vpop.f32.mrb[8].mxu0 }
 0x991   :  { %9311 = vmatprep.subr.bf16.mxu1 %v11666_v0  ;;  %v8820_v58 = vpop.f32.mrb[9].mxu0  ;;  %v1791_v61 = vadd.f32 %v8146_v56, %v1790_v57 }
 0x993   :  { %v1794_v63 = vmax.f32 %v1791_v61, 0.0 }
 0x994   :  { %9313 = vmatpush3.bf16.msra.mxu1 %v9312_v55 }
 0x995   :  { %9314 = vmatprep.subr.bf16.mxu1 %v11666_v0 }
 0x998   :  { %9316 = vmatpush3.bf16.msra.mxu1 %v9315_v62 }
 0x999   :  { %9329 = vmatprep.subr.bf16.mxu1 %v11666_v0 }
 0x99b   :  { %8838 = vmatmul.mubr.msk.f32.vlgmr.msra.gmra.mrb[8].mxu1 %vm1107_vm3, %v1794_v63 }
 0x99c   :  { %8867 = vmatprep.mubr.msk.f32.mxu1 %vm11667_vm0, %v11668_v1  ;;  %9331 = vmatpush3.bf16.msra.mxu1 %v9330_v16 }
 0x99d   :  { %9332 = vmatprep.subr.bf16.mxu1 %v11666_v0 }
 0x9a0   :  { %9334 = vmatpush3.bf16.msra.mxu1 %v9333_v35  ;;  %v12524_v35 = vld [vmem:[#allocation37] ss:$0 sm:$0xff] }
 0x9a1   :  { %8884 = vmatprep.subr.mxu1 %v11668_v1 }
 0xa5e   :  { %v12464_v17 = vpop.f32.mrb[6].mxu1 }
 0xa5f   :  { %v8807_v18 = vpop.f32.mrb[7].mxu1 }
 0xa6e   :  { %v1879_v23 = vpop.f32.mrb[8].mxu1 }
 0xa6f   :  { %v1880_v25 = vadd.f32 %v8148_v19, %v1879_v23  ;;  %v8839_v26 = vpop.f32.mrb[9].mxu1 }
 0xa71   :  { %v1883_v29 = vmax.f32 %v1880_v25, 0.0 }
 0xa73   :  { %8857 = vmatmul.mubr.msk.f32.vlgmr.msra.gmra.mrb[10].mxu0 %vm1107_vm3, %v1883_v29 }
 0xa74   :  { %9337 = vmatpush3.bf16.msra.mxu0 %v9336_v27  ;;  %8874 = vmatprep.mubr.msk.f32.mxu0 %vm11667_vm0, %v11668_v1 }
 0xa75   :  { %9338 = vmatprep.subr.bf16.mxu0 %v11666_v0 }
 0xa77   :  { %8875 = vmatmul.mubr.msk.f32.vlgmr.msra.gmra.mrb[12].mxu0 %vm2067_vm7, %v12470_v33 }
 0xa78   :  { %9340 = vmatpush3.bf16.msra.mxu0 %v9339_v32  ;;  %8881 = vmatprep.mubr.msk.f32.mxu0 %vm11667_vm0, %v11668_v1 }
 0xa79   :  { %8889 = vmatprep.subr.mxu0 %v11668_v1 }
 0xa7b   :  { %8882 = vmatmul.mubr.msk.f32.vlgmr.msra.gmra.mrb[14].mxu0 %vm2067_vm7, %v12470_v33 }
 0xa7c   :  { %8890 = vmatpush3.msra.mxu0 %v12470_v33  ;;  %8891 = vmatprep.mubr.msk.f32.mxu0 %vm11667_vm0, %v11668_v1 }
 0xa7d   :  { %9344 = vmatprep.subr.bf16.mxu0 %v11666_v0 }
 0xb46   :  { %v1968_v37 = vpop.f32.mrb[10].mxu0 }
 0xb47   :  { %v1969_v38 = vadd.f32 %v8150_v36, %v1968_v37  ;;  %v8858_v39 = vpop.f32.mrb[11].mxu0  ;;  %v12527_v36 = vld [vmem:[%s13389_s9] sm:$0xff]  ;;  %v1703_v37 = vadd.f32 %v12524_v35, %v12464_v17 }
 0xb49   :  { %v1972_v40 = vmax.f32 %v1969_v38, 0.0  ;;  %v1706_v38 = vmax.f32 %v1703_v37, 0.0 }
 0xb4a   :  { %v2137_v41 = vpop.f32.mrb[12].mxu0 }
 0xb4b   :  { %8868 = vmatmul.mubr.msk.f32.vlgmr.msra.gmra.mrb[10].mxu1 %vm1282_vm5, %v1972_v40  ;;  %v8876_v42 = vpop.f32.mrb[13].mxu0  ;;  %v2138_v48 = vadd.f32 %v8154_v44, %v2137_v41  ;;  %v2795_v40 = vld [vmem:[#allocation53] sm:$0xff]  ;;  %v2796_v41 = vld [vmem:[#allocation53 + $0x8] sm:$0xff] }
 0xb4c   :  { %8886 = vmatprep.mubr.msk.f32.mxu1 %vm11667_vm0, %v11668_v1  ;;  %v8152_v42 = vld [vmem:[#allocation29] ss:$0 sm:$0xff]  ;;  %v9351_v44 = vpack.c.bf16 %v2796_v41, %v2795_v40 }
 0xb4d   :  { %v2141_v50 = vmax.f32 %v2138_v48, 0.0  ;;  %v2712_v48 = vld [vmem:[#allocation50] sm:$0xff] }
 0xb4e   :  { %v2217_v45 = vpop.f32.mrb[14].mxu0 }
 0xb4f   :  { %v2218_v46 = vadd.f32 %v8156_v43, %v2217_v45  ;;  %v8883_v47 = vpop.f32.mrb[15].mxu0 }
 0xb50   :  { %v2966_v47 = vld [vmem:[#allocation11] sm:$0xff] }
 0xb51   :  { %v2221_v49 = vmax.f32 %v2218_v46, 0.0 }
 0xb53   :  { %8885 = vmatpush3.xpose.msk.msra.mxu1 %vm1282_vm5, %v2221_v49  ;;  %v2713_v49 = vld [vmem:[#allocation50 + $0x8] sm:$0xff] }
 0xb54   :  { %9341 = vmatprep.subr.bf16.mxu1 %v11666_v0 }
 0xb56   :  { %8887 = vmatmul.mubr.msk.f32.vlgmr.msra.gmra.mrb[12].mxu1 %vm1282_vm5, %v2141_v50  ;;  %v9348_v50 = vpack.c.bf16 %v2713_v49, %v2712_v48 }
 0xb57   :  { %8898 = vmatprep.mubr.msk.f32.mxu1 %vm11667_vm0, %v11668_v1  ;;  %9343 = vmatpush3.bf16.msra.mxu1 %v9342_v10  ;;  %v3062_v10 = vld [vmem:[#allocation56 + $0x10] sm:$0xff] }
 0xb58   :  { %8908 = vmatprep.subr.mxu1 %v11668_v1 }
 0xc1e   :  { %v12495_v51 = vpop.f32.mrb[10].mxu1 }
 0xc1f   :  { %v8869_v52 = vpop.f32.mrb[11].mxu1  ;;  %v2054_v45 = vadd.f32 %v8152_v42, %v12495_v51 }
 0xc21   :  { %v2057_v17 = vmax.f32 %v2054_v45, 0.0 }
 0xc29   :  { %v2294_v53 = vpop.f32.mrb[12].mxu1 }
 0xc2a   :  { %v2298_v55 = vmul.f32 0.17677669, %v2294_v53  ;;  %v8888_v56 = vpop.f32.mrb[13].mxu1 }
 0xc2c   :  { %v2299_v57 = vmul.f32 %v2298_v55, %v1000_v54 }
 0xc2e   :  { %v2301_v58 = vsel %vm2300_vm8, %v2299_v57, -inf }
 0xc2f   :  { %2302 = vmax.xlane.f32.xlu0 %v2301_v58 }
 0xcbc   :  { %v2303_v59 = vpop.xlane.xlu0 %2302 }
 0xcbd   :  { %v2304_v60 = vsub.f32 %v2299_v57, %v2303_v59 }
 0xcbf   :  { %v2305_v61 = vmul.f32 1.442695, %v2304_v60 }
 0xcc1   :  { %10163 = vpow2.f32 %v2305_v61 }
 0xccb   :  { %v10164_v62 = vpop.eup %10163 }
 0xccc   :  { %v2307_v63 = vsel %vm2300_vm8, %v10164_v62, 0.0 }
 0xccd   :  { %2308 = vadd.xlane.f32.xlu0 %v2307_v63 }
 0xd5a   :  { %v2309_v2 = vpop.xlane.xlu0 %2308 }
 0xd5b   :  { %10165 = vrcp.f32 %v2309_v2  ;;  %v8168_v2 = vld [vmem:[#allocation52] ss:$0 sm:$0xff] }
 0xd65   :  { %v10166_v5 = vpop.eup %10165 }
 0xd66   :  { %v2311_v7 = vmul.f32 %v10166_v5, %v10164_v62 }
 0xd68   :  { %8892 = vmatmul.mubr.msk.f32.vlgmr.msra.gmra.mrb[16].mxu0 %vm2300_vm8, %v2311_v7 }
 0xd69   :  { %9346 = vmatpush3.bf16.msra.mxu0 %v9345_v6  ;;  %8905 = vmatprep.mubr.msk.f32.mxu0 %vm11667_vm0, %v11668_v1 }
 0xd6a   :  { %8913 = vmatprep.subr.mxu0 %v11668_v1 }
 0xe3b   :  { %v2381_v11 = vpop.f32.mrb[16].mxu0 }
 0xe3c   :  { %v12505_v12 = vadd.f32 %v2381_v11, %v12470_v33  ;;  %v8893_v13 = vpop.f32.mrb[17].mxu0  ;;  %v3063_v11 = vld [vmem:[#allocation56 + $0x18] sm:$0xff] }
 0xe3d   :  { %v3064_v13 = vld [vmem:[#allocation56 + $0x20] sm:$0xff] }
 0xe3e   :  { %8899 = vmatmul.mubr.msk.f32.vlgmr.msra.gmra.mrb[14].mxu1 %vm2067_vm7, %v12505_v12  ;;  %8906 = vmatmul.mubr.msk.f32.vlgmr.msra.gmra.mrb[18].mxu0 %vm2067_vm7, %v12505_v12 }
 0xe3f   :  { %8914 = vmatpush3.msra.mxu0 %v12505_v12  ;;  %8910 = vmatprep.mubr.msk.f32.mxu1 %vm11667_vm0, %v11668_v1 }
 0xe40   :  { %8915 = vmatprep.mubr.msk.f32.mxu0 %vm11667_vm0, %v11668_v1  ;;  %9350 = vmatprep.subr.bf16.mxu0 %v11666_v0 }
 0xf11   :  { %v2464_v16 = vpop.f32.mrb[14].mxu1  ;;  %v2544_v18 = vpop.f32.mrb[18].mxu0 }
 0xf12   :  { %v2545_v19 = vadd.f32 %v8163_v14, %v2544_v18  ;;  %v8900_v20 = vpop.f32.mrb[15].mxu1  ;;  %v8907_v21 = vpop.f32.mrb[19].mxu0  ;;  %v2465_v22 = vadd.f32 %v8161_v15, %v2464_v16  ;;  %v3065_v14 = vld [vmem:[#allocation56 + $0x28] sm:$0xff]  ;;  %v3066_v16 = vld [vmem:[#allocation56 + $0x30] sm:$0x3] }
 0xf13   :  { %v9360_v15 = vpack.c.bf16 %v3065_v14, %v3064_v13  ;;  %v3153_v20 = vld [vmem:[#allocation59 + $0x8] sm:$0xff]  ;;  %v3154_v21 = vld [vmem:[#allocation59 + $0x10] sm:$0xff] }
 0xf14   :  { %v2548_v23 = vmax.f32 %v2545_v19, 0.0  ;;  %v2468_v25 = vmax.f32 %v2465_v22, 0.0  ;;  %v3152_v19 = vld [vmem:[#allocation59] sm:$0xff]  ;;  %v3434_v14 = vld [vmem:[#allocation65 + $0x8] sm:$0xff] }
 0xf15   :  { %v9363_v22 = vpack.c.bf16 %v3153_v20, %v3152_v19  ;;  %v3433_v13 = vld [vmem:[#allocation65] sm:$0xff] }
 0xf16   :  { %8909 = vmatpush3.xpose.msk.msra.mxu1 %vm1282_vm5, %v2548_v23  ;;  %v3155_v23 = vld [vmem:[#allocation59 + $0x18] sm:$0xff] }
 0xf17   :  { %9347 = vmatprep.subr.bf16.mxu1 %v11666_v0 }
 0xf19   :  { %8911 = vmatmul.mubr.msk.f32.vlgmr.msra.gmra.mrb[16].mxu1 %vm1282_vm5, %v2468_v25  ;;  %v9366_v25 = vpack.c.bf16 %v3155_v23, %v3154_v21  ;;  %v3437_v21 = vld [vmem:[#allocation65 + $0x20] sm:$0xff] }
 0xf1a   :  { %8922 = vmatprep.mubr.msk.f32.mxu1 %vm11667_vm0, %v11668_v1  ;;  %9349 = vmatpush3.bf16.msra.mxu1 %v9348_v50 }
 0xf1b   :  { %8932 = vmatprep.subr.mxu1 %v11668_v1 }
 0xfec   :  { %v2621_v26 = vpop.f32.mrb[16].mxu1 }
 0xfed   :  { %v2625_v27 = vmul.f32 0.17677669, %v2621_v26  ;;  %v8912_v28 = vpop.f32.mrb[17].mxu1  ;;  %v3156_v26 = vld [vmem:[#allocation59 + $0x20] sm:$0xff] }
 0xfef   :  { %v2626_v29 = vmul.f32 %v2625_v27, %v1000_v54  ;;  %v8170_v54 = vld [vmem:[#allocation55] ss:$0 sm:$0xff]  ;;  %v3157_v27 = vld [vmem:[#allocation59 + $0x28] sm:$0xff] }
 0xff0   :  { %v9369_v28 = vpack.c.bf16 %v3157_v27, %v3156_v26  ;;  %v3417_v26 = vld [vmem:[#allocation13] sm:$0xff] }
 0xff1   :  { %v2627_v30 = vsel %vm2300_vm8, %v2626_v29, -inf }
 0xff2   :  { %2628 = vmax.xlane.f32.xlu1 %v2627_v30  ;;  %v3159_v30 = vld [vmem:[#allocation59 + $0x38] sm:$0xff] }
0x107f   :  { %v2629_v31 = vpop.xlane.xlu1 %2628 }
0x1080   :  { %v2630_v32 = vsub.f32 %v2626_v29, %v2629_v31  ;;  %v3158_v29 = vld [vmem:[#allocation59 + $0x30] sm:$0xff] }
0x1081   :  { %v9372_v31 = vpack.c.bf16 %v3159_v30, %v3158_v29  ;;  %v3525_v29 = vld [vmem:[#allocation68 + $0x8] sm:$0xff]  ;;  %v3526_v30 = vld [vmem:[#allocation68 + $0x10] sm:$0xff] }
0x1082   :  { %v2631_v33 = vmul.f32 1.442695, %v2630_v32 }
0x1084   :  { %10167 = vpow2.f32 %v2631_v33 }
0x108e   :  { %v10168_v24 = vpop.eup %10167 }
0x108f   :  { %v2633_v34 = vsel %vm2300_vm8, %v10168_v24, 0.0 }
0x1090   :  { %2634 = vadd.xlane.f32.xlu1 %v2633_v34 }
0x10a1   :  { %3048 = vrot.lane.b32.xlu1 %v12527_v36, %s11669_s16 }
0x10a5   :  { %3054 = vrot.lane.b32.xlu1 %v1706_v38, %s11670_s1 }
0x111d   :  { %v2635_v39 = vpop.xlane.xlu1 %2634 }
0x111e   :  { %10169 = vrcp.f32 %v2635_v39 }
0x1121   :  { %v3049_v61 = vpop.permute.xlu1 %3048 }
0x1125   :  { %v3055_v63 = vpop.permute.xlu1 %3054 }
0x1128   :  { %v10170_v43 = vpop.eup %10169 }
0x1129   :  { %v2637_v46 = vmul.f32 %v10170_v43, %v10168_v24 }
0x112b   :  { %8916 = vmatmul.mubr.msk.f32.vlgmr.msra.gmra.mrb[20].mxu0 %vm2300_vm8, %v2637_v46 }
0x112c   :  { %9352 = vmatpush3.bf16.msra.mxu0 %v9351_v44  ;;  %8929 = vmatprep.mubr.msk.f32.mxu0 %vm11667_vm0, %v11668_v1  ;;  %v8175_v44 = vld [vmem:[#allocation58] ss:$0 sm:$0xff] }
0x112d   :  { %8937 = vmatprep.subr.mxu0 %v11668_v1 }
0x112f   :  { %8930 = vmatmul.mubr.msk.f32.vlgmr.msra.gmra.mrb[22].mxu0 %vm2067_vm7, %v2057_v17 }
0x1130   :  { %8938 = vmatpush3.msra.mxu0 %v2057_v17  ;;  %8939 = vmatprep.mubr.msk.f32.mxu0 %vm11667_vm0, %v11668_v1 }
0x1131   :  { %9362 = vmatprep.subr.bf16.mxu0 %v11666_v0 }
0x1133   :  { %8940 = vmatmul.mubr.msk.f32.vlgmr.msra.gmra.mrb[24].mxu0 %vm2300_vm8, %v2966_v47 }
0x1134   :  { %8975 = vmatprep.mubr.msk.f32.mxu0 %vm11667_vm0, %v11668_v1  ;;  %9364 = vmatpush3.bf16.msra.mxu0 %v9363_v22  ;;  %v3438_v22 = vld [vmem:[#allocation65 + $0x28] sm:$0xff] }
0x1135   :  { %9365 = vmatprep.subr.bf16.mxu0 %v11666_v0  ;;  %v9399_v23 = vpack.c.bf16 %v3438_v22, %v3437_v21  ;;  %v3875_v22 = vld [vmem:[#allocation32 + $0x18] sm:$0xff] }
0x1138   :  { %9367 = vmatpush3.bf16.msra.mxu0 %v9366_v25  ;;  %v3439_v25 = vld [vmem:[#allocation65 + $0x30] sm:$0x3] }
0x1139   :  { %9368 = vmatprep.subr.bf16.mxu0 %v11666_v0 }
0x113c   :  { %9370 = vmatpush3.bf16.msra.mxu0 %v9369_v28  ;;  %v3524_v28 = vld [vmem:[#allocation68] sm:$0xff] }
0x113d   :  { %9371 = vmatprep.subr.bf16.mxu0 %v11666_v0 }
0x1140   :  { %9373 = vmatpush3.bf16.msra.mxu0 %v9372_v31 }
0x1141   :  { %9386 = vmatprep.subr.bf16.mxu0 %v11666_v0 }
0x11fe   :  { %v2707_v51 = vpop.f32.mrb[20].mxu0 }
0x11ff   :  { %v2711_v52 = vadd.f32 %v2707_v51, %v12505_v12  ;;  %v8917_v53 = vpop.f32.mrb[21].mxu0  ;;  %v9357_v12 = vpack.c.bf16 %v3063_v11, %v3062_v10  ;;  %v3330_v51 = vld [vmem:[%s13391_s20] sm:$0xff] }
0x1201   :  { %3040 = vst.msk [vmem:[#allocation2] sm:$0xff] %vm2067_vm7, %v2711_v52  ;;  %8923 = vmatmul.mubr.msk.f32.vlgmr.msra.gmra.mrb[18].mxu1 %vm2067_vm7, %v2711_v52  ;;  %v3331_v52 = vld [vmem:[%s13391_s20 + $0x8] sm:$0xff] }
0x1202   :  { %v2873_v55 = vpop.f32.mrb[22].mxu0  ;;  %8934 = vmatprep.mubr.msk.f32.mxu1 %vm11667_vm0, %v11668_v1  ;;  %v9387_v53 = vpack.c.bf16 %v3331_v52, %v3330_v51  ;;  %v3617_v51 = vld [vmem:[%s13392_s2 + $0x20] sm:$0xff]  ;;  %v3618_v52 = vld [vmem:[%s13392_s2 + $0x28] sm:$0xff] }
0x1203   :  { %v2874_v56 = vadd.f32 %v8170_v54, %v2873_v55  ;;  %v8931_v57 = vpop.f32.mrb[23].mxu0  ;;  %v8178_v54 = vld [vmem:[#allocation61] ss:$0 sm:$0xff] }
0x1205   :  { %v2877_v58 = vmax.f32 %v2874_v56, 0.0 }
0x1206   :  { %v3036_v59 = vpop.f32.mrb[24].mxu0 }
0x1207   :  { %8933 = vmatpush3.xpose.msk.msra.mxu1 %vm1282_vm5, %v2877_v58  ;;  %3042 = vrot.lane.b32.xlu0 %v3036_v59, %s11634_s23  ;;  %v8941_v60 = vpop.f32.mrb[25].mxu0  ;;  %s13390_s23 = sld [smem:[#allocation156_spill]]  ;;  %v3332_v59 = vld [vmem:[%s13391_s20 + $0x10] sm:$0xff] }
0x1208   :  { %9353 = vmatprep.subr.bf16.mxu1 %v11666_v0  ;;  %v3333_v60 = vld [vmem:[%s13391_s20 + $0x18] sm:$0xff] }
0x120d   :  { %v3241_v32 = vld [vmem:[%s13390_s23] sm:$0xff]  ;;  %v3242_v33 = vld [vmem:[%s13390_s23 + $0x8] sm:$0xff]  ;;  %v3243_v24 = vld [vmem:[%s13390_s23 + $0x10] sm:$0xff] }
0x120e   :  { %v9375_v34 = vpack.c.bf16 %v3242_v33, %v3241_v32  ;;  %v3244_v37 = vld [vmem:[%s13390_s23 + $0x18] sm:$0xff]  ;;  %v3245_v39 = vld [vmem:[%s13390_s23 + $0x20] sm:$0xff]  ;;  %v3246_v40 = vld [vmem:[%s13390_s23 + $0x28] sm:$0xff]  ;;  %v9402_v32 = vpack.c.bf16 %v3525_v29, %v3524_v28 }
0x120f   :  { %v9378_v38 = vpack.c.bf16 %v3244_v37, %v3243_v24  ;;  %v9381_v41 = vpack.c.bf16 %v3246_v40, %v3245_v39  ;;  %v3247_v48 = vld [vmem:[%s13390_s23 + $0x30] sm:$0xff]  ;;  %v3248_v49 = vld [vmem:[%s13390_s23 + $0x38] sm:$0xff]  ;;  %v8191_v28 = vld [vmem:[#allocation73] ss:$0 sm:$0xff] }
0x1210   :  { %v9384_v50 = vpack.c.bf16 %v3248_v49, %v3247_v48  ;;  %v3527_v33 = vld [vmem:[#allocation68 + $0x18] sm:$0xff]  ;;  %v3528_v37 = vld [vmem:[#allocation68 + $0x20] sm:$0xff] }
0x1211   :  { %v3616_v49 = vld [vmem:[%s13392_s2 + $0x18] sm:$0xff] }
0x1279   :  { %v3043_v62 = vpop.permute.xlu0 %3042 }
0x127a   :  { %3046 = vst.msk [vmem:[#allocation2] sm:$0xff] %vm3045_vm9, %v3043_v62  ;;  %v8180_v62 = vld [vmem:[#allocation62] ss:$0 sm:$0xff] }
0x127b   :  { %3052 = vst.msk [vmem:[#allocation2] sm:$0xff] %vm3051_vm10, %v3049_v61  ;;  %v9390_v61 = vpack.c.bf16 %v3333_v60, %v3332_v59  ;;  %v3619_v59 = vld [vmem:[%s13392_s2 + $0x30] sm:$0xff]  ;;  %v3620_v60 = vld [vmem:[%s13392_s2 + $0x38] sm:$0xff] }
0x127c   :  { %3058 = vst.msk [vmem:[#allocation2] sm:$0xff] %vm3057_vm11, %v3055_v63 }
0x1283   :  { %v3059_v18 = vld [vmem:[#allocation2] sm:$0xff] }
0x12d4   :  { %v2790_v5 = vpop.f32.mrb[18].mxu1 }
0x12d5   :  { %v2791_v6 = vadd.f32 %v8168_v2, %v2790_v5  ;;  %v8924_v7 = vpop.f32.mrb[19].mxu1  ;;  %v8182_v5 = vld [vmem:[#allocation64] ss:$0 sm:$0xff] }
0x12d7   :  { %v2794_v9 = vmax.f32 %v2791_v6, 0.0 }
0x12d9   :  { %8935 = vmatmul.mubr.msk.f32.vlgmr.msra.gmra.mrb[20].mxu1 %vm1282_vm5, %v2794_v9 }
0x12da   :  { %9355 = vmatpush3.bf16.msra.mxu1 %v9354_v8  ;;  %8956 = vmatprep.mubr.msk.f32.mxu1 %vm11667_vm0, %v11668_v1 }
0x12db   :  { %9356 = vmatprep.subr.bf16.mxu1 %v11666_v0 }
0x12de   :  { %9358 = vmatpush3.bf16.msra.mxu1 %v9357_v12 }
0x12df   :  { %9359 = vmatprep.subr.bf16.mxu1 %v11666_v0 }
0x12e2   :  { %9361 = vmatpush3.bf16.msra.mxu1 %v9360_v15  ;;  %v3435_v15 = vld [vmem:[#allocation65 + $0x10] sm:$0xff] }
0x12e3   :  { %8954 = vmatprep.subr.mxu1 %v11668_v1 }
0x12e6   :  { %8955 = vmatpush3.msk.msra.mxu1 %vm1017_vm1, %v3066_v16  ;;  %v9393_v16 = vpack.c.bf16 %v3434_v14, %v3433_v13 }
0x12e7   :  { %8957 = vmatmul.mubr.msk.f32.vlgmr.msra.gmra.mrb[22].mxu1 %vm3074_vm12, %v3059_v18  ;;  %9374 = vmatprep.subr.bf16.mxu1 %v11666_v0  ;;  %v3436_v18 = vld [vmem:[#allocation65 + $0x18] sm:$0xff] }
0x12e8   :  { %8994 = vmatprep.mubr.msk.f32.mxu1 %vm11667_vm0, %v11668_v1  ;;  %9376 = vmatpush3.bf16.msra.mxu1 %v9375_v34  ;;  %v9396_v19 = vpack.c.bf16 %v3436_v18, %v3435_v15  ;;  %v9405_v34 = vpack.c.bf16 %v3527_v33, %v3526_v30  ;;  %v3872_v18 = vld [vmem:[#allocation32] sm:$0xff]  ;;  %v3878_v33 = vld [vmem:[#allocation32 + $0x30] sm:$0xff] }
0x12e9   :  { %9377 = vmatprep.subr.bf16.mxu1 %v11666_v0 }
0x12ec   :  { %9379 = vmatpush3.bf16.msra.mxu1 %v9378_v38  ;;  %v3529_v38 = vld [vmem:[#allocation68 + $0x28] sm:$0xff] }
0x12ed   :  { %9380 = vmatprep.subr.bf16.mxu1 %v11666_v0  ;;  %v9408_v39 = vpack.c.bf16 %v3529_v38, %v3528_v37  ;;  %v3961_v37 = vld [vmem:[%s13385_s22] sm:$0xff]  ;;  %v3962_v38 = vld [vmem:[%s13385_s22 + $0x8] sm:$0xff] }
0x12f0   :  { %9382 = vmatpush3.bf16.msra.mxu1 %v9381_v41 }
0x12f1   :  { %9383 = vmatprep.subr.bf16.mxu1 %v11666_v0 }
0x12f4   :  { %9385 = vmatpush3.bf16.msra.mxu1 %v9384_v50 }
0x12f5   :  { %9401 = vmatprep.subr.bf16.mxu1 %v11666_v0 }
0x13ac   :  { %v12580_v42 = vpop.f32.mrb[20].mxu1 }
0x13ad   :  { %v8936_v43 = vpop.f32.mrb[21].mxu1 }
0x13ae   :  { %v3530_v43 = vld [vmem:[#allocation68 + $0x30] sm:$0xff] }
0x13ba   :  { %v3147_v45 = vpop.f32.mrb[22].mxu1 }
0x13bb   :  { %v3148_v46 = vadd.f32 %v8175_v44, %v3147_v45  ;;  %v8958_v17 = vpop.f32.mrb[23].mxu1  ;;  %v3531_v44 = vld [vmem:[#allocation68 + $0x38] sm:$0xff] }
0x13bc   :  { %v9411_v45 = vpack.c.bf16 %v3531_v44, %v3530_v43  ;;  %v3614_v17 = vld [vmem:[%s13392_s2 + $0x8] sm:$0xff]  ;;  %v3965_v44 = vld [vmem:[%s13385_s22 + $0x20] sm:$0xff] }
0x13bd   :  { %v3151_v47 = vmax.f32 %v3148_v46, 0.0  ;;  %v3613_v46 = vld [vmem:[%s13392_s2] sm:$0xff] }
0x13be   :  { %v9414_v48 = vpack.c.bf16 %v3614_v17, %v3613_v46  ;;  %v8193_v17 = vld [vmem:[#allocation31] ss:$0 sm:$0xff] }
0x13bf   :  { %8976 = vmatmul.mubr.msk.f32.vlgmr.msra.gmra.mrb[26].mxu0 %vm1107_vm3, %v3151_v47  ;;  %v3615_v47 = vld [vmem:[%s13392_s2 + $0x10] sm:$0xff] }
0x13c0   :  { %9005 = vmatprep.mubr.msk.f32.mxu0 %vm11667_vm0, %v11668_v1  ;;  %9388 = vmatpush3.bf16.msra.mxu0 %v9387_v53  ;;  %v9417_v50 = vpack.c.bf16 %v3616_v49, %v3615_v47  ;;  %v9420_v53 = vpack.c.bf16 %v3618_v52, %v3617_v51  ;;  %v3967_v51 = vld [vmem:[%s13385_s22 + $0x30] sm:$0xff]  ;;  %v3968_v52 = vld [vmem:[%s13385_s22 + $0x38] sm:$0xff] }
0x13c1   :  { %9389 = vmatprep.subr.bf16.mxu0 %v11666_v0 }
0x13c4   :  { %9391 = vmatpush3.bf16.msra.mxu0 %v9390_v61  ;;  %v9423_v61 = vpack.c.bf16 %v3620_v60, %v3619_v59 }
0x13c5   :  { %9392 = vmatprep.subr.bf16.mxu0 %v11666_v0 }
0x1492   :  { %v3236_v55 = vpop.f32.mrb[26].mxu0 }
0x1493   :  { %v3237_v56 = vadd.f32 %v8178_v54, %v3236_v55  ;;  %v8977_v57 = vpop.f32.mrb[27].mxu0  ;;  %v8184_v54 = vld [vmem:[#allocation67] ss:$0 sm:$0xff] }
0x1495   :  { %v3240_v58 = vmax.f32 %v3237_v56, 0.0 }
0x1497   :  { %8995 = vmatmul.mubr.msk.f32.vlgmr.msra.gmra.mrb[24].mxu1 %vm1107_vm3, %v3240_v58 }
0x1498   :  { %9041 = vmatprep.mubr.msk.f32.mxu1 %vm11667_vm0, %v11668_v1  ;;  %9403 = vmatpush3.bf16.msra.mxu1 %v9402_v32 }
0x1499   :  { %9404 = vmatprep.subr.bf16.mxu1 %v11666_v0 }
0x149c   :  { %9406 = vmatpush3.bf16.msra.mxu1 %v9405_v34 }
0x149d   :  { %9407 = vmatprep.subr.bf16.mxu1 %v11666_v0 }
0x14a0   :  { %9409 = vmatpush3.bf16.msra.mxu1 %v9408_v39  ;;  %v3963_v39 = vld [vmem:[%s13385_s22 + $0x10] sm:$0xff] }
0x14a1   :  { %9410 = vmatprep.subr.bf16.mxu1 %v11666_v0 }
0x14a4   :  { %9412 = vmatpush3.bf16.msra.mxu1 %v9411_v45  ;;  %v3966_v45 = vld [vmem:[%s13385_s22 + $0x28] sm:$0xff] }
0x14a5   :  { %9425 = vmatprep.subr.bf16.mxu1 %v11666_v0  ;;  %v9450_v46 = vpack.c.bf16 %v3966_v45, %v3965_v44 }
0x156a   :  { %v3325_v63 = vpop.f32.mrb[24].mxu1 }
0x156b   :  { %v3326_v2 = vadd.f32 %v8180_v62, %v3325_v63  ;;  %v8996_v3 = vpop.f32.mrb[25].mxu1  ;;  %v3702_v62 = vld [vmem:[%s13393_s7] sm:$0xff]  ;;  %v3703_v63 = vld [vmem:[%s13393_s7 + $0x8] sm:$0xff] }
0x156c   :  { %v8187_v3 = vld [vmem:[#allocation70] ss:$0 sm:$0xff] }
0x156d   :  { %v3329_v4 = vmax.f32 %v3326_v2, 0.0  ;;  %v9426_v2 = vpack.c.bf16 %v3703_v63, %v3702_v62  ;;  %v4052_v62 = vld [vmem:[%s13386_s27 + $0x10] sm:$0xff]  ;;  %v4053_v63 = vld [vmem:[%s13386_s27 + $0x18] sm:$0xff] }
0x156f   :  { %9006 = vmatmul.mubr.msk.f32.vlgmr.msra.gmra.mrb[28].mxu0 %vm1282_vm5, %v3329_v4 }
0x1570   :  { %9022 = vmatprep.mubr.msk.f32.mxu0 %vm11667_vm0, %v11668_v1  ;;  %9394 = vmatpush3.bf16.msra.mxu0 %v9393_v16  ;;  %v3787_v16 = vld [vmem:[%s13383_s12] sm:$0x3] }
0x1571   :  { %9395 = vmatprep.subr.bf16.mxu0 %v11666_v0 }
0x1574   :  { %9397 = vmatpush3.bf16.msra.mxu0 %v9396_v19  ;;  %v3873_v19 = vld [vmem:[#allocation32 + $0x8] sm:$0xff] }
0x1575   :  { %9398 = vmatprep.subr.bf16.mxu0 %v11666_v0  ;;  %v9432_v21 = vpack.c.bf16 %v3873_v19, %v3872_v18  ;;  %v4151_v18 = vld [vmem:[#allocation83 + $0x20] sm:$0xff]  ;;  %v4153_v19 = vld [vmem:[#allocation83 + $0x30] sm:$0xff] }
0x1578   :  { %9400 = vmatpush3.bf16.msra.mxu0 %v9399_v23 }
0x1579   :  { %9020 = vmatprep.subr.mxu0 %v11668_v1 }
0x157c   :  { %9021 = vmatpush3.msk.msra.mxu0 %vm1017_vm1, %v3439_v25  ;;  %v3876_v25 = vld [vmem:[#allocation32 + $0x20] sm:$0xff] }
0x157d   :  { %9413 = vmatprep.subr.bf16.mxu0 %v11666_v0 }
0x1642   :  { %v3410_v6 = vpop.f32.mrb[28].mxu0 }
0x1643   :  { %v3411_v7 = vadd.f32 %v8182_v5, %v3410_v6  ;;  %v9007_v8 = vpop.f32.mrb[29].mxu0 }
0x1644   :  { %v3704_v8 = vld [vmem:[%s13393_s7 + $0x10] sm:$0xff] }
0x1645   :  { %v3414_v9 = vmax.f32 %v3411_v7, 0.0 }
0x1647   :  { %3415 = vst.msk [vmem:[#allocation3] sm:$0xff] %vm1282_vm5, %v3414_v9  ;;  %v3705_v9 = vld [vmem:[%s13393_s7 + $0x18] sm:$0xff] }
0x164e   :  { %v3416_v10 = vld [vmem:[#allocation3] sm:$0xff] }
0x164f   :  { %v3418_v11 = vmul.f32 0.5, %v3416_v10 }
0x1651   :  { %v3419_v12 = vmul.f32 1.442695, %v3418_v11  ;;  %v8189_v11 = vld [vmem:[#allocation71] ss:$0 sm:$0xff] }
0x1653   :  { %10171 = vpow2.f32 %v3419_v12 }
0x165d   :  { %v10172_v20 = vpop.eup %10171 }
0x165e   :  { %3422 = vrot.lane.b32.xlu1 %v10172_v20, %s11671_s3  ;;  %v3874_v20 = vld [vmem:[#allocation32 + $0x10] sm:$0xff] }
0x165f   :  { %v9435_v23 = vpack.c.bf16 %v3875_v22, %v3874_v20  ;;  %v9467_v20 = vpack.c.bf16 %v4153_v19, %v4151_v18  ;;  %v4158_v22 = vld [vmem:[#allocation83 + $0x58] sm:$0xff] }
0x1660   :  { %v4283_v19 = vld [vmem:[#allocation86 + $0xe0] sm:$0xff] }
0x16d0   :  { %v3423_v27 = vpop.permute.xlu1 %3422 }
0x16d1   :  { %v3425_v31 = vmul.f32 %v3423_v27, %v3417_v26  ;;  %v3877_v26 = vld [vmem:[#allocation32 + $0x28] sm:$0xff] }
0x16d2   :  { %v9438_v27 = vpack.c.bf16 %v3877_v26, %v3876_v25  ;;  %v4155_v25 = vld [vmem:[#allocation83 + $0x40] sm:$0xff]  ;;  %v4157_v26 = vld [vmem:[#allocation83 + $0x50] sm:$0xff] }
0x16d3   :  { %v3426_v24 = vadd.f32 %v3425_v31, %v3416_v10  ;;  %v9429_v10 = vpack.c.bf16 %v3705_v9, %v3704_v8  ;;  %v4148_v8 = vld [vmem:[#allocation83 + $0x8] sm:$0xff]  ;;  %v4150_v9 = vld [vmem:[#allocation83 + $0x18] sm:$0xff] }
0x16d5   :  { %3428 = vrot.lane.b32.xlu0 %v3426_v24, %s11670_s1  ;;  %v3879_v24 = vld [vmem:[#allocation32 + $0x38] sm:$0xff] }
0x16d6   :  { %v9441_v34 = vpack.c.bf16 %v3879_v24, %v3878_v33  ;;  %v4256_v24 = vld [vmem:[#allocation86 + $0x8] sm:$0xff] }
0x16d9   :  { %4141 = vrot.lane.b32.xlu0 %v12527_v36, %s11672_s25  ;;  %v4160_v36 = vld [vmem:[#allocation83 + $0x68] sm:$0x3] }
0x1747   :  { %v3429_v40 = vpop.permute.xlu0 %3428 }
0x1748   :  { %3431 = vst.msk [vmem:[#allocation2] sm:$0xff] %vm3057_vm11, %v3429_v40  ;;  %v9444_v40 = vpack.c.bf16 %v3962_v38, %v3961_v37  ;;  %v4255_v37 = vld [vmem:[#allocation86] sm:$0xff] }
0x174f   :  { %v3432_v41 = vld [vmem:[#allocation2] sm:$0xff] }
0x1750   :  { %9023 = vmatmul.mubr.msk.f32.vlgmr.msra.gmra.mrb[30].mxu0 %vm3074_vm12, %v3432_v41  ;;  %v3964_v41 = vld [vmem:[%s13385_s22 + $0x18] sm:$0xff] }
0x1751   :  { %9060 = vmatprep.mubr.msk.f32.mxu0 %vm11667_vm0, %v11668_v1  ;;  %9415 = vmatpush3.bf16.msra.mxu0 %v9414_v48  ;;  %v9447_v43 = vpack.c.bf16 %v3964_v41, %v3963_v39  ;;  %v4257_v39 = vld [vmem:[#allocation86 + $0x10] sm:$0xff]  ;;  %v4262_v41 = vld [vmem:[#allocation86 + $0x38] sm:$0xff] }
0x1752   :  { %9416 = vmatprep.subr.bf16.mxu0 %v11666_v0  ;;  %v9475_v44 = vpack.c.bf16 %v4257_v39, %v4255_v37  ;;  %v4298_v37 = vld [vmem:[#allocation86 + $0x158] sm:$0xff] }
0x1755   :  { %9418 = vmatpush3.bf16.msra.mxu0 %v9417_v50 }
0x1756   :  { %9419 = vmatprep.subr.bf16.mxu0 %v11666_v0 }
0x1759   :  { %9421 = vmatpush3.bf16.msra.mxu0 %v9420_v53  ;;  %v9453_v53 = vpack.c.bf16 %v3968_v52, %v3967_v51  ;;  %v4265_v51 = vld [vmem:[#allocation86 + $0x50] sm:$0xff]  ;;  %v4268_v52 = vld [vmem:[#allocation86 + $0x68] sm:$0xff] }
0x175a   :  { %9422 = vmatprep.subr.bf16.mxu0 %v11666_v0 }
0x175d   :  { %9424 = vmatpush3.bf16.msra.mxu0 %v9423_v61 }
0x175e   :  { %9431 = vmatprep.subr.bf16.mxu0 %v11666_v0 }
0x1823   :  { %v3519_v55 = vpop.f32.mrb[30].mxu0 }
0x1824   :  { %v3520_v56 = vadd.f32 %v8184_v54, %v3519_v55  ;;  %v9024_v57 = vpop.f32.mrb[31].mxu0  ;;  %v4050_v54 = vld [vmem:[%s13386_s27] sm:$0xff]  ;;  %v4051_v55 = vld [vmem:[%s13386_s27 + $0x8] sm:$0xff] }
0x1825   :  { %v8196_v57 = vld [vmem:[#allocation34] ss:$0 sm:$0xff] }
0x1826   :  { %v3523_v58 = vmax.f32 %v3520_v56, 0.0  ;;  %v9456_v56 = vpack.c.bf16 %v4051_v55, %v4050_v54 }
0x1828   :  { %9042 = vmatmul.mubr.msk.f32.vlgmr.msra.gmra.mrb[26].mxu1 %vm1107_vm3, %v3523_v58 }
0x1829   :  { %9071 = vmatprep.mubr.msk.f32.mxu1 %vm11667_vm0, %v11668_v1  ;;  %9427 = vmatpush3.bf16.msra.mxu1 %v9426_v2  ;;  %v9459_v2 = vpack.c.bf16 %v4053_v63, %v4052_v62  ;;  %v4271_v62 = vld [vmem:[#allocation86 + $0x80] sm:$0xff]  ;;  %v4273_v63 = vld [vmem:[#allocation86 + $0x90] sm:$0xff] }
0x182a   :  { %9428 = vmatprep.subr.bf16.mxu1 %v11666_v0 }
0x182d   :  { %9430 = vmatpush3.bf16.msra.mxu1 %v9429_v10  ;;  %v4147_v10 = vld [vmem:[#allocation83] sm:$0xff] }
0x182e   :  { %9074 = vmatprep.subr.mxu1 %v11668_v1 }
0x18fb   :  { %v3608_v4 = vpop.f32.mrb[26].mxu1 }
0x18fc   :  { %v3609_v5 = vadd.f32 %v8187_v3, %v3608_v4  ;;  %v9043_v6 = vpop.f32.mrb[27].mxu1  ;;  %v8198_v3 = vld [vmem:[#allocation35] ss:$0 sm:$0xff] }
0x18fe   :  { %v3612_v7 = vmax.f32 %v3609_v5, 0.0 }
0x1900   :  { %9061 = vmatmul.mubr.msk.f32.vlgmr.msra.gmra.mrb[32].mxu0 %vm1107_vm3, %v3612_v7 }
0x1901   :  { %9095 = vmatprep.mubr.msk.f32.mxu0 %vm11667_vm0, %v11668_v1  ;;  %9433 = vmatpush3.bf16.msra.mxu0 %v9432_v21  ;;  %v4156_v21 = vld [vmem:[#allocation83 + $0x48] sm:$0xff] }
0x1902   :  { %9434 = vmatprep.subr.bf16.mxu0 %v11666_v0 }
0x1905   :  { %9436 = vmatpush3.bf16.msra.mxu0 %v9435_v23  ;;  %v9469_v23 = vpack.c.bf16 %v4158_v22, %v4156_v21  ;;  %v4288_v21 = vld [vmem:[#allocation86 + $0x108] sm:$0xff]  ;;  %v4290_v22 = vld [vmem:[#allocation86 + $0x118] sm:$0xff] }
0x1906   :  { %9437 = vmatprep.subr.bf16.mxu0 %v11666_v0 }
0x1909   :  { %9439 = vmatpush3.bf16.msra.mxu0 %v9438_v27  ;;  %v9471_v27 = vpack.c.bf16 %v4157_v26, %v4155_v25  ;;  %v9505_v25 = vpack.c.bf16 %v4290_v22, %v4288_v21  ;;  %v4287_v26 = vld [vmem:[#allocation86 + $0x100] sm:$0xff] }
0x190a   :  { %9440 = vmatprep.subr.bf16.mxu0 %v11666_v0 }
0x190d   :  { %9442 = vmatpush3.bf16.msra.mxu0 %v9441_v34  ;;  %v4258_v34 = vld [vmem:[#allocation86 + $0x18] sm:$0xff] }
0x190e   :  { %9455 = vmatprep.subr.bf16.mxu0 %v11666_v0  ;;  %v9473_v38 = vpack.c.bf16 %v4258_v34, %v4256_v24  ;;  %v4293_v24 = vld [vmem:[#allocation86 + $0x130] sm:$0xff]  ;;  %v4296_v34 = vld [vmem:[#allocation86 + $0x148] sm:$0xff] }
0x190f   :  { %v9513_v39 = vpack.c.bf16 %v4298_v37, %v4296_v34  ;;  %v4411_v34 = vld [vmem:[%s13394_s19 + $0xa0] sm:$0xff]  ;;  %v4412_v37 = vld [vmem:[%s13394_s19 + $0xa8] sm:$0xff] }
0x19d3   :  { %v3697_v12 = vpop.f32.mrb[32].mxu0 }
0x19d4   :  { %v3698_v13 = vadd.f32 %v8189_v11, %v3697_v12  ;;  %v9062_v14 = vpop.f32.mrb[33].mxu0  ;;  %v9461_v11 = vpack.c.bf16 %v4150_v9, %v4148_v8  ;;  %v4149_v12 = vld [vmem:[#allocation83 + $0x10] sm:$0xff]  ;;  %v4280_v8 = vld [vmem:[#allocation86 + $0xc8] sm:$0xff] }
0x19d5   :  { %v4154_v14 = vld [vmem:[#allocation83 + $0x38] sm:$0xff]  ;;  %v4282_v9 = vld [vmem:[#allocation86 + $0xd8] sm:$0xff] }
0x19d6   :  { %v3701_v15 = vmax.f32 %v3698_v13, 0.0  ;;  %v4152_v13 = vld [vmem:[#allocation83 + $0x28] sm:$0xff] }
0x19d8   :  { %9072 = vmatmul.mubr.msk.f32.vlgmr.msra.gmra.mrb[28].mxu1 %vm1282_vm5, %v3701_v15  ;;  %v9463_v15 = vpack.c.bf16 %v4149_v12, %v4147_v10  ;;  %v4279_v12 = vld [vmem:[#allocation86 + $0xc0] sm:$0xff] }
0x19d9   :  { %9076 = vmatprep.mubr.msk.f32.mxu1 %vm11667_vm0, %v11668_v1  ;;  %9075 = vmatpush3.msk.msra.mxu1 %vm1017_vm1, %v3787_v16  ;;  %v9465_v16 = vpack.c.bf16 %v4154_v14, %v4152_v13  ;;  %v4281_v13 = vld [vmem:[#allocation86 + $0xd0] sm:$0xff]  ;;  %v4284_v14 = vld [vmem:[#allocation86 + $0xe8] sm:$0xff] }
0x19da   :  { %9443 = vmatprep.subr.bf16.mxu1 %v11666_v0 }
0x1aab   :  { %v3782_v29 = vpop.f32.mrb[28].mxu1 }
0x1aac   :  { %v12648_v30 = vadd.f32 %v8191_v28, %v3782_v29  ;;  %v9073_v31 = vpop.f32.mrb[29].mxu1  ;;  %v4159_v28 = vld [vmem:[#allocation83 + $0x60] sm:$0x3] }
0x1aae   :  { %v3786_v32 = vmax.f32 %v12648_v30, 0.0 }
0x1ab0   :  { %9077 = vmatmul.mubr.msk.f32.vlgmr.msra.gmra.mrb[30].mxu1 %vm1366_vm4, %v3786_v32  ;;  %vm7997_vm4 = vcmask 326848  }
0x1ab1   :  { %9114 = vmatprep.mubr.msk.f32.mxu1 %vm11667_vm0, %v11668_v1  ;;  %9445 = vmatpush3.bf16.msra.mxu1 %v9444_v40  ;;  %v4260_v40 = vld [vmem:[#allocation86 + $0x28] sm:$0xff] }
0x1ab2   :  { %9446 = vmatprep.subr.bf16.mxu1 %v11666_v0  ;;  %v9477_v45 = vpack.c.bf16 %v4262_v41, %v4260_v40  ;;  %v4142_v40 = vpop.permute.xlu0 %4141 }
0x1ab5   :  { %9448 = vmatpush3.bf16.msra.mxu1 %v9447_v43 }
0x1ab6   :  { %9449 = vmatprep.subr.bf16.mxu1 %v11666_v0 }
0x1ab9   :  { %9451 = vmatpush3.bf16.msra.mxu1 %v9450_v46  ;;  %v4259_v46 = vld [vmem:[#allocation86 + $0x20] sm:$0xff] }
0x1aba   :  { %9452 = vmatprep.subr.bf16.mxu1 %v11666_v0 }
0x1abd   :  { %9454 = vmatpush3.bf16.msra.mxu1 %v9453_v53  ;;  %v4270_v53 = vld [vmem:[#allocation86 + $0x78] sm:$0xff] }
0x1abe   :  { %9462 = vmatprep.subr.bf16.mxu1 %v9461_v11  ;;  %v9485_v55 = vpack.c.bf16 %v4270_v53, %v4268_v52  ;;  %v9497_v11 = vpack.c.bf16 %v4282_v9, %v4280_v8  ;;  %v4392_v52 = vld [vmem:[%s13394_s19 + $0x8] sm:$0xff]  ;;  %v4393_v53 = vld [vmem:[%s13394_s19 + $0x10] sm:$0xff] }
0x1abf   :  { %v4404_v8 = vld [vmem:[%s13394_s19 + $0x68] sm:$0xff] }
0x1b83   :  { %v3867_v47 = vpop.f32.mrb[30].mxu1 }
0x1b84   :  { %v3868_v48 = vadd.f32 %v8193_v17, %v3867_v47  ;;  %v9078_v49 = vpop.f32.mrb[31].mxu1  ;;  %v4261_v17 = vld [vmem:[#allocation86 + $0x30] sm:$0xff]  ;;  %v4264_v47 = vld [vmem:[#allocation86 + $0x48] sm:$0xff] }
0x1b86   :  { %v3871_v50 = vmax.f32 %v3868_v48, 0.0  ;;  %v4266_v48 = vld [vmem:[#allocation86 + $0x58] sm:$0xff] }
0x1b87   :  { %v9481_v49 = vpack.c.bf16 %v4266_v48, %v4264_v47  ;;  %v4302_v47 = vld [vmem:[#allocation86 + $0x178] sm:$0xff] }
0x1b88   :  { %9096 = vmatmul.mubr.msk.f32.vlgmr.msra.gmra.mrb[34].mxu0 %vm1107_vm3, %v3871_v50  ;;  %v4263_v50 = vld [vmem:[#allocation86 + $0x40] sm:$0xff] }
0x1b89   :  { %9125 = vmatprep.mubr.msk.f32.mxu0 %vm11667_vm0, %v11668_v1  ;;  %9457 = vmatpush3.bf16.msra.mxu0 %v9456_v56  ;;  %v9483_v54 = vpack.c.bf16 %v4265_v51, %v4263_v50  ;;  %v4267_v56 = vld [vmem:[#allocation86 + $0x60] sm:$0xff]  ;;  %v4391_v51 = vld [vmem:[%s13394_s19] sm:$0xff] }
0x1b8a   :  { %9458 = vmatprep.subr.bf16.mxu0 %v11666_v0 }
0x1b8d   :  { %9460 = vmatpush3.bf16.msra.mxu0 %v9459_v2  ;;  %v4276_v2 = vld [vmem:[#allocation86 + $0xa8] sm:$0xff] }
0x1b8e   :  { %9474 = vmatprep.subr.bf16.mxu0 %v9473_v38 }
0x1c5b   :  { %v3956_v58 = vpop.f32.mrb[34].mxu0 }
0x1c5c   :  { %v3957_v59 = vadd.f32 %v8196_v57, %v3956_v58  ;;  %v9097_v60 = vpop.f32.mrb[35].mxu0  ;;  %v4269_v57 = vld [vmem:[#allocation86 + $0x70] sm:$0xff]  ;;  %v4272_v58 = vld [vmem:[#allocation86 + $0x88] sm:$0xff] }
0x1c5d   :  { %v9487_v60 = vpack.c.bf16 %v4269_v57, %v4267_v56  ;;  %v4395_v57 = vld [vmem:[%s13394_s19 + $0x20] sm:$0xff] }
0x1c5e   :  { %v3960_v61 = vmax.f32 %v3957_v59, 0.0  ;;  %v4274_v59 = vld [vmem:[#allocation86 + $0x98] sm:$0xff] }
0x1c60   :  { %9115 = vmatmul.mubr.msk.f32.vlgmr.msra.gmra.mrb[32].mxu1 %vm1107_vm3, %v3960_v61  ;;  %v9489_v61 = vpack.c.bf16 %v4274_v59, %v4272_v58  ;;  %v4396_v58 = vld [vmem:[%s13394_s19 + $0x28] sm:$0xff] }
0x1c61   :  { %4246 = vmatprep.mubr.f32.mxu1 %v11668_v1  ;;  %9464 = vmatpush1.bf16.msra.mxu1 %v9463_v15  ;;  %v4286_v15 = vld [vmem:[#allocation86 + $0xf8] sm:$0xff]  ;;  %v9528_v59 = vpack.c.bf16 %v4396_v58, %v4395_v57 }
0x1c62   :  { %9466 = vmatprep.subr.bf16.mxu1 %v9465_v16  ;;  %v9499_v16 = vpack.c.bf16 %v4281_v13, %v4279_v12  ;;  %v9501_v18 = vpack.c.bf16 %v4286_v15, %v4284_v14  ;;  %v4407_v13 = vld [vmem:[%s13394_s19 + $0x80] sm:$0xff]  ;;  %v4408_v14 = vld [vmem:[%s13394_s19 + $0x88] sm:$0xff] }
0x1c63   :  { %v9546_v15 = vpack.c.bf16 %v4408_v14, %v4407_v13  ;;  %v9904_v13 = vld [vmem:[%s12050_s5 + $0x1c] ss:$68 sps:$4 sm:$0xff]   ;;  %v11673_v14 = vmov 0  }
0x1c65   :  { %9468 = vmatpush1.bf16.msra.mxu1 %v9467_v20  ;;  %v4285_v20 = vld [vmem:[#allocation86 + $0xf0] sm:$0xff] }
0x1c66   :  { %9470 = vmatprep.subr.bf16.mxu1 %v9469_v23  ;;  %v9503_v23 = vpack.c.bf16 %v4285_v20, %v4283_v19  ;;  %v4163_v20 = vlaneseq }
0x1c68   :  { %v12716_v21 = vshrl.u32 %v4163_v20, 7 }
0x1c69   :  { %9472 = vmatpush1.bf16.msra.mxu1 %v9471_v27  ;;  %v4289_v27 = vld [vmem:[#allocation86 + $0x110] sm:$0xff] }
0x1c6a   :  { %8202 = vmatprep.subr.msk.mxu1 %vm1017_vm1, %v4160_v36  ;;  %v4292_v36 = vld [vmem:[#allocation86 + $0x128] sm:$0xff]  ;;  %v12719_v22 = vsub.s32 0, %v12716_v21 }
0x1c6d   :  { %8203 = vmatpush1.msk.msra.mxu1 %vm1017_vm1, %v4159_v28  ;;  %v4294_v28 = vld [vmem:[#allocation86 + $0x138] sm:$0xff] }
0x1c6e   :  { %9521 = vmatprep.subr.bf16.mxu1 %v11666_v0 }
0x1d33   :  { %v4045_v4 = vpop.f32.mrb[32].mxu1 }
0x1d34   :  { %v4046_v5 = vadd.f32 %v8198_v3, %v4045_v4  ;;  %v9116_v6 = vpop.f32.mrb[33].mxu1  ;;  %v4278_v3 = vld [vmem:[#allocation86 + $0xb8] sm:$0xff]  ;;  %v9491_v4 = vpack.c.bf16 %v4273_v63, %v4271_v62  ;;  %v4399_v63 = vld [vmem:[%s13394_s19 + $0x40] sm:$0xff] }
0x1d35   :  { %v4275_v6 = vld [vmem:[#allocation86 + $0xa0] sm:$0xff] }
0x1d36   :  { %v4049_v7 = vmax.f32 %v4046_v5, 0.0  ;;  %v9493_v5 = vpack.c.bf16 %v4278_v3, %v4276_v2  ;;  %v4400_v2 = vld [vmem:[%s13394_s19 + $0x48] sm:$0xff] }
0x1d37   :  { %v9534_v3 = vpack.c.bf16 %v4400_v2, %v4399_v63  ;;  %v9872_v63 = vld [vmem:[%s12050_s5 + $0x90] ss:$68 sps:$4 sm:$0xff]   ;;  %v9880_v2 = vld [vmem:[%s12050_s5 + $0x11c] ss:$68 sps:$4 sm:$0xff]  }
0x1d38   :  { %9126 = vmatmul.mubr.msk.f32.vlgmr.msra.gmra.mrb[36].mxu0 %vm1282_vm5, %v4049_v7  ;;  %v4277_v7 = vld [vmem:[#allocation86 + $0xb0] sm:$0xff] }
0x1d39   :  { %9476 = vmatpush1.bf16.msra.mxu0 %v9475_v44  ;;  %v9495_v10 = vpack.c.bf16 %v4277_v7, %v4275_v6  ;;  %v4295_v44 = vld [vmem:[#allocation86 + $0x140] sm:$0xff]  ;;  %v4403_v7 = vld [vmem:[%s13394_s19 + $0x60] sm:$0xff] }
0x1d3a   :  { %9478 = vmatprep.subr.bf16.mxu0 %v9477_v45  ;;  %v4297_v45 = vld [vmem:[#allocation86 + $0x150] sm:$0xff]  ;;  %v9540_v9 = vpack.c.bf16 %v4404_v8, %v4403_v7 }
0x1d3b   :  { %v9890_v7 = vld [vmem:[%s12050_s5 + $0x228] ss:$68 sps:$4 sm:$0xff]  }
0x1d3c   :  { %v9895_v8 = vld [vmem:[%s12050_s5 + $0x2ac] ss:$68 sps:$4 sm:$0xff]  }
0x1e0b   :  { %v4130_v29 = vpop.f32.mrb[36].mxu0 }
0x1e0c   :  { %v4131_v31 = vadd.f32 %v12524_v35, %v4130_v29  ;;  %v9127_v33 = vpop.f32.mrb[37].mxu0  ;;  %v9479_v35 = vpack.c.bf16 %v4261_v17, %v4259_v46  ;;  %v9507_v29 = vpack.c.bf16 %v4289_v27, %v4287_v26  ;;  %v9515_v46 = vpack.c.bf16 %v4297_v45, %v4295_v44  ;;  %v4300_v17 = vld [vmem:[#allocation86 + $0x168] sm:$0xff]  ;;  %v9868_v45 = vld [vmem:[%s12050_s5 + $0xc] ss:$68 sps:$4 sm:$0xff]  }
0x1e0d   :  { %v4291_v33 = vld [vmem:[#allocation86 + $0x120] sm:$0xff]  ;;  %v9517_v48 = vpack.c.bf16 %v4302_v47, %v4300_v17  ;;  %v9865_v44 = vld [vmem:[%s12050_s5 + $0x4] ss:$68 sps:$4 sm:$0xff]  }
0x1e0e   :  { %v4134_v43 = vmax.f32 %v4131_v31, 0.0  ;;  %9480 = vmatpush1.bf16.msra.mxu0 %v9479_v35  ;;  %v9509_v31 = vpack.c.bf16 %v4294_v28, %v4292_v36  ;;  %v9511_v38 = vpack.c.bf16 %v4293_v24, %v4291_v33  ;;  %v4299_v35 = vld [vmem:[#allocation86 + $0x160] sm:$0xff]  ;;  %v9869_v17 = vld [vmem:[%s12050_s5 + $0x88] ss:$68 sps:$4 sm:$0xff]  }
0x1e0f   :  { %9482 = vmatprep.subr.bf16.mxu0 %v9481_v49  ;;  %v4301_v49 = vld [vmem:[#allocation86 + $0x170] sm:$0xff]  ;;  %v9877_v47 = vld [vmem:[%s12050_s5 + $0x114] ss:$68 sps:$4 sm:$0xff]  }
0x1e10   :  { %4136 = vrot.lane.b32.xlu1 %v4134_v43, %s11669_s16  ;;  %v9519_v50 = vpack.c.bf16 %v4301_v49, %v4299_v35  ;;  %v9883_v35 = vld [vmem:[%s12050_s5 + $0x19c] ss:$68 sps:$4 sm:$0xff]  }
0x1e11   :  { %v9881_v49 = vld [vmem:[%s12050_s5 + $0x198] ss:$68 sps:$4 sm:$0xff]  }
0x1e12   :  { %9484 = vmatpush1.bf16.msra.mxu0 %v9483_v54  ;;  %v9522_v54 = vpack.c.bf16 %v4392_v52, %v4391_v51  ;;  %v9887_v51 = vld [vmem:[%s12050_s5 + $0x220] ss:$68 sps:$4 sm:$0xff]   ;;  %v4303_v52 = vld [vmem:[#allocation88] sm:$0x3] }
0x1e13   :  { %9486 = vmatprep.subr.bf16.mxu0 %v9485_v55  ;;  %v4394_v55 = vld [vmem:[%s13394_s19 + $0x18] sm:$0xff] }
0x1e14   :  { %v9525_v56 = vpack.c.bf16 %v4394_v55, %v4393_v53  ;;  %v4308_v53 = vrot.slane %v4303_v52, %v12719_v22 }
0x1e16   :  { %9488 = vmatpush1.bf16.msra.mxu0 %v9487_v60  ;;  %v4397_v60 = vld [vmem:[%s13394_s19 + $0x30] sm:$0xff] }
0x1e17   :  { %9490 = vmatprep.subr.bf16.mxu0 %v9489_v61  ;;  %v4398_v61 = vld [vmem:[%s13394_s19 + $0x38] sm:$0xff] }
0x1e18   :  { %v9531_v62 = vpack.c.bf16 %v4398_v61, %v4397_v60  ;;  %v9866_v60 = vld [vmem:[%s12050_s5 + $0x8] ss:$68 sps:$4 sm:$0xff]  }
0x1e1a   :  { %9492 = vmatpush1.bf16.msra.mxu0 %v9491_v4  ;;  %v4401_v4 = vld [vmem:[%s13394_s19 + $0x50] sm:$0xff] }
0x1e1b   :  { %9494 = vmatprep.subr.bf16.mxu0 %v9493_v5  ;;  %v4402_v5 = vld [vmem:[%s13394_s19 + $0x58] sm:$0xff] }
0x1e1c   :  { %v9537_v6 = vpack.c.bf16 %v4402_v5, %v4401_v4  ;;  %v9886_v4 = vld [vmem:[%s12050_s5 + $0x1a4] ss:$68 sps:$4 sm:$0xff]  }
0x1e1d   :  { %v9884_v5 = vld [vmem:[%s12050_s5 + $0x1a0] ss:$68 sps:$4 sm:$0xff]  }
0x1e1e   :  { %9496 = vmatpush1.bf16.msra.mxu0 %v9495_v10  ;;  %v4405_v10 = vld [vmem:[%s13394_s19 + $0x70] sm:$0xff] }
0x1e1f   :  { %9498 = vmatprep.subr.bf16.mxu0 %v9497_v11  ;;  %v4406_v11 = vld [vmem:[%s13394_s19 + $0x78] sm:$0xff] }
0x1e20   :  { %v9543_v12 = vpack.c.bf16 %v4406_v11, %v4405_v10  ;;  %v9893_v10 = vld [vmem:[%s12050_s5 + $0x2a8] ss:$68 sps:$4 sm:$0xff]   ;;  %v9896_v11 = vld [vmem:[%s12050_s5 + $0x2b0] ss:$68 sps:$4 sm:$0xff]  }
0x1e22   :  { %9500 = vmatpush1.bf16.msra.mxu0 %v9499_v16  ;;  %v4409_v16 = vld [vmem:[%s13394_s19 + $0x90] sm:$0xff] }
0x1e23   :  { %9502 = vmatprep.subr.bf16.mxu0 %v9501_v18  ;;  %v4410_v18 = vld [vmem:[%s13394_s19 + $0x98] sm:$0xff] }
0x1e24   :  { %v9549_v19 = vpack.c.bf16 %v4410_v18, %v4409_v16 }
0x1e26   :  { %9504 = vmatpush1.bf16.msra.mxu0 %v9503_v23  ;;  %v4161_v23 = vld [vmem:[#allocation85] sm:$0x3] }
0x1e27   :  { %9506 = vmatprep.subr.bf16.mxu0 %v9505_v25  ;;  %v12722_v25 = vsub.s32 1, %v12716_v21  ;;  %v4166_v26 = vrot.slane %v4161_v23, %v12719_v22 }
0x1e29   :  { %v4170_v27 = vrot.slane %v4161_v23, %v12722_v25  ;;  %v9899_v23 = vld [vmem:[%s12050_s5 + $0x10] ss:$68 sps:$4 sm:$0xff]  }
0x1e2a   :  { %9508 = vmatpush1.bf16.msra.mxu0 %v9507_v29 }
0x1e2b   :  { %9510 = vmatprep.subr.bf16.mxu0 %v9509_v31 }
0x1e2e   :  { %9512 = vmatpush1.bf16.msra.mxu0 %v9511_v38  ;;  %v9552_v38 = vpack.c.bf16 %v4412_v37, %v4411_v34  ;;  %v9911_v34 = vld [vmem:[%s12050_s5 + $0x120] ss:$68 sps:$4 sm:$0xff]   ;;  %v9914_v37 = vld [vmem:[%s12050_s5 + $0x128] ss:$68 sps:$4 sm:$0xff]  }
0x1e2f   :  { %9514 = vmatprep.subr.bf16.mxu0 %v9513_v39  ;;  %v4413_v39 = vld [vmem:[%s13394_s19 + $0xb0] sm:$0xff] }
0x1e32   :  { %9516 = vmatpush1.bf16.msra.mxu0 %v9515_v46  ;;  %v9871_v46 = vld [vmem:[%s12050_s5 + $0x8c] ss:$68 sps:$4 sm:$0xff]  }
0x1e33   :  { %9518 = vmatprep.subr.bf16.mxu0 %v9517_v48  ;;  %v9875_v48 = vld [vmem:[%s12050_s5 + $0x110] ss:$68 sps:$4 sm:$0xff]  }
0x1e36   :  { %9520 = vmatpush1.bf16.msra.mxu0 %v9519_v50  ;;  %v9889_v50 = vld [vmem:[%s12050_s5 + $0x224] ss:$68 sps:$4 sm:$0xff]  }
0x1e37   :  { %5216 = vmatprep.subr.bf16.mxu0 %v9865_v44  ;;  %v9928_v44 = vld [vmem:[%s12050_s5 + $0x23c] ss:$68 sps:$4 sm:$0xff]  }
0x1e82   :  { %v4137_v41 = vpop.permute.xlu1 %4136 }
0x1e83   :  { %4140 = vst.msk [vmem:[#allocation2] sm:$0xff] %vm4139_vm13, %v4137_v41 }
0x1e84   :  { %4145 = vst.msk [vmem:[#allocation2] sm:$0xff] %vm4144_vm14, %v4142_v40  ;;  %v4414_v40 = vld [vmem:[%s13394_s19 + $0xb8] sm:$0xff] }
0x1e85   :  { %v9555_v41 = vpack.c.bf16 %v4414_v40, %v4413_v39  ;;  %v9922_v39 = vld [vmem:[%s12050_s5 + $0x1b4] ss:$68 sps:$4 sm:$0xff]   ;;  %v9917_v40 = vld [vmem:[%s12050_s5 + $0x1a8] ss:$68 sps:$4 sm:$0xff]  }
0x1e8b   :  { %v4146_v43 = vld [vmem:[#allocation2] sm:$0xff] }
0x1e8c   :  { %8204 = vmatmul.mubr.msk.f32.vlgmr.msra.gmra.mrb[34].mxu1 %vm3074_vm12, %v4146_v43  ;;  %v9863_v43 = vld [vmem:[%s12050_s5] ss:$68 sps:$4 sm:$0xff]  }
0x1e8d   :  { %9523 = vmatpush1.bf16.msra.mxu1 %v9522_v54  ;;  %v4312_v54 = vrot.slane %v4303_v52, %v12722_v25  ;;  %v9938_v52 = vld [vmem:[%s12050_s5 + $0x28] ss:$68 sps:$4 sm:$0xff]  }
0x1e8e   :  { %9524 = vmatprep.subr.bf16.mxu1 %v11666_v0 }
0x1e91   :  { %9526 = vmatpush1.bf16.msra.mxu1 %v9525_v56 }
0x1e92   :  { %9527 = vmatprep.subr.bf16.mxu1 %v11666_v0 }
0x1e95   :  { %9529 = vmatpush1.bf16.msra.mxu1 %v9528_v59 }
0x1e96   :  { %9530 = vmatprep.subr.bf16.mxu1 %v11666_v0 }
0x1e99   :  { %9532 = vmatpush1.bf16.msra.mxu1 %v9531_v62  ;;  %v9874_v62 = vld [vmem:[%s12050_s5 + $0x94] ss:$68 sps:$4 sm:$0xff]  }
0x1e9a   :  { %9533 = vmatprep.subr.bf16.mxu1 %v11666_v0 }
0x1e9d   :  { %9535 = vmatpush1.bf16.msra.mxu1 %v9534_v3  ;;  %v9878_v3 = vld [vmem:[%s12050_s5 + $0x118] ss:$68 sps:$4 sm:$0xff]  }
0x1e9e   :  { %9536 = vmatprep.subr.bf16.mxu1 %v11666_v0 }
0x1ea1   :  { %9538 = vmatpush1.bf16.msra.mxu1 %v9537_v6  ;;  %v9892_v6 = vld [vmem:[%s12050_s5 + $0x22c] ss:$68 sps:$4 sm:$0xff]  }
0x1ea2   :  { %9539 = vmatprep.subr.bf16.mxu1 %v11666_v0 }
0x1ea5   :  { %9541 = vmatpush1.bf16.msra.mxu1 %v9540_v9  ;;  %v9898_v9 = vld [vmem:[%s12050_s5 + $0x2b4] ss:$68 sps:$4 sm:$0xff]  }
0x1ea6   :  { %9542 = vmatprep.subr.bf16.mxu1 %v11666_v0 }
0x1ea9   :  { %9544 = vmatpush1.bf16.msra.mxu1 %v9543_v12  ;;  %v9901_v12 = vld [vmem:[%s12050_s5 + $0x14] ss:$68 sps:$4 sm:$0xff]  }
0x1eaa   :  { %9545 = vmatprep.subr.bf16.mxu1 %v11666_v0 }
0x1ead   :  { %9547 = vmatpush1.bf16.msra.mxu1 %v9546_v15  ;;  %v8206_v15 = vld [vmem:[#allocation89] ss:$0 sm:$0xff] }
0x1eae   :  { %9548 = vmatprep.subr.bf16.mxu1 %v11666_v0 }
0x1eb1   :  { %9550 = vmatpush1.bf16.msra.mxu1 %v9549_v19 }
0x1eb2   :  { %9551 = vmatprep.subr.bf16.mxu1 %v11666_v0 }
0x1eb5   :  { %9553 = vmatpush1.bf16.msra.mxu1 %v9552_v38  ;;  %v9919_v38 = vld [vmem:[%s12050_s5 + $0x1ac] ss:$68 sps:$4 sm:$0xff]  }
0x1eb6   :  { %9554 = vmatprep.subr.bf16.mxu1 %v11666_v0 }
0x1eb9   :  { %9556 = vmatpush1.bf16.msra.mxu1 %v9555_v41  ;;  %v9920_v41 = vld [vmem:[%s12050_s5 + $0x1b0] ss:$68 sps:$4 sm:$0xff]  }
0x1eba   :  { %5257 = vmatprep.subr.bf16.mxu1 %v9868_v45  ;;  %v9923_v45 = vld [vmem:[%s12050_s5 + $0x230] ss:$68 sps:$4 sm:$0xff]  }
0x1f5f   :  { %v4248_v36 = vpop.f32.mrb[34].mxu1 }
0x1f60   :  { %v4249_v28 = vadd.f32 %v4248_v36, %v4166_v26  ;;  %v4250_v29 = vpop.f32.mrb[35].mxu1  ;;  %v9902_v26 = vld [vmem:[%s12050_s5 + $0x18] ss:$68 sps:$4 sm:$0xff]  }
0x1f61   :  { %v4251_v31 = vadd.f32 %v4250_v29, %v4170_v27  ;;  %v9907_v36 = vld [vmem:[%s12050_s5 + $0x9c] ss:$68 sps:$4 sm:$0xff]  }
0x1f62   :  { %v4253_v24 = vmax.f32 %v4249_v28, 0.0  ;;  %v9910_v28 = vld [vmem:[%s12050_s5 + $0xa4] ss:$68 sps:$4 sm:$0xff]   ;;  %v9905_v29 = vld [vmem:[%s12050_s5 + $0x98] ss:$68 sps:$4 sm:$0xff]  }
0x1f63   :  { %v4254_v33 = vmax.f32 %v4251_v31, 0.0  ;;  %v9908_v31 = vld [vmem:[%s12050_s5 + $0xa0] ss:$68 sps:$4 sm:$0xff]  }
0x1f65   :  { %8205 = vmatprep.mubr.msk.f32.mxu0 %vm1107_vm3, %v4254_v33  ;;  %v9913_v33 = vld [vmem:[%s12050_s5 + $0x124] ss:$68 sps:$4 sm:$0xff]  }
0x1f66   :  { %4383 = vmatmul.mubr.f32.vlgmr.msra.gmra.mrb[38].mxu0 %v4253_v24  ;;  %v9916_v24 = vld [vmem:[%s12050_s5 + $0x12c] ss:$68 sps:$4 sm:$0xff]  }
0x1f67   :  { %5217 = vmatpush1.bf16.msra.mxu0 %v9863_v43  ;;  %5248 = vmatprep.mubr.bf16.mxu0 %v11673_v14  ;;  %v9925_v43 = vld [vmem:[%s12050_s5 + $0x234] ss:$68 sps:$4 sm:$0xff]  }
0x1f68   :  { %5218 = vmatprep.subr.bf16.mxu0 %v9871_v46  ;;  %v9926_v46 = vld [vmem:[%s12050_s5 + $0x238] ss:$68 sps:$4 sm:$0xff]  }
0x1f6b   :  { %5219 = vmatpush1.bf16.msra.mxu0 %v9869_v17  ;;  %v9931_v17 = vld [vmem:[%s12050_s5 + $0x2bc] ss:$68 sps:$4 sm:$0xff]  }
0x1f6c   :  { %5220 = vmatprep.subr.bf16.mxu0 %v9877_v47  ;;  %v9934_v47 = vld [vmem:[%s12050_s5 + $0x2c4] ss:$68 sps:$4 sm:$0xff]  }
0x1f6f   :  { %5221 = vmatpush1.bf16.msra.mxu0 %v9875_v48  ;;  %v9929_v48 = vld [vmem:[%s12050_s5 + $0x2b8] ss:$68 sps:$4 sm:$0xff]  }
0x1f70   :  { %5222 = vmatprep.subr.bf16.mxu0 %v9883_v35  ;;  %v9932_v35 = vld [vmem:[%s12050_s5 + $0x2c0] ss:$68 sps:$4 sm:$0xff]  }
0x1f73   :  { %5223 = vmatpush1.bf16.msra.mxu0 %v9881_v49  ;;  %v9937_v49 = vld [vmem:[%s12050_s5 + $0x24] ss:$68 sps:$4 sm:$0xff]  }
0x1f74   :  { %5224 = vmatprep.subr.bf16.mxu0 %v9889_v50  ;;  %v9940_v50 = vld [vmem:[%s12050_s5 + $0x2c] ss:$68 sps:$4 sm:$0xff]  }
0x1f77   :  { %5225 = vmatpush1.bf16.msra.mxu0 %v9887_v51  ;;  %v9935_v51 = vld [vmem:[%s12050_s5 + $0x20] ss:$68 sps:$4 sm:$0xff]  }
0x1f78   :  { %5226 = vmatprep.subr.bf16.mxu0 %v9895_v8  ;;  %v9970_v8 = vld [vmem:[%s12050_s5 + $0x2d4] ss:$68 sps:$4 sm:$0xff]  }
0x1f7b   :  { %5227 = vmatpush1.bf16.msra.mxu0 %v9893_v10  ;;  %v9968_v10 = vld [vmem:[%s12050_s5 + $0x2d0] ss:$68 sps:$4 sm:$0xff]  }
0x1f7c   :  { %5298 = vmatprep.subr.bf16.mxu0 %v9901_v12  ;;  %v9976_v12 = vld [vmem:[%s12050_s5 + $0x3c] ss:$68 sps:$4 sm:$0xff]  }
0x2039   :  { %v4384_v55 = vpop.f32.mrb[38].mxu0 }
0x203a   :  { %v4385_v56 = vadd.f32 %v4384_v55, %v4308_v53  ;;  %v4386_v57 = vpop.f32.mrb[39].mxu0  ;;  %v9943_v53 = vld [vmem:[%s12050_s5 + $0xac] ss:$68 sps:$4 sm:$0xff]  }
0x203b   :  { %v4387_v58 = vadd.f32 %v4386_v57, %v4312_v54  ;;  %v9946_v54 = vld [vmem:[%s12050_s5 + $0xb4] ss:$68 sps:$4 sm:$0xff]   ;;  %v9941_v55 = vld [vmem:[%s12050_s5 + $0xa8] ss:$68 sps:$4 sm:$0xff]  }
0x203c   :  { %v4389_v61 = vmax.f32 %v4385_v56, 0.0  ;;  %v9944_v56 = vld [vmem:[%s12050_s5 + $0xb0] ss:$68 sps:$4 sm:$0xff]  }
0x203d   :  { %v4390_v59 = vmax.f32 %v4387_v58, 0.0  ;;  %v9949_v57 = vld [vmem:[%s12050_s5 + $0x134] ss:$68 sps:$4 sm:$0xff]   ;;  %v9952_v58 = vld [vmem:[%s12050_s5 + $0x13c] ss:$68 sps:$4 sm:$0xff]  }
0x203f   :  { %8207 = vmatprep.mubr.msk.f32.mxu1 %vm1107_vm3, %v4390_v59  ;;  %v9947_v59 = vld [vmem:[%s12050_s5 + $0x130] ss:$68 sps:$4 sm:$0xff]  }
0x2040   :  { %4490 = vmatmul.mubr.f32.vlgmr.msra.gmra.mrb[36].mxu1 %v4389_v61  ;;  %v9955_v61 = vld [vmem:[%s12050_s5 + $0x1bc] ss:$68 sps:$4 sm:$0xff]  }
0x2041   :  { %5258 = vmatpush1.bf16.msra.mxu1 %v9866_v60  ;;  %5289 = vmatprep.mubr.bf16.mxu1 %v11673_v14  ;;  %v9950_v60 = vld [vmem:[%s12050_s5 + $0x138] ss:$68 sps:$4 sm:$0xff]  }
0x2042   :  { %5259 = vmatprep.subr.bf16.mxu1 %v9874_v62  ;;  %v9958_v62 = vld [vmem:[%s12050_s5 + $0x1c4] ss:$68 sps:$4 sm:$0xff]  }
0x2045   :  { %5260 = vmatpush1.bf16.msra.mxu1 %v9872_v63  ;;  %v9953_v63 = vld [vmem:[%s12050_s5 + $0x1b8] ss:$68 sps:$4 sm:$0xff]  }
0x2046   :  { %5261 = vmatprep.subr.bf16.mxu1 %v9880_v2  ;;  %v9956_v2 = vld [vmem:[%s12050_s5 + $0x1c0] ss:$68 sps:$4 sm:$0xff]  }
0x2049   :  { %5262 = vmatpush1.bf16.msra.mxu1 %v9878_v3  ;;  %v9961_v3 = vld [vmem:[%s12050_s5 + $0x244] ss:$68 sps:$4 sm:$0xff]  }
0x204a   :  { %5263 = vmatprep.subr.bf16.mxu1 %v9886_v4  ;;  %v9964_v4 = vld [vmem:[%s12050_s5 + $0x24c] ss:$68 sps:$4 sm:$0xff]  }
0x204d   :  { %5264 = vmatpush1.bf16.msra.mxu1 %v9884_v5  ;;  %v9959_v5 = vld [vmem:[%s12050_s5 + $0x240] ss:$68 sps:$4 sm:$0xff]  }
0x204e   :  { %5265 = vmatprep.subr.bf16.mxu1 %v9892_v6  ;;  %v9962_v6 = vld [vmem:[%s12050_s5 + $0x248] ss:$68 sps:$4 sm:$0xff]  }
0x2051   :  { %5266 = vmatpush1.bf16.msra.mxu1 %v9890_v7  ;;  %v9967_v7 = vld [vmem:[%s12050_s5 + $0x2cc] ss:$68 sps:$4 sm:$0xff]  }
0x2052   :  { %5267 = vmatprep.subr.bf16.mxu1 %v9898_v9  ;;  %v9965_v9 = vld [vmem:[%s12050_s5 + $0x2c8] ss:$68 sps:$4 sm:$0xff]  }
0x2055   :  { %5268 = vmatpush1.bf16.msra.mxu1 %v9896_v11  ;;  %v9973_v11 = vld [vmem:[%s12050_s5 + $0x34] ss:$68 sps:$4 sm:$0xff]  }
0x2056   :  { %5339 = vmatprep.subr.bf16.mxu1 %v9904_v13  ;;  %v9971_v13 = vld [vmem:[%s12050_s5 + $0x30] ss:$68 sps:$4 sm:$0xff]  }
0x2113   :  { %v4491_v16 = vpop.f32.mrb[36].mxu1 }
0x2114   :  { %v4492_v18 = vadd.f32 %v8206_v15, %v4491_v16  ;;  %v4493_v19 = vpop.f32.mrb[37].mxu1  ;;  %v9974_v15 = vld [vmem:[%s12050_s5 + $0x38] ss:$68 sps:$4 sm:$0xff]  }
0x2115   :  { %v9979_v16 = vld [vmem:[%s12050_s5 + $0xbc] ss:$68 sps:$4 sm:$0xff]  }
0x2116   :  { %v4495_v20 = vmax.f32 %v4492_v18, 0.0  ;;  %v9982_v18 = vld [vmem:[%s12050_s5 + $0xc4] ss:$68 sps:$4 sm:$0xff]   ;;  %v9977_v19 = vld [vmem:[%s12050_s5 + $0xb8] ss:$68 sps:$4 sm:$0xff]  }
0x2118   :  { %v12765_v27 = vpack.c.bf16 %v4495_v20, %v4495_v20  ;;  %v9980_v20 = vld [vmem:[%s12050_s5 + $0xc0] ss:$68 sps:$4 sm:$0xff]  }
0x211a   :  { %8311 = vmatmul.mubr.msk.bf16.vlgmr.msra.gmra.mrb[40].mxu0 %vm5212_vm15, %v12765_v27  ;;  %8312 = vmatmul.mubr.msk.bf16.vlgmr.msra.gmra.mrb[40].mxu1 %vm5212_vm15, %v12765_v27 }
0x211b   :  { %5299 = vmatpush1.bf16.msra.mxu0 %v9899_v23  ;;  %5340 = vmatpush1.bf16.msra.mxu1 %v9902_v26  ;;  %v9985_v23 = vld [vmem:[%s12050_s5 + $0x144] ss:$68 sps:$4 sm:$0xff]   ;;  %v9988_v26 = vld [vmem:[%s12050_s5 + $0x14c] ss:$68 sps:$4 sm:$0xff]  }
0x211c   :  { %5300 = vmatprep.subr.bf16.mxu0 %v9907_v36  ;;  %5341 = vmatprep.subr.bf16.mxu1 %v9910_v28  ;;  %v9983_v36 = vld [vmem:[%s12050_s5 + $0x140] ss:$68 sps:$4 sm:$0xff]   ;;  %v9986_v28 = vld [vmem:[%s12050_s5 + $0x148] ss:$68 sps:$4 sm:$0xff]  }
0x211d   :  { %5330 = vmatprep.mubr.bf16.mxu0 %v11673_v14  ;;  %5371 = vmatprep.mubr.bf16.mxu1 %v11673_v14 }
0x211f   :  { %5301 = vmatpush1.bf16.msra.mxu0 %v9905_v29  ;;  %5342 = vmatpush1.bf16.msra.mxu1 %v9908_v31  ;;  %v9991_v29 = vld [vmem:[%s12050_s5 + $0x1cc] ss:$68 sps:$4 sm:$0xff]   ;;  %v9994_v31 = vld [vmem:[%s12050_s5 + $0x1d4] ss:$68 sps:$4 sm:$0xff]  }
0x2120   :  { %5302 = vmatprep.subr.bf16.mxu0 %v9913_v33  ;;  %5343 = vmatprep.subr.bf16.mxu1 %v9916_v24  ;;  %v9989_v33 = vld [vmem:[%s12050_s5 + $0x1c8] ss:$68 sps:$4 sm:$0xff]   ;;  %v9992_v24 = vld [vmem:[%s12050_s5 + $0x1d0] ss:$68 sps:$4 sm:$0xff]  }
0x2123   :  { %5303 = vmatpush1.bf16.msra.mxu0 %v9911_v34  ;;  %5344 = vmatpush1.bf16.msra.mxu1 %v9914_v37  ;;  %v9997_v34 = vld [vmem:[%s12050_s5 + $0x254] ss:$68 sps:$4 sm:$0xff]   ;;  %v10000_v37 = vld [vmem:[%s12050_s5 + $0x25c] ss:$68 sps:$4 sm:$0xff]  }
0x2124   :  { %5304 = vmatprep.subr.bf16.mxu0 %v9919_v38  ;;  %5345 = vmatprep.subr.bf16.mxu1 %v9922_v39  ;;  %v9995_v38 = vld [vmem:[%s12050_s5 + $0x250] ss:$68 sps:$4 sm:$0xff]   ;;  %v9998_v39 = vld [vmem:[%s12050_s5 + $0x258] ss:$68 sps:$4 sm:$0xff]  }
0x2127   :  { %5305 = vmatpush1.bf16.msra.mxu0 %v9917_v40  ;;  %5346 = vmatpush1.bf16.msra.mxu1 %v9920_v41  ;;  %v10003_v40 = vld [vmem:[%s12050_s5 + $0x2dc] ss:$68 sps:$4 sm:$0xff]   ;;  %v10006_v41 = vld [vmem:[%s12050_s5 + $0x2e4] ss:$68 sps:$4 sm:$0xff]  }
0x2128   :  { %5306 = vmatprep.subr.bf16.mxu0 %v9925_v43  ;;  %5347 = vmatprep.subr.bf16.mxu1 %v9928_v44  ;;  %v10001_v43 = vld [vmem:[%s12050_s5 + $0x2d8] ss:$68 sps:$4 sm:$0xff]   ;;  %v10004_v44 = vld [vmem:[%s12050_s5 + $0x2e0] ss:$68 sps:$4 sm:$0xff]  }
0x212b   :  { %5307 = vmatpush1.bf16.msra.mxu0 %v9923_v45  ;;  %5348 = vmatpush1.bf16.msra.mxu1 %v9926_v46  ;;  %v10007_v45 = vld [vmem:[%s12050_s5 + $0x40] ss:$68 sps:$4 sm:$0xff]   ;;  %v10008_v46 = vld [vmem:[%s12050_s5 + $0xc8] ss:$68 sps:$4 sm:$0xff]  }
0x212c   :  { %5308 = vmatprep.subr.bf16.mxu0 %v9931_v17  ;;  %5349 = vmatprep.subr.bf16.mxu1 %v9934_v47  ;;  %v10009_v17 = vld [vmem:[%s12050_s5 + $0x150] ss:$68 sps:$4 sm:$0xff]   ;;  %v10010_v47 = vld [vmem:[%s12050_s5 + $0x1d8] ss:$68 sps:$4 sm:$0xff]  }
0x212f   :  { %5309 = vmatpush1.bf16.msra.mxu0 %v9929_v48  ;;  %5350 = vmatpush1.bf16.msra.mxu1 %v9932_v35  ;;  %v10011_v48 = vld [vmem:[%s12050_s5 + $0x260] ss:$68 sps:$4 sm:$0xff]   ;;  %v10012_v35 = vld [vmem:[%s12050_s5 + $0x2e8] ss:$68 sps:$4 sm:$0xff]  }
0x2130   :  { %5380 = vmatprep.subr.bf16.mxu0 %v9937_v49  ;;  %5421 = vmatprep.subr.bf16.mxu1 %v9940_v50  ;;  %v12876_v49 = vld [vmem:[#allocation91] sm:$0xff] }
0x2131   :  { %v4618_v50 = vrot.slane %v12876_v49, %v12722_v25 }
0x2132   :  { %8313 = vmatmul.mubr.msk.bf16.vlgmr.msra.gmra.mrb[44].mxu0 %vm5212_vm15, %v12765_v27  ;;  %8314 = vmatmul.mubr.msk.bf16.vlgmr.msra.gmra.mrb[44].mxu1 %vm5212_vm15, %v12765_v27 }
0x2133   :  { %5381 = vmatpush1.bf16.msra.mxu0 %v9935_v51  ;;  %5422 = vmatpush1.bf16.msra.mxu1 %v9938_v52 }
0x2134   :  { %5382 = vmatprep.subr.bf16.mxu0 %v9943_v53  ;;  %5423 = vmatprep.subr.bf16.mxu1 %v9946_v54 }
0x2135   :  { %5412 = vmatprep.mubr.bf16.mxu0 %v11673_v14  ;;  %5453 = vmatprep.mubr.bf16.mxu1 %v11673_v14 }
0x2137   :  { %5383 = vmatpush1.bf16.msra.mxu0 %v9941_v55  ;;  %5424 = vmatpush1.bf16.msra.mxu1 %v9944_v56 }
0x2138   :  { %5384 = vmatprep.subr.bf16.mxu0 %v9949_v57  ;;  %5425 = vmatprep.subr.bf16.mxu1 %v9952_v58 }
0x213b   :  { %5385 = vmatpush1.bf16.msra.mxu0 %v9947_v59  ;;  %5426 = vmatpush1.bf16.msra.mxu1 %v9950_v60 }
0x213c   :  { %5386 = vmatprep.subr.bf16.mxu0 %v9955_v61  ;;  %5427 = vmatprep.subr.bf16.mxu1 %v9958_v62 }
0x213f   :  { %5387 = vmatpush1.bf16.msra.mxu0 %v9953_v63  ;;  %5428 = vmatpush1.bf16.msra.mxu1 %v9956_v2 }
0x2140   :  { %5388 = vmatprep.subr.bf16.mxu0 %v9961_v3  ;;  %5429 = vmatprep.subr.bf16.mxu1 %v9964_v4 }
0x2143   :  { %5389 = vmatpush1.bf16.msra.mxu0 %v9959_v5  ;;  %5430 = vmatpush1.bf16.msra.mxu1 %v9962_v6  ;;  %v12886_v6 = vld [vmem:[#allocation91 + $0x8] sm:$0xff] }
0x2144   :  { %5390 = vmatprep.subr.bf16.mxu0 %v9967_v7  ;;  %5431 = vmatprep.subr.bf16.mxu1 %v9970_v8  ;;  %v12889_v7 = vsub.s32 3, %v12716_v21  ;;  %v4646_v8 = vrot.slane %v12886_v6, %v12719_v22 }
0x2147   :  { %5391 = vmatpush1.bf16.msra.mxu0 %v9965_v9  ;;  %5432 = vmatpush1.bf16.msra.mxu1 %v9968_v10  ;;  %v4650_v9 = vrot.slane %v12886_v6, %v12722_v25  ;;  %v4658_v10 = vrot.slane %v12886_v6, %v12889_v7 }
0x2148   :  { %5462 = vmatprep.subr.bf16.mxu0 %v9973_v11  ;;  %5503 = vmatprep.subr.bf16.mxu1 %v9976_v12 }
0x214a   :  { %8315 = vmatmul.mubr.msk.bf16.vlgmr.msra.gmra.mrb[48].mxu0 %vm5212_vm15, %v12765_v27  ;;  %8316 = vmatmul.mubr.msk.bf16.vlgmr.msra.gmra.mrb[48].mxu1 %vm5212_vm15, %v12765_v27 }
0x214b   :  { %5463 = vmatpush1.bf16.msra.mxu0 %v9971_v13  ;;  %5504 = vmatpush1.bf16.msra.mxu1 %v9974_v15 }
0x214c   :  { %5464 = vmatprep.subr.bf16.mxu0 %v9979_v16  ;;  %5505 = vmatprep.subr.bf16.mxu1 %v9982_v18 }
0x214d   :  { %5494 = vmatprep.mubr.bf16.mxu0 %v11673_v14  ;;  %5535 = vmatprep.mubr.bf16.mxu1 %v11673_v14 }
0x214f   :  { %5465 = vmatpush1.bf16.msra.mxu0 %v9977_v19  ;;  %5506 = vmatpush1.bf16.msra.mxu1 %v9980_v20 }
0x2150   :  { %5466 = vmatprep.subr.bf16.mxu0 %v9985_v23  ;;  %5507 = vmatprep.subr.bf16.mxu1 %v9988_v26  ;;  %v12898_v26 = vsub.s32 2, %v12716_v21 }
0x2153   :  { %5467 = vmatpush1.bf16.msra.mxu0 %v9983_v36  ;;  %5508 = vmatpush1.bf16.msra.mxu1 %v9986_v28 }
0x2154   :  { %5468 = vmatprep.subr.bf16.mxu0 %v9991_v29  ;;  %5509 = vmatprep.subr.bf16.mxu1 %v9994_v31  ;;  %v4614_v29 = vrot.slane %v12876_v49, %v12719_v22 }
0x2157   :  { %5469 = vmatpush1.bf16.msra.mxu0 %v9989_v33  ;;  %5510 = vmatpush1.bf16.msra.mxu1 %v9992_v24  ;;  %v4626_v33 = vrot.slane %v12876_v49, %v12889_v7  ;;  %v4654_v24 = vrot.slane %v12886_v6, %v12898_v26 }
0x2158   :  { %5470 = vmatprep.subr.bf16.mxu0 %v9997_v34  ;;  %5511 = vmatprep.subr.bf16.mxu1 %v10000_v37 }
0x215b   :  { %5471 = vmatpush1.bf16.msra.mxu0 %v9995_v38  ;;  %5512 = vmatpush1.bf16.msra.mxu1 %v9998_v39 }
0x215c   :  { %5472 = vmatprep.subr.bf16.mxu0 %v10003_v40  ;;  %5513 = vmatprep.subr.bf16.mxu1 %v10006_v41 }
0x215f   :  { %5473 = vmatpush1.bf16.msra.mxu0 %v10001_v43  ;;  %5514 = vmatpush1.bf16.msra.mxu1 %v10004_v44  ;;  %v12907_v43 = vsub.s32 5, %v12716_v21 }
0x2160   :  { %9128 = vmatprep.subr.bf16.mxu0 %v11668_v1 }
0x2162   :  { %8317 = vmatmul.mubr.msk.bf16.vlgmr.msra.gmra.mrb[52].mxu0 %vm5212_vm15, %v12765_v27  ;;  %8318 = vmatmul.mubr.msk.bf16.vlgmr.msra.gmra.mrb[52].mxu1 %vm5212_vm15, %v12765_v27 }
0x2163   :  { %9129 = vmatpush3.bf16.msra.mxu0 %v10007_v45  ;;  %9140 = vmatprep.mubr.msk.bf16.mxu0 %vm11667_vm0, %v11668_v1 }
0x2164   :  { %9130 = vmatprep.subr.bf16.mxu0 %v11668_v1 }
0x2167   :  { %9131 = vmatpush3.bf16.msra.mxu0 %v10008_v46  ;;  %v4622_v46 = vrot.slane %v12876_v49, %v12898_v26 }
0x2168   :  { %9132 = vmatprep.subr.bf16.mxu0 %v11668_v1 }
0x216b   :  { %9133 = vmatpush3.bf16.msra.mxu0 %v10009_v17  ;;  %v4634_v17 = vrot.slane %v12876_v49, %v12907_v43 }
0x216c   :  { %9134 = vmatprep.subr.bf16.mxu0 %v11668_v1 }
0x216f   :  { %9135 = vmatpush3.bf16.msra.mxu0 %v10010_v47  ;;  %v12914_v47 = vsub.s32 4, %v12716_v21 }
0x2170   :  { %9136 = vmatprep.subr.bf16.mxu0 %v11668_v1 }
0x2173   :  { %9137 = vmatpush3.bf16.msra.mxu0 %v10011_v48 }
0x2174   :  { %9138 = vmatprep.subr.bf16.mxu0 %v11668_v1 }
0x2177   :  { %9139 = vmatpush3.bf16.msra.mxu0 %v10012_v35  ;;  %v12917_v35 = vsub.s32 7, %v12716_v21 }
0x2178   :  { %9144 = vmatprep.subr.mxu0 %v11668_v1 }
0x217a   :  { %9141 = vmatmul.mubr.msk.bf16.vlgmr.msra.gmra.mrb[56].mxu0 %vm5212_vm15, %v12765_v27 }
0x217b   :  { %9146 = vmatprep.mubr.msk.f32.mxu0 %vm11667_vm0, %v11668_v1 }
0x21ed   :  { %v5250_v51 = vpop.f32.mrb[40].mxu0  ;;  %v5291_v52 = vpop.f32.mrb[40].mxu1 }
0x21ee   :  { %v5252_v53 = vpop.f32.mrb[41].mxu0  ;;  %v5293_v54 = vpop.f32.mrb[41].mxu1  ;;  %v5251_v38 = vadd.f32 %v5250_v51, %v4614_v29  ;;  %v5292_v48 = vadd.f32 %v5291_v52, %v4622_v46  ;;  %v4662_v51 = vrot.slane %v12886_v6, %v12914_v47  ;;  %v8208_v29 = vld [vmem:[#allocation91 + $0x10] ss:$0 sm:$0xff] }
0x21ef   :  { %v5253_v55 = vadd.f32 %v5252_v53, %v4618_v50  ;;  %v5254_v56 = vpop.f32.mrb[42].mxu0  ;;  %v5295_v57 = vpop.f32.mrb[42].mxu1  ;;  %v5294_v39 = vadd.f32 %v5293_v54, %v4626_v33  ;;  %v4666_v53 = vrot.slane %v12886_v6, %v12907_v43  ;;  %v4674_v54 = vrot.slane %v12886_v6, %v12917_v35 }
0x21f0   :  { %v5255_v58 = vpop.f32.mrb[43].mxu0  ;;  %v5296_v59 = vpop.f32.mrb[43].mxu1  ;;  %v5609_v41 = vpack.c.bf16 %v5251_v38, %v5251_v38  ;;  %v5611_v57 = vpack.c.bf16 %v5292_v48, %v5292_v48 }
0x21f1   :  { %v5610_v60 = vpack.c.bf16 %v5253_v55, %v5253_v55  ;;  %v5612_v45 = vpack.c.bf16 %v5294_v39, %v5294_v39  ;;  %v12941_v39 = vmul.f32 0.17677669, %v12580_v42 }
0x21f3   :  { %5666 = vmatprep.mubr.bf16.mxu1 %v5610_v60 }
0x2205   :  { %v12880_v27 = vpop.f32.mrb[44].mxu0  ;;  %v12882_v61 = vpop.f32.mrb[44].mxu1 }
0x2206   :  { %v5334_v62 = vpop.f32.mrb[45].mxu0  ;;  %v12884_v63 = vpop.f32.mrb[45].mxu1 }
0x2207   :  { %v5336_v2 = vpop.f32.mrb[46].mxu0  ;;  %v5377_v3 = vpop.f32.mrb[46].mxu1  ;;  %v5335_v50 = vadd.f32 %v5334_v62, %v4634_v17 }
0x2208   :  { %v5337_v4 = vpop.f32.mrb[47].mxu0  ;;  %v5378_v5 = vpop.f32.mrb[47].mxu1 }
0x2209   :  { %v5614_v52 = vpack.c.bf16 %v5335_v50, %v5335_v50  ;;  %v12926_v5 = vsub.s32 6, %v12716_v21 }
0x221d   :  { %v5414_v11 = vpop.f32.mrb[48].mxu0  ;;  %v5455_v12 = vpop.f32.mrb[48].mxu1 }
0x221e   :  { %v5415_v13 = vadd.f32 %v5414_v11, %v4646_v8  ;;  %v5416_v15 = vpop.f32.mrb[49].mxu0  ;;  %v5457_v16 = vpop.f32.mrb[49].mxu1  ;;  %v5456_v40 = vadd.f32 %v5455_v12, %v4654_v24  ;;  %v4642_v12 = vrot.slane %v12876_v49, %v12917_v35 }
0x221f   :  { %v5417_v18 = vadd.f32 %v5416_v15, %v4650_v9  ;;  %v5458_v19 = vadd.f32 %v5457_v16, %v4658_v10  ;;  %v5418_v20 = vpop.f32.mrb[50].mxu0  ;;  %v5459_v23 = vpop.f32.mrb[50].mxu1  ;;  %v4630_v10 = vrot.slane %v12876_v49, %v12914_v47 }
0x2220   :  { %v5419_v36 = vpop.f32.mrb[51].mxu0  ;;  %v5460_v28 = vpop.f32.mrb[51].mxu1  ;;  %v5625_v34 = vpack.c.bf16 %v5415_v13, %v5415_v13  ;;  %v5627_v44 = vpack.c.bf16 %v5456_v40, %v5456_v40  ;;  %v4670_v13 = vrot.slane %v12886_v6, %v12926_v5 }
0x2221   :  { %v5626_v31 = vpack.c.bf16 %v5417_v18, %v5417_v18  ;;  %v5628_v37 = vpack.c.bf16 %v5458_v19, %v5458_v19  ;;  %v5333_v21 = vadd.f32 %v12880_v27, %v4630_v10  ;;  %v5376_v18 = vadd.f32 %v12884_v63, %v4642_v12  ;;  %v5894_v12 = vld [vmem:[#allocation83 + $0x10] sm:$0xff] }
0x2222   :  { %v4638_v28 = vrot.slane %v12876_v49, %v12926_v5 }
0x2223   :  { %5634 = vmatprep.subr.bf16.mxu1 %v5626_v31  ;;  %v5613_v20 = vpack.c.bf16 %v5333_v21, %v5333_v21  ;;  %v5616_v36 = vpack.c.bf16 %v5376_v18, %v5376_v18  ;;  %v5897_v21 = vld [vmem:[#allocation83 + $0x28] sm:$0xff]  ;;  %v5899_v18 = vld [vmem:[#allocation83 + $0x38] sm:$0xff] }
0x2224   :  { %5635 = vmatpush1.bf16.xpose.msra.mxu1 %v5625_v34  ;;  %v5374_v6 = vadd.f32 %v12882_v61, %v4638_v28  ;;  %v5901_v28 = vld [vmem:[#allocation83 + $0x48] sm:$0xff] }
0x2225   :  { %5674 = vmatprep.subr.bf16.mxu1 %v5628_v37 }
0x2226   :  { %v5615_v33 = vpack.c.bf16 %v5374_v6, %v5374_v6  ;;  %v5903_v6 = vld [vmem:[#allocation83 + $0x58] sm:$0xff] }
0x222b   :  { %5667 = vmatmul.mubr.bf16.vlgmr.msra.gmra.mrb[56].mxu1 %v5609_v41 }
0x222c   :  { %5675 = vmatpush1.bf16.xpose.msra.mxu1 %v5627_v44  ;;  %5706 = vmatprep.mubr.bf16.mxu1 %v5612_v45  ;;  %v2955_v44 = vsel %vm2300_vm8, %v12941_v39, -inf  ;;  %v10189_v45 = vld [vmem:[#allocation3] sm:$0xff] }
0x2235   :  { %v5496_v55 = vpop.f32.mrb[52].mxu0  ;;  %v5537_v56 = vpop.f32.mrb[52].mxu1 }
0x2236   :  { %v5497_v58 = vadd.f32 %v5496_v55, %v4662_v51  ;;  %v5498_v59 = vpop.f32.mrb[53].mxu0  ;;  %v5539_v60 = vpop.f32.mrb[53].mxu1  ;;  %v5538_v19 = vadd.f32 %v5537_v56, %v4670_v13  ;;  %v5893_v51 = vld [vmem:[#allocation83 + $0x8] sm:$0xff] }
0x2237   :  { %v5499_v2 = vadd.f32 %v5498_v59, %v4666_v53  ;;  %v5540_v3 = vadd.f32 %v5539_v60, %v4674_v54  ;;  %v5500_v4 = vpop.f32.mrb[54].mxu0  ;;  %v5541_v62 = vpop.f32.mrb[54].mxu1  ;;  %5707 = vmatmul.mubr.bf16.vlgmr.msra.gmra.mrb[56].mxu1 %v5611_v57  ;;  %v5895_v53 = vld [vmem:[#allocation83 + $0x18] sm:$0xff] }
0x2238   :  { %v5501_v8 = vpop.f32.mrb[55].mxu0  ;;  %v5542_v9 = vpop.f32.mrb[55].mxu1  ;;  %5746 = vmatprep.mubr.bf16.mxu1 %v5614_v52  ;;  %v5629_v15 = vpack.c.bf16 %v5497_v58, %v5497_v58  ;;  %v5631_v23 = vpack.c.bf16 %v5538_v19, %v5538_v19  ;;  %v9557_v54 = vpack.c.bf16 %v5895_v53, %v5893_v51  ;;  %v10190_v58 = vld [vmem:[#allocation10] sm:$0xff]  ;;  %v9561_v19 = vpack.c.bf16 %v5899_v18, %v5897_v21  ;;  %v6008_v53 = vld [vmem:[#allocation86 + $0x40] sm:$0xff] }
0x2239   :  { %v5630_v11 = vpack.c.bf16 %v5499_v2, %v5499_v2  ;;  %v5632_v16 = vpack.c.bf16 %v5540_v3, %v5540_v3  ;;  %v6027_v21 = vld [vmem:[#allocation86 + $0xd8] sm:$0xff] }
0x223b   :  { %5714 = vmatprep.subr.bf16.mxu1 %v5630_v11  ;;  %v5892_v11 = vld [vmem:[#allocation83] sm:$0xff] }
0x223c   :  { %5715 = vmatpush1.bf16.xpose.msra.mxu1 %v5629_v15  ;;  %v9559_v15 = vpack.c.bf16 %v5894_v12, %v5892_v11 }
0x223d   :  { %5754 = vmatprep.subr.bf16.mxu1 %v5632_v16 }
0x2243   :  { %5747 = vmatmul.mubr.bf16.vlgmr.msra.gmra.mrb[56].mxu1 %v5613_v20  ;;  %v5896_v20 = vld [vmem:[#allocation83 + $0x20] sm:$0xff] }
0x2244   :  { %5755 = vmatpush1.bf16.xpose.msra.mxu1 %v5631_v23  ;;  %5786 = vmatprep.mubr.bf16.mxu1 %v5616_v36  ;;  %v5898_v23 = vld [vmem:[#allocation83 + $0x30] sm:$0xff] }
0x2245   :  { %v9563_v36 = vpack.c.bf16 %v5898_v23, %v5896_v20  ;;  %v6024_v20 = vld [vmem:[#allocation86 + $0xc0] sm:$0xff]  ;;  %v6026_v23 = vld [vmem:[#allocation86 + $0xd0] sm:$0xff] }
0x224d   :  { %v5578_v31 = vpop.f32.mrb[56].mxu0 }
0x224e   :  { %v5579_v24 = vadd.f32 %v8208_v29, %v5578_v31  ;;  %v9142_v27 = vpop.f32.mrb[57].mxu0  ;;  %v9565_v29 = vpack.c.bf16 %v5903_v6, %v5901_v28  ;;  %v5900_v31 = vld [vmem:[#allocation83 + $0x40] sm:$0xff]  ;;  %v6031_v28 = vld [vmem:[#allocation86 + $0xf8] sm:$0xff]  ;;  %v9595_v6 = vpack.c.bf16 %v6026_v23, %v6024_v20 }
0x224f   :  { %v5581_v34 = vpop.f32.mrb[58].mxu0  ;;  %5787 = vmatmul.mubr.bf16.vlgmr.msra.gmra.mrb[56].mxu1 %v5615_v33  ;;  %v5902_v33 = vld [vmem:[#allocation83 + $0x50] sm:$0xff]  ;;  %v5905_v27 = vld [vmem:[#allocation83 + $0x68] sm:$0x3]  ;;  %v6144_v20 = vld [vmem:[%s13394_s19 + $0x40] sm:$0xff] }
0x2250   :  { %5600 = vst.msk [vmem:[#allocation4 + $0x80] sm:$0xff] %vm3074_vm12, %v5579_v24  ;;  %v9143_v63 = vpop.f32.mrb[59].mxu0  ;;  %v9567_v24 = vpack.c.bf16 %v5902_v33, %v5900_v31  ;;  %v5904_v34 = vld [vmem:[#allocation83 + $0x60] sm:$0x3]  ;;  %v6028_v31 = vld [vmem:[#allocation86 + $0xe0] sm:$0xff]  ;;  %v6030_v33 = vld [vmem:[#allocation86 + $0xf0] sm:$0xff] }
0x2251   :  { %v6001_v63 = vld [vmem:[#allocation86 + $0x8] sm:$0xff]  ;;  %v6145_v23 = vld [vmem:[%s13394_s19 + $0x48] sm:$0xff] }
0x2257   :  { %v5633_v37 = vld [vmem:[#allocation4 + $0x80] sm:$0xff] }
0x2258   :  { %9145 = vmatpush3.msra.mxu0 %v5633_v37  ;;  %v6003_v37 = vld [vmem:[#allocation86 + $0x18] sm:$0xff] }
0x2259   :  { %9558 = vmatprep.subr.bf16.mxu0 %v9557_v54  ;;  %v6010_v54 = vld [vmem:[#allocation86 + $0x50] sm:$0xff] }
0x2322   :  { %v5788_v38 = vpop.f32.mrb[56].mxu1 }
0x2323   :  { %v5790_v40 = vpop.f32.mrb[57].mxu1  ;;  %v5794_v49 = vsel %vm2300_vm8, %v5788_v38, -inf }
0x2324   :  { %5795 = vmax.xlane.f32.xlu1 %v5794_v49  ;;  %v5791_v61 = vpop.f32.mrb[58].mxu1  ;;  %v9569_v40 = vpack.c.bf16 %v6003_v37, %v6001_v63  ;;  %v6002_v49 = vld [vmem:[#allocation86 + $0x10] sm:$0xff]  ;;  %v6032_v37 = vld [vmem:[#allocation86 + $0x100] sm:$0xff] }
0x2325   :  { %v5792_v41 = vpop.f32.mrb[59].mxu1  ;;  %v6005_v61 = vld [vmem:[#allocation86 + $0x28] sm:$0xff] }
0x2326   :  { %v6007_v41 = vld [vmem:[#allocation86 + $0x38] sm:$0xff]  ;;  %9570 = vmatprep.subr.bf16.mxu1 %v9569_v40  ;;  %v6037_v40 = vld [vmem:[#allocation86 + $0x128] sm:$0xff] }
0x2328   :  { %2956 = vmax.xlane.f32.xlu1 %v2955_v44 }
0x2339   :  { %7992 = vrot.lane.b32.xlu1 %v10189_v45, %s11609_s21  ;;  %v9573_v45 = vpack.c.bf16 %v6007_v41, %v6005_v61  ;;  %s13395_s21 = sld [smem:[#allocation172_spill]] }
0x23b1   :  { %v5796_v46 = vpop.xlane.xlu1 %5795 }
0x23b2   :  { %v5797_v17 = vsub.f32 %v5788_v38, %v5796_v46  ;;  %v6000_v38 = vld [vmem:[#allocation86] sm:$0xff] }
0x23b3   :  { %v9571_v44 = vpack.c.bf16 %v6002_v49, %v6000_v38  ;;  %v6004_v46 = vld [vmem:[#allocation86 + $0x20] sm:$0xff]  ;;  %v6034_v38 = vld [vmem:[#allocation86 + $0x110] sm:$0xff]  ;;  %v6039_v49 = vld [vmem:[#allocation86 + $0x138] sm:$0xff] }
0x23b4   :  { %v5798_v48 = vmul.f32 1.442695, %v5797_v17  ;;  %v6006_v17 = vld [vmem:[#allocation86 + $0x30] sm:$0xff]  ;;  %v9603_v61 = vpack.c.bf16 %v6034_v38, %v6032_v37  ;;  %v9605_v41 = vpack.c.bf16 %v6039_v49, %v6037_v40  ;;  %v6154_v49 = vld [vmem:[%s13394_s19 + $0x90] sm:$0xff] }
0x23b5   :  { %9572 = vmatpush1.bf16.msra.mxu1 %v9571_v44  ;;  %v6036_v44 = vld [vmem:[#allocation86 + $0x120] sm:$0xff]  ;;  %v6152_v37 = vld [vmem:[%s13394_s19 + $0x80] sm:$0xff]  ;;  %v6153_v38 = vld [vmem:[%s13394_s19 + $0x88] sm:$0xff] }
0x23b6   :  { %10173 = vpow2.f32 %v5798_v48  ;;  %v6009_v48 = vld [vmem:[#allocation86 + $0x48] sm:$0xff]  ;;  %9574 = vmatprep.subr.bf16.mxu1 %v9573_v45  ;;  %v6038_v45 = vld [vmem:[#allocation86 + $0x130] sm:$0xff]  ;;  %v9642_v40 = vpack.c.bf16 %v6153_v38, %v6152_v37  ;;  %v10048_v38 = vld [vmem:[%s12050_s5 + $0x2b4] ss:$68 sps:$4 sm:$0xff]  }
0x23b7   :  { %v10045_v37 = vld [vmem:[%s12050_s5 + $0x2ac] ss:$68 sps:$4 sm:$0xff]  }
0x23c0   :  { %v10174_v50 = vpop.eup %10173 }
0x23c1   :  { %v5800_v42 = vsel %vm2300_vm8, %v10174_v50, 0.0 }
0x23c2   :  { %5801 = vadd.xlane.f32.xlu0 %v5800_v42  ;;  %v9575_v42 = vpack.c.bf16 %v6006_v17, %v6004_v46  ;;  %v6041_v46 = vld [vmem:[#allocation86 + $0x148] sm:$0xff]  ;;  %v6043_v17 = vld [vmem:[#allocation86 + $0x158] sm:$0xff] }
0x23c4   :  { %9576 = vmatpush1.bf16.msra.mxu1 %v9575_v42 }
0x244f   :  { %v5802_v55 = vpop.xlane.xlu0 %5801 }
0x2450   :  { %10175 = vrcp.f32 %v5802_v55  ;;  %v6013_v55 = vld [vmem:[#allocation86 + $0x68] sm:$0xff] }
0x245a   :  { %v10176_v56 = vpop.eup %10175 }
0x245b   :  { %v5804_v57 = vmul.f32 %v10176_v56, %v10174_v50  ;;  %v6011_v50 = vld [vmem:[#allocation86 + $0x58] sm:$0xff] }
0x245c   :  { %v9577_v51 = vpack.c.bf16 %v6011_v50, %v6009_v48  ;;  %v6015_v56 = vld [vmem:[#allocation86 + $0x78] sm:$0xff]  ;;  %v9607_v48 = vpack.c.bf16 %v6038_v45, %v6036_v44  ;;  %v9609_v50 = vpack.c.bf16 %v6043_v17, %v6041_v46 }
0x245d   :  { %v5805_v59 = vmul.f32 %v10190_v58, %v5804_v57  ;;  %v9579_v57 = vpack.c.bf16 %v6010_v54, %v6008_v53  ;;  %v9581_v58 = vpack.c.bf16 %v6015_v56, %v6013_v55  ;;  %v6040_v56 = vld [vmem:[#allocation86 + $0x140] sm:$0xff]  ;;  %v5906_v44 = vld [vmem:[#allocation85] sm:$0x3] }
0x245e   :  { %9578 = vmatprep.subr.bf16.mxu1 %v9577_v51  ;;  %v10191_v51 = vld [vmem:[#allocation2] sm:$0xff]  ;;  %v5911_v45 = vrot.slane %v5906_v44, %v12719_v22  ;;  %v5915_v46 = vrot.slane %v5906_v44, %v12722_v25  ;;  %v8325_v44 = vld [vmem:[#allocation89] ss:$0 sm:$0xff] }
0x245f   :  { %v5806_v60 = vand.u32 2147483647, %v5805_v59  ;;  %9580 = vmatpush1.bf16.msra.mxu1 %v9579_v57  ;;  %v6042_v57 = vld [vmem:[#allocation86 + $0x150] sm:$0xff] }
0x2460   :  { %9582 = vmatprep.subr.bf16.mxu1 %v9581_v58  ;;  %v9611_v58 = vpack.c.bf16 %v6042_v57, %v6040_v56  ;;  %v6158_v57 = vld [vmem:[%s13394_s19 + $0xb0] sm:$0xff] }
0x2461   :  { %v5807_v52 = vsel %vm2300_vm8, %v5806_v60, 0.0  ;;  %v6014_v60 = vld [vmem:[#allocation86 + $0x70] sm:$0xff] }
0x2462   :  { %v5808_v2 = vrot.slane %v5807_v52, 4 }
0x2464   :  { %v5809_v3 = vadd.f32 %v5808_v2, %v5807_v52  ;;  %v6017_v52 = vld [vmem:[#allocation86 + $0x88] sm:$0xff]  ;;  %v6019_v2 = vld [vmem:[#allocation86 + $0x98] sm:$0xff] }
0x2466   :  { %v5810_v4 = vrot.slane %v5809_v3, 2 }
0x2468   :  { %v5811_v62 = vadd.f32 %v5810_v4, %v5809_v3  ;;  %v9585_v4 = vpack.c.bf16 %v6019_v2, %v6017_v52  ;;  %v6044_v2 = vld [vmem:[#allocation86 + $0x160] sm:$0xff] }
0x246a   :  { %v5812_v8 = vrot.slane %v5811_v62, 1 }
0x246c   :  { %v5813_v9 = vadd.f32 %v5812_v8, %v5811_v62  ;;  %v6016_v62 = vld [vmem:[#allocation86 + $0x80] sm:$0xff]  ;;  %v6018_v8 = vld [vmem:[#allocation86 + $0x90] sm:$0xff] }
0x246d   :  { %v9587_v11 = vpack.c.bf16 %v6018_v8, %v6016_v62  ;;  %v6136_v62 = vld [vmem:[%s13394_s19] sm:$0xff]  ;;  %v6137_v8 = vld [vmem:[%s13394_s19 + $0x8] sm:$0xff] }
0x246e   :  { %v5814_v10 = vmax.f32 %v5813_v9, 1e-12  ;;  %v6021_v9 = vld [vmem:[#allocation86 + $0xa8] sm:$0xff] }
0x2470   :  { %10177 = vrcp.f32 %v5814_v10  ;;  %v6023_v10 = vld [vmem:[#allocation86 + $0xb8] sm:$0xff] }
0x2471   :  { %v9589_v12 = vpack.c.bf16 %v6023_v10, %v6021_v9  ;;  %v6138_v9 = vld [vmem:[%s13394_s19 + $0x10] sm:$0xff]  ;;  %v9618_v10 = vpack.c.bf16 %v6137_v8, %v6136_v62 }
0x2472   :  { %v10027_v62 = vld [vmem:[%s12050_s5 + $0x114] ss:$68 sps:$4 sm:$0xff]  }
0x2473   :  { %v10025_v8 = vld [vmem:[%s12050_s5 + $0x110] ss:$68 sps:$4 sm:$0xff]  }
0x247a   :  { %v10178_v13 = vpop.eup %10177 }
0x247b   :  { %v5816_v16 = vmul.f32 %v10178_v13, %v5805_v59  ;;  %v6012_v59 = vld [vmem:[#allocation86 + $0x60] sm:$0xff] }
0x247c   :  { %v9583_v3 = vpack.c.bf16 %v6014_v60, %v6012_v59  ;;  %v6020_v13 = vld [vmem:[#allocation86 + $0xa0] sm:$0xff]  ;;  %v6045_v59 = vld [vmem:[#allocation86 + $0x168] sm:$0xff]  ;;  %v6047_v60 = vld [vmem:[#allocation86 + $0x178] sm:$0xff] }
0x247d   :  { %9147 = vmatmul.mubr.msk.f32.vlgmr.msra.gmra.mrb[60].mxu0 %vm2300_vm8, %v5816_v16  ;;  %v6025_v16 = vld [vmem:[#allocation86 + $0xc8] sm:$0xff]  ;;  %v9613_v52 = vpack.c.bf16 %v6047_v60, %v6045_v59 }
0x247e   :  { %9560 = vmatpush1.bf16.msra.mxu0 %v9559_v15  ;;  %5991 = vmatprep.mubr.f32.mxu0 %v11668_v1  ;;  %v6022_v15 = vld [vmem:[#allocation86 + $0xb0] sm:$0xff] }
0x247f   :  { %9562 = vmatprep.subr.bf16.mxu0 %v9561_v19  ;;  %9584 = vmatpush1.bf16.msra.mxu1 %v9583_v3  ;;  %v9591_v18 = vpack.c.bf16 %v6022_v15, %v6020_v13  ;;  %v9593_v19 = vpack.c.bf16 %v6027_v21, %v6025_v16  ;;  %v6046_v3 = vld [vmem:[#allocation86 + $0x170] sm:$0xff]  ;;  %v6142_v21 = vld [vmem:[%s13394_s19 + $0x30] sm:$0xff] }
0x2480   :  { %9586 = vmatprep.subr.bf16.mxu1 %v9585_v4  ;;  %v9615_v4 = vpack.c.bf16 %v6046_v3, %v6044_v2  ;;  %v6140_v13 = vld [vmem:[%s13394_s19 + $0x20] sm:$0xff]  ;;  %v6141_v15 = vld [vmem:[%s13394_s19 + $0x28] sm:$0xff] }
0x2481   :  { %v9624_v16 = vpack.c.bf16 %v6141_v15, %v6140_v13  ;;  %v10013_v60 = vld [vmem:[%s12050_s5] ss:$68 sps:$4 sm:$0xff]   ;;  %v10018_v2 = vld [vmem:[%s12050_s5 + $0xc] ss:$68 sps:$4 sm:$0xff]   ;;  %v6048_v13 = vld [vmem:[#allocation88] sm:$0x3] }
0x2482   :  { %9564 = vmatpush1.bf16.msra.mxu0 %v9563_v36  ;;  %v6029_v36 = vld [vmem:[#allocation86 + $0xe8] sm:$0xff]  ;;  %v10021_v3 = vld [vmem:[%s12050_s5 + $0x8c] ss:$68 sps:$4 sm:$0xff]   ;;  %v6053_v15 = vrot.slane %v6048_v13, %v12719_v22 }
0x2483   :  { %9566 = vmatprep.subr.bf16.mxu0 %v9565_v29  ;;  %9588 = vmatpush1.bf16.msra.mxu1 %v9587_v11  ;;  %v9597_v29 = vpack.c.bf16 %v6031_v28, %v6029_v36  ;;  %v6139_v11 = vld [vmem:[%s13394_s19 + $0x18] sm:$0xff]  ;;  %v9630_v36 = vpack.c.bf16 %v6145_v23, %v6144_v20  ;;  %v6146_v28 = vld [vmem:[%s13394_s19 + $0x50] sm:$0xff] }
0x2484   :  { %9590 = vmatprep.subr.bf16.mxu1 %v9589_v12  ;;  %v9621_v12 = vpack.c.bf16 %v6139_v11, %v6138_v9  ;;  %v10033_v9 = vld [vmem:[%s12050_s5 + $0x19c] ss:$68 sps:$4 sm:$0xff]   ;;  %v10039_v11 = vld [vmem:[%s12050_s5 + $0x224] ss:$68 sps:$4 sm:$0xff]  }
0x2486   :  { %9568 = vmatpush1.bf16.msra.mxu0 %v9567_v24  ;;  %v6033_v24 = vld [vmem:[#allocation86 + $0x108] sm:$0xff] }
0x2487   :  { %8321 = vmatprep.subr.msk.mxu0 %vm1017_vm1, %v5905_v27  ;;  %9592 = vmatpush1.bf16.msra.mxu1 %v9591_v18  ;;  %v6035_v27 = vld [vmem:[#allocation86 + $0x118] sm:$0xff]  ;;  %v6143_v18 = vld [vmem:[%s13394_s19 + $0x38] sm:$0xff] }
0x2488   :  { %9594 = vmatprep.subr.bf16.mxu1 %v9593_v19  ;;  %v9601_v63 = vpack.c.bf16 %v6035_v27, %v6033_v24  ;;  %v9627_v19 = vpack.c.bf16 %v6143_v18, %v6142_v21  ;;  %v6150_v27 = vld [vmem:[%s13394_s19 + $0x70] sm:$0xff] }
0x248a   :  { %8322 = vmatpush1.msk.msra.mxu0 %vm1017_vm1, %v5904_v34  ;;  %v9599_v34 = vpack.c.bf16 %v6030_v33, %v6028_v31  ;;  %v6148_v31 = vld [vmem:[%s13394_s19 + $0x60] sm:$0xff]  ;;  %v6149_v33 = vld [vmem:[%s13394_s19 + $0x68] sm:$0xff] }
0x248b   :  { %9617 = vmatprep.subr.bf16.mxu0 %v11666_v0  ;;  %9596 = vmatpush1.bf16.msra.mxu1 %v9595_v6  ;;  %v6147_v6 = vld [vmem:[%s13394_s19 + $0x58] sm:$0xff]  ;;  %v9636_v24 = vpack.c.bf16 %v6149_v33, %v6148_v31 }
0x248c   :  { %9598 = vmatprep.subr.bf16.mxu1 %v9597_v29  ;;  %v9633_v29 = vpack.c.bf16 %v6147_v6, %v6146_v28  ;;  %v10024_v6 = vld [vmem:[%s12050_s5 + $0x94] ss:$68 sps:$4 sm:$0xff]   ;;  %v10030_v31 = vld [vmem:[%s12050_s5 + $0x11c] ss:$68 sps:$4 sm:$0xff]  }
0x248d   :  { %v10028_v33 = vld [vmem:[%s12050_s5 + $0x118] ss:$68 sps:$4 sm:$0xff]  }
0x248f   :  { %9600 = vmatpush1.bf16.msra.mxu1 %v9599_v34  ;;  %v6151_v34 = vld [vmem:[%s13394_s19 + $0x78] sm:$0xff] }
0x2490   :  { %9602 = vmatprep.subr.bf16.mxu1 %v9601_v63  ;;  %v9639_v63 = vpack.c.bf16 %v6151_v34, %v6150_v27  ;;  %v10034_v27 = vld [vmem:[%s12050_s5 + $0x1a0] ss:$68 sps:$4 sm:$0xff]   ;;  %v10042_v34 = vld [vmem:[%s12050_s5 + $0x22c] ss:$68 sps:$4 sm:$0xff]  }
0x2493   :  { %9604 = vmatpush1.bf16.msra.mxu1 %v9603_v61  ;;  %v6155_v61 = vld [vmem:[%s13394_s19 + $0x98] sm:$0xff] }
0x2494   :  { %9606 = vmatprep.subr.bf16.mxu1 %v9605_v41  ;;  %v9645_v41 = vpack.c.bf16 %v6155_v61, %v6154_v49  ;;  %v10046_v49 = vld [vmem:[%s12050_s5 + $0x2b0] ss:$68 sps:$4 sm:$0xff]  }
0x2495   :  { %v10051_v61 = vld [vmem:[%s12050_s5 + $0x14] ss:$68 sps:$4 sm:$0xff]  }
0x2497   :  { %9608 = vmatpush1.bf16.msra.mxu1 %v9607_v48 }
0x2498   :  { %9610 = vmatprep.subr.bf16.mxu1 %v9609_v50 }
0x249b   :  { %9612 = vmatpush1.bf16.msra.mxu1 %v9611_v58  ;;  %v6159_v58 = vld [vmem:[%s13394_s19 + $0xb8] sm:$0xff] }
0x249c   :  { %9614 = vmatprep.subr.bf16.mxu1 %v9613_v52  ;;  %v9651_v59 = vpack.c.bf16 %v6159_v58, %v6158_v57  ;;  %v10015_v52 = vld [vmem:[%s12050_s5 + $0x4] ss:$68 sps:$4 sm:$0xff]   ;;  %v10066_v58 = vld [vmem:[%s12050_s5 + $0x12c] ss:$68 sps:$4 sm:$0xff]  }
0x249d   :  { %v10063_v57 = vld [vmem:[%s12050_s5 + $0x124] ss:$68 sps:$4 sm:$0xff]  }
0x249f   :  { %9616 = vmatpush1.bf16.msra.mxu1 %v9615_v4  ;;  %v10019_v4 = vld [vmem:[%s12050_s5 + $0x88] ss:$68 sps:$4 sm:$0xff]  }
0x24a0   :  { %6960 = vmatprep.subr.bf16.mxu1 %v10015_v52  ;;  %v10069_v52 = vld [vmem:[%s12050_s5 + $0x1ac] ss:$68 sps:$4 sm:$0xff]  }
0x2550   :  { %v5886_v42 = vpop.f32.mrb[60].mxu0 }
0x2551   :  { %v5887_v53 = vadd.f32 %v10191_v51, %v5886_v42  ;;  %v9148_v54 = vpop.f32.mrb[61].mxu0 }
0x2552   :  { %v6156_v54 = vld [vmem:[%s13394_s19 + $0xa0] sm:$0xff] }
0x2553   :  { %5890 = vst.msk [vmem:[#allocation2] sm:$0xff] %vm3074_vm12, %v5887_v53 }
0x255a   :  { %v5891_v55 = vld [vmem:[#allocation2] sm:$0xff] }
0x255b   :  { %8323 = vmatmul.mubr.msk.f32.vlgmr.msra.gmra.mrb[62].mxu0 %vm3074_vm12, %v5891_v55  ;;  %v6157_v55 = vld [vmem:[%s13394_s19 + $0xa8] sm:$0xff] }
0x255c   :  { %9619 = vmatpush1.bf16.msra.mxu0 %v9618_v10  ;;  %v9648_v56 = vpack.c.bf16 %v6157_v55, %v6156_v54  ;;  %v10031_v10 = vld [vmem:[%s12050_s5 + $0x198] ss:$68 sps:$4 sm:$0xff]   ;;  %v10060_v54 = vld [vmem:[%s12050_s5 + $0xa4] ss:$68 sps:$4 sm:$0xff]  }
0x255d   :  { %9620 = vmatprep.subr.bf16.mxu0 %v11666_v0  ;;  %v10055_v55 = vld [vmem:[%s12050_s5 + $0x98] ss:$68 sps:$4 sm:$0xff]  }
0x2560   :  { %9622 = vmatpush1.bf16.msra.mxu0 %v9621_v12  ;;  %v10037_v12 = vld [vmem:[%s12050_s5 + $0x220] ss:$68 sps:$4 sm:$0xff]  }
0x2561   :  { %9623 = vmatprep.subr.bf16.mxu0 %v11666_v0 }
0x2564   :  { %9625 = vmatpush1.bf16.msra.mxu0 %v9624_v16  ;;  %v6057_v16 = vrot.slane %v6048_v13, %v12722_v25  ;;  %v10079_v13 = vld [vmem:[%s12050_s5 + $0x2b8] ss:$68 sps:$4 sm:$0xff]  }
0x2565   :  { %9626 = vmatprep.subr.bf16.mxu0 %v11666_v0 }
0x2568   :  { %9628 = vmatpush1.bf16.msra.mxu0 %v9627_v19 }
0x2569   :  { %9629 = vmatprep.subr.bf16.mxu0 %v11666_v0 }
0x256c   :  { %9631 = vmatpush1.bf16.msra.mxu0 %v9630_v36  ;;  %v10016_v36 = vld [vmem:[%s12050_s5 + $0x8] ss:$68 sps:$4 sm:$0xff]  }
0x256d   :  { %9632 = vmatprep.subr.bf16.mxu0 %v11666_v0 }
0x2570   :  { %9634 = vmatpush1.bf16.msra.mxu0 %v9633_v29  ;;  %v10022_v29 = vld [vmem:[%s12050_s5 + $0x90] ss:$68 sps:$4 sm:$0xff]  }
0x2571   :  { %9635 = vmatprep.subr.bf16.mxu0 %v11666_v0 }
0x2574   :  { %9637 = vmatpush1.bf16.msra.mxu0 %v9636_v24  ;;  %v10036_v24 = vld [vmem:[%s12050_s5 + $0x1a4] ss:$68 sps:$4 sm:$0xff]  }
0x2575   :  { %9638 = vmatprep.subr.bf16.mxu0 %v11666_v0 }
0x2578   :  { %9640 = vmatpush1.bf16.msra.mxu0 %v9639_v63  ;;  %v10040_v63 = vld [vmem:[%s12050_s5 + $0x228] ss:$68 sps:$4 sm:$0xff]  }
0x2579   :  { %9641 = vmatprep.subr.bf16.mxu0 %v11666_v0 }
0x257c   :  { %9643 = vmatpush1.bf16.msra.mxu0 %v9642_v40  ;;  %v10043_v40 = vld [vmem:[%s12050_s5 + $0x2a8] ss:$68 sps:$4 sm:$0xff]  }
0x257d   :  { %9644 = vmatprep.subr.bf16.mxu0 %v11666_v0 }
0x2580   :  { %9646 = vmatpush1.bf16.msra.mxu0 %v9645_v41  ;;  %v10054_v41 = vld [vmem:[%s12050_s5 + $0x1c] ss:$68 sps:$4 sm:$0xff]  }
0x2581   :  { %9647 = vmatprep.subr.bf16.mxu0 %v11666_v0 }
0x2584   :  { %9649 = vmatpush1.bf16.msra.mxu0 %v9648_v56  ;;  %v10058_v56 = vld [vmem:[%s12050_s5 + $0xa0] ss:$68 sps:$4 sm:$0xff]  }
0x2585   :  { %9650 = vmatprep.subr.bf16.mxu0 %v11666_v0 }
0x2588   :  { %9652 = vmatpush1.bf16.msra.mxu0 %v9651_v59  ;;  %v10061_v59 = vld [vmem:[%s12050_s5 + $0x120] ss:$68 sps:$4 sm:$0xff]  }
0x2589   :  { %7001 = vmatprep.subr.bf16.mxu0 %v10018_v2  ;;  %v10072_v2 = vld [vmem:[%s12050_s5 + $0x1b4] ss:$68 sps:$4 sm:$0xff]  }
0x262e   :  { %v5993_v17 = vpop.f32.mrb[62].mxu0 }
0x262f   :  { %v5994_v48 = vadd.f32 %v5993_v17, %v5911_v45  ;;  %v5995_v50 = vpop.f32.mrb[63].mxu0 }
0x2630   :  { %v5996_v42 = vadd.f32 %v5995_v50, %v5915_v46  ;;  %v10049_v50 = vld [vmem:[%s12050_s5 + $0x10] ss:$68 sps:$4 sm:$0xff]  }
0x2631   :  { %v5998_v53 = vmax.f32 %v5994_v48, 0.0 }
0x2632   :  { %v5999_v51 = vmax.f32 %v5996_v42, 0.0  ;;  %v10052_v42 = vld [vmem:[%s12050_s5 + $0x18] ss:$68 sps:$4 sm:$0xff]  }
0x2634   :  { %8324 = vmatprep.mubr.msk.f32.mxu1 %vm1107_vm3, %v5999_v51 }
0x2635   :  { %6128 = vmatmul.mubr.f32.vlgmr.msra.gmra.mrb[38].mxu1 %v5998_v53  ;;  %v10057_v53 = vld [vmem:[%s12050_s5 + $0x9c] ss:$68 sps:$4 sm:$0xff]  }
0x2636   :  { %6992 = vmatprep.mubr.bf16.mxu1 %v11673_v14  ;;  %6961 = vmatpush1.bf16.msra.mxu1 %v10013_v60  ;;  %v10064_v60 = vld [vmem:[%s12050_s5 + $0x128] ss:$68 sps:$4 sm:$0xff]  }
0x2637   :  { %6962 = vmatprep.subr.bf16.mxu1 %v10021_v3  ;;  %v10067_v3 = vld [vmem:[%s12050_s5 + $0x1a8] ss:$68 sps:$4 sm:$0xff]  }
0x263a   :  { %6963 = vmatpush1.bf16.msra.mxu1 %v10019_v4  ;;  %v10070_v4 = vld [vmem:[%s12050_s5 + $0x1b0] ss:$68 sps:$4 sm:$0xff]  }
0x263b   :  { %6964 = vmatprep.subr.bf16.mxu1 %v10027_v62  ;;  %v10075_v62 = vld [vmem:[%s12050_s5 + $0x234] ss:$68 sps:$4 sm:$0xff]  }
0x263e   :  { %6965 = vmatpush1.bf16.msra.mxu1 %v10025_v8  ;;  %v10078_v8 = vld [vmem:[%s12050_s5 + $0x23c] ss:$68 sps:$4 sm:$0xff]  }
0x263f   :  { %6966 = vmatprep.subr.bf16.mxu1 %v10033_v9  ;;  %v10073_v9 = vld [vmem:[%s12050_s5 + $0x230] ss:$68 sps:$4 sm:$0xff]  }
0x2642   :  { %6967 = vmatpush1.bf16.msra.mxu1 %v10031_v10  ;;  %v10076_v10 = vld [vmem:[%s12050_s5 + $0x238] ss:$68 sps:$4 sm:$0xff]  }
0x2643   :  { %6968 = vmatprep.subr.bf16.mxu1 %v10039_v11  ;;  %v10081_v11 = vld [vmem:[%s12050_s5 + $0x2bc] ss:$68 sps:$4 sm:$0xff]  }
0x2646   :  { %6969 = vmatpush1.bf16.msra.mxu1 %v10037_v12  ;;  %v10084_v12 = vld [vmem:[%s12050_s5 + $0x2c4] ss:$68 sps:$4 sm:$0xff]  }
0x2647   :  { %6970 = vmatprep.subr.bf16.mxu1 %v10045_v37  ;;  %v10111_v37 = vld [vmem:[%s12050_s5 + $0x244] ss:$68 sps:$4 sm:$0xff]  }
0x264a   :  { %6971 = vmatpush1.bf16.msra.mxu1 %v10043_v40  ;;  %v10109_v40 = vld [vmem:[%s12050_s5 + $0x240] ss:$68 sps:$4 sm:$0xff]  }
0x264b   :  { %7042 = vmatprep.subr.bf16.mxu1 %v10051_v61  ;;  %v10117_v61 = vld [vmem:[%s12050_s5 + $0x2cc] ss:$68 sps:$4 sm:$0xff]  }
0x2708   :  { %v6129_v21 = vpop.f32.mrb[38].mxu1 }
0x2709   :  { %v6130_v18 = vadd.f32 %v6129_v21, %v6053_v15  ;;  %v6131_v19 = vpop.f32.mrb[39].mxu1  ;;  %v10082_v15 = vld [vmem:[%s12050_s5 + $0x2c0] ss:$68 sps:$4 sm:$0xff]   ;;  %v10090_v21 = vld [vmem:[%s12050_s5 + $0x2c] ss:$68 sps:$4 sm:$0xff]  }
0x270a   :  { %v6132_v20 = vadd.f32 %v6131_v19, %v6057_v16  ;;  %v10087_v16 = vld [vmem:[%s12050_s5 + $0x24] ss:$68 sps:$4 sm:$0xff]  }
0x270b   :  { %v6134_v28 = vmax.f32 %v6130_v18, 0.0  ;;  %v10085_v18 = vld [vmem:[%s12050_s5 + $0x20] ss:$68 sps:$4 sm:$0xff]   ;;  %v10088_v19 = vld [vmem:[%s12050_s5 + $0x28] ss:$68 sps:$4 sm:$0xff]  }
0x270c   :  { %v6135_v23 = vmax.f32 %v6132_v20, 0.0  ;;  %v10093_v20 = vld [vmem:[%s12050_s5 + $0xac] ss:$68 sps:$4 sm:$0xff]  }
0x270e   :  { %8326 = vmatprep.mubr.msk.f32.mxu0 %vm1107_vm3, %v6135_v23  ;;  %v10096_v23 = vld [vmem:[%s12050_s5 + $0xb4] ss:$68 sps:$4 sm:$0xff]  }
0x270f   :  { %6235 = vmatmul.mubr.f32.vlgmr.msra.gmra.mrb[64].mxu0 %v6134_v28  ;;  %v10094_v28 = vld [vmem:[%s12050_s5 + $0xb0] ss:$68 sps:$4 sm:$0xff]  }
0x2710   :  { %7002 = vmatpush1.bf16.msra.mxu0 %v10016_v36  ;;  %7033 = vmatprep.mubr.bf16.mxu0 %v11673_v14  ;;  %v10091_v36 = vld [vmem:[%s12050_s5 + $0xa8] ss:$68 sps:$4 sm:$0xff]  }
0x2711   :  { %7003 = vmatprep.subr.bf16.mxu0 %v10024_v6  ;;  %v10099_v6 = vld [vmem:[%s12050_s5 + $0x134] ss:$68 sps:$4 sm:$0xff]  }
0x2714   :  { %7004 = vmatpush1.bf16.msra.mxu0 %v10022_v29  ;;  %v10102_v29 = vld [vmem:[%s12050_s5 + $0x13c] ss:$68 sps:$4 sm:$0xff]  }
0x2715   :  { %7005 = vmatprep.subr.bf16.mxu0 %v10030_v31  ;;  %v10097_v31 = vld [vmem:[%s12050_s5 + $0x130] ss:$68 sps:$4 sm:$0xff]  }
0x2718   :  { %7006 = vmatpush1.bf16.msra.mxu0 %v10028_v33  ;;  %v10100_v33 = vld [vmem:[%s12050_s5 + $0x138] ss:$68 sps:$4 sm:$0xff]  }
0x2719   :  { %7007 = vmatprep.subr.bf16.mxu0 %v10036_v24  ;;  %v10105_v24 = vld [vmem:[%s12050_s5 + $0x1bc] ss:$68 sps:$4 sm:$0xff]  }
0x271c   :  { %7008 = vmatpush1.bf16.msra.mxu0 %v10034_v27  ;;  %v10108_v27 = vld [vmem:[%s12050_s5 + $0x1c4] ss:$68 sps:$4 sm:$0xff]  }
0x271d   :  { %7009 = vmatprep.subr.bf16.mxu0 %v10042_v34  ;;  %v10103_v34 = vld [vmem:[%s12050_s5 + $0x1b8] ss:$68 sps:$4 sm:$0xff]  }
0x2720   :  { %7010 = vmatpush1.bf16.msra.mxu0 %v10040_v63  ;;  %v10106_v63 = vld [vmem:[%s12050_s5 + $0x1c0] ss:$68 sps:$4 sm:$0xff]  }
0x2721   :  { %7011 = vmatprep.subr.bf16.mxu0 %v10048_v38  ;;  %v10114_v38 = vld [vmem:[%s12050_s5 + $0x24c] ss:$68 sps:$4 sm:$0xff]  }
0x2724   :  { %7012 = vmatpush1.bf16.msra.mxu0 %v10046_v49  ;;  %v10112_v49 = vld [vmem:[%s12050_s5 + $0x248] ss:$68 sps:$4 sm:$0xff]  }
0x2725   :  { %7083 = vmatprep.subr.bf16.mxu0 %v10054_v41  ;;  %v10120_v41 = vld [vmem:[%s12050_s5 + $0x2d4] ss:$68 sps:$4 sm:$0xff]  }
0x27e2   :  { %v6236_v45 = vpop.f32.mrb[64].mxu0 }
0x27e3   :  { %v6237_v46 = vadd.f32 %v8325_v44, %v6236_v45  ;;  %v6238_v17 = vpop.f32.mrb[65].mxu0  ;;  %v10115_v44 = vld [vmem:[%s12050_s5 + $0x2c8] ss:$68 sps:$4 sm:$0xff]   ;;  %v10118_v45 = vld [vmem:[%s12050_s5 + $0x2d0] ss:$68 sps:$4 sm:$0xff]  }
0x27e4   :  { %v10126_v17 = vld [vmem:[%s12050_s5 + $0x3c] ss:$68 sps:$4 sm:$0xff]  }
0x27e5   :  { %v6240_v48 = vmax.f32 %v6237_v46, 0.0  ;;  %v10123_v46 = vld [vmem:[%s12050_s5 + $0x34] ss:$68 sps:$4 sm:$0xff]  }
0x27e7   :  { %v13027_v51 = vpack.c.bf16 %v6240_v48, %v6240_v48  ;;  %v10121_v48 = vld [vmem:[%s12050_s5 + $0x30] ss:$68 sps:$4 sm:$0xff]  }
0x27e9   :  { %8430 = vmatmul.mubr.msk.bf16.vlgmr.msra.gmra.mrb[60].mxu1 %vm5212_vm15, %v13027_v51  ;;  %8431 = vmatmul.mubr.msk.bf16.vlgmr.msra.gmra.mrb[68].mxu0 %vm5212_vm15, %v13027_v51 }
0x27ea   :  { %7043 = vmatpush1.bf16.msra.mxu1 %v10049_v50  ;;  %7084 = vmatpush1.bf16.msra.mxu0 %v10052_v42  ;;  %v10124_v50 = vld [vmem:[%s12050_s5 + $0x38] ss:$68 sps:$4 sm:$0xff]  }
0x27eb   :  { %7044 = vmatprep.subr.bf16.mxu1 %v10057_v53  ;;  %7085 = vmatprep.subr.bf16.mxu0 %v10060_v54  ;;  %v10129_v42 = vld [vmem:[%s12050_s5 + $0xbc] ss:$68 sps:$4 sm:$0xff]   ;;  %v10132_v53 = vld [vmem:[%s12050_s5 + $0xc4] ss:$68 sps:$4 sm:$0xff]  }
0x27ec   :  { %7074 = vmatprep.mubr.bf16.mxu1 %v11673_v14  ;;  %7115 = vmatprep.mubr.bf16.mxu0 %v11673_v14  ;;  %v10127_v54 = vld [vmem:[%s12050_s5 + $0xb8] ss:$68 sps:$4 sm:$0xff]  }
0x27ee   :  { %7045 = vmatpush1.bf16.msra.mxu1 %v10055_v55  ;;  %7086 = vmatpush1.bf16.msra.mxu0 %v10058_v56  ;;  %v10130_v55 = vld [vmem:[%s12050_s5 + $0xc0] ss:$68 sps:$4 sm:$0xff]  }
0x27ef   :  { %7046 = vmatprep.subr.bf16.mxu1 %v10063_v57  ;;  %7087 = vmatprep.subr.bf16.mxu0 %v10066_v58  ;;  %v10135_v56 = vld [vmem:[%s12050_s5 + $0x144] ss:$68 sps:$4 sm:$0xff]   ;;  %v10138_v57 = vld [vmem:[%s12050_s5 + $0x14c] ss:$68 sps:$4 sm:$0xff]  }
0x27f0   :  { %v10133_v58 = vld [vmem:[%s12050_s5 + $0x140] ss:$68 sps:$4 sm:$0xff]  }
0x27f2   :  { %7047 = vmatpush1.bf16.msra.mxu1 %v10061_v59  ;;  %7088 = vmatpush1.bf16.msra.mxu0 %v10064_v60  ;;  %v10136_v59 = vld [vmem:[%s12050_s5 + $0x148] ss:$68 sps:$4 sm:$0xff]  }
0x27f3   :  { %7048 = vmatprep.subr.bf16.mxu1 %v10069_v52  ;;  %7089 = vmatprep.subr.bf16.mxu0 %v10072_v2  ;;  %v10141_v60 = vld [vmem:[%s12050_s5 + $0x1cc] ss:$68 sps:$4 sm:$0xff]   ;;  %v10144_v52 = vld [vmem:[%s12050_s5 + $0x1d4] ss:$68 sps:$4 sm:$0xff]  }
0x27f4   :  { %v10139_v2 = vld [vmem:[%s12050_s5 + $0x1c8] ss:$68 sps:$4 sm:$0xff]  }
0x27f6   :  { %7049 = vmatpush1.bf16.msra.mxu1 %v10067_v3  ;;  %7090 = vmatpush1.bf16.msra.mxu0 %v10070_v4  ;;  %v10142_v3 = vld [vmem:[%s12050_s5 + $0x1d0] ss:$68 sps:$4 sm:$0xff]   ;;  %v10150_v4 = vld [vmem:[%s12050_s5 + $0x25c] ss:$68 sps:$4 sm:$0xff]  }
0x27f7   :  { %7050 = vmatprep.subr.bf16.mxu1 %v10075_v62  ;;  %7091 = vmatprep.subr.bf16.mxu0 %v10078_v8  ;;  %v10145_v62 = vld [vmem:[%s12050_s5 + $0x250] ss:$68 sps:$4 sm:$0xff]   ;;  %v10148_v8 = vld [vmem:[%s12050_s5 + $0x258] ss:$68 sps:$4 sm:$0xff]  }
0x27fa   :  { %7051 = vmatpush1.bf16.msra.mxu1 %v10073_v9  ;;  %7092 = vmatpush1.bf16.msra.mxu0 %v10076_v10  ;;  %v10153_v9 = vld [vmem:[%s12050_s5 + $0x2dc] ss:$68 sps:$4 sm:$0xff]   ;;  %v10156_v10 = vld [vmem:[%s12050_s5 + $0x2e4] ss:$68 sps:$4 sm:$0xff]  }
0x27fb   :  { %7052 = vmatprep.subr.bf16.mxu1 %v10081_v11  ;;  %7093 = vmatprep.subr.bf16.mxu0 %v10084_v12  ;;  %v10151_v11 = vld [vmem:[%s12050_s5 + $0x2d8] ss:$68 sps:$4 sm:$0xff]   ;;  %v10154_v12 = vld [vmem:[%s12050_s5 + $0x2e0] ss:$68 sps:$4 sm:$0xff]  }
0x27fe   :  { %7053 = vmatpush1.bf16.msra.mxu1 %v10079_v13  ;;  %7094 = vmatpush1.bf16.msra.mxu0 %v10082_v15  ;;  %v10157_v13 = vld [vmem:[%s12050_s5 + $0x40] ss:$68 sps:$4 sm:$0xff]   ;;  %v10158_v15 = vld [vmem:[%s12050_s5 + $0xc8] ss:$68 sps:$4 sm:$0xff]  }
0x27ff   :  { %7124 = vmatprep.subr.bf16.mxu1 %v10087_v16  ;;  %7165 = vmatprep.subr.bf16.mxu0 %v10090_v21  ;;  %v10159_v16 = vld [vmem:[%s12050_s5 + $0x150] ss:$68 sps:$4 sm:$0xff]   ;;  %v10160_v21 = vld [vmem:[%s12050_s5 + $0x1d8] ss:$68 sps:$4 sm:$0xff]  }
0x2801   :  { %8432 = vmatmul.mubr.msk.bf16.vlgmr.msra.gmra.mrb[64].mxu1 %vm5212_vm15, %v13027_v51  ;;  %8433 = vmatmul.mubr.msk.bf16.vlgmr.msra.gmra.mrb[72].mxu0 %vm5212_vm15, %v13027_v51 }
0x2802   :  { %7125 = vmatpush1.bf16.msra.mxu1 %v10085_v18  ;;  %7166 = vmatpush1.bf16.msra.mxu0 %v10088_v19  ;;  %v10161_v18 = vld [vmem:[%s12050_s5 + $0x260] ss:$68 sps:$4 sm:$0xff]   ;;  %v10162_v19 = vld [vmem:[%s12050_s5 + $0x2e8] ss:$68 sps:$4 sm:$0xff]  }
0x2803   :  { %7126 = vmatprep.subr.bf16.mxu1 %v10093_v20  ;;  %7167 = vmatprep.subr.bf16.mxu0 %v10096_v23  ;;  %v6350_v20 = vld [vmem:[#allocation91] sm:$0xff] }
0x2804   :  { %7156 = vmatprep.mubr.bf16.mxu1 %v11673_v14  ;;  %7197 = vmatprep.mubr.bf16.mxu0 %v11673_v14  ;;  %v6359_v23 = vrot.slane %v6350_v20, %v12719_v22 }
0x2806   :  { %7127 = vmatpush1.bf16.msra.mxu1 %v10091_v36  ;;  %7168 = vmatpush1.bf16.msra.mxu0 %v10094_v28  ;;  %v6367_v36 = vrot.slane %v6350_v20, %v12898_v26  ;;  %v6363_v28 = vrot.slane %v6350_v20, %v12722_v25 }
0x2807   :  { %7128 = vmatprep.subr.bf16.mxu1 %v10099_v6  ;;  %7169 = vmatprep.subr.bf16.mxu0 %v10102_v29  ;;  %v6371_v6 = vrot.slane %v6350_v20, %v12889_v7 }
0x280a   :  { %7129 = vmatpush1.bf16.msra.mxu1 %v10097_v31  ;;  %7170 = vmatpush1.bf16.msra.mxu0 %v10100_v33 }
0x280b   :  { %7130 = vmatprep.subr.bf16.mxu1 %v10105_v24  ;;  %7171 = vmatprep.subr.bf16.mxu0 %v10108_v27 }
0x280e   :  { %7131 = vmatpush1.bf16.msra.mxu1 %v10103_v34  ;;  %7172 = vmatpush1.bf16.msra.mxu0 %v10106_v63 }
0x280f   :  { %7132 = vmatprep.subr.bf16.mxu1 %v10111_v37  ;;  %7173 = vmatprep.subr.bf16.mxu0 %v10114_v38 }
0x2812   :  { %7133 = vmatpush1.bf16.msra.mxu1 %v10109_v40  ;;  %7174 = vmatpush1.bf16.msra.mxu0 %v10112_v49 }
0x2813   :  { %7134 = vmatprep.subr.bf16.mxu1 %v10117_v61  ;;  %7175 = vmatprep.subr.bf16.mxu0 %v10120_v41  ;;  %v6375_v41 = vrot.slane %v6350_v20, %v12914_v47 }
0x2816   :  { %7135 = vmatpush1.bf16.msra.mxu1 %v10115_v44  ;;  %7176 = vmatpush1.bf16.msra.mxu0 %v10118_v45  ;;  %v6383_v44 = vrot.slane %v6350_v20, %v12926_v5  ;;  %v6379_v45 = vrot.slane %v6350_v20, %v12907_v43 }
0x2817   :  { %7206 = vmatprep.subr.bf16.mxu1 %v10123_v46  ;;  %7247 = vmatprep.subr.bf16.mxu0 %v10126_v17  ;;  %v6387_v46 = vrot.slane %v6350_v20, %v12917_v35 }
0x2819   :  { %8434 = vmatmul.mubr.msk.bf16.vlgmr.msra.gmra.mrb[68].mxu1 %vm5212_vm15, %v13027_v51  ;;  %8435 = vmatmul.mubr.msk.bf16.vlgmr.msra.gmra.mrb[76].mxu0 %vm5212_vm15, %v13027_v51 }
0x281a   :  { %7207 = vmatpush1.bf16.msra.mxu1 %v10121_v48  ;;  %7248 = vmatpush1.bf16.msra.mxu0 %v10124_v50 }
0x281b   :  { %7208 = vmatprep.subr.bf16.mxu1 %v10129_v42  ;;  %7249 = vmatprep.subr.bf16.mxu0 %v10132_v53 }
0x281c   :  { %7238 = vmatprep.mubr.bf16.mxu1 %v11673_v14  ;;  %7279 = vmatprep.mubr.bf16.mxu0 %v11673_v14  ;;  %v10147_v14 = vld [vmem:[%s12050_s5 + $0x254] ss:$68 sps:$4 sm:$0xff]   ;;  %s11674_s5 = smov 40  }
0x281e   :  { %7209 = vmatpush1.bf16.msra.mxu1 %v10127_v54  ;;  %7250 = vmatpush1.bf16.msra.mxu0 %v10130_v55 }
0x281f   :  { %7210 = vmatprep.subr.bf16.mxu1 %v10135_v56  ;;  %7251 = vmatprep.subr.bf16.mxu0 %v10138_v57 }
0x2822   :  { %7211 = vmatpush1.bf16.msra.mxu1 %v10133_v58  ;;  %7252 = vmatpush1.bf16.msra.mxu0 %v10136_v59 }
0x2823   :  { %7212 = vmatprep.subr.bf16.mxu1 %v10141_v60  ;;  %7253 = vmatprep.subr.bf16.mxu0 %v10144_v52  ;;  %v6351_v52 = vld [vmem:[#allocation91 + $0x8] sm:$0xff] }
0x2826   :  { %7213 = vmatpush1.bf16.msra.mxu1 %v10139_v2  ;;  %7254 = vmatpush1.bf16.msra.mxu0 %v10142_v3  ;;  %v6391_v2 = vrot.slane %v6351_v52, %v12719_v22  ;;  %v6399_v3 = vrot.slane %v6351_v52, %v12898_v26 }
0x2827   :  { %7214 = vmatprep.subr.bf16.mxu1 %v10147_v14  ;;  %7255 = vmatprep.subr.bf16.mxu0 %v10150_v4  ;;  %v6395_v14 = vrot.slane %v6351_v52, %v12722_v25  ;;  %v6403_v4 = vrot.slane %v6351_v52, %v12889_v7 }
0x282a   :  { %7215 = vmatpush1.bf16.msra.mxu1 %v10145_v62  ;;  %7256 = vmatpush1.bf16.msra.mxu0 %v10148_v8 }
0x282b   :  { %7216 = vmatprep.subr.bf16.mxu1 %v10153_v9  ;;  %7257 = vmatprep.subr.bf16.mxu0 %v10156_v10 }
0x282e   :  { %7217 = vmatpush1.bf16.msra.mxu1 %v10151_v11  ;;  %7258 = vmatpush1.bf16.msra.mxu0 %v10154_v12 }
0x282f   :  { %9149 = vmatprep.subr.bf16.mxu1 %v11668_v1 }
0x2831   :  { %8436 = vmatmul.mubr.msk.bf16.vlgmr.msra.gmra.mrb[72].mxu1 %vm5212_vm15, %v13027_v51  ;;  %8437 = vmatmul.mubr.msk.bf16.vlgmr.msra.gmra.mrb[80].mxu0 %vm5212_vm15, %v13027_v51 }
0x2832   :  { %9150 = vmatpush3.bf16.msra.mxu1 %v10157_v13  ;;  %9161 = vmatprep.mubr.msk.bf16.mxu1 %vm11667_vm0, %v11668_v1 }
0x2833   :  { %9151 = vmatprep.subr.bf16.mxu1 %v11668_v1 }
0x2836   :  { %9152 = vmatpush3.bf16.msra.mxu1 %v10158_v15 }
0x2837   :  { %9153 = vmatprep.subr.bf16.mxu1 %v11668_v1 }
0x283a   :  { %9154 = vmatpush3.bf16.msra.mxu1 %v10159_v16 }
0x283b   :  { %9155 = vmatprep.subr.bf16.mxu1 %v11668_v1 }
0x283e   :  { %9156 = vmatpush3.bf16.msra.mxu1 %v10160_v21 }
0x283f   :  { %9157 = vmatprep.subr.bf16.mxu1 %v11668_v1 }
0x2842   :  { %9158 = vmatpush3.bf16.msra.mxu1 %v10161_v18 }
0x2843   :  { %9159 = vmatprep.subr.bf16.mxu1 %v11668_v1 }
0x2846   :  { %9160 = vmatpush3.bf16.msra.mxu1 %v10162_v19 }
0x2847   :  { %9165 = vmatprep.subr.mxu1 %v11668_v1 }
0x2849   :  { %9162 = vmatmul.mubr.msk.bf16.vlgmr.msra.gmra.mrb[76].mxu1 %vm5212_vm15, %v13027_v51 }
0x284a   :  { %9167 = vmatprep.mubr.msk.f32.mxu1 %vm11667_vm0, %v11668_v1 }
0x28bc   :  { %v6994_v29 = vpop.f32.mrb[60].mxu1  ;;  %v7035_v31 = vpop.f32.mrb[68].mxu0 }
0x28bd   :  { %v6995_v33 = vadd.f32 %v6994_v29, %v6359_v23  ;;  %v13142_v24 = vadd.f32 %v7035_v31, %v6367_v36  ;;  %v6996_v27 = vpop.f32.mrb[61].mxu1  ;;  %v7037_v34 = vpop.f32.mrb[69].mxu0  ;;  %v6407_v36 = vrot.slane %v6351_v52, %v12914_v47  ;;  %v6419_v29 = vrot.slane %v6351_v52, %v12917_v35 }
0x28be   :  { %v6997_v51 = vadd.f32 %v6996_v27, %v6363_v28  ;;  %v7038_v63 = vadd.f32 %v7037_v34, %v6371_v6  ;;  %v6998_v37 = vpop.f32.mrb[62].mxu1  ;;  %v7039_v38 = vpop.f32.mrb[70].mxu0  ;;  %v6415_v28 = vrot.slane %v6351_v52, %v12926_v5  ;;  %v6411_v6 = vrot.slane %v6351_v52, %v12907_v43 }
0x28bf   :  { %v6999_v40 = vpop.f32.mrb[63].mxu1  ;;  %v7040_v49 = vpop.f32.mrb[71].mxu0  ;;  %v7353_v25 = vpack.c.bf16 %v6995_v33, %v6995_v33  ;;  %v7355_v34 = vpack.c.bf16 %v13142_v24, %v13142_v24 }
0x28c0   :  { %v7354_v61 = vpack.c.bf16 %v6997_v51, %v6997_v51  ;;  %v7356_v23 = vpack.c.bf16 %v7038_v63, %v7038_v63 }
0x28c2   :  { %7410 = vmatprep.mubr.bf16.mxu0 %v7354_v61 }
0x28d4   :  { %v7076_v17 = vpop.f32.mrb[64].mxu1  ;;  %v7117_v48 = vpop.f32.mrb[72].mxu0 }
0x28d5   :  { %v13148_v50 = vadd.f32 %v7076_v17, %v6375_v41  ;;  %v13150_v42 = vadd.f32 %v7117_v48, %v6383_v44  ;;  %v7078_v53 = vpop.f32.mrb[65].mxu1  ;;  %v7119_v54 = vpop.f32.mrb[73].mxu0  ;;  %v8327_v17 = vld [vmem:[#allocation91 + $0x10] ss:$0 sm:$0xff] }
0x28d6   :  { %v7079_v55 = vadd.f32 %v7078_v53, %v6379_v45  ;;  %v13152_v56 = vadd.f32 %v7119_v54, %v6387_v46  ;;  %v7080_v57 = vpop.f32.mrb[66].mxu1  ;;  %v7121_v58 = vpop.f32.mrb[74].mxu0 }
0x28d7   :  { %v7081_v59 = vpop.f32.mrb[67].mxu1  ;;  %v7122_v60 = vpop.f32.mrb[75].mxu0  ;;  %v7357_v24 = vpack.c.bf16 %v13148_v50, %v13148_v50  ;;  %v7359_v53 = vpack.c.bf16 %v13150_v42, %v13150_v42 }
0x28d8   :  { %v7358_v38 = vpack.c.bf16 %v7079_v55, %v7079_v55  ;;  %v7360_v46 = vpack.c.bf16 %v13152_v56, %v13152_v56 }
0x28ec   :  { %v7158_v62 = vpop.f32.mrb[68].mxu1  ;;  %v7199_v8 = vpop.f32.mrb[76].mxu0 }
0x28ed   :  { %v7159_v9 = vadd.f32 %v7158_v62, %v6391_v2  ;;  %v7200_v10 = vadd.f32 %v7199_v8, %v6399_v3  ;;  %v7160_v11 = vpop.f32.mrb[69].mxu1  ;;  %v7201_v12 = vpop.f32.mrb[77].mxu0 }
0x28ee   :  { %v7161_v13 = vadd.f32 %v7160_v11, %v6395_v14  ;;  %v7202_v15 = vadd.f32 %v7201_v12, %v6403_v4  ;;  %v7162_v16 = vpop.f32.mrb[70].mxu1  ;;  %v7203_v21 = vpop.f32.mrb[78].mxu0 }
0x28ef   :  { %v7163_v18 = vpop.f32.mrb[71].mxu1  ;;  %v7204_v19 = vpop.f32.mrb[79].mxu0  ;;  %v7369_v22 = vpack.c.bf16 %v7159_v9, %v7159_v9  ;;  %v7371_v7 = vpack.c.bf16 %v7200_v10, %v7200_v10  ;;  %v10192_v21 = vld [vmem:[#allocation10] sm:$0xff] }
0x28f0   :  { %v7370_v20 = vpack.c.bf16 %v7161_v13, %v7161_v13  ;;  %v7372_v26 = vpack.c.bf16 %v7202_v15, %v7202_v15  ;;  %v2957_v2 = vpop.xlane.xlu1 %2956 }
0x28f1   :  { %v2958_v3 = vsub.f32 %v12941_v39, %v2957_v2  ;;  %v7819_v2 = vld [vmem:[%s13395_s21 + $0x18] sm:$0xff] }
0x28f2   :  { %7378 = vmatprep.subr.bf16.mxu0 %v7370_v20 }
0x28f3   :  { %7379 = vmatpush1.bf16.xpose.msra.mxu0 %v7369_v22  ;;  %v2959_v62 = vmul.f32 1.442695, %v2958_v3 }
0x28f4   :  { %7418 = vmatprep.subr.bf16.mxu0 %v7372_v26  ;;  %v7993_v26 = vpop.permute.xlu1 %7992 }
0x28fa   :  { %7411 = vmatmul.mubr.bf16.vlgmr.msra.gmra.mrb[84].mxu0 %v7353_v25 }
0x28fb   :  { %7419 = vmatpush1.bf16.xpose.msra.mxu0 %v7371_v7  ;;  %7450 = vmatprep.mubr.bf16.mxu0 %v7356_v23 }
0x2904   :  { %v7240_v31 = vpop.f32.mrb[72].mxu1  ;;  %v7281_v27 = vpop.f32.mrb[80].mxu0 }
0x2905   :  { %v7241_v51 = vadd.f32 %v7240_v31, %v6407_v36  ;;  %v7282_v33 = vadd.f32 %v7281_v27, %v6415_v28  ;;  %v7242_v37 = vpop.f32.mrb[73].mxu1  ;;  %v7283_v63 = vpop.f32.mrb[81].mxu0  ;;  %v7636_v31 = vld [vmem:[#allocation74] sm:$0xff]  ;;  %v7637_v27 = vld [vmem:[#allocation74 + $0x8] sm:$0xff] }
0x2906   :  { %v7243_v40 = vadd.f32 %v7242_v37, %v6411_v6  ;;  %v7284_v49 = vadd.f32 %v7283_v63, %v6419_v29  ;;  %v7244_v61 = vpop.f32.mrb[74].mxu1  ;;  %v7285_v47 = vpop.f32.mrb[82].mxu0  ;;  %7451 = vmatmul.mubr.bf16.vlgmr.msra.gmra.mrb[84].mxu0 %v7355_v34  ;;  %v7638_v37 = vld [vmem:[#allocation74 + $0x10] sm:$0xff]  ;;  %v7639_v63 = vld [vmem:[#allocation74 + $0x18] sm:$0xff] }
0x2907   :  { %v7245_v5 = vpop.f32.mrb[75].mxu1  ;;  %v7286_v41 = vpop.f32.mrb[83].mxu0  ;;  %7490 = vmatprep.mubr.bf16.mxu0 %v7358_v38  ;;  %v7373_v35 = vpack.c.bf16 %v7241_v51, %v7241_v51  ;;  %v7375_v45 = vpack.c.bf16 %v7282_v33, %v7282_v33  ;;  %v9654_v51 = vpack.c.bf16 %v7637_v27, %v7636_v31  ;;  %v9657_v38 = vpack.c.bf16 %v7639_v63, %v7638_v37  ;;  %v7642_v47 = vld [vmem:[#allocation74 + $0x30] sm:$0x3] }
0x2908   :  { %v7374_v43 = vpack.c.bf16 %v7243_v40, %v7243_v40  ;;  %v7376_v44 = vpack.c.bf16 %v7284_v49, %v7284_v49  ;;  %v7640_v40 = vld [vmem:[#allocation74 + $0x20] sm:$0xff]  ;;  %v7641_v49 = vld [vmem:[#allocation74 + $0x28] sm:$0xff] }
0x2909   :  { %v9660_v61 = vpack.c.bf16 %v7641_v49, %v7640_v40  ;;  %v7727_v5 = vld [vmem:[#allocation77] sm:$0xff]  ;;  %v7728_v41 = vld [vmem:[#allocation77 + $0x8] sm:$0xff] }
0x290a   :  { %7458 = vmatprep.subr.bf16.mxu0 %v7374_v43  ;;  %v7729_v43 = vld [vmem:[#allocation77 + $0x10] sm:$0xff] }
0x290b   :  { %7459 = vmatpush1.bf16.xpose.msra.mxu0 %v7373_v35  ;;  %v9663_v35 = vpack.c.bf16 %v7728_v41, %v7727_v5 }
0x290c   :  { %7498 = vmatprep.subr.bf16.mxu0 %v7376_v44  ;;  %v7730_v44 = vld [vmem:[#allocation77 + $0x18] sm:$0xff] }
0x2912   :  { %7491 = vmatmul.mubr.bf16.vlgmr.msra.gmra.mrb[84].mxu0 %v7357_v24  ;;  %v9666_v24 = vpack.c.bf16 %v7730_v44, %v7729_v43 }
0x2913   :  { %7499 = vmatpush1.bf16.xpose.msra.mxu0 %v7375_v45  ;;  %7530 = vmatprep.mubr.bf16.mxu0 %v7360_v46  ;;  %v7731_v45 = vld [vmem:[#allocation77 + $0x20] sm:$0xff]  ;;  %v7732_v46 = vld [vmem:[#allocation77 + $0x28] sm:$0xff] }
0x2914   :  { %9662 = vmatprep.subr.bf16.mxu0 %v11666_v0 }
0x291c   :  { %v7322_v48 = vpop.f32.mrb[76].mxu1 }
0x291d   :  { %v7323_v54 = vadd.f32 %v8327_v17, %v7322_v48  ;;  %v9163_v55 = vpop.f32.mrb[77].mxu1  ;;  %v9669_v17 = vpack.c.bf16 %v7732_v46, %v7731_v45 }
0x291e   :  { %v7325_v57 = vpop.f32.mrb[78].mxu1  ;;  %7531 = vmatmul.mubr.bf16.vlgmr.msra.gmra.mrb[84].mxu0 %v7359_v53  ;;  %v10193_v53 = vld [vmem:[#allocation2] sm:$0xff] }
0x291f   :  { %7344 = vst.msk [vmem:[#allocation4 + $0x80] sm:$0xff] %vm3074_vm12, %v7323_v54  ;;  %v9164_v50 = vpop.f32.mrb[79].mxu1  ;;  %9203 = vmatprep.mubr.msk.f32.mxu0 %vm11667_vm0, %v11668_v1  ;;  %9664 = vmatpush3.bf16.msra.mxu0 %v9663_v35 }
0x2920   :  { %9665 = vmatprep.subr.bf16.mxu0 %v11666_v0  ;;  %v7733_v50 = vld [vmem:[#allocation77 + $0x30] sm:$0xff] }
0x2923   :  { %9667 = vmatpush3.bf16.msra.mxu0 %v9666_v24 }
0x2924   :  { %9668 = vmatprep.subr.bf16.mxu0 %v11666_v0 }
0x2926   :  { %v7377_v56 = vld [vmem:[#allocation4 + $0x80] sm:$0xff] }
0x2927   :  { %9166 = vmatpush3.msra.mxu1 %v7377_v56  ;;  %9670 = vmatpush3.bf16.msra.mxu0 %v9669_v17  ;;  %v7734_v56 = vld [vmem:[#allocation77 + $0x38] sm:$0xff] }
0x2928   :  { %9653 = vmatprep.subr.bf16.mxu1 %v11666_v0  ;;  %9671 = vmatprep.subr.bf16.mxu0 %v11666_v0 }
0x29f1   :  { %v7532_v58 = vpop.f32.mrb[84].mxu0 }
0x29f2   :  { %v7534_v59 = vpop.f32.mrb[85].mxu0  ;;  %v7538_v60 = vsel %vm2300_vm8, %v7532_v58, -inf }
0x29f3   :  { %7539 = vmax.xlane.f32.xlu0 %v7538_v60  ;;  %v7535_v42 = vpop.f32.mrb[86].mxu0  ;;  %v7816_v59 = vld [vmem:[%s13395_s21] sm:$0xff]  ;;  %v7817_v60 = vld [vmem:[%s13395_s21 + $0x8] sm:$0xff] }
0x29f4   :  { %v7536_v52 = vpop.f32.mrb[87].mxu0  ;;  %v7818_v42 = vld [vmem:[%s13395_s21 + $0x10] sm:$0xff] }
0x29f5   :  { %v9675_v52 = vpack.c.bf16 %v7817_v60, %v7816_v59  ;;  %v9678_v3 = vpack.c.bf16 %v7819_v2, %v7818_v42 }
0x2a80   :  { %v7540_v14 = vpop.xlane.xlu0 %7539 }
0x2a81   :  { %v7541_v4 = vsub.f32 %v7532_v58, %v7540_v14  ;;  %v9672_v58 = vpack.c.bf16 %v7734_v56, %v7733_v50  ;;  %v7820_v14 = vld [vmem:[%s13395_s21 + $0x20] sm:$0xff] }
0x2a83   :  { %v7542_v8 = vmul.f32 1.442695, %v7541_v4  ;;  %9673 = vmatpush3.bf16.msra.mxu0 %v9672_v58  ;;  %v7821_v4 = vld [vmem:[%s13395_s21 + $0x28] sm:$0xff] }
0x2a84   :  { %9686 = vmatprep.subr.bf16.mxu0 %v11666_v0 }
0x2a85   :  { %10179 = vpow2.f32 %v7542_v8  ;;  %v8440_v8 = vld [vmem:[#allocation76] ss:$0 sm:$0xff] }
0x2a86   :  { %10181 = vpow2.f32 %v2959_v62  ;;  %v9681_v62 = vpack.c.bf16 %v7821_v4, %v7820_v14 }
0x2a8f   :  { %v10180_v9 = vpop.eup %10179 }
0x2a90   :  { %v7544_v10 = vsel %vm2300_vm8, %v10180_v9, 0.0  ;;  %v10182_v11 = vpop.eup %10181 }
0x2a91   :  { %7545 = vadd.xlane.f32.xlu0 %v7544_v10  ;;  %v2961_v12 = vsel %vm2300_vm8, %v10182_v11, 0.0 }
0x2a95   :  { %2962 = vadd.xlane.f32.xlu0 %v2961_v12 }
0x2aab   :  { %7999 = vrot.lane.b32.xlu0 %v3786_v32, %s11674_s5 }
0x2b1e   :  { %v7546_v13 = vpop.xlane.xlu0 %7545 }
0x2b1f   :  { %10183 = vrcp.f32 %v7546_v13  ;;  %v7822_v13 = vld [vmem:[%s13395_s21 + $0x30] sm:$0xff] }
0x2b22   :  { %v2963_v39 = vpop.xlane.xlu0 %2962 }
0x2b23   :  { %10185 = vrcp.f32 %v2963_v39  ;;  %v7823_v39 = vld [vmem:[%s13395_s21 + $0x38] sm:$0xff] }
0x2b26   :  { %v8000_v32 = vpop.permute.xlu0 %7999 }
0x2b29   :  { %v10184_v15 = vpop.eup %10183 }
0x2b2a   :  { %v7548_v16 = vmul.f32 %v10184_v15, %v10180_v9  ;;  %v9684_v15 = vpack.c.bf16 %v7823_v39, %v7822_v13 }
0x2b2c   :  { %v7549_v18 = vmul.f32 %v10192_v21, %v7548_v16  ;;  %v7905_v16 = vld [vmem:[%s13396_s8] sm:$0xff]  ;;  %v7906_v21 = vld [vmem:[%s13396_s8 + $0x8] sm:$0xff] }
0x2b2d   :  { %v10186_v19 = vpop.eup %10185 }
0x2b2e   :  { %v7550_v20 = vand.u32 2147483647, %v7549_v18  ;;  %v2965_v22 = vmul.f32 %v10186_v19, %v10182_v11  ;;  %v8443_v19 = vld [vmem:[#allocation79] ss:$0 sm:$0xff] }
0x2b30   :  { %v7551_v25 = vsel %vm2300_vm8, %v7550_v20, 0.0  ;;  %7990 = vst.msk [vmem:[#allocation92] sm:$0xff] %vm2300_vm8, %v2965_v22 }
0x2b31   :  { %v7552_v30 = vrot.slane %v7551_v25, 4  ;;  %7996 = vst.msk [vmem:[#allocation92] sm:$0xff] %vm7995_vm2, %v7993_v26 }
0x2b32   :  { %7998 = vst.msk [vmem:[#allocation92] sm:$0xff] %vm7997_vm4, %v7993_v26 }
0x2b33   :  { %v7553_v7 = vadd.f32 %v7552_v30, %v7551_v25  ;;  %8003 = vst.msk [vmem:[#allocation92] sm:$0xff] %vm8002_vm6, %v8000_v32  ;;  %v7908_v30 = vld [vmem:[%s13396_s8 + $0x18] sm:$0xff] }
0x2b35   :  { %v7554_v23 = vrot.slane %v7553_v7, 2 }
0x2b37   :  { %v7555_v36 = vadd.f32 %v7554_v23, %v7553_v7  ;;  %v8445_v7 = vld [vmem:[#allocation80] ss:$0 sm:$0xff] }
0x2b39   :  { %v7556_v28 = vrot.slane %v7555_v36, 1 }
0x2b3b   :  { %v7557_v6 = vadd.f32 %v7556_v28, %v7555_v36 }
0x2b3d   :  { %v7558_v29 = vmax.f32 %v7557_v6, 1e-12 }
0x2b3f   :  { %10187 = vrcp.f32 %v7558_v29  ;;  %v8447_v29 = vld [vmem:[#allocation82] ss:$0 sm:$0xff] }
0x2b49   :  { %v10188_v34 = vpop.eup %10187 }
0x2b4a   :  { %v7560_v33 = vmul.f32 %v10188_v34, %v7549_v18  ;;  %v9687_v18 = vpack.c.bf16 %v7906_v21, %v7905_v16 }
0x2b4c   :  { %9168 = vmatmul.mubr.msk.f32.vlgmr.msra.gmra.mrb[80].mxu1 %vm2300_vm8, %v7560_v33 }
0x2b4d   :  { %9655 = vmatpush3.bf16.msra.mxu1 %v9654_v51  ;;  %9184 = vmatprep.mubr.msk.f32.mxu1 %vm11667_vm0, %v11668_v1 }
0x2b4e   :  { %9656 = vmatprep.subr.bf16.mxu1 %v11666_v0 }
0x2b51   :  { %9658 = vmatpush3.bf16.msra.mxu1 %v9657_v38 }
0x2b52   :  { %9659 = vmatprep.subr.bf16.mxu1 %v11666_v0 }
0x2b55   :  { %9661 = vmatpush3.bf16.msra.mxu1 %v9660_v61 }
0x2b56   :  { %9182 = vmatprep.subr.mxu1 %v11668_v1 }
0x2b59   :  { %9183 = vmatpush3.msk.msra.mxu1 %vm1017_vm1, %v7642_v47 }
0x2b5a   :  { %9674 = vmatprep.subr.bf16.mxu1 %v11666_v0 }
0x2c1f   :  { %v7630_v48 = vpop.f32.mrb[80].mxu1 }
0x2c20   :  { %v7631_v54 = vadd.f32 %v10193_v53, %v7630_v48  ;;  %v9169_v55 = vpop.f32.mrb[81].mxu1 }
0x2c22   :  { %7634 = vst.msk [vmem:[#allocation2] sm:$0xff] %vm3074_vm12, %v7631_v54 }
0x2c29   :  { %v7635_v57 = vld [vmem:[#allocation2] sm:$0xff] }
0x2c2a   :  { %9185 = vmatmul.mubr.msk.f32.vlgmr.msra.gmra.mrb[82].mxu1 %vm3074_vm12, %v7635_v57 }
0x2c2b   :  { %9222 = vmatprep.mubr.msk.f32.mxu1 %vm11667_vm0, %v11668_v1  ;;  %9676 = vmatpush3.bf16.msra.mxu1 %v9675_v52 }
0x2c2c   :  { %9677 = vmatprep.subr.bf16.mxu1 %v11666_v0 }
0x2c2f   :  { %9679 = vmatpush3.bf16.msra.mxu1 %v9678_v3 }
0x2c30   :  { %9680 = vmatprep.subr.bf16.mxu1 %v11666_v0 }
0x2c33   :  { %9682 = vmatpush3.bf16.msra.mxu1 %v9681_v62 }
0x2c34   :  { %9683 = vmatprep.subr.bf16.mxu1 %v11666_v0 }
0x2c37   :  { %9685 = vmatpush3.bf16.msra.mxu1 %v9684_v15 }
0x2cfd   :  { %v7722_v9 = vpop.f32.mrb[82].mxu1 }
0x2cfe   :  { %v7723_v10 = vadd.f32 %v8440_v8, %v7722_v9  ;;  %v9186_v11 = vpop.f32.mrb[83].mxu1 }
0x2d00   :  { %v7726_v12 = vmax.f32 %v7723_v10, 0.0 }
0x2d02   :  { %9204 = vmatmul.mubr.msk.f32.vlgmr.msra.gmra.mrb[66].mxu0 %vm1107_vm3, %v7726_v12 }
0x2d03   :  { %9233 = vmatprep.mubr.msk.f32.mxu0 %vm11667_vm0, %v11668_v1  ;;  %9688 = vmatpush3.bf16.msra.mxu0 %v9687_v18  ;;  %v7907_v1 = vld [vmem:[%s13396_s8 + $0x10] sm:$0xff]  ;;  %vm8008_vm0 = vcmask 539984  }
0x2d04   :  { %9689 = vmatprep.subr.bf16.mxu0 %v11666_v0  ;;  %v9690_v32 = vpack.c.bf16 %v7908_v30, %v7907_v1 }
0x2d07   :  { %9691 = vmatpush3.bf16.msra.mxu0 %v9690_v32 }
0x2dd5   :  { %v7811_v20 = vpop.f32.mrb[66].mxu0 }
0x2dd6   :  { %v7812_v22 = vadd.f32 %v8443_v19, %v7811_v20  ;;  %v9205_v26 = vpop.f32.mrb[67].mxu0 }
0x2dd8   :  { %v7815_v25 = vmax.f32 %v7812_v22, 0.0 }
0x2dda   :  { %9223 = vmatmul.mubr.msk.f32.vlgmr.msra.gmra.mrb[84].mxu1 %vm1107_vm3, %v7815_v25 }
0x2ead   :  { %v7900_v23 = vpop.f32.mrb[84].mxu1 }
0x2eae   :  { %v7901_v36 = vadd.f32 %v8445_v7, %v7900_v23  ;;  %v9224_v28 = vpop.f32.mrb[85].mxu1 }
0x2eb0   :  { %v7904_v6 = vmax.f32 %v7901_v36, 0.0 }
0x2eb2   :  { %9234 = vmatmul.mubr.msk.f32.vlgmr.msra.gmra.mrb[88].mxu0 %vm1282_vm5, %v7904_v6 }
0x2f85   :  { %v7985_v0 = vpop.f32.mrb[88].mxu0 }
0x2f86   :  { %v7986_v31 = vadd.f32 %v8447_v29, %v7985_v0  ;;  %v9235_v27 = vpop.f32.mrb[89].mxu0 }
0x2f88   :  { %v7989_v34 = vmax.f32 %v7986_v31, 0.0 }
0x2f8a   :  { %8005 = vrot.lane.b32.xlu1 %v7989_v34, %s11675_s14 }
0x2ffc   :  { %v8006_v51 = vpop.permute.xlu1 %8005 }
0x2ffd   :  { %8009 = vst.msk [vmem:[#allocation92] sm:$0xff] %vm8008_vm0, %v8006_v51 }
0x2ffe   :  { %11459 = shalt.err (!%p11456_p12)
}
0x2fff   :  { %s11460_s30 = scalar_lea.hbm %s12060_s17, 128 }
0x3000   :  { %p11461_p13 = scmp.ne.s32.totalorder %s12060_s17, %s11460_s30  ;;  %p11464_p0 = scmp.lt.u32.totalorder %s11460_s30, %s12060_s17 }
0x3002   :  { %p11466_p1 = pnand %p11464_p0, %p11461_p13 }
0x3004   :  { %11469 = shalt.err (!%p11466_p1)
}
0x3005   :  { %8019 = dma.vmem_to_hbm [thread:$0]  %s8017_s11, 128, %s12060_s17, [#allocation7]  }
0x3006   :  { %11528 = dma.done.wait [#allocation7], 128  }
0x3007   :  { %11529 = vsyncadd [#allocation7], 4294967168 }
0x3008   :  { %8023 = vsyncpa [#allocation6], 1 }
0x3009   :  { %8024 = vsyncpa [#allocation9], 1 }
0x300a   :  { %8025 = vsyncpa [#allocation12], 1 }
0x300b   :  { %8026 = vsyncpa [#allocation15], 1 }
0x300c   :  { %8027 = vsyncpa [#allocation18], 1 }
0x300d   :  { %8028 = vsyncpa [#allocation21], 1 }
0x300e   :  { %8029 = vsyncpa [#allocation24], 1 }
0x300f   :  { %8030 = vsyncpa [#allocation27], 1 }
0x3010   :  { %8031 = vsyncpa [#allocation30], 1 }
0x3011   :  { %8032 = vsyncpa [#allocation33], 1 }
0x3012   :  { %8033 = vsyncpa [#allocation36], 1 }
0x3013   :  { %8034 = vsyncpa [#allocation39], 1 }
0x3014   :  { %8035 = vsyncpa [#allocation42], 1 }
0x3015   :  { %8036 = vsyncpa [#allocation45], 1 }
0x3016   :  { %8037 = vsyncpa [#allocation48], 1 }
0x3017   :  { %8038 = vsyncpa [#allocation51], 1 }
0x3018   :  { %8039 = vsyncpa [#allocation54], 1 }
0x3019   :  { %8040 = vsyncpa [#allocation57], 1 }
0x301a   :  { %8041 = vsyncpa [#allocation60], 1 }
0x301b   :  { %8042 = vsyncpa [#allocation63], 1 }
0x301c   :  { %8043 = vsyncpa [#allocation66], 1 }
0x301d   :  { %8044 = vsyncpa [#allocation69], 1 }
0x301e   :  { %8045 = vsyncpa [#allocation72], 1 }
0x301f   :  { %8046 = vsyncpa [#allocation75], 1 }
0x3020   :  { %8047 = vsyncpa [#allocation78], 1 }
0x3021   :  { %8048 = vsyncpa [#allocation81], 1 }
0x3022   :  { %8049 = vsyncpa [#allocation84], 1 }
0x3023   :  { %8050 = vsyncpa [#allocation87], 1 }
0x3024   :  { %8051 = vsyncpa [#allocation90], 1 }
0x3025   :  { %8052 = vsyncpa [#allocation7], 1 }

</bundles_post_ra>
